<compile_context>
chip_gen: v6e
topology: v6e:2x2x1
jax: 0.10.0
libtpu: 0.0.40
codegen_flags: <defaults>
</compile_context>

<pallas_src>
import functools
import math

import jax
import jax.numpy as jnp
from jax import lax
from jax.experimental import pallas as pl
from jax.experimental.pallas import tpu as pltpu

_NEG_BIG = -1e30  # finite "-inf": safe even if a row were ever fully masked


def _layernorm(x, gamma, beta, eps=1e-5):
    x = x.astype(jnp.float32)
    mu = jnp.mean(x, axis=-1, keepdims=True)
    xc = x - mu
    var = jnp.mean(xc * xc, axis=-1, keepdims=True)
    return xc * lax.rsqrt(var + eps) * gamma + beta


def _gelu_tanh(x):
    # matches nn.GELU(approximate='tanh')
    c = math.sqrt(2.0 / math.pi)
    return 0.5 * x * (1.0 + jnp.tanh(c * (x + 0.044715 * x * x * x)))


# --------------------------------------------------------------------------- #
# Kernel 1: ln_1 + c_attn projection -> head-major q/k/v (bf16)                #
# --------------------------------------------------------------------------- #
def qkv_kernel(x_ref, g1_ref, b1_ref, wqkv_ref, bqkv_ref,
               q_ref, k_ref, v_ref, *, n_head: int, scale: float):
    x = x_ref[0]                                   # (rows, C) f32
    rows, C = x.shape
    hd = C // n_head

    h = _layernorm(x, g1_ref[0], b1_ref[0]).astype(jnp.bfloat16)
    qkv = jnp.dot(h, wqkv_ref[...], preferred_element_type=jnp.float32) + bqkv_ref[0]

    def heads(m):  # (rows, C) -> (n_head, rows, hd); minor dim (hd) unchanged
        return jnp.transpose(m.astype(jnp.bfloat16).reshape(rows, n_head, hd),
                             (1, 0, 2))

    q_ref[0] = heads(qkv[:, :C] * scale)           # fold 1/sqrt(hd) into q once
    k_ref[0] = heads(qkv[:, C:2 * C])
    v_ref[0] = heads(qkv[:, 2 * C:])


# --------------------------------------------------------------------------- #
# Kernel 2: causal attention (online softmax) + c_proj + residual              #
# --------------------------------------------------------------------------- #
def attn_kernel(x_ref, q_ref, k_ref, v_ref, wpr_ref, bpr_ref, o_ref, *, q_tile: int):
    qi = pl.program_id(1)
    q = q_ref[0]                                   # (nh, q_tile, hd) bf16, scaled
    nh, _, hd = q.shape

    m0 = jnp.full((nh, q_tile, 1), _NEG_BIG, jnp.float32)
    l0 = jnp.zeros((nh, q_tile, 1), jnp.float32)
    a0 = jnp.zeros((nh, q_tile, hd), jnp.float32)

    def kv_block(kv_idx):
        start = pl.multiple_of(kv_idx * q_tile, q_tile)
        kt = k_ref[0, :, pl.ds(start, q_tile), :]  # (nh, q_tile, hd) bf16
        vt = v_ref[0, :, pl.ds(start, q_tile), :]
        return kt, vt

    def update(carry, s, vt):
        m, l, acc = carry
        m_new = jnp.maximum(m, s.max(axis=-1, keepdims=True))
        alpha = jnp.exp(m - m_new)
        p = jnp.exp(s - m_new)
        l_new = alpha * l + p.sum(axis=-1, keepdims=True)
        acc_new = alpha * acc + jnp.einsum('nqk,nkh->nqh',
                                           p.astype(jnp.bfloat16), vt,
                                           preferred_element_type=jnp.float32)
        return m_new, l_new, acc_new

    # Fully-visible (below-diagonal) kv tiles: no mask work at all.
    def body(kv, carry):
        kt, vt = kv_block(kv)
        s = jnp.einsum('nqh,nkh->nqk', q, kt, preferred_element_type=jnp.float32)
        return update(carry, s, vt)

    m, l, acc = lax.fori_loop(0, qi, body, (m0, l0, a0))

    # Diagonal kv tile: the only one that needs the causal mask.
    kt, vt = kv_block(qi)
    s = jnp.einsum('nqh,nkh->nqk', q, kt, preferred_element_type=jnp.float32)
    row = lax.broadcasted_iota(jnp.int32, (q_tile, q_tile), 0)
    col = lax.broadcasted_iota(jnp.int32, (q_tile, q_tile), 1)
    s = jnp.where((col <= row)[None, :, :], s, _NEG_BIG)
    m, l, acc = update((m, l, acc), s, vt)

    acc = acc / l                                   # exact softmax normalization

    # head-concat folded into the projection: (nh,q,hd)->(q,C) keeps minor dim.
    y = jnp.transpose(acc.astype(jnp.bfloat16), (1, 0, 2)).reshape(q_tile, nh * hd)
    proj = jnp.dot(y, wpr_ref[...], preferred_element_type=jnp.float32) + bpr_ref[0]
    o_ref[0] = x_ref[0] + proj                      # lane-dense (q_tile, C) store


# --------------------------------------------------------------------------- #
# Kernel 3: ln_2 + MLP + residual (row-tiled)                                   #
# --------------------------------------------------------------------------- #
def mlp_kernel(x_ref, g2_ref, b2_ref, wfc_ref, bfc_ref, wp2_ref, bp2_ref, o_ref):
    x = x_ref[0]                                                # (rows, C) f32
    h = _layernorm(x, g2_ref[0], b2_ref[0]).astype(jnp.bfloat16)
    f = jnp.dot(h, wfc_ref[...], preferred_element_type=jnp.float32) + bfc_ref[0]
    # bf16 GELU (v6e/v7x bf16 VPU/EUP path).
    # TODO(synk): keep this in f32 on v5e, whose VPU/EUP lack bf16 support.
    f = _gelu_tanh(f.astype(jnp.bfloat16))
    m = jnp.dot(f, wp2_ref[...], preferred_element_type=jnp.float32) + bp2_ref[0]
    o_ref[0] = x + m


# --------------------------------------------------------------------------- #
# Wrapper                                                                      #
# --------------------------------------------------------------------------- #
def gpt2_block(x, params, n_head, *, q_tile=256, mlp_rows=512, qkv_rows=256):
    # q_tile=256 / mlp_rows=512 target v6e/v7x (256^2 MXU); use q_tile=128 on v5e.
    B, T, C = x.shape
    assert C % n_head == 0
    hd = C // n_head
    C4 = 4 * C
    q_tile = min(q_tile, T)
    mlp_rows = min(mlp_rows, T)
    qkv_rows = min(qkv_rows, T)
    assert T % q_tile == 0 and T % mlp_rows == 0 and T % qkv_rows == 0
    n_q = T // q_tile
    scale = 1.0 / math.sqrt(hd)

    # 48 MiB: leaves headroom on v7x (64 MiB physical VMEM); fine on v5e/v6e.
    vmem_limit = 48 * 1024 * 1024

    # ---------------- kernel 1: ln_1 + qkv projection ------------------------
    w1 = lambda shape: pl.BlockSpec(shape, lambda b, t: (0,) * len(shape))
    qkv_cost = pl.CostEstimate(
        flops=int(6 * B * T * C * C),
        transcendentals=int(B * T),
        bytes_accessed=int(B * T * C * 4 + 3 * B * T * C * 2 + 3 * C * C * 2),
    )
    head_shape = jax.ShapeDtypeStruct((B, n_head, T, hd), jnp.bfloat16)
    hm_out_spec = pl.BlockSpec((1, n_head, qkv_rows, hd), lambda b, t: (b, 0, t, 0))
    q_hm, k_hm, v_hm = pl.pallas_call(
        functools.partial(qkv_kernel, n_head=n_head, scale=scale),
        out_shape=(head_shape, head_shape, head_shape),
        grid_spec=pltpu.PrefetchScalarGridSpec(
            num_scalar_prefetch=0,
            grid=(B, T // qkv_rows),
            in_specs=[
                pl.BlockSpec((1, qkv_rows, C), lambda b, t: (b, t, 0)),  # x tile
                w1((1, C)), w1((1, C)),                                  # ln_1 g/b
                w1((C, 3 * C)), w1((1, 3 * C)),                          # c_attn W,b
            ],
            out_specs=(hm_out_spec, hm_out_spec, hm_out_spec),
        ),
        compiler_params=pltpu.CompilerParams(
            dimension_semantics=("parallel", "parallel"),
            vmem_limit_bytes=vmem_limit,
        ),
        cost_estimate=qkv_cost,
    )(x, params["ln1_g"], params["ln1_b"], params["w_qkv"], params["b_qkv"])

    # ---------------- kernel 2: causal attention + residual ------------------
    w2 = lambda shape: pl.BlockSpec(shape, lambda b, qi: (0,) * len(shape))
    attn_cost = pl.CostEstimate(
        flops=int(B * (2 * T * T * C + 2 * T * C * C)),
        transcendentals=int(B * n_head * T * T // 2),
        bytes_accessed=int(2 * B * T * C * 4 + 3 * B * T * C * 2 + C * C * 2),
    )
    x1 = pl.pallas_call(
        functools.partial(attn_kernel, q_tile=q_tile),
        out_shape=jax.ShapeDtypeStruct((B, T, C), x.dtype),
        grid_spec=pltpu.PrefetchScalarGridSpec(
            num_scalar_prefetch=0,
            grid=(B, n_q),
            in_specs=[
                pl.BlockSpec((1, q_tile, C), lambda b, qi: (b, qi, 0)),            # residual x
                pl.BlockSpec((1, n_head, q_tile, hd), lambda b, qi: (b, 0, qi, 0)),  # q tile
                pl.BlockSpec((1, n_head, T, hd), lambda b, qi: (b, 0, 0, 0)),        # k (reused across qi)
                pl.BlockSpec((1, n_head, T, hd), lambda b, qi: (b, 0, 0, 0)),        # v (reused across qi)
                w2((C, C)), w2((1, C)),                                              # attn c_proj W,b
            ],
            out_specs=pl.BlockSpec((1, q_tile, C), lambda b, qi: (b, qi, 0)),
        ),
        compiler_params=pltpu.CompilerParams(
            dimension_semantics=("parallel", "parallel"),
            vmem_limit_bytes=vmem_limit,
        ),
        cost_estimate=attn_cost,
    )(x, q_hm, k_hm, v_hm, params["w_attn_proj"], params["b_attn_proj"])

    # ---------------- kernel 3: MLP + second residual ------------------------
    w3 = lambda shape: pl.BlockSpec(shape, lambda b, t: (0,) * len(shape))
    mlp_cost = pl.CostEstimate(
        flops=int(16 * B * T * C * C),
        transcendentals=int(B * T * C4),
        bytes_accessed=int(2 * B * T * C * 4 + 2 * C * C4 * 2),
    )
    out = pl.pallas_call(
        mlp_kernel,
        out_shape=jax.ShapeDtypeStruct((B, T, C), x.dtype),
        grid_spec=pltpu.PrefetchScalarGridSpec(
            num_scalar_prefetch=0,
            grid=(B, T // mlp_rows),
            in_specs=[
                pl.BlockSpec((1, mlp_rows, C), lambda b, t: (b, t, 0)),  # x1 tile
                w3((1, C)), w3((1, C)),                                  # ln_2 g/b
                w3((C, C4)), w3((1, C4)),                                # c_fc W,b
                w3((C4, C)), w3((1, C)),                                 # mlp c_proj W,b
            ],
            out_specs=pl.BlockSpec((1, mlp_rows, C), lambda b, t: (b, t, 0)),
        ),
        compiler_params=pltpu.CompilerParams(
            dimension_semantics=("parallel", "parallel"),
            vmem_limit_bytes=vmem_limit,
        ),
        cost_estimate=mlp_cost,
    )(x1, params["ln2_g"], params["ln2_b"], params["w_fc"], params["b_fc"],
      params["w_mlp_proj"], params["b_mlp_proj"])
    return out


def init_params(key, C):
    C4 = 4 * C
    k = jax.random.split(key, 4)
    std = 0.02
    bf = jnp.bfloat16
    return {
        "ln1_g": jnp.ones((1, C), jnp.float32),
        "ln1_b": jnp.zeros((1, C), jnp.float32),
        "w_qkv": (std * jax.random.normal(k[0], (C, 3 * C), jnp.float32)).astype(bf),
        "b_qkv": jnp.zeros((1, 3 * C), jnp.float32),
        "w_attn_proj": (std * jax.random.normal(k[1], (C, C), jnp.float32)).astype(bf),
        "b_attn_proj": jnp.zeros((1, C), jnp.float32),
        "ln2_g": jnp.ones((1, C), jnp.float32),
        "ln2_b": jnp.zeros((1, C), jnp.float32),
        "w_fc": (std * jax.random.normal(k[2], (C, C4), jnp.float32)).astype(bf),
        "b_fc": jnp.zeros((1, C4), jnp.float32),
        "w_mlp_proj": (std * jax.random.normal(k[3], (C4, C), jnp.float32)).astype(bf),
        "b_mlp_proj": jnp.zeros((1, C), jnp.float32),
    }


if __name__ == "__main__":
    # Small, TPU-aligned shapes consistent with the module (B, T, n_embd).
    B, T, C, n_head = 2, 256, 128, 4

    key = jax.random.PRNGKey(0)
    kx, kp = jax.random.split(key)
    x = jax.random.normal(kx, (B, T, C), jnp.float32)
    params = init_params(kp, C)

    # q_tile=128 here so n_q=2 and both the masked diagonal tile and the
    # unmasked off-diagonal kv path are exercised at this small T.
    out = gpt2_block(x, params, n_head, q_tile=128, mlp_rows=256, qkv_rows=256)
    out = jax.block_until_ready(out)
    assert out.shape == (B, T, C)
    assert bool(jnp.all(jnp.isfinite(out)))
    print("KERNEL_OK")
</pallas_src>

<mosaic_0001>
module attributes {stable_mosaic.version = 11 : i64} {
  func.func @qkv_kernel(%arg0: i32, %arg1: i32, %arg2: memref<1x256x128xf32, #tpu.memory_space<vmem>>, %arg3: memref<1x128xf32, #tpu.memory_space<vmem>>, %arg4: memref<1x128xf32, #tpu.memory_space<vmem>>, %arg5: memref<128x384xbf16, #tpu.memory_space<vmem>>, %arg6: memref<1x384xf32, #tpu.memory_space<vmem>>, %arg7: memref<1x4x256x32xbf16, #tpu.memory_space<vmem>>, %arg8: memref<1x4x256x32xbf16, #tpu.memory_space<vmem>>, %arg9: memref<1x4x256x32xbf16, #tpu.memory_space<vmem>>) attributes {dimension_semantics = [#tpu.dimension_semantics<parallel>, #tpu.dimension_semantics<parallel>], iteration_bounds = array<i64: 2, 1>, scalar_prefetch = 0 : i64, scratch_operands = 0 : i64, tpu.core_type = #tpu.core_type<tc>, window_params = [{transform_indices = @transform_0, window_bounds = array<i64: 1, 256, 128>}, {pipeline_mode = #tpu.pipeline_mode<synchronous>, transform_indices = @transform_1, window_bounds = array<i64: 1, 128>}, {pipeline_mode = #tpu.pipeline_mode<synchronous>, transform_indices = @transform_2, window_bounds = array<i64: 1, 128>}, {pipeline_mode = #tpu.pipeline_mode<synchronous>, transform_indices = @transform_3, window_bounds = array<i64: 128, 384>}, {pipeline_mode = #tpu.pipeline_mode<synchronous>, transform_indices = @transform_4, window_bounds = array<i64: 1, 384>}, {transform_indices = @transform_5, window_bounds = array<i64: 1, 4, 256, 32>}, {transform_indices = @transform_6, window_bounds = array<i64: 1, 4, 256, 32>}, {transform_indices = @transform_7, window_bounds = array<i64: 1, 4, 256, 32>}]} {
    %c0 = arith.constant 0 : index
    %c0_0 = arith.constant 0 : index
    %c0_1 = arith.constant 0 : index
    %0 = vector.load %arg2[%c0, %c0_0, %c0_1] : memref<1x256x128xf32, #tpu.memory_space<vmem>>, vector<1x256x128xf32>
    %1 = vector.shape_cast %0 : vector<1x256x128xf32> to vector<256x128xf32>
    %c0_2 = arith.constant 0 : index
    %c0_3 = arith.constant 0 : index
    %2 = vector.load %arg3[%c0_2, %c0_3] : memref<1x128xf32, #tpu.memory_space<vmem>>, vector<1x128xf32>
    %3 = vector.shape_cast %2 : vector<1x128xf32> to vector<128xf32>
    %c0_4 = arith.constant 0 : index
    %c0_5 = arith.constant 0 : index
    %4 = vector.load %arg4[%c0_4, %c0_5] : memref<1x128xf32, #tpu.memory_space<vmem>>, vector<1x128xf32>
    %5 = vector.shape_cast %4 : vector<1x128xf32> to vector<128xf32>
    %cst = arith.constant dense<0.000000e+00> : vector<256xf32>
    %6 = vector.multi_reduction <add>, %1, %cst [1] : vector<256x128xf32> to vector<256xf32>
    %7 = vector.shape_cast %6 : vector<256xf32> to vector<256x1xf32>
    %cst_6 = arith.constant 1.280000e+02 : f32
    %8 = vector.broadcast %cst_6 : f32 to vector<256x1xf32>
    %9 = arith.divf %7, %8 : vector<256x1xf32>
    %10 = vector.broadcast %9 : vector<256x1xf32> to vector<256x128xf32>
    %11 = arith.subf %1, %10 : vector<256x128xf32>
    %12 = arith.mulf %11, %11 : vector<256x128xf32>
    %cst_7 = arith.constant dense<0.000000e+00> : vector<256xf32>
    %13 = vector.multi_reduction <add>, %12, %cst_7 [1] : vector<256x128xf32> to vector<256xf32>
    %14 = vector.shape_cast %13 : vector<256xf32> to vector<256x1xf32>
    %cst_8 = arith.constant 1.280000e+02 : f32
    %15 = vector.broadcast %cst_8 : f32 to vector<256x1xf32>
    %16 = arith.divf %14, %15 : vector<256x1xf32>
    %cst_9 = arith.constant 9.99999974E-6 : f32
    %17 = vector.broadcast %cst_9 : f32 to vector<256x1xf32>
    %18 = arith.addf %16, %17 : vector<256x1xf32>
    %19 = math.rsqrt %18 : vector<256x1xf32>
    %20 = vector.broadcast %19 : vector<256x1xf32> to vector<256x128xf32>
    %21 = arith.mulf %11, %20 : vector<256x128xf32>
    %22 = vector.shape_cast %3 : vector<128xf32> to vector<1x128xf32>
    %23 = vector.broadcast %22 : vector<1x128xf32> to vector<256x128xf32>
    %24 = arith.mulf %21, %23 : vector<256x128xf32>
    %25 = vector.shape_cast %5 : vector<128xf32> to vector<1x128xf32>
    %26 = vector.broadcast %25 : vector<1x128xf32> to vector<256x128xf32>
    %27 = arith.addf %24, %26 : vector<256x128xf32>
    %28 = arith.truncf %27 : vector<256x128xf32> to vector<256x128xbf16>
    %c0_10 = arith.constant 0 : index
    %c0_11 = arith.constant 0 : index
    %29 = vector.load %arg5[%c0_10, %c0_11] : memref<128x384xbf16, #tpu.memory_space<vmem>>, vector<128x384xbf16>
    %cst_12 = arith.constant dense<0.000000e+00> : vector<256x384xf32>
    %30 = tpu.matmul %28, %29, %cst_12 {dimension_numbers = #tpu.dot_dimension_numbers<[1], [0], [0], [1], [0, 0, 1, 1], [], []>} : vector<256x128xbf16>, vector<128x384xbf16>, vector<256x384xf32> -> vector<256x384xf32>
    %c0_13 = arith.constant 0 : index
    %c0_14 = arith.constant 0 : index
    %31 = vector.load %arg6[%c0_13, %c0_14] : memref<1x384xf32, #tpu.memory_space<vmem>>, vector<1x384xf32>
    %32 = vector.shape_cast %31 : vector<1x384xf32> to vector<384xf32>
    %33 = vector.shape_cast %32 : vector<384xf32> to vector<1x384xf32>
    %34 = vector.broadcast %33 : vector<1x384xf32> to vector<256x384xf32>
    %35 = arith.addf %30, %34 : vector<256x384xf32>
    %36 = vector.extract_strided_slice %35 {offsets = [0, 0], sizes = [256, 128], strides = [1, 1]} : vector<256x384xf32> to vector<256x128xf32>
    %cst_15 = arith.constant 0.176776692 : f32
    %37 = vector.broadcast %cst_15 : f32 to vector<256x128xf32>
    %38 = arith.mulf %36, %37 : vector<256x128xf32>
    %39 = arith.truncf %38 : vector<256x128xf32> to vector<256x128xbf16>
    %40 = vector.shape_cast %39 : vector<256x128xbf16> to vector<256x4x32xbf16>
    %41 = tpu.transpose %40, [1, 0, 2] : vector<256x4x32xbf16> -> vector<4x256x32xbf16>
    %c0_16 = arith.constant 0 : index
    %c0_17 = arith.constant 0 : index
    %c0_18 = arith.constant 0 : index
    %c0_19 = arith.constant 0 : index
    %42 = vector.load %arg7[%c0_16, %c0_17, %c0_18, %c0_19] : memref<1x4x256x32xbf16, #tpu.memory_space<vmem>>, vector<1x4x256x32xbf16>
    %43 = vector.shape_cast %42 : vector<1x4x256x32xbf16> to vector<4x256x32xbf16>
    %44 = vector.shape_cast %41 : vector<4x256x32xbf16> to vector<1x4x256x32xbf16>
    tpu.vector_store %arg7[%c0_16, %c0_17, %c0_18, %c0_19], %44 {strides = array<i32>} : memref<1x4x256x32xbf16, #tpu.memory_space<vmem>>, vector<1x4x256x32xbf16>,
    %45 = vector.extract_strided_slice %35 {offsets = [0, 128], sizes = [256, 128], strides = [1, 1]} : vector<256x384xf32> to vector<256x128xf32>
    %46 = arith.truncf %45 : vector<256x128xf32> to vector<256x128xbf16>
    %47 = vector.shape_cast %46 : vector<256x128xbf16> to vector<256x4x32xbf16>
    %48 = tpu.transpose %47, [1, 0, 2] : vector<256x4x32xbf16> -> vector<4x256x32xbf16>
    %c0_20 = arith.constant 0 : index
    %c0_21 = arith.constant 0 : index
    %c0_22 = arith.constant 0 : index
    %c0_23 = arith.constant 0 : index
    %49 = vector.load %arg8[%c0_20, %c0_21, %c0_22, %c0_23] : memref<1x4x256x32xbf16, #tpu.memory_space<vmem>>, vector<1x4x256x32xbf16>
    %50 = vector.shape_cast %49 : vector<1x4x256x32xbf16> to vector<4x256x32xbf16>
    %51 = vector.shape_cast %48 : vector<4x256x32xbf16> to vector<1x4x256x32xbf16>
    tpu.vector_store %arg8[%c0_20, %c0_21, %c0_22, %c0_23], %51 {strides = array<i32>} : memref<1x4x256x32xbf16, #tpu.memory_space<vmem>>, vector<1x4x256x32xbf16>,
    %52 = vector.extract_strided_slice %35 {offsets = [0, 256], sizes = [256, 128], strides = [1, 1]} : vector<256x384xf32> to vector<256x128xf32>
    %53 = arith.truncf %52 : vector<256x128xf32> to vector<256x128xbf16>
    %54 = vector.shape_cast %53 : vector<256x128xbf16> to vector<256x4x32xbf16>
    %55 = tpu.transpose %54, [1, 0, 2] : vector<256x4x32xbf16> -> vector<4x256x32xbf16>
    %c0_24 = arith.constant 0 : index
    %c0_25 = arith.constant 0 : index
    %c0_26 = arith.constant 0 : index
    %c0_27 = arith.constant 0 : index
    %56 = vector.load %arg9[%c0_24, %c0_25, %c0_26, %c0_27] : memref<1x4x256x32xbf16, #tpu.memory_space<vmem>>, vector<1x4x256x32xbf16>
    %57 = vector.shape_cast %56 : vector<1x4x256x32xbf16> to vector<4x256x32xbf16>
    %58 = vector.shape_cast %55 : vector<4x256x32xbf16> to vector<1x4x256x32xbf16>
    tpu.vector_store %arg9[%c0_24, %c0_25, %c0_26, %c0_27], %58 {strides = array<i32>} : memref<1x4x256x32xbf16, #tpu.memory_space<vmem>>, vector<1x4x256x32xbf16>,
    return
  }
  func.func @transform_0(%arg0: i32, %arg1: i32) -> (i32, i32, i32) {
    %c0_i32 = arith.constant 0 : i32
    %c0_i32_0 = arith.constant 0 : i32
    return %arg0, %arg1, %c0_i32 : i32, i32, i32
  }
  func.func @transform_1(%arg0: i32, %arg1: i32) -> (i32, i32) {
    %c0_i32 = arith.constant 0 : i32
    %c0_i32_0 = arith.constant 0 : i32
    %c0_i32_1 = arith.constant 0 : i32
    return %c0_i32, %c0_i32_0 : i32, i32
  }
  func.func @transform_2(%arg0: i32, %arg1: i32) -> (i32, i32) {
    %c0_i32 = arith.constant 0 : i32
    %c0_i32_0 = arith.constant 0 : i32
    %c0_i32_1 = arith.constant 0 : i32
    return %c0_i32, %c0_i32_0 : i32, i32
  }
  func.func @transform_3(%arg0: i32, %arg1: i32) -> (i32, i32) {
    %c0_i32 = arith.constant 0 : i32
    %c0_i32_0 = arith.constant 0 : i32
    %c0_i32_1 = arith.constant 0 : i32
    return %c0_i32, %c0_i32_0 : i32, i32
  }
  func.func @transform_4(%arg0: i32, %arg1: i32) -> (i32, i32) {
    %c0_i32 = arith.constant 0 : i32
    %c0_i32_0 = arith.constant 0 : i32
    %c0_i32_1 = arith.constant 0 : i32
    return %c0_i32, %c0_i32_0 : i32, i32
  }
  func.func @transform_5(%arg0: i32, %arg1: i32) -> (i32, i32, i32, i32) {
    %c0_i32 = arith.constant 0 : i32
    %c0_i32_0 = arith.constant 0 : i32
    %c0_i32_1 = arith.constant 0 : i32
    return %arg0, %c0_i32, %arg1, %c0_i32_0 : i32, i32, i32, i32
  }
  func.func @transform_6(%arg0: i32, %arg1: i32) -> (i32, i32, i32, i32) {
    %c0_i32 = arith.constant 0 : i32
    %c0_i32_0 = arith.constant 0 : i32
    %c0_i32_1 = arith.constant 0 : i32
    return %arg0, %c0_i32, %arg1, %c0_i32_0 : i32, i32, i32, i32
  }
  func.func @transform_7(%arg0: i32, %arg1: i32) -> (i32, i32, i32, i32) {
    %c0_i32 = arith.constant 0 : i32
    %c0_i32_0 = arith.constant 0 : i32
    %c0_i32_1 = arith.constant 0 : i32
    return %arg0, %c0_i32, %arg1, %c0_i32_0 : i32, i32, i32, i32
  }
}

</mosaic_0001>

<bundles_post_ra>
// kernel: tpu_custom_call.1
= control target key start
LH: loop header
LB: loop body
LE: loop exit
PB: predicated region body
PF: predicated region fallthrough
CT: control target
= control target key end

     0   :  { %13 = vsyncpa [#allocation3], 0  ;;  %s21968_s0 = inlined_call_operand.hbm [shape: f32[2,256,128], index: 0, kind: input, shape index: {}]   ;;  %s21969_s1 = inlined_call_operand.vmem [shape: f32[1,128], index: 1, kind: input, shape index: {}]   ;;  %s21970_s2 = inlined_call_operand.vmem [shape: f32[1,128], index: 2, kind: input, shape index: {}]   ;;  %s21971_s3 = inlined_call_operand.hbm [shape: bf16[128,384], index: 3, kind: input, shape index: {}]   ;;  %s21972_s4 = inlined_call_operand.vmem [shape: f32[1,384], index: 4, kind: input, shape index: {}]   ;;  %s21973_s5 = inlined_call_operand.vmem [shape: bf16[2,4,256,32], index: 5, kind: output, shape index: {0}]   ;;  %s21974_s6 = inlined_call_operand.vmem [shape: bf16[2,4,256,32], index: 6, kind: output, shape index: {1}]   ;;  %s21975_s7 = inlined_call_operand.vmem [shape: bf16[2,4,256,32], index: 7, kind: output, shape index: {2}]  }
   0x1   :  { %15 = vsyncpa [#allocation3 + $0x1], 0 }
   0x2   :  { %16 = vsyncpa [#allocation5], 0  ;;  %s17091_s24 = smov 0   ;;  %s17093_s25 = smov 0  }
   0x3   :  { %s17095_s26 = smov 0   ;;  %s17097_s27 = smov 0  }
   0x4   :  { %s17099_s28 = smov 0   ;;  %s17101_s29 = smov 0  }
   0x5 LB: > { %s16044_s30 = sadd.s32 4294967295, %s17037_s29   ;;  %p56_p0 = scmp.ne.s32.totalorder %s17021_s25, %s17017_s24  ;;  %s17037_s29 = sphi %s17101_s29, %s22_s29   ;;  %s17033_s28 = sphi %s17099_s28, %s22184_s28   ;;  %s17029_s27 = sphi %s17097_s27, %s22183_s27   ;;  %s17025_s26 = sphi %s17095_s26, %s22182_s26   ;;  %s17021_s25 = sphi %s17093_s25, %s22181_s25   ;;  %s17017_s24 = sphi %s17091_s24, %s22180_s24  }
   0x6   : > { %p17121_p1 = scmp.eq.s32.totalorder %s16044_s30, 0  ;;  %p16046_p2 = scmp.ge.s32.totalorder %s17037_s29, 1 }
   0x7   : > { %p235_p3 = scmp.lt.s32.totalorder %s17037_s29, 3  ;;  %s17039_s11 = smov [#allocation4]  }
   0x8   : > { %p17129_p4 = por %p17121_p1, %p56_p0  ;;  %s253_s12 = sshll.u32 %s17039_s11, 4  ;;  %s254_s12 = int_to_ptr.vmem [resolvable:$true] %s253_s12 }
   0x9   : > { %p17133_p5 = pnand %p16046_p2, %p235_p3  ;;  %s34_s14 = sadd.s32 1, %s17033_s28 }
   0xa   : > { %s16940_s15 = scalar_lea.vmem %s254_s12, 3072  ;;  %p16948_p12 = scmp.lt.s32.totalorder %s254_s12, %s254_s12 }
   0xb   : > { %p16763_p6 = pneg %p17133_p5  ;;  %p16941_p9 = scmp.ne.s32.totalorder %s254_s12, %s16940_s15 }
   0xc   : > { %p16949_p13 = scmp.lt.s32.totalorder %s16940_s15, %s16940_s15 }
   0xd   : > { %p17141_p7 = pnand %p16763_p6, %p17121_p1 }
   0xe   : > { %p16950_p0 = por %p16949_p13, %p16948_p12 }
   0xf   : > { %p16931_p8 = pneg %p17141_p7 }
  0x11   : > { %p16943_p10 = pnand %p16941_p9, %p16931_p8 }
  0x13   : > { %p16944_p11 = pneg %p16943_p10 }
  0x15   : > { %p16951_p2 = pnand %p16950_p0, %p16944_p11 }
  0x17   : > { %16954 = shalt.err (!%p16951_p2)
}
  0x18   : > { %s17040_s16 = smov 192   ;;  %s17041_s17 = smov 12  }
  0x19   : > { %16766 = dma.hbm_to_vmem [thread:$0]  (!%p17141_p7), %s21971_s3, 3072, %s254_s12, [#allocation5], %s17040_s16, %s17040_s16, %s17041_s17  }
  0x1a   : > { %p36_p3 = scmp.ge.s32.totalorder %s34_s14, 2  ;;  %s43_s20 = sadd.s32 1, %s17025_s26 }
  0x1b   : > { %p50_p6 = scmp.ne.s32.totalorder %s17025_s26, %s17021_s25  ;;  %p51_p8 = scmp.eq.s32.totalorder %s17037_s29, 0 }
  0x1c   : > { %s22186_s14 = smov (%p36_p3, %s34_s14), 0  ;;  %p16772_p10 = scmp.lt.s32.totalorder %s17037_s29, 2 }
  0x1d   : > { %p52_p9 = por %p51_p8, %p50_p6  ;;  %s38_s21 = ssub.s32 %s17033_s28, %s22186_s14 }
  0x1e   : > { %s270_s22 = sand.u32 1, %s17025_s26   ;;  %p41_p11 = scmp.eq.s32.totalorder %s38_s21, 0 }
  0x1f   : > { %s16049_s23 = sshll.u32 %s270_s22, 8  ;;  %s16665_s24 = sshll.u32 %s17033_s28, 12 }
  0x20   : > { %s17165_s30 = scalar_select %p41_p11, %s17025_s26, %s43_s20  }
  0x21   : > { %s282_s12 = scalar_lea.hbm %s21968_s0, %s16665_s24  ;;  %s274_s15 = scalar_lea.vmem [#allocation2], %s16049_s23 }
  0x22   : > { %s283_s16 = sshll.u32 %s274_s15, 4  ;;  %p17170_p7 = pnand %p16772_p10, %p52_p9  ;;  %s284_s16 = int_to_ptr.vmem [resolvable:$true] %s283_s16 }
  0x23   : > { %s271_s18 = scalar_lea.sflag [#allocation3], %s270_s22  ;;  %s16968_s19 = scalar_lea.vmem %s284_s16, 4096 }
  0x24   : > { %p16957_p12 = pneg %p17170_p7  ;;  %p16969_p13 = scmp.ne.s32.totalorder %s284_s16, %s16968_s19 }
  0x25   : > { %s17042_s20 = smov [#allocation2]  }
  0x26   : > { %p16971_p0 = pnand %p16969_p13, %p16957_p12  ;;  %s16973_s21 = sshll.u32 %s17042_s20, 4  ;;  %s16974_s21 = int_to_ptr.vmem [resolvable:$false] %s16973_s21 }
  0x27   : > { %s16975_s11 = scalar_lea.vmem %s16974_s21, 8192  ;;  %p16976_p3 = scmp.lt.s32.totalorder %s284_s16, %s16974_s21 }
  0x28   : > { %p16972_p2 = pneg %p16971_p0  ;;  %p16977_p6 = scmp.lt.s32.totalorder %s16975_s11, %s16968_s19 }
  0x2a   : > { %p16978_p8 = por %p16977_p6, %p16976_p3 }
  0x2c   : > { %p16979_p9 = pnand %p16978_p8, %p16972_p2 }
  0x2e   : > { %16982 = shalt.err (!%p16979_p9)
}
  0x2f   : > { %s17043_s23 = smov 128   ;;  %s17044_s24 = smov 8  }
  0x30   : > { %16770 = dma.hbm_to_vmem [thread:$0]  (!%p17170_p7), %s282_s12, 4096, %s284_s16, %s271_s18, %s17043_s23, %s17043_s23, %s17044_s24  }
  0x31   : > { %295 = sbr.rel (%p17133_p5) target bundleno = 1688 (0x698), region = 40 }
  0x36   : > { %s297_s22 = sand.u32 1, %s17021_s25  }
  0x37   : > { %s16053_s13 = sshll.u32 %s297_s22, 8  ;;  %s298_s15 = scalar_lea.sflag [#allocation3], %s297_s22 }
  0x38   : > { %s17181_s20 = scalar_lea.vmem [#allocation2], %s16053_s13 }
  0x39   : > { %17008 = dma.done.wait (%p17129_p4), %s298_s15, 4096  }
  0x3a   : > { %17010 = vsyncadd (%p17129_p4), %s298_s15, 4294963200 }
  0x3b   : > { %17012 = dma.done.wait (%p17121_p1), [#allocation5], 3072  }
  0x3c   : > { %17014 = vsyncadd (%p17121_p1), [#allocation5], 4294964224  ;;  %v17192_v0 = vld [vmem:[%s17181_s20] sm:$0xff]  ;;  %v17200_v2 = vld [vmem:[%s17181_s20 + $0x8] sm:$0xff]  ;;  %s17046_s18 = smov 96   ;;  %s17047_s19 = smov 64  }
  0x3d   : > { %v17195_v1 = vld [vmem:[%s17181_s20 + $0xc0] sm:$0xff]  ;;  %424 = vadd.xlane.f32.xlu0 %v17192_v0  ;;  %v17203_v3 = vld [vmem:[%s17181_s20 + $0xc8] sm:$0xff]  ;;  %v17208_v4 = vld [vmem:[%s17181_s20 + $0x10] sm:$0xff]  ;;  %s17048_s21 = smov 32   ;;  %p360_p1 = scmp.lt.s32.totalorder %s17029_s27, 1  ;;  %vm6110_vm0 = vcmask 257024  }
  0x3e   : > { %472 = vadd.xlane.f32.xlu1 %v17195_v1  ;;  %v17211_v5 = vld [vmem:[%s17181_s20 + $0x18] sm:$0xff]  ;;  %v17216_v6 = vld [vmem:[%s17181_s20 + $0xd0] sm:$0xff]  ;;  %v17222_v8 = vld [vmem:[%s17181_s20 + $0x20] sm:$0xff] }
  0x3f   : > { %v17219_v7 = vld [vmem:[%s17181_s20 + $0xd8] sm:$0xff]  ;;  %v17225_v9 = vld [vmem:[%s17181_s20 + $0x28] sm:$0xff]  ;;  %v17230_v10 = vld [vmem:[%s17181_s20 + $0xe0] sm:$0xff]  ;;  %s22188_s27 = smov (!%p360_p1, %s17029_s27), 1 }
  0x40   : > { %v17233_v11 = vld [vmem:[%s17181_s20 + $0xe8] sm:$0xff]  ;;  %v17240_v12 = vld [vmem:[%s17181_s20 + $0x30] sm:$0xff]  ;;  %v17243_v13 = vld [vmem:[%s17181_s20 + $0x38] sm:$0xff]  ;;  %s18377_s11 = sshll.u32 %s22188_s27, 9 }
  0x41   : > { %426 = vadd.xlane.f32.xlu0 %v17200_v2  ;;  %v17248_v14 = vld [vmem:[%s17181_s20 + $0xf0] sm:$0xff]  ;;  %v17251_v15 = vld [vmem:[%s17181_s20 + $0xf8] sm:$0xff]  ;;  %v17256_v16 = vld [vmem:[%s17181_s20 + $0x40] sm:$0xff]  ;;  %s18390_s24 = scalar_lea.vmem %s21973_s5, %s18377_s11  ;;  %s18823_s15 = scalar_lea.vmem %s21974_s6, %s18377_s11 }
  0x42   : > { %474 = vadd.xlane.f32.xlu1 %v17203_v3  ;;  %v17259_v17 = vld [vmem:[%s17181_s20 + $0x48] sm:$0xff]  ;;  %v17264_v18 = vld [vmem:[%s17181_s20 + $0x50] sm:$0xff]  ;;  %v17267_v19 = vld [vmem:[%s17181_s20 + $0x58] sm:$0xff]  ;;  %s19921_s9 = scalar_lea.vmem %s21975_s7, %s18377_s11 }
  0x43   : > { %v17272_v20 = vld [vmem:[%s17181_s20 + $0x60] sm:$0xff]  ;;  %v17275_v21 = vld [vmem:[%s17181_s20 + $0x68] sm:$0xff]  ;;  %v17280_v22 = vld [vmem:[%s17181_s20 + $0x70] sm:$0xff] }
  0x44   : > { %v17283_v23 = vld [vmem:[%s17181_s20 + $0x78] sm:$0xff]  ;;  %v17288_v24 = vld [vmem:[%s17181_s20 + $0x80] sm:$0xff]  ;;  %v17291_v25 = vld [vmem:[%s17181_s20 + $0x88] sm:$0xff] }
  0x45   : > { %428 = vadd.xlane.f32.xlu0 %v17208_v4  ;;  %v17296_v26 = vld [vmem:[%s17181_s20 + $0x90] sm:$0xff]  ;;  %v17299_v27 = vld [vmem:[%s17181_s20 + $0x98] sm:$0xff]  ;;  %v17304_v28 = vld [vmem:[%s17181_s20 + $0xa0] sm:$0xff] }
  0x46   : > { %430 = vadd.xlane.f32.xlu1 %v17211_v5  ;;  %v17307_v29 = vld [vmem:[%s17181_s20 + $0xa8] sm:$0xff]  ;;  %v17312_v30 = vld [vmem:[%s17181_s20 + $0xb0] sm:$0xff]  ;;  %v17315_v31 = vld [vmem:[%s17181_s20 + $0xb8] sm:$0xff] }
  0x47   : > { %v16833_v32 = vld [vmem:[#allocation4 + $0xac] ss:$12 sps:$4 sm:$0xff]   ;;  %v16835_v33 = vld [vmem:[#allocation4 + $0xa8] ss:$12 sps:$4 sm:$0xff]  }
  0x48   : > { %1046 = vmatprep.subr.bf16.mxu0 %v16833_v32  ;;  %16741 = vmatprep.subr.bf16.mxu1 %v16833_v32  ;;  %v16838_v32 = vld [vmem:[#allocation4 + $0x90] ss:$12 sps:$4 sm:$0xff]  }
  0x49   : > { %476 = vadd.xlane.f32.xlu0 %v17216_v6  ;;  %1047 = vmatpush1.bf16.msra.mxu0 %v16835_v33 }
  0x4a   : > { %478 = vadd.xlane.f32.xlu1 %v17219_v7  ;;  %16749 = vmatpush1.bf16.msra.mxu1 %v16835_v33 }
  0x4d   : > { %432 = vadd.xlane.f32.xlu0 %v17222_v8 }
  0x4e   : > { %434 = vadd.xlane.f32.xlu1 %v17225_v9 }
  0x51   : > { %480 = vadd.xlane.f32.xlu0 %v17230_v10 }
  0x52   : > { %482 = vadd.xlane.f32.xlu1 %v17233_v11 }
  0x55   : > { %436 = vadd.xlane.f32.xlu0 %v17240_v12 }
  0x56   : > { %438 = vadd.xlane.f32.xlu1 %v17243_v13 }
  0x59   : > { %484 = vadd.xlane.f32.xlu0 %v17248_v14 }
  0x5a   : > { %486 = vadd.xlane.f32.xlu1 %v17251_v15 }
  0x5d   : > { %440 = vadd.xlane.f32.xlu0 %v17256_v16 }
  0x5e   : > { %442 = vadd.xlane.f32.xlu1 %v17259_v17 }
  0x61   : > { %444 = vadd.xlane.f32.xlu0 %v17264_v18 }
  0x62   : > { %446 = vadd.xlane.f32.xlu1 %v17267_v19 }
  0x65   : > { %448 = vadd.xlane.f32.xlu0 %v17272_v20 }
  0x66   : > { %450 = vadd.xlane.f32.xlu1 %v17275_v21 }
  0x69   : > { %452 = vadd.xlane.f32.xlu0 %v17280_v22 }
  0x6a   : > { %454 = vadd.xlane.f32.xlu1 %v17283_v23 }
  0x6d   : > { %456 = vadd.xlane.f32.xlu0 %v17288_v24 }
  0x6e   : > { %458 = vadd.xlane.f32.xlu1 %v17291_v25 }
  0x71   : > { %460 = vadd.xlane.f32.xlu0 %v17296_v26 }
  0x72   : > { %462 = vadd.xlane.f32.xlu1 %v17299_v27 }
  0x75   : > { %464 = vadd.xlane.f32.xlu0 %v17304_v28 }
  0x76   : > { %466 = vadd.xlane.f32.xlu1 %v17307_v29 }
  0x79   : > { %468 = vadd.xlane.f32.xlu0 %v17312_v30 }
  0x7a   : > { %470 = vadd.xlane.f32.xlu1 %v17315_v31 }
  0xc6   : > { %v425_v34 = vpop.xlane.xlu0 %424 }
  0xc7   : > { %v473_v35 = vpop.xlane.xlu1 %472  ;;  %v489_v36 = vmul.f32 0.0078125, %v425_v34 }
  0xc8   : > { %v513_v37 = vmul.f32 0.0078125, %v473_v35 }
  0xc9   : > { %v17320_v38 = vsub.f32 %v17192_v0, %v489_v36 }
  0xca   : > { %v17323_v39 = vsub.f32 %v17195_v1, %v513_v37  ;;  %v427_v40 = vpop.xlane.xlu0 %426 }
  0xcb   : > { %v475_v41 = vpop.xlane.xlu1 %474  ;;  %v490_v42 = vmul.f32 0.0078125, %v427_v40  ;;  %v553_v43 = vmul.f32 %v17320_v38, %v17320_v38 }
  0xcc   : > { %v514_v44 = vmul.f32 0.0078125, %v475_v41  ;;  %v577_v45 = vmul.f32 %v17323_v39, %v17323_v39  ;;  %v16839_v41 = vld [vmem:[#allocation4 + $0x7c] ss:$12 sps:$4 sm:$0xff]  }
  0xcd   : > { %585 = vadd.xlane.f32.xlu0 %v553_v43  ;;  %v17330_v46 = vsub.f32 %v17200_v2, %v490_v42  ;;  %v16841_v43 = vld [vmem:[#allocation4 + $0x78] ss:$12 sps:$4 sm:$0xff]  }
  0xce   : > { %v17333_v47 = vsub.f32 %v17203_v3, %v514_v44  ;;  %v429_v48 = vpop.xlane.xlu0 %428 }
  0xcf   : > { %v431_v49 = vpop.xlane.xlu1 %430  ;;  %v491_v50 = vmul.f32 0.0078125, %v429_v48  ;;  %v554_v51 = vmul.f32 %v17330_v46, %v17330_v46 }
  0xd0   : > { %v492_v52 = vmul.f32 0.0078125, %v431_v49  ;;  %v578_v53 = vmul.f32 %v17333_v47, %v17333_v47 }
  0xd1   : > { %633 = vadd.xlane.f32.xlu0 %v577_v45  ;;  %587 = vadd.xlane.f32.xlu1 %v554_v51  ;;  %v17340_v54 = vsub.f32 %v17208_v4, %v491_v50  ;;  %v16842_v51 = vld [vmem:[#allocation4 + $0x64] ss:$12 sps:$4 sm:$0xff]  }
  0xd2   : > { %v17343_v55 = vsub.f32 %v17211_v5, %v492_v52  ;;  %v477_v56 = vpop.xlane.xlu0 %476  ;;  %v16836_v5 = vld [vmem:[#allocation4 + $0x94] ss:$12 sps:$4 sm:$0xff]  }
  0xd3   : > { %v479_v57 = vpop.xlane.xlu1 %478  ;;  %v515_v58 = vmul.f32 0.0078125, %v477_v56  ;;  %v555_v59 = vmul.f32 %v17340_v54, %v17340_v54  ;;  %1048 = vmatprep.subr.bf16.mxu0 %v16836_v5  ;;  %16742 = vmatprep.subr.bf16.mxu1 %v16836_v5 }
  0xd4   : > { %v516_v60 = vmul.f32 0.0078125, %v479_v57  ;;  %v556_v61 = vmul.f32 %v17343_v55, %v17343_v55  ;;  %1049 = vmatpush1.bf16.msra.mxu0 %v16838_v32  ;;  %16750 = vmatpush1.bf16.msra.mxu1 %v16838_v32 }
  0xd5   : > { %635 = vadd.xlane.f32.xlu1 %v578_v53  ;;  %589 = vadd.xlane.f32.xlu0 %v555_v59  ;;  %v17350_v62 = vsub.f32 %v17216_v6, %v515_v58  ;;  %v16844_v53 = vld [vmem:[#allocation4 + $0x60] ss:$12 sps:$4 sm:$0xff]  }
  0xd6   : > { %v17353_v63 = vsub.f32 %v17219_v7, %v516_v60  ;;  %v433_v0 = vpop.xlane.xlu0 %432  ;;  %1050 = vmatprep.subr.bf16.mxu0 %v16839_v41  ;;  %16743 = vmatprep.subr.bf16.mxu1 %v16839_v41 }
  0xd7   : > { %v435_v1 = vpop.xlane.xlu1 %434  ;;  %v493_v2 = vmul.f32 0.0078125, %v433_v0  ;;  %v579_v3 = vmul.f32 %v17350_v62, %v17350_v62 }
  0xd8   : > { %v494_v4 = vmul.f32 0.0078125, %v435_v1  ;;  %v580_v33 = vmul.f32 %v17353_v63, %v17353_v63  ;;  %1051 = vmatpush1.bf16.msra.mxu0 %v16841_v43  ;;  %16751 = vmatpush1.bf16.msra.mxu1 %v16841_v43  ;;  %v16847_v1 = vld [vmem:[#allocation4 + $0x48] ss:$12 sps:$4 sm:$0xff]  }
  0xd9   : > { %591 = vadd.xlane.f32.xlu1 %v556_v61  ;;  %637 = vadd.xlane.f32.xlu0 %v579_v3  ;;  %v17360_v6 = vsub.f32 %v17222_v8, %v493_v2  ;;  %v16845_v61 = vld [vmem:[#allocation4 + $0x4c] ss:$12 sps:$4 sm:$0xff]   ;;  %v16851_v43 = vld [vmem:[#allocation4 + $0x1c] ss:$12 sps:$4 sm:$0xff]  }
  0xda   : > { %v17363_v7 = vsub.f32 %v17225_v9, %v494_v4  ;;  %v481_v34 = vpop.xlane.xlu0 %480  ;;  %1052 = vmatprep.subr.bf16.mxu0 %v16842_v51  ;;  %16744 = vmatprep.subr.bf16.mxu1 %v16842_v51 }
  0xdb   : > { %v483_v35 = vpop.xlane.xlu1 %482  ;;  %v517_v36 = vmul.f32 0.0078125, %v481_v34  ;;  %v557_v37 = vmul.f32 %v17360_v6, %v17360_v6 }
  0xdc   : > { %v518_v40 = vmul.f32 0.0078125, %v483_v35  ;;  %v558_v8 = vmul.f32 %v17363_v7, %v17363_v7  ;;  %1053 = vmatpush1.bf16.msra.mxu0 %v16844_v53  ;;  %16752 = vmatpush1.bf16.msra.mxu1 %v16844_v53  ;;  %v16850_v35 = vld [vmem:[#allocation4 + $0x30] ss:$12 sps:$4 sm:$0xff]  }
  0xdd   : > { %639 = vadd.xlane.f32.xlu1 %v580_v33  ;;  %593 = vadd.xlane.f32.xlu0 %v557_v37  ;;  %v17370_v9 = vsub.f32 %v17230_v10, %v517_v36  ;;  %v16848_v33 = vld [vmem:[#allocation4 + $0x34] ss:$12 sps:$4 sm:$0xff]   ;;  %v16854_v53 = vld [vmem:[#allocation4 + $0x4] ss:$12 sps:$4 sm:$0xff]  }
  0xde   : > { %v17373_v42 = vsub.f32 %v17233_v11, %v518_v40  ;;  %v437_v44 = vpop.xlane.xlu0 %436  ;;  %1054 = vmatprep.subr.bf16.mxu0 %v16845_v61  ;;  %16745 = vmatprep.subr.bf16.mxu1 %v16845_v61 }
  0xdf   : > { %v439_v45 = vpop.xlane.xlu1 %438  ;;  %v495_v48 = vmul.f32 0.0078125, %v437_v44  ;;  %v581_v49 = vmul.f32 %v17370_v9, %v17370_v9 }
  0xe0   : > { %v496_v50 = vmul.f32 0.0078125, %v439_v45  ;;  %v582_v10 = vmul.f32 %v17373_v42, %v17373_v42  ;;  %1055 = vmatpush1.bf16.msra.mxu0 %v16847_v1  ;;  %16753 = vmatpush1.bf16.msra.mxu1 %v16847_v1  ;;  %v16853_v45 = vld [vmem:[#allocation4 + $0x18] ss:$12 sps:$4 sm:$0xff]  }
  0xe1   : > { %595 = vadd.xlane.f32.xlu1 %v558_v8  ;;  %641 = vadd.xlane.f32.xlu0 %v581_v49  ;;  %v17380_v11 = vsub.f32 %v17240_v12, %v495_v48 }
  0xe2   : > { %v17383_v52 = vsub.f32 %v17243_v13, %v496_v50  ;;  %v485_v56 = vpop.xlane.xlu0 %484  ;;  %1056 = vmatprep.subr.bf16.mxu0 %v16848_v33  ;;  %16746 = vmatprep.subr.bf16.mxu1 %v16848_v33 }
  0xe3   : > { %v487_v57 = vpop.xlane.xlu1 %486  ;;  %v519_v58 = vmul.f32 0.0078125, %v485_v56  ;;  %v559_v59 = vmul.f32 %v17380_v11, %v17380_v11 }
  0xe4   : > { %v520_v60 = vmul.f32 0.0078125, %v487_v57  ;;  %v560_v12 = vmul.f32 %v17383_v52, %v17383_v52  ;;  %1057 = vmatpush1.bf16.msra.mxu0 %v16850_v35  ;;  %16754 = vmatpush1.bf16.msra.mxu1 %v16850_v35  ;;  %v16856_v57 = vld [vmem:[#allocation4] ss:$12 sps:$4 sm:$0xff]  }
  0xe5   : > { %643 = vadd.xlane.f32.xlu1 %v582_v10  ;;  %597 = vadd.xlane.f32.xlu0 %v559_v59  ;;  %v17390_v13 = vsub.f32 %v17248_v14, %v519_v58 }
  0xe6   : > { %v17393_v0 = vsub.f32 %v17251_v15, %v520_v60  ;;  %v441_v2 = vpop.xlane.xlu0 %440  ;;  %1058 = vmatprep.subr.bf16.mxu0 %v16851_v43  ;;  %16747 = vmatprep.subr.bf16.mxu1 %v16851_v43 }
  0xe7   : > { %v443_v3 = vpop.xlane.xlu1 %442  ;;  %v497_v4 = vmul.f32 0.0078125, %v441_v2  ;;  %v583_v5 = vmul.f32 %v17390_v13, %v17390_v13 }
  0xe8   : > { %v498_v32 = vmul.f32 0.0078125, %v443_v3  ;;  %v584_v14 = vmul.f32 %v17393_v0, %v17393_v0  ;;  %1059 = vmatpush1.bf16.msra.mxu0 %v16853_v45  ;;  %16755 = vmatpush1.bf16.msra.mxu1 %v16853_v45 }
  0xe9   : > { %599 = vadd.xlane.f32.xlu1 %v560_v12  ;;  %645 = vadd.xlane.f32.xlu0 %v583_v5  ;;  %v17400_v15 = vsub.f32 %v17256_v16, %v497_v4  ;;  %v21976_v4 = vmov 0  }
  0xea   : > { %v17403_v34 = vsub.f32 %v17259_v17, %v498_v32  ;;  %v445_v36 = vpop.xlane.xlu0 %444  ;;  %1060 = vmatprep.subr.bf16.mxu0 %v16854_v53  ;;  %16748 = vmatprep.subr.bf16.mxu1 %v16854_v53 }
  0xeb   : > { %v447_v37 = vpop.xlane.xlu1 %446  ;;  %v499_v40 = vmul.f32 0.0078125, %v445_v36  ;;  %v561_v41 = vmul.f32 %v17400_v15, %v17400_v15  ;;  %1078 = vmatprep.mubr.bf16.mxu0 %v21976_v4  ;;  %1198 = vmatprep.mubr.bf16.mxu1 %v21976_v4 }
  0xec   : > { %v500_v8 = vmul.f32 0.0078125, %v447_v37  ;;  %v562_v16 = vmul.f32 %v17403_v34, %v17403_v34  ;;  %1061 = vmatpush1.bf16.msra.mxu0 %v16856_v57  ;;  %16756 = vmatpush1.bf16.msra.mxu1 %v16856_v57 }
  0xed   : > { %647 = vadd.xlane.f32.xlu1 %v584_v14  ;;  %601 = vadd.xlane.f32.xlu0 %v561_v41  ;;  %v17410_v17 = vsub.f32 %v17264_v18, %v499_v40  ;;  %v17439_v14 = vld [vmem:[#allocation4 + $0xb0] ss:$12 sps:$4 sm:$0xff]  }
  0xee   : > { %v17413_v44 = vsub.f32 %v17267_v19, %v500_v8  ;;  %v449_v48 = vpop.xlane.xlu0 %448  ;;  %16693 = vmatprep.subr.bf16.mxu1 %v17439_v14 }
  0xef   : > { %v451_v49 = vpop.xlane.xlu1 %450  ;;  %v501_v50 = vmul.f32 0.0078125, %v449_v48  ;;  %v563_v51 = vmul.f32 %v17410_v17, %v17410_v17 }
  0xf0   : > { %v502_v10 = vmul.f32 0.0078125, %v451_v49  ;;  %v564_v18 = vmul.f32 %v17413_v44, %v17413_v44 }
  0xf1   : > { %603 = vadd.xlane.f32.xlu1 %v562_v16  ;;  %605 = vadd.xlane.f32.xlu0 %v563_v51  ;;  %v17420_v19 = vsub.f32 %v17272_v20, %v501_v50 }
  0xf2   : > { %v17423_v56 = vsub.f32 %v17275_v21, %v502_v10  ;;  %v453_v58 = vpop.xlane.xlu0 %452 }
  0xf3   : > { %v455_v59 = vpop.xlane.xlu1 %454  ;;  %v503_v60 = vmul.f32 0.0078125, %v453_v58  ;;  %v565_v61 = vmul.f32 %v17420_v19, %v17420_v19 }
  0xf4   : > { %v504_v12 = vmul.f32 0.0078125, %v455_v59  ;;  %v566_v20 = vmul.f32 %v17423_v56, %v17423_v56 }
  0xf5   : > { %607 = vadd.xlane.f32.xlu1 %v564_v18  ;;  %609 = vadd.xlane.f32.xlu0 %v565_v61  ;;  %v17430_v21 = vsub.f32 %v17280_v22, %v503_v60 }
  0xf6   : > { %v17433_v1 = vsub.f32 %v17283_v23, %v504_v12  ;;  %v457_v2 = vpop.xlane.xlu0 %456 }
  0xf7   : > { %v459_v3 = vpop.xlane.xlu1 %458  ;;  %v505_v5 = vmul.f32 0.0078125, %v457_v2  ;;  %v567_v32 = vmul.f32 %v17430_v21, %v17430_v21 }
  0xf8   : > { %v506_v33 = vmul.f32 0.0078125, %v459_v3  ;;  %v568_v22 = vmul.f32 %v17433_v1, %v17433_v1 }
  0xf9   : > { %611 = vadd.xlane.f32.xlu1 %v566_v20  ;;  %613 = vadd.xlane.f32.xlu0 %v567_v32  ;;  %v17444_v23 = vsub.f32 %v17288_v24, %v505_v5 }
  0xfa   : > { %v17447_v35 = vsub.f32 %v17291_v25, %v506_v33  ;;  %v461_v36 = vpop.xlane.xlu0 %460 }
  0xfb   : > { %v463_v37 = vpop.xlane.xlu1 %462  ;;  %v507_v40 = vmul.f32 0.0078125, %v461_v36  ;;  %v569_v41 = vmul.f32 %v17444_v23, %v17444_v23 }
  0xfc   : > { %v508_v8 = vmul.f32 0.0078125, %v463_v37  ;;  %v570_v43 = vmul.f32 %v17447_v35, %v17447_v35 }
  0xfd   : > { %615 = vadd.xlane.f32.xlu1 %v568_v22  ;;  %617 = vadd.xlane.f32.xlu0 %v569_v41  ;;  %v17455_v24 = vsub.f32 %v17296_v26, %v507_v40 }
  0xfe   : > { %v17458_v25 = vsub.f32 %v17299_v27, %v508_v8  ;;  %v465_v16 = vpop.xlane.xlu0 %464 }
  0xff   : > { %v467_v45 = vpop.xlane.xlu1 %466  ;;  %v509_v48 = vmul.f32 0.0078125, %v465_v16  ;;  %v571_v49 = vmul.f32 %v17455_v24, %v17455_v24 }
 0x100   : > { %v510_v50 = vmul.f32 0.0078125, %v467_v45  ;;  %v572_v51 = vmul.f32 %v17458_v25, %v17458_v25 }
 0x101   : > { %619 = vadd.xlane.f32.xlu1 %v570_v43  ;;  %621 = vadd.xlane.f32.xlu0 %v571_v49  ;;  %v17465_v10 = vsub.f32 %v17304_v28, %v509_v48 }
 0x102   : > { %v17468_v26 = vsub.f32 %v17307_v29, %v510_v50  ;;  %v469_v27 = vpop.xlane.xlu0 %468 }
 0x103   : > { %v471_v53 = vpop.xlane.xlu1 %470  ;;  %v511_v18 = vmul.f32 0.0078125, %v469_v27  ;;  %v573_v57 = vmul.f32 %v17465_v10, %v17465_v10 }
 0x104   : > { %v512_v58 = vmul.f32 0.0078125, %v471_v53  ;;  %v574_v59 = vmul.f32 %v17468_v26, %v17468_v26 }
 0x105   : > { %623 = vadd.xlane.f32.xlu1 %v572_v51  ;;  %625 = vadd.xlane.f32.xlu0 %v573_v57  ;;  %v17475_v60 = vsub.f32 %v17312_v30, %v511_v18 }
 0x106   : > { %v17478_v28 = vsub.f32 %v17315_v31, %v512_v58 }
 0x107   : > { %v575_v29 = vmul.f32 %v17475_v60, %v17475_v60 }
 0x108   : > { %v576_v61 = vmul.f32 %v17478_v28, %v17478_v28 }
 0x109   : > { %627 = vadd.xlane.f32.xlu1 %v574_v59  ;;  %629 = vadd.xlane.f32.xlu0 %v575_v29  ;;  %v17487_v29 = vld [vmem:[%s21969_s1] ss:$0 sm:$0xff] }
 0x10d   : > { %631 = vadd.xlane.f32.xlu1 %v576_v61 }
 0x156   : > { %v586_v12 = vpop.xlane.xlu0 %585 }
 0x157   : > { %v649_v20 = vmul.f32 0.0078125, %v586_v12 }
 0x159   : > { %v681_v2 = vadd.f32 1e-05, %v649_v20 }
 0x15a   : > { %v588_v3 = vpop.xlane.xlu1 %587  ;;  %v634_v5 = vpop.xlane.xlu0 %633 }
 0x15b   : > { %16865 = vrsqrt.f32 %v681_v2  ;;  %v650_v30 = vmul.f32 0.0078125, %v588_v3  ;;  %v673_v32 = vmul.f32 0.0078125, %v634_v5 }
 0x15d   : > { %v682_v33 = vadd.f32 1e-05, %v650_v30  ;;  %v705_v31 = vadd.f32 1e-05, %v673_v32 }
 0x15e   : > { %v636_v22 = vpop.xlane.xlu1 %635  ;;  %v590_v36 = vpop.xlane.xlu0 %589 }
 0x15f   : > { %16867 = vrsqrt.f32 %v682_v33  ;;  %v674_v37 = vmul.f32 0.0078125, %v636_v22  ;;  %v651_v40 = vmul.f32 0.0078125, %v590_v36  ;;  %v17494_v22 = vld [vmem:[%s21970_s2] ss:$0 sm:$0xff] }
 0x160   : > { %16869 = vrsqrt.f32 %v705_v31 }
 0x161   : > { %v706_v41 = vadd.f32 1e-05, %v674_v37  ;;  %v683_v8 = vadd.f32 1e-05, %v651_v40 }
 0x162   : > { %v592_v43 = vpop.xlane.xlu1 %591  ;;  %v638_v16 = vpop.xlane.xlu0 %637 }
 0x163   : > { %16871 = vrsqrt.f32 %v706_v41  ;;  %v652_v45 = vmul.f32 0.0078125, %v592_v43  ;;  %v675_v48 = vmul.f32 0.0078125, %v638_v16 }
 0x164   : > { %16873 = vrsqrt.f32 %v683_v8 }
 0x165   : > { %v684_v49 = vadd.f32 1e-05, %v652_v45  ;;  %v707_v50 = vadd.f32 1e-05, %v675_v48 }
 0x166   : > { %v640_v51 = vpop.xlane.xlu1 %639  ;;  %v594_v27 = vpop.xlane.xlu0 %593 }
 0x167   : > { %16875 = vrsqrt.f32 %v684_v49  ;;  %v676_v53 = vmul.f32 0.0078125, %v640_v51  ;;  %v653_v18 = vmul.f32 0.0078125, %v594_v27 }
 0x168   : > { %v16866_v57 = vpop.eup %16865  ;;  %16877 = vrsqrt.f32 %v707_v50 }
 0x169   : > { %v708_v58 = vadd.f32 1e-05, %v676_v53  ;;  %v685_v59 = vadd.f32 1e-05, %v653_v18  ;;  %v745_v61 = vmul.f32 %v16866_v57, %v17320_v38 }
 0x16a   : > { %v596_v12 = vpop.xlane.xlu1 %595  ;;  %v642_v20 = vpop.xlane.xlu0 %641 }
 0x16b   : > { %16879 = vrsqrt.f32 %v708_v58  ;;  %v654_v2 = vmul.f32 0.0078125, %v596_v12  ;;  %v677_v3 = vmul.f32 0.0078125, %v642_v20  ;;  %v783_v30 = vmul.f32 %v17487_v29, %v745_v61 }
 0x16c   : > { %v16868_v5 = vpop.eup %16867  ;;  %16881 = vrsqrt.f32 %v685_v59 }
 0x16d   : > { %v16870_v32 = vpop.eup %16869  ;;  %v686_v33 = vadd.f32 1e-05, %v654_v2  ;;  %v709_v31 = vadd.f32 1e-05, %v677_v3  ;;  %v746_v36 = vmul.f32 %v16868_v5, %v17330_v46  ;;  %v821_v45 = vadd.f32 %v17494_v22, %v783_v30 }
 0x16e   : > { %v644_v38 = vpop.xlane.xlu1 %643  ;;  %v598_v37 = vpop.xlane.xlu0 %597  ;;  %v769_v40 = vmul.f32 %v16870_v32, %v17323_v39 }
 0x16f   : > { %16883 = vrsqrt.f32 %v686_v33  ;;  %v678_v41 = vmul.f32 0.0078125, %v644_v38  ;;  %v655_v8 = vmul.f32 0.0078125, %v598_v37  ;;  %v784_v43 = vmul.f32 %v17487_v29, %v746_v36 }
 0x170   : > { %v16872_v16 = vpop.eup %16871  ;;  %16885 = vrsqrt.f32 %v709_v31  ;;  %v807_v39 = vmul.f32 %v17487_v29, %v769_v40 }
 0x171   : > { %v16874_v48 = vpop.eup %16873  ;;  %v710_v49 = vadd.f32 1e-05, %v678_v41  ;;  %v687_v50 = vadd.f32 1e-05, %v655_v8  ;;  %v822_v51 = vadd.f32 %v17494_v22, %v784_v43  ;;  %v770_v46 = vmul.f32 %v16872_v16, %v17333_v47  ;;  %v16858_v8 = vld [vmem:[#allocation4 + $0x98] ss:$12 sps:$4 sm:$0xff]  }
 0x172   : > { %v600_v27 = vpop.xlane.xlu1 %599  ;;  %v646_v53 = vpop.xlane.xlu0 %645  ;;  %v747_v18 = vmul.f32 %v16874_v48, %v17340_v54  ;;  %v845_v32 = vadd.f32 %v17494_v22, %v807_v39 }
 0x173   : > { %16887 = vrsqrt.f32 %v710_v49  ;;  %v656_v57 = vmul.f32 0.0078125, %v600_v27  ;;  %v679_v58 = vmul.f32 0.0078125, %v646_v53  ;;  %v17504_v59 = vpack.c.bf16 %v822_v51, %v821_v45 }
 0x174   : > { %v16876_v61 = vpop.eup %16875  ;;  %16889 = vrsqrt.f32 %v687_v50  ;;  %v808_v12 = vmul.f32 %v17487_v29, %v770_v46  ;;  %v785_v20 = vmul.f32 %v17487_v29, %v747_v18 }
 0x175   : > { %v16878_v2 = vpop.eup %16877  ;;  %v688_v3 = vadd.f32 1e-05, %v656_v57  ;;  %v711_v47 = vadd.f32 1e-05, %v679_v58  ;;  %1079 = vmatmul.mubr.bf16.vlgmr.msra.gmra.mxu0 %v17504_v59  ;;  %v748_v5 = vmul.f32 %v16876_v61, %v17343_v55  ;;  %v16859_v57 = vld [vmem:[#allocation4 + $0x80] ss:$12 sps:$4 sm:$0xff]  }
 0x176   : > { %v648_v30 = vpop.xlane.xlu1 %647  ;;  %v602_v54 = vpop.xlane.xlu0 %601  ;;  %v846_v33 = vadd.f32 %v17494_v22, %v808_v12  ;;  %1088 = vmatprep.mubr.bf16.mxu0 %v21976_v4  ;;  %v771_v31 = vmul.f32 %v16878_v2, %v17350_v62  ;;  %v823_v55 = vadd.f32 %v17494_v22, %v785_v20 }
 0x177   : > { %16891 = vrsqrt.f32 %v688_v3  ;;  %v680_v36 = vmul.f32 0.0078125, %v648_v30  ;;  %v657_v38 = vmul.f32 0.0078125, %v602_v54  ;;  %v786_v37 = vmul.f32 %v17487_v29, %v748_v5 }
 0x178   : > { %v16880_v40 = vpop.eup %16879  ;;  %16893 = vrsqrt.f32 %v711_v47  ;;  %v17515_v41 = vpack.c.bf16 %v846_v33, %v845_v32  ;;  %v809_v51 = vmul.f32 %v17487_v29, %v771_v31  ;;  %v16860_v31 = vld [vmem:[#allocation4 + $0x68] ss:$12 sps:$4 sm:$0xff]  }
 0x179   : > { %v16882_v43 = vpop.eup %16881  ;;  %v712_v16 = vadd.f32 1e-05, %v680_v36  ;;  %v689_v45 = vadd.f32 1e-05, %v657_v38  ;;  %v824_v48 = vadd.f32 %v17494_v22, %v786_v37  ;;  %v772_v49 = vmul.f32 %v16880_v40, %v17353_v63 }
 0x17a   : > { %1199 = vmatmul.mubr.bf16.vlgmr.msra.gmra.mxu1 %v17515_v41  ;;  %v604_v62 = vpop.xlane.xlu1 %603  ;;  %v606_v50 = vpop.xlane.xlu0 %605  ;;  %v749_v46 = vmul.f32 %v16882_v43, %v17360_v6  ;;  %v847_v3 = vadd.f32 %v17494_v22, %v809_v51 }
 0x17b   : > { %16895 = vrsqrt.f32 %v712_v16  ;;  %v658_v27 = vmul.f32 0.0078125, %v604_v62  ;;  %16694 = vmatpush3.bf16.msra.mxu1 %v17439_v14  ;;  %v659_v53 = vmul.f32 0.0078125, %v606_v50  ;;  %v17524_v39 = vpack.c.bf16 %v824_v48, %v823_v55  ;;  %1208 = vmatprep.mubr.bf16.mxu1 %v21976_v4  ;;  %v16861_v50 = vld [vmem:[#allocation4 + $0x50] ss:$12 sps:$4 sm:$0xff]  }
 0x17c   : > { %v16884_v18 = vpop.eup %16883  ;;  %16897 = vrsqrt.f32 %v689_v45  ;;  %16695 = vmatprep.subr.bf16.mxu1 %v16858_v8  ;;  %v810_v63 = vmul.f32 %v17487_v29, %v772_v49  ;;  %v787_v14 = vmul.f32 %v17487_v29, %v749_v46 }
 0x17d   : > { %v16886_v58 = vpop.eup %16885  ;;  %v690_v61 = vadd.f32 1e-05, %v658_v27  ;;  %v691_v12 = vadd.f32 1e-05, %v659_v53  ;;  %1089 = vmatmul.mubr.bf16.gmra.mxu0 %v17524_v39  ;;  %v750_v6 = vmul.f32 %v16884_v18, %v17363_v7 }
 0x17e   : > { %v608_v20 = vpop.xlane.xlu1 %607  ;;  %v610_v2 = vpop.xlane.xlu0 %609  ;;  %v848_v47 = vadd.f32 %v17494_v22, %v810_v63  ;;  %1098 = vmatprep.mubr.bf16.mxu0 %v21976_v4  ;;  %v773_v5 = vmul.f32 %v16886_v58, %v17370_v9  ;;  %v825_v37 = vadd.f32 %v17494_v22, %v787_v14 }
 0x17f   : > { %16899 = vrsqrt.f32 %v690_v61  ;;  %v660_v30 = vmul.f32 0.0078125, %v608_v20  ;;  %16696 = vmatpush3.bf16.msra.mxu1 %v16858_v8  ;;  %v788_v54 = vmul.f32 %v17487_v29, %v750_v6  ;;  %v661_v7 = vmul.f32 0.0078125, %v610_v2  ;;  %v16862_v20 = vld [vmem:[#allocation4 + $0x38] ss:$12 sps:$4 sm:$0xff]  }
 0x180   : > { %v16888_v32 = vpop.eup %16887  ;;  %16901 = vrsqrt.f32 %v691_v12  ;;  %v17536_v33 = vpack.c.bf16 %v848_v47, %v847_v3  ;;  %16697 = vmatprep.subr.bf16.mxu1 %v16859_v57  ;;  %v811_v43 = vmul.f32 %v17487_v29, %v773_v5 }
 0x181   : > { %v16890_v36 = vpop.eup %16889  ;;  %v692_v38 = vadd.f32 1e-05, %v660_v30  ;;  %v826_v40 = vadd.f32 %v17494_v22, %v788_v54  ;;  %v774_v9 = vmul.f32 %v16888_v32, %v17373_v42  ;;  %v693_v62 = vadd.f32 1e-05, %v661_v7 }
 0x182   : > { %1209 = vmatmul.mubr.bf16.gmra.mxu1 %v17536_v33  ;;  %v612_v55 = vpop.xlane.xlu1 %611  ;;  %v614_v8 = vpop.xlane.xlu0 %613  ;;  %v751_v16 = vmul.f32 %v16890_v36, %v17380_v11 }
 0x183   : > { %16903 = vrsqrt.f32 %v692_v38  ;;  %v662_v45 = vmul.f32 0.0078125, %v612_v55  ;;  %16698 = vmatpush3.bf16.msra.mxu1 %v16859_v57  ;;  %v17544_v48 = vpack.c.bf16 %v826_v40, %v825_v37  ;;  %1218 = vmatprep.mubr.bf16.mxu1 %v21976_v4  ;;  %v812_v42 = vmul.f32 %v17487_v29, %v774_v9  ;;  %v16863_v9 = vld [vmem:[#allocation4 + $0x20] ss:$12 sps:$4 sm:$0xff]  }
 0x184   : > { %v16892_v49 = vpop.eup %16891  ;;  %16699 = vmatprep.subr.bf16.mxu1 %v16860_v31  ;;  %v663_v27 = vmul.f32 0.0078125, %v614_v8  ;;  %v789_v53 = vmul.f32 %v17487_v29, %v751_v16  ;;  %v849_v57 = vadd.f32 %v17494_v22, %v811_v43 }
 0x185   : > { %v16894_v51 = vpop.eup %16893  ;;  %v694_v46 = vadd.f32 1e-05, %v662_v45  ;;  %1099 = vmatmul.mubr.bf16.gmra.mxu0 %v17544_v48  ;;  %v752_v11 = vmul.f32 %v16892_v49, %v17383_v52  ;;  %v850_v58 = vadd.f32 %v17494_v22, %v812_v42 }
 0x186   : > { %v616_v18 = vpop.xlane.xlu1 %615  ;;  %v618_v63 = vpop.xlane.xlu0 %617  ;;  %1108 = vmatprep.mubr.bf16.mxu0 %v21976_v4  ;;  %v775_v61 = vmul.f32 %v16894_v51, %v17390_v13  ;;  %v695_v3 = vadd.f32 1e-05, %v663_v27  ;;  %v827_v47 = vadd.f32 %v17494_v22, %v789_v53 }
 0x187   : > { %16905 = vrsqrt.f32 %v694_v46  ;;  %v664_v12 = vmul.f32 0.0078125, %v616_v18  ;;  %16700 = vmatpush3.bf16.msra.mxu1 %v16860_v31  ;;  %v790_v6 = vmul.f32 %v17487_v29, %v752_v11  ;;  %v17556_v52 = vpack.c.bf16 %v850_v58, %v849_v57  ;;  %v16864_v18 = vld [vmem:[#allocation4 + $0x8] ss:$12 sps:$4 sm:$0xff]  }
 0x188   : > { %v16896_v14 = vpop.eup %16895  ;;  %16907 = vrsqrt.f32 %v693_v62  ;;  %16701 = vmatprep.subr.bf16.mxu1 %v16861_v50  ;;  %v813_v7 = vmul.f32 %v17487_v29, %v775_v61  ;;  %v665_v16 = vmul.f32 0.0078125, %v618_v63 }
 0x189   : > { %v16898_v2 = vpop.eup %16897  ;;  %v828_v5 = vadd.f32 %v17494_v22, %v790_v6  ;;  %v776_v30 = vmul.f32 %v16896_v14, %v17393_v0  ;;  %v696_v13 = vadd.f32 1e-05, %v664_v12  ;;  %16909 = vrsqrt.f32 %v695_v3 }
 0x18a   : > { %1219 = vmatmul.mubr.bf16.gmra.mxu1 %v17556_v52  ;;  %v620_v54 = vpop.xlane.xlu1 %619  ;;  %v622_v32 = vpop.xlane.xlu0 %621  ;;  %v753_v31 = vmul.f32 %v16898_v2, %v17400_v15  ;;  %v851_v62 = vadd.f32 %v17494_v22, %v813_v7  ;;  %v697_v6 = vadd.f32 1e-05, %v665_v16 }
 0x18b   : > { %v666_v36 = vmul.f32 0.0078125, %v620_v54  ;;  %16702 = vmatpush3.bf16.msra.mxu1 %v16861_v50  ;;  %v667_v38 = vmul.f32 0.0078125, %v622_v32  ;;  %v17564_v37 = vpack.c.bf16 %v828_v5, %v827_v47  ;;  %1228 = vmatprep.mubr.bf16.mxu1 %v21976_v4  ;;  %v814_v0 = vmul.f32 %v17487_v29, %v776_v30 }
 0x18c   : > { %v16900_v40 = vpop.eup %16899  ;;  %16703 = vmatprep.subr.bf16.mxu1 %v16862_v20  ;;  %v791_v55 = vmul.f32 %v17487_v29, %v753_v31  ;;  %16911 = vrsqrt.f32 %v696_v13 }
 0x18d   : > { %v16902_v8 = vpop.eup %16901  ;;  %v699_v43 = vadd.f32 1e-05, %v667_v38  ;;  %1109 = vmatmul.mubr.bf16.gmra.mxu0 %v17564_v37  ;;  %v754_v15 = vmul.f32 %v16900_v40, %v17403_v34  ;;  %v852_v42 = vadd.f32 %v17494_v22, %v814_v0  ;;  %v698_v50 = vadd.f32 1e-05, %v666_v36 }
 0x18e   : > { %v624_v45 = vpop.xlane.xlu1 %623  ;;  %v626_v49 = vpop.xlane.xlu0 %625  ;;  %1118 = vmatprep.mubr.bf16.mxu0 %v21976_v4  ;;  %v829_v34 = vadd.f32 %v17494_v22, %v791_v55  ;;  %v755_v63 = vmul.f32 %v16902_v8, %v17410_v17 }
 0x18f   : > { %v668_v51 = vmul.f32 0.0078125, %v624_v45  ;;  %16704 = vmatpush3.bf16.msra.mxu1 %v16862_v20  ;;  %v669_v46 = vmul.f32 0.0078125, %v626_v49  ;;  %v792_v27 = vmul.f32 %v17487_v29, %v754_v15  ;;  %16913 = vrsqrt.f32 %v699_v43 }
 0x190   : > { %v16904_v11 = vpop.eup %16903  ;;  %v17575_v53 = vpack.c.bf16 %v852_v42, %v851_v62  ;;  %16705 = vmatprep.subr.bf16.mxu1 %v16863_v9  ;;  %v793_v54 = vmul.f32 %v17487_v29, %v755_v63 }
 0x191   : > { %v700_v57 = vadd.f32 1e-05, %v668_v51  ;;  %v701_v58 = vadd.f32 1e-05, %v669_v46  ;;  %v830_v61 = vadd.f32 %v17494_v22, %v792_v27  ;;  %v756_v12 = vmul.f32 %v16904_v11, %v17413_v44 }
 0x192   : > { %1229 = vmatmul.mubr.bf16.gmra.mxu1 %v17575_v53  ;;  %v628_v14 = vpop.xlane.xlu1 %627  ;;  %v630_v20 = vpop.xlane.xlu0 %629  ;;  %v831_v38 = vadd.f32 %v17494_v22, %v793_v54 }
 0x193   : > { %16915 = vrsqrt.f32 %v700_v57  ;;  %v670_v2 = vmul.f32 0.0078125, %v628_v14  ;;  %16706 = vmatpush3.bf16.msra.mxu1 %v16863_v9  ;;  %16709 = vmatprep.mubr.bf16.mxu1 %v17504_v59  ;;  %v671_v3 = vmul.f32 0.0078125, %v630_v20  ;;  %v857_v47 = vpack.c.bf16 %v830_v61, %v829_v34 }
 0x194   : > { %v16906_v5 = vpop.eup %16905  ;;  %16917 = vrsqrt.f32 %v701_v58  ;;  %16707 = vmatprep.subr.bf16.mxu1 %v16864_v18  ;;  %v794_v17 = vmul.f32 %v17487_v29, %v756_v12 }
 0x195   : > { %v16908_v30 = vpop.eup %16907  ;;  %16919 = vrsqrt.f32 %v698_v50  ;;  %v702_v44 = vadd.f32 1e-05, %v670_v2  ;;  %v703_v13 = vadd.f32 1e-05, %v671_v3  ;;  %1119 = vmatmul.mubr.bf16.gmra.mxu0 %v857_v47  ;;  %v758_v31 = vmul.f32 %v16906_v5, %v17423_v56 }
 0x196   : > { %16921 = vrsqrt.f32 %v697_v6  ;;  %v632_v32 = vpop.xlane.xlu1 %631  ;;  %1128 = vmatprep.mubr.bf16.mxu0 %v21976_v4  ;;  %v832_v7 = vadd.f32 %v17494_v22, %v794_v17  ;;  %v757_v40 = vmul.f32 %v16908_v30, %v17420_v19  ;;  %v16910_v0 = vpop.eup %16909 }
 0x197   : > { %16923 = vrsqrt.f32 %v702_v44  ;;  %v672_v59 = vmul.f32 0.0078125, %v632_v32  ;;  %16708 = vmatpush3.bf16.msra.mxu1 %v16864_v18  ;;  %v796_v8 = vmul.f32 %v17487_v29, %v758_v31  ;;  %v759_v62 = vmul.f32 %v16910_v0, %v17430_v21 }
 0x198   : > { %16925 = vrsqrt.f32 %v703_v13  ;;  %v858_v55 = vpack.c.bf16 %v832_v7, %v831_v38  ;;  %v795_v56 = vmul.f32 %v17487_v29, %v757_v40  ;;  %v17643_v7 = vld [vmem:[%s21972_s4] sm:$0x7] }
 0x199   : > { %v704_v36 = vadd.f32 1e-05, %v672_v59  ;;  %v16912_v9 = vpop.eup %16911  ;;  %v834_v19 = vadd.f32 %v17494_v22, %v796_v8 }
 0x19a   : > { %16710 = vmatmul.mubr.bf16.vlgmr.msra.gmra.mxu1 %v17524_v39  ;;  %v760_v16 = vmul.f32 %v16912_v9, %v17433_v1 }
 0x19b   : > { %16927 = vrsqrt.f32 %v704_v36  ;;  %16713 = vmatprep.mubr.bf16.mxu1 %v17544_v48  ;;  %v833_v48 = vadd.f32 %v17494_v22, %v795_v56 }
 0x19c   : > { %v16914_v43 = vpop.eup %16913  ;;  %v798_v27 = vmul.f32 %v17487_v29, %v760_v16 }
 0x19d   : > { %1129 = vmatmul.mubr.bf16.gmra.mxu0 %v858_v55  ;;  %v763_v15 = vmul.f32 %v16914_v43, %v17455_v24  ;;  %v859_v1 = vpack.c.bf16 %v834_v19, %v833_v48 }
 0x19e   : > { %1138 = vmatprep.mubr.bf16.mxu0 %v21976_v4  ;;  %v836_v61 = vadd.f32 %v17494_v22, %v798_v27 }
 0x19f   : > { %v801_v45 = vmul.f32 %v17487_v29, %v763_v15 }
 0x1a0   : > { %v16916_v39 = vpop.eup %16915 }
 0x1a1   : > { %v16918_v49 = vpop.eup %16917  ;;  %v764_v42 = vmul.f32 %v16916_v39, %v17458_v25  ;;  %v839_v51 = vadd.f32 %v17494_v22, %v801_v45  ;;  %v797_v25 = vmul.f32 %v17487_v29, %v759_v62 }
 0x1a2   : > { %v16920_v50 = vpop.eup %16919  ;;  %16714 = vmatmul.mubr.bf16.gmra.mxu1 %v17564_v37  ;;  %v765_v24 = vmul.f32 %v16918_v49, %v17465_v10 }
 0x1a3   : > { %v16922_v46 = vpop.eup %16921  ;;  %16717 = vmatprep.mubr.bf16.mxu1 %v857_v47  ;;  %v802_v11 = vmul.f32 %v17487_v29, %v764_v42  ;;  %v762_v37 = vmul.f32 %v16920_v50, %v17447_v35  ;;  %v835_v2 = vadd.f32 %v17494_v22, %v797_v25 }
 0x1a4   : > { %v16924_v34 = vpop.eup %16923  ;;  %v803_v18 = vmul.f32 %v17487_v29, %v765_v24  ;;  %v761_v12 = vmul.f32 %v16922_v46, %v17444_v23 }
 0x1a5   : > { %v16926_v21 = vpop.eup %16925  ;;  %1139 = vmatmul.mubr.bf16.gmra.mxu0 %v859_v1  ;;  %v840_v63 = vadd.f32 %v17494_v22, %v802_v11  ;;  %v766_v10 = vmul.f32 %v16924_v34, %v17468_v26  ;;  %v800_v26 = vmul.f32 %v17487_v29, %v762_v37  ;;  %v860_v5 = vpack.c.bf16 %v836_v61, %v835_v2 }
 0x1a6   : > { %1148 = vmatprep.mubr.bf16.mxu0 %v21976_v4  ;;  %v841_v57 = vadd.f32 %v17494_v22, %v803_v18  ;;  %v767_v58 = vmul.f32 %v16926_v21, %v17475_v60  ;;  %v799_v23 = vmul.f32 %v17487_v29, %v761_v12 }
 0x1a7   : > { %v862_v6 = vpack.c.bf16 %v840_v63, %v839_v51  ;;  %v804_v14 = vmul.f32 %v17487_v29, %v766_v10  ;;  %v838_v44 = vadd.f32 %v17494_v22, %v800_v26 }
 0x1a8   : > { %v16928_v20 = vpop.eup %16927  ;;  %v805_v35 = vmul.f32 %v17487_v29, %v767_v58  ;;  %v837_v54 = vadd.f32 %v17494_v22, %v799_v23 }
 0x1a9   : > { %v842_v3 = vadd.f32 %v17494_v22, %v804_v14  ;;  %v768_v47 = vmul.f32 %v16928_v20, %v17478_v28 }
 0x1aa   : > { %16718 = vmatmul.mubr.bf16.gmra.mxu1 %v858_v55  ;;  %v843_v60 = vadd.f32 %v17494_v22, %v805_v35  ;;  %v861_v32 = vpack.c.bf16 %v838_v44, %v837_v54 }
 0x1ab   : > { %16721 = vmatprep.mubr.bf16.mxu1 %v859_v1  ;;  %v863_v17 = vpack.c.bf16 %v842_v3, %v841_v57  ;;  %v806_v30 = vmul.f32 %v17487_v29, %v768_v47  ;;  %v903_v29 = vlaneseq }
 0x1ad   : > { %1149 = vmatmul.mubr.bf16.gmra.mxu0 %v860_v5  ;;  %v844_v13 = vadd.f32 %v17494_v22, %v806_v30  ;;  %v17637_v22 = vshrl.u32 %v903_v29, 7 }
 0x1ae   : > { %1158 = vmatprep.mubr.bf16.mxu0 %v21976_v4 }
 0x1af   : > { %v864_v28 = vpack.c.bf16 %v844_v13, %v843_v60  ;;  %v905_v59 = vsub.s32 0, %v17637_v22  ;;  %v909_v20 = vsub.s32 1, %v17637_v22 }
 0x1b1   : > { %v17700_v47 = vrot.slane %v17643_v7, %v909_v20 }
 0x1b2   : > { %16722 = vmatmul.mubr.bf16.gmra.mxu1 %v860_v5 }
 0x1b3   : > { %16725 = vmatprep.mubr.bf16.mxu1 %v861_v32 }
 0x1b5   : > { %1159 = vmatmul.mubr.bf16.gmra.mxu0 %v861_v32 }
 0x1b6   : > { %1168 = vmatprep.mubr.bf16.mxu0 %v21976_v4 }
 0x1ba   : > { %16726 = vmatmul.mubr.bf16.gmra.mxu1 %v862_v6 }
 0x1bb   : > { %16729 = vmatprep.mubr.bf16.mxu1 %v863_v17 }
 0x1bd   : > { %1169 = vmatmul.mubr.bf16.gmra.mxu0 %v862_v6 }
 0x1be   : > { %1178 = vmatprep.mubr.bf16.mxu0 %v21976_v4 }
 0x1c2   : > { %16730 = vmatmul.mubr.bf16.gmra.mxu1 %v864_v28 }
 0x1c3   : > { %16733 = vmatprep.mubr.bf16.mxu1 %v17515_v41  ;;  %v17646_v41 = vrot.slane %v17643_v7, %v905_v59 }
 0x1c5   : > { %1179 = vmatmul.mubr.bf16.gmra.mxu0 %v863_v17 }
 0x1c6   : > { %1188 = vmatprep.mubr.bf16.mxu0 %v21976_v4 }
 0x1ca   : > { %16734 = vmatmul.mubr.bf16.gmra.mxu1 %v17536_v33 }
 0x1cb   : > { %16737 = vmatprep.mubr.bf16.mxu1 %v17556_v52 }
 0x1cd   : > { %1189 = vmatmul.mubr.bf16.gmra.mxu0 %v864_v28 }
 0x1d2   : > { %16738 = vmatmul.mubr.bf16.gmra.mxu1 %v17575_v53 }
 0x235   : > { %v1080_v31 = vpop.f32.mrf.mxu0 }
 0x236   : > { %v1081_v52 = vadd.f32 %v1080_v31, %v17646_v41 }
 0x237   : > { %v17648_v33 = vpop.f32.mrf.mxu0 }
 0x238   : > { %v1400_v0 = vmul.f32 0.17677669, %v1081_v52  ;;  %v1083_v44 = vadd.f32 %v17648_v33, %v17700_v47 }
 0x239   : > { %v1084_v36 = vpop.f32.mrf.mxu0 }
 0x23a   : > { %v1085_v53 = vadd.f32 %v1084_v36, %v17646_v41  ;;  %v1200_v38 = vpop.f32.mrf.mxu1 }
 0x23b   : > { %v1086_v40 = vpop.f32.mrf.mxu0  ;;  %v1201_v8 = vadd.f32 %v1200_v38, %v17646_v41 }
 0x23c   : > { %v1401_v9 = vmul.f32 0.17677669, %v1085_v53  ;;  %v17652_v55 = vpop.f32.mrf.mxu1  ;;  %v1087_v23 = vadd.f32 %v1086_v40, %v17700_v47 }
 0x23d   : > { %v1090_v43 = vpop.f32.mrf.mxu0  ;;  %v1424_v49 = vmul.f32 0.17677669, %v1201_v8  ;;  %v1203_v31 = vadd.f32 %v17652_v55, %v17700_v47 }
 0x23e   : > { %v17655_v56 = vpack.c.bf16 %v1401_v9, %v1400_v0  ;;  %v1204_v15 = vpop.f32.mrf.mxu1  ;;  %v1091_v39 = vadd.f32 %v1090_v43, %v17646_v41  ;;  %v17725_v28 = vpack.c.bf16 %v1087_v23, %v1083_v44 }
 0x23f   : > { %v1205_v19 = vadd.f32 %v1204_v15, %v17646_v41  ;;  %v17658_v16 = vpop.f32.mrf.mxu0 }
 0x240   : > { %v1206_v45 = vpop.f32.mrf.mxu1  ;;  %1464 = vrot.lane.b32.xlu0 %v17655_v56, %s17046_s18  ;;  %v1402_v46 = vmul.f32 0.17677669, %v1091_v39  ;;  %v1093_v0 = vadd.f32 %v17658_v16, %v17700_v47 }
 0x241   : > { %v1425_v48 = vmul.f32 0.17677669, %v1205_v19  ;;  %v1094_v62 = vpop.f32.mrf.mxu0  ;;  %v1207_v32 = vadd.f32 %v1206_v45, %v17700_v47 }
 0x242   : > { %v1095_v42 = vadd.f32 %v1094_v62, %v17646_v41  ;;  %v1210_v50 = vpop.f32.mrf.mxu1 }
 0x243   : > { %v17664_v51 = vpack.c.bf16 %v1425_v48, %v1424_v49  ;;  %v1096_v24 = vpop.f32.mrf.mxu0  ;;  %v1211_v11 = vadd.f32 %v1210_v50, %v17646_v41  ;;  %v17742_v36 = vpack.c.bf16 %v1207_v32, %v1203_v31 }
 0x244   : > { %v1403_v1 = vmul.f32 0.17677669, %v1095_v42  ;;  %v1212_v27 = vpop.f32.mrf.mxu1  ;;  %v1097_v53 = vadd.f32 %v1096_v24, %v17700_v47 }
 0x245   : > { %1488 = vrot.lane.b32.xlu0 %v17664_v51, %s17046_s18  ;;  %v17669_v34 = vpop.f32.mrf.mxu0  ;;  %v1426_v10 = vmul.f32 0.17677669, %v1211_v11  ;;  %v1213_v16 = vadd.f32 %v1212_v27, %v17700_v47 }
 0x246   : > { %v17671_v18 = vpack.c.bf16 %v1403_v1, %v1402_v46  ;;  %v1214_v21 = vpop.f32.mrf.mxu1  ;;  %v17759_v8 = vpack.c.bf16 %v1097_v53, %v1093_v0 }
 0x247   : > { %v1215_v25 = vadd.f32 %v1214_v21, %v17646_v41  ;;  %v17674_v37 = vpop.f32.mrf.mxu0 }
 0x248   : > { %v1216_v63 = vpop.f32.mrf.mxu1  ;;  %1466 = vrot.lane.b32.xlu1 %v17671_v18, %s17046_s18  ;;  %22050 = vst [vmem:[#allocation8_spill] sm:$0xff] %v17759_v8 }
 0x249   : > { %v1427_v57 = vmul.f32 0.17677669, %v1215_v25  ;;  %1496 = vrot.lane.b32.xlu0 %v17655_v56, %s17047_s19  ;;  %v17680_v58 = vpop.f32.mrf.mxu0  ;;  %v1217_v43 = vadd.f32 %v1216_v63, %v17700_v47 }
 0x24a   : > { %v1220_v61 = vpop.f32.mrf.mxu1  ;;  %v1105_v25 = vadd.f32 %v17680_v58, %v17646_v41 }
 0x24b   : > { %v17682_v12 = vpack.c.bf16 %v1427_v57, %v1426_v10  ;;  %v17684_v6 = vpop.f32.mrf.mxu0  ;;  %v17775_v49 = vpack.c.bf16 %v1217_v43, %v1213_v16  ;;  %v1221_v27 = vadd.f32 %v1220_v61, %v17646_v41  ;;  %v1101_v61 = vadd.f32 %v17669_v34, %v17646_v41 }
 0x24c   : > { %v17686_v14 = vpop.f32.mrf.mxu1  ;;  %v1405_v58 = vmul.f32 0.17677669, %v1105_v25 }
 0x24d   : > { %1520 = vrot.lane.b32.xlu0 %v17664_v51, %s17047_s19  ;;  %1490 = vrot.lane.b32.xlu1 %v17682_v12, %s17046_s18  ;;  %v17693_v35 = vpop.f32.mrf.mxu0  ;;  %22051 = vst [vmem:[#allocation9_spill] sm:$0xff] %v17775_v49  ;;  %v1428_v20 = vmul.f32 0.17677669, %v1221_v27  ;;  %v1404_v53 = vmul.f32 0.17677669, %v1101_v61 }
 0x24e   : > { %v1224_v2 = vpop.f32.mrf.mxu1  ;;  %v1111_v27 = vadd.f32 %v17693_v35, %v17646_v41 }
 0x24f   : > { %v17695_v26 = vpop.f32.mrf.mxu0  ;;  %v1225_v24 = vadd.f32 %v1224_v2, %v17646_v41  ;;  %v17831_v0 = vpack.c.bf16 %v1405_v58, %v1404_v53 }
 0x250   : > { %v17697_v3 = vpop.f32.mrf.mxu1  ;;  %v1406_v58 = vmul.f32 0.17677669, %v1111_v27 }
 0x251   : > { %1528 = vrot.lane.b32.xlu0 %v17655_v56, %s17048_s21  ;;  %1498 = vrot.lane.b32.xlu1 %v17671_v18, %s17047_s19  ;;  %v17706_v60 = vpop.f32.mrf.mxu0  ;;  %v1429_v63 = vmul.f32 0.17677669, %v1225_v24  ;;  %22054 = vst [vmem:[#allocation12_spill] sm:$0xff] %v17831_v0 }
 0x252   : > { %v17708_v5 = vpop.f32.mrf.mxu1  ;;  %v1115_v43 = vadd.f32 %v17706_v60, %v17646_v41 }
 0x253   : > { %v17711_v17 = vpop.f32.mrf.mxu0  ;;  %v17819_v44 = vpack.c.bf16 %v1429_v63, %v1428_v20  ;;  %v1231_v35 = vadd.f32 %v17708_v5, %v17646_v41  ;;  %v1107_v5 = vadd.f32 %v17684_v6, %v17700_v47  ;;  %v1227_v6 = vadd.f32 %v17697_v3, %v17700_v47 }
 0x254   : > { %v17713_v30 = vpop.f32.mrf.mxu1  ;;  %v1407_v63 = vmul.f32 0.17677669, %v1115_v43 }
 0x255   : > { %1552 = vrot.lane.b32.xlu0 %v17664_v51, %s17048_s21  ;;  %1522 = vrot.lane.b32.xlu1 %v17682_v12, %s17047_s19  ;;  %v17721_v13 = vpop.f32.mrf.mxu0  ;;  %22052 = vst [vmem:[#allocation10_spill] sm:$0xff] %v17819_v44 }
 0x256   : > { %v17723_v54 = vpop.f32.mrf.mxu1  ;;  %v17859_v53 = vpack.c.bf16 %v1407_v63, %v1406_v58 }
 0x257   : > { %v17728_v29 = vpop.f32.mrf.mxu0  ;;  %v1235_v61 = vadd.f32 %v17723_v54, %v17646_v41 }
 0x258   : > { %v17730_v59 = vpop.f32.mrf.mxu1  ;;  %22056 = vst [vmem:[#allocation14_spill] sm:$0xff] %v17859_v53 }
 0x259   : > { %6271 = vrot.lane.b32.xlu0 %v17725_v28, %s17046_s18  ;;  %1530 = vrot.lane.b32.xlu1 %v17671_v18, %s17048_s21  ;;  %v17738_v33 = vpop.f32.mrf.mxu0  ;;  %v1431_v43 = vmul.f32 0.17677669, %v1235_v61  ;;  %v1103_v61 = vadd.f32 %v17674_v37, %v17700_v47 }
 0x25a   : > { %v17740_v52 = vpop.f32.mrf.mxu1 }
 0x25b   : > { %v17745_v38 = vpop.f32.mrf.mxu0  ;;  %v17883_v58 = vpack.c.bf16 %v1107_v5, %v1103_v61 }
 0x25c   : > { %v17747_v40 = vpop.f32.mrf.mxu1 }
 0x25d   : > { %6295 = vrot.lane.b32.xlu0 %v17742_v36, %s17046_s18  ;;  %1554 = vrot.lane.b32.xlu1 %v17682_v12, %s17048_s21  ;;  %v17755_v9 = vpop.f32.mrf.mxu0  ;;  %22061 = vst [vmem:[#allocation19_spill] sm:$0xff] %v17883_v58 }
 0x25e   : > { %v17757_v55 = vpop.f32.mrf.mxu1 }
 0x25f   : > { %v17762_v15 = vpop.f32.mrf.mxu0 }
 0x260   : > { %v17764_v19 = vpop.f32.mrf.mxu1 }
 0x261   : > { %6303 = vrot.lane.b32.xlu0 %v17725_v28, %s17047_s19  ;;  %6273 = vrot.lane.b32.xlu1 %v17759_v8, %s17046_s18  ;;  %v17771_v39 = vpop.f32.mrf.mxu0 }
 0x262   : > { %v17773_v45 = vpop.f32.mrf.mxu1 }
 0x263   : > { %v17777_v48 = vpop.f32.mrf.mxu0 }
 0x264   : > { %v17779_v62 = vpop.f32.mrf.mxu1 }
 0x265   : > { %6327 = vrot.lane.b32.xlu0 %v17742_v36, %s17047_s19  ;;  %6297 = vrot.lane.b32.xlu1 %v17775_v49, %s17046_s18  ;;  %v17785_v42 = vpop.f32.mrf.mxu0 }
 0x266   : > { %v17787_v50 = vpop.f32.mrf.mxu1 }
 0x267   : > { %v17790_v46 = vpop.f32.mrf.mxu0 }
 0x268   : > { %v17792_v1 = vpop.f32.mrf.mxu1 }
 0x269   : > { %6335 = vrot.lane.b32.xlu0 %v17725_v28, %s17048_s21  ;;  %6305 = vrot.lane.b32.xlu1 %v17759_v8, %s17047_s19  ;;  %v17799_v11 = vpop.f32.mrf.mxu0 }
 0x26a   : > { %v17801_v21 = vpop.f32.mrf.mxu1 }
 0x26b   : > { %v17805_v10 = vpop.f32.mrf.mxu0 }
 0x26c   : > { %v17807_v57 = vpop.f32.mrf.mxu1 }
 0x26d   : > { %6359 = vrot.lane.b32.xlu0 %v17742_v36, %s17048_s21  ;;  %6329 = vrot.lane.b32.xlu1 %v17775_v49, %s17047_s19  ;;  %v17815_v2 = vpop.f32.mrf.mxu0 }
 0x26e   : > { %v17817_v23 = vpop.f32.mrf.mxu1 }
 0x26f   : > { %v17821_v32 = vpop.f32.mrf.mxu0 }
 0x270   : > { %v17823_v31 = vpop.f32.mrf.mxu1 }
 0x271   : > { %6337 = vrot.lane.b32.xlu1 %v17759_v8, %s17048_s21  ;;  %1492 = vrot.lane.b32.xlu0 %v17819_v44, %s17046_s18  ;;  %v17835_v16 = vpop.f32.mrf.mxu0 }
 0x272   : > { %v17829_v34 = vpop.f32.mrf.mxu1 }
 0x273   : > { %22053 = vst [vmem:[#allocation11_spill] sm:$0xff] %v17829_v34  ;;  %v17849_v60 = vpop.f32.mrf.mxu0 }
 0x274   : > { %v17837_v24 = vpop.f32.mrf.mxu1 }
 0x275   : > { %22055 = vst [vmem:[#allocation13_spill] sm:$0xff] %v17837_v24  ;;  %6361 = vrot.lane.b32.xlu1 %v17775_v49, %s17048_s21  ;;  %1500 = vrot.lane.b32.xlu0 %v17831_v0, %s17047_s19  ;;  %v17861_v4 = vpop.f32.mrf.mxu0  ;;  %v1430_v24 = vmul.f32 0.17677669, %v1231_v35 }
 0x276   : > { %v17845_v25 = vpop.f32.mrf.mxu1 }
 0x277   : > { %v17871_v27 = vpack.c.bf16 %v1431_v43, %v1430_v24  ;;  %v17873_v34 = vpop.f32.mrf.mxu0  ;;  %v1223_v43 = vadd.f32 %v17686_v14, %v17700_v47 }
 0x278   : > { %v17851_v20 = vpop.f32.mrf.mxu1  ;;  %22059 = vst [vmem:[#allocation17_spill] sm:$0xff] %v17873_v34 }
 0x279   : > { %1468 = vrot.lane.b32.xlu1 %v17831_v0, %s17046_s18  ;;  %1524 = vrot.lane.b32.xlu0 %v17819_v44, %s17047_s19  ;;  %22058 = vst [vmem:[#allocation16_spill] sm:$0xff] %v17871_v27  ;;  %v17887_v24 = vpop.f32.mrf.mxu0  ;;  %v17897_v37 = vpack.c.bf16 %v1227_v6, %v1223_v43  ;;  %v1117_v6 = vadd.f32 %v17711_v17, %v17700_v47 }
 0x27a   : > { %v17863_v54 = vpop.f32.mrf.mxu1  ;;  %v1125_v17 = vadd.f32 %v17738_v33, %v17646_v41 }
 0x27b   : > { %22057 = vst [vmem:[#allocation15_spill] sm:$0xff] %v17863_v54  ;;  %22063 = vst [vmem:[#allocation21_spill] sm:$0xff] %v17897_v37  ;;  %v17899_v5 = vpop.f32.mrf.mxu0  ;;  %v1113_v54 = vadd.f32 %v17695_v26, %v17700_v47  ;;  %v17050_v26 = vmov 1934713408  }
 0x27c   : > { %v17875_v63 = vpop.f32.mrf.mxu1  ;;  %22064 = vst [vmem:[#allocation22_spill] sm:$0xff] %v17899_v5  ;;  %v1855_v34 = vunpack.c.l.s4 %v17050_v26  ;;  %v1233_v5 = vadd.f32 %v17713_v30, %v17700_v47  ;;  %v1409_v33 = vmul.f32 0.17677669, %v1125_v17  ;;  %v913_v30 = vsub.s32 2, %v17637_v22 }
 0x27d   : > { %1532 = vrot.lane.b32.xlu0 %v17831_v0, %s17048_s21  ;;  %1470 = vrot.lane.b32.xlu1 %v17859_v53, %s17046_s18  ;;  %22060 = vst [vmem:[#allocation18_spill] sm:$0xff] %v17875_v63  ;;  %v17907_v3 = vpop.f32.mrf.mxu0 }
 0x27e   : > { %v17889_v35 = vpop.f32.mrf.mxu1  ;;  %22066 = vst [vmem:[#allocation24_spill] sm:$0xff] %v17907_v3  ;;  %v1856_v26 = vunpack.c.0.s8 %v1855_v34  ;;  %v17969_v17 = vrot.slane %v17643_v7, %v913_v30  ;;  %v1135_v7 = vadd.f32 %v17771_v39, %v17646_v41  ;;  %v1123_v39 = vadd.f32 %v17728_v29, %v17700_v47 }
 0x27f   : > { %22062 = vst [vmem:[#allocation20_spill] sm:$0xff] %v17889_v35  ;;  %v17917_v43 = vpop.f32.mrf.mxu0 }
 0x280   : > { %v17901_v61 = vpop.f32.mrf.mxu1  ;;  %22068 = vst [vmem:[#allocation26_spill] sm:$0xff] %v17917_v43  ;;  %v17966_v34 = vsub.s32 %v1856_v26, %v17637_v22  ;;  %v1274_v29 = vadd.f32 %v17747_v40, %v17969_v17  ;;  %v1133_v40 = vadd.f32 %v17762_v15, %v17700_v47 }
 0x281   : > { %1556 = vrot.lane.b32.xlu0 %v17819_v44, %s17048_s21  ;;  %1494 = vrot.lane.b32.xlu1 %v17871_v27, %s17046_s18  ;;  %22065 = vst [vmem:[#allocation23_spill] sm:$0xff] %v17901_v61  ;;  %v1237_v61 = vadd.f32 %v17730_v59, %v17700_v47  ;;  %v17933_v43 = vpop.f32.mrf.mxu0 }
 0x282   : > { %v17909_v14 = vpop.f32.mrf.mxu1  ;;  %22071 = vst [vmem:[#allocation29_spill] sm:$0xff] %v17933_v43  ;;  %22076 = vst [vmem:[#allocation34_spill] sm:$0xff] %v17966_v34  ;;  %v1131_v34 = vadd.f32 %v17755_v9, %v17646_v41  ;;  %v1277_v9 = vadd.f32 %v17764_v19, %v17969_v17  ;;  %v1301_v19 = vadd.f32 %v17787_v50, %v17969_v17 }
 0x283   : > { %22067 = vst [vmem:[#allocation25_spill] sm:$0xff] %v17909_v14  ;;  %v17927_v14 = vpack.c.bf16 %v1117_v6, %v1113_v54  ;;  %v1121_v54 = vadd.f32 %v17721_v13, %v17646_v41  ;;  %v17945_v59 = vpack.c.bf16 %v1237_v61, %v1233_v5  ;;  %v1298_v50 = vadd.f32 %v17773_v45, %v17969_v17 }
 0x284   : > { %v17919_v63 = vpop.f32.mrf.mxu1  ;;  %v18041_v15 = vpack.c.bf16 %v1277_v9, %v1274_v29  ;;  %v1143_v45 = vadd.f32 %v17790_v46, %v17700_v47  ;;  %v1314_v46 = vadd.f32 %v17801_v21, %v17969_v17 }
 0x285   : > { %6275 = vrot.lane.b32.xlu0 %v17883_v58, %s17046_s18  ;;  %1502 = vrot.lane.b32.xlu1 %v17859_v53, %s17047_s19  ;;  %22069 = vst [vmem:[#allocation27_spill] sm:$0xff] %v17919_v63  ;;  %22070 = vst [vmem:[#allocation28_spill] sm:$0xff] %v17927_v14  ;;  %v17049_v63 = vmov 1983009808   ;;  %v1408_v43 = vmul.f32 0.17677669, %v1121_v54  ;;  %v18057_v29 = vpack.c.bf16 %v1301_v19, %v1298_v50 }
 0x286   : > { %v1824_v35 = vunpack.c.l.s4 %v17049_v63  ;;  %v17935_v3 = vpop.f32.mrf.mxu1  ;;  %22073 = vst [vmem:[#allocation31_spill] sm:$0xff] %v17945_v59  ;;  %v17947_v63 = vpop.f32.mrf.mxu0  ;;  %22081 = vst [vmem:[#allocation38_spill] sm:$0xff] %v18041_v15 }
 0x287   : > { %22072 = vst [vmem:[#allocation30_spill] sm:$0xff] %v17935_v3  ;;  %v17956_v13 = vpack.c.bf16 %v1409_v33, %v1408_v43  ;;  %v22077_v43 = vmov 0   ;;  %v1127_v33 = vadd.f32 %v17745_v38, %v17700_v47  ;;  %22082 = vst [vmem:[#allocation39_spill] sm:$0xff] %v18057_v29 }
 0x288   : > { %v1825_v6 = vunpack.c.0.s8 %v1824_v35  ;;  %v17949_v3 = vpop.f32.mrf.mxu1  ;;  %v17958_v5 = vpop.f32.mrf.mxu0  ;;  %v17977_v54 = vpack.i.b16 %v22077_v43, %v22077_v43  ;;  %v1285_v43 = vadd.f32 %v17757_v55, %v17969_v17  ;;  %v1411_v55 = vmul.f32 0.17677669, %v1135_v7 }
 0x289   : > { %6299 = vrot.lane.b32.xlu0 %v17897_v37, %s17046_s18  ;;  %1526 = vrot.lane.b32.xlu1 %v17871_v27, %s17047_s19  ;;  %22074 = vst [vmem:[#allocation32_spill] sm:$0xff] %v17956_v13 }
 0x28a   : > { %v17961_v61 = vsub.s32 %v1825_v6, %v17637_v22  ;;  %v17963_v35 = vpop.f32.mrf.mxu1  ;;  %22078 = vst [vmem:[#allocation35_spill] sm:$0xff] %v17977_v54  ;;  %v17985_v30 = vpop.f32.mrf.mxu0  ;;  %v1282_v6 = vadd.f32 %v17740_v52, %v17969_v17  ;;  %v1137_v22 = vadd.f32 %v17777_v48, %v17700_v47  ;;  %v18022_v52 = vpack.c.bf16 %v1127_v33, %v1123_v39 }
 0x28b   : > { %v1410_v48 = vmul.f32 0.17677669, %v1131_v34  ;;  %v1293_v33 = vadd.f32 %v17792_v1, %v17969_v17  ;;  %v1290_v34 = vadd.f32 %v17779_v62, %v17969_v17  ;;  %v1147_v39 = vadd.f32 %v17805_v10, %v17700_v47 }
 0x28c   : > { %22075 = vst [vmem:[#allocation33_spill] sm:$0xff] %v17961_v61  ;;  %v17992_v54 = vpop.f32.mrf.mxu1  ;;  %v1145_v61 = vadd.f32 %v17799_v11, %v17646_v41  ;;  %22079 = vst [vmem:[#allocation36_spill] sm:$0xff] %v18022_v52  ;;  %v1141_v11 = vadd.f32 %v17785_v42, %v17646_v41  ;;  %v1155_v42 = vadd.f32 %v17835_v16, %v17646_v41 }
 0x28d   : > { %6307 = vrot.lane.b32.xlu0 %v17883_v58, %s17047_s19  ;;  %1534 = vrot.lane.b32.xlu1 %v17859_v53, %s17048_s21  ;;  %v18031_v53 = vpack.c.bf16 %v1285_v43, %v1282_v6  ;;  %v18049_v6 = vpack.c.bf16 %v1411_v55, %v1410_v48  ;;  %v18051_v1 = vpack.c.bf16 %v1137_v22, %v1133_v40 }
 0x28e   : > { %v18028_v26 = vpop.f32.mrf.mxu1  ;;  %v1413_v43 = vmul.f32 0.17677669, %v1145_v61  ;;  %v1151_v62 = vadd.f32 %v17815_v2, %v17646_v41  ;;  %v1317_v16 = vadd.f32 %v17817_v23, %v17969_v17  ;;  %v1412_v22 = vmul.f32 0.17677669, %v1141_v11 }
 0x28f   : > { %22080 = vst [vmem:[#allocation37_spill] sm:$0xff] %v18031_v53  ;;  %v18067_v61 = vpack.c.bf16 %v1293_v33, %v1290_v34  ;;  %v1309_v10 = vadd.f32 %v17823_v31, %v17969_v17  ;;  %v1165_v55 = vadd.f32 %v17887_v24, %v17646_v41  ;;  %v1306_v2 = vadd.f32 %v17807_v57, %v17969_v17 }
 0x290   : > { %v18065_v9 = vpop.f32.mrf.mxu1  ;;  %v1415_v23 = vmul.f32 0.17677669, %v1155_v42  ;;  %v1157_v40 = vadd.f32 %v17849_v60, %v17700_v47  ;;  %v18083_v31 = vpack.c.bf16 %v1413_v43, %v1412_v22  ;;  %v18085_v19 = vpack.c.bf16 %v1147_v39, %v1143_v45  ;;  %v22084_v42 = vld [vmem:[#allocation11_spill] sm:$0xff]  ;;  %v22085_v43 = vld [vmem:[#allocation13_spill] sm:$0xff]  ;;  %v22087_v45 = vld [vmem:[#allocation22_spill] sm:$0xff] }
 0x291   : > { %6331 = vrot.lane.b32.xlu0 %v17897_v37, %s17047_s19  ;;  %1558 = vrot.lane.b32.xlu1 %v17871_v27, %s17048_s21  ;;  %22083 = vst [vmem:[#allocation40_spill] sm:$0xff] %v18067_v61  ;;  %v1161_v24 = vadd.f32 %v17861_v4, %v17646_v41  ;;  %v1333_v48 = vadd.f32 %v17845_v25, %v17969_v17  ;;  %v1414_v33 = vmul.f32 0.17677669, %v1151_v62  ;;  %v1417_v39 = vmul.f32 0.17677669, %v1165_v55  ;;  %v22089_v55 = vld [vmem:[#allocation17_spill] sm:$0xff] }
 0x292   : > { %v18091_v21 = vpack.c.bf16 %v1317_v16, %v1314_v46  ;;  %v1153_v57 = vadd.f32 %v17821_v32, %v17700_v47  ;;  %v1325_v60 = vadd.f32 %v17851_v20, %v17969_v17  ;;  %v18097_v50 = vpop.f32.mrf.mxu1  ;;  %v18099_v34 = vpack.c.bf16 %v1309_v10, %v1306_v2  ;;  %v22088_v16 = vld [vmem:[#allocation29_spill] sm:$0xff]  ;;  %v22098_v27 = vld [vmem:[#allocation30_spill] sm:$0xff] }
 0x293   : > { %v1330_v4 = vadd.f32 %v22084_v42, %v17969_v17  ;;  %v1322_v25 = vadd.f32 %v22085_v43, %v17969_v17  ;;  %v18109_v32 = vpack.c.bf16 %v1415_v23, %v1414_v33  ;;  %v1167_v62 = vadd.f32 %v22087_v45, %v17700_v47  ;;  %v22090_v42 = vld [vmem:[#allocation24_spill] sm:$0xff] }
 0x294   : > { %v18111_v20 = vpack.c.bf16 %v1157_v40, %v1153_v57  ;;  %v1175_v22 = vadd.f32 %v22088_v16, %v17646_v41  ;;  %v1416_v10 = vmul.f32 0.17677669, %v1161_v24  ;;  %v1163_v2 = vadd.f32 %v22089_v55, %v17700_v47  ;;  %v22091_v40 = vld [vmem:[#allocation20_spill] sm:$0xff]  ;;  %v22092_v57 = vld [vmem:[#allocation23_spill] sm:$0xff] }
 0x295   : > { %6339 = vrot.lane.b32.xlu0 %v17883_v58, %s17048_s21  ;;  %6277 = vrot.lane.b32.xlu1 %v17927_v14, %s17046_s18  ;;  %v18019_v58 = vpop.f32.mrf.mxu0  ;;  %v18117_v46 = vpack.c.bf16 %v1333_v48, %v1330_v4  ;;  %v1171_v43 = vadd.f32 %v22090_v42, %v17646_v41  ;;  %v18123_v23 = vpack.c.bf16 %v1325_v60, %v1322_v25  ;;  %v18131_v48 = vpop.f32.mrf.mxu1  ;;  %v22094_v16 = vld [vmem:[#allocation15_spill] sm:$0xff]  ;;  %v22095_v42 = vld [vmem:[#allocation18_spill] sm:$0xff] }
 0x296   : > { %22086 = vst [vmem:[#allocation11_spill] sm:$0xff] %v18111_v20  ;;  %v1349_v33 = vadd.f32 %v22091_v40, %v17969_v17  ;;  %v1341_v45 = vadd.f32 %v22092_v57, %v17969_v17  ;;  %v1185_v24 = vadd.f32 %v18019_v58, %v17646_v41  ;;  %v18133_v4 = vpack.c.bf16 %v1417_v39, %v1416_v10 }
 0x297   : > { %v18055_v7 = vpop.f32.mrf.mxu0  ;;  %v1346_v55 = vadd.f32 %v22094_v16, %v17969_v17  ;;  %v1338_v60 = vadd.f32 %v22095_v42, %v17969_v17  ;;  %v18144_v40 = vpack.c.bf16 %v1167_v62, %v1163_v2  ;;  %v1419_v58 = vmul.f32 0.17677669, %v1175_v22  ;;  %v22097_v42 = vld [vmem:[#allocation26_spill] sm:$0xff]  ;;  %v16740_v44 = vpop.f32.mrf.mxu1 }
 0x298   : > { %22093 = vst [vmem:[#allocation13_spill] sm:$0xff] %v18133_v4  ;;  %v1177_v39 = vadd.f32 %v17947_v63, %v17700_v47  ;;  %v1181_v10 = vadd.f32 %v17958_v5, %v17646_v41  ;;  %v1418_v16 = vmul.f32 0.17677669, %v1171_v43  ;;  %v1365_v0 = vadd.f32 %v22098_v27, %v17969_v17  ;;  %v22101_v63 = vld [vmem:[#allocation25_spill] sm:$0xff]  ;;  %v22102_v43 = vld [vmem:[#allocation27_spill] sm:$0xff] }
 0x299   : > { %6363 = vrot.lane.b32.xlu0 %v17897_v37, %s17048_s21  ;;  %6301 = vrot.lane.b32.xlu1 %v17945_v59, %s17046_s18  ;;  %v1190_v11 = vpop.f32.mrf.mxu0  ;;  %22096 = vst [vmem:[#allocation22_spill] sm:$0xff] %v18144_v40  ;;  %v1173_v37 = vadd.f32 %v22097_v42, %v17700_v47  ;;  %v1357_v25 = vadd.f32 %v17949_v3, %v17969_v17  ;;  %v1421_v5 = vmul.f32 0.17677669, %v1185_v24 }
 0x29a   : > { %v18156_v2 = vpack.c.bf16 %v1349_v33, %v1346_v55  ;;  %v18158_v22 = vpack.c.bf16 %v1341_v45, %v1338_v60  ;;  %v1354_v49 = vadd.f32 %v22102_v43, %v17969_v17  ;;  %v1187_v42 = vadd.f32 %v18055_v7, %v17700_v47 }
 0x29b   : > { %v1192_v38 = vpop.f32.mrf.mxu0  ;;  %v1191_v27 = vadd.f32 %v1190_v11, %v17646_v41  ;;  %v18171_v3 = vpack.c.bf16 %v1419_v58, %v1418_v16  ;;  %v18173_v33 = vpack.c.bf16 %v1177_v39, %v1173_v37  ;;  %v1420_v45 = vmul.f32 0.17677669, %v1181_v10 }
 0x29c   : > { %22099 = vst [vmem:[#allocation29_spill] sm:$0xff] %v18156_v2  ;;  %22100 = vst [vmem:[#allocation17_spill] sm:$0xff] %v18158_v22  ;;  %v1183_v7 = vadd.f32 %v17985_v30, %v17700_v47  ;;  %v18180_v11 = vpack.c.bf16 %v1357_v25, %v1354_v49  ;;  %v1378_v60 = vadd.f32 %v17963_v35, %v17969_v17  ;;  %v22109_v25 = vshrl.u32 %v17655_v56, 16 }
 0x29d   : > { %6309 = vrot.lane.b32.xlu1 %v17927_v14, %s17047_s19  ;;  %1472 = vrot.lane.b32.xlu0 %v17956_v13, %s17046_s18  ;;  %v1194_v62 = vpop.f32.mrf.mxu0  ;;  %22103 = vst [vmem:[#allocation24_spill] sm:$0xff] %v18171_v3  ;;  %22104 = vst [vmem:[#allocation20_spill] sm:$0xff] %v18173_v33  ;;  %v1370_v37 = vadd.f32 %v17992_v54, %v17969_v17  ;;  %v1422_v30 = vmul.f32 0.17677669, %v1191_v27  ;;  %v1193_v54 = vadd.f32 %v1192_v38, %v17700_v47 }
 0x29e   : > { %v1195_v24 = vadd.f32 %v1194_v62, %v17646_v41  ;;  %22106 = vst [vmem:[#allocation15_spill] sm:$0xff] %v18180_v11  ;;  %v1381_v41 = vadd.f32 %v18028_v26, %v17969_v17  ;;  %v18190_v58 = vpack.c.bf16 %v1187_v42, %v1183_v7  ;;  %v1373_v26 = vadd.f32 %v18065_v9, %v17969_v17 }
 0x29f   : > { %v1394_v38 = vadd.f32 %v18097_v50, %v17969_v17  ;;  %v22111_v27 = vshrl.u32 %v17664_v51, 16 }
 0x2a0   : > { %22108 = vst [vmem:[#allocation26_spill] sm:$0xff] %v18190_v58  ;;  %v1423_v39 = vmul.f32 0.17677669, %v1195_v24  ;;  %v18206_v42 = vpack.c.bf16 %v1381_v41, %v1378_v60  ;;  %v18222_v60 = vpack.c.bf16 %v1373_v26, %v1370_v37 }
 0x2a1   : > { %6333 = vrot.lane.b32.xlu1 %v17945_v59, %s17047_s19  ;;  %1504 = vrot.lane.b32.xlu0 %v17956_v13, %s17047_s19 }
 0x2a2   : > { %22110 = vst [vmem:[#allocation30_spill] sm:$0xff] %v18206_v42  ;;  %22113 = vst [vmem:[#allocation25_spill] sm:$0xff] %v18222_v60 }
 0x2a5   : > { %6341 = vrot.lane.b32.xlu1 %v17927_v14, %s17048_s21  ;;  %1536 = vrot.lane.b32.xlu0 %v17956_v13, %s17048_s21  ;;  %v1362_v14 = vadd.f32 %v22101_v63, %v17969_v17  ;;  %v1196_v63 = vpop.f32.mrf.mxu0 }
 0x2a6   : > { %v1197_v10 = vadd.f32 %v1196_v63, %v17700_v47  ;;  %v1386_v47 = vadd.f32 %v18131_v48, %v17969_v17 }
 0x2a7   : > { %v18176_v55 = vpack.c.bf16 %v1365_v0, %v1362_v14  ;;  %v1388_v0 = vpop.f32.mrf.mxu1 }
 0x2a8   : > { %v18226_v63 = vpack.c.bf16 %v1197_v10, %v1193_v54 }
 0x2a9   : > { %6365 = vrot.lane.b32.xlu1 %v17945_v59, %s17048_s21  ;;  %6279 = vrot.lane.b32.xlu0 %v18022_v52, %s17046_s18  ;;  %22105 = vst [vmem:[#allocation23_spill] sm:$0xff] %v18176_v55 }
 0x2ad   : > { %11073 = vrot.lane.b32.xlu1 %v18031_v53, %s17046_s18  ;;  %6311 = vrot.lane.b32.xlu0 %v18022_v52, %s17047_s19 }
 0x2b1   : > { %11105 = vrot.lane.b32.xlu1 %v18031_v53, %s17047_s19  ;;  %6343 = vrot.lane.b32.xlu0 %v18022_v52, %s17048_s21 }
 0x2b2   : > { %v1465_v57 = vpop.permute.xlu0 %1464 }
 0x2b3   : > { %v1565_v8 = vshrl.u32 %v1465_v57, 16  ;;  %v1562_v49 = vpack.i.b16 %v1465_v57, %v17655_v56  ;;  %v1397_v57 = vadd.f32 %v16740_v44, %v17969_v17  ;;  %v1389_v56 = vadd.f32 %v1388_v0, %v17969_v17  ;;  %v22112_v44 = vld [vmem:[#allocation35_spill] sm:$0xff]  ;;  %v22119_v0 = vld [vmem:[#allocation33_spill] sm:$0xff] }
 0x2b4   : > { %22115 = vst [vmem:[#allocation35_spill] sm:$0xff] %v18226_v63  ;;  %v22116_v17 = vshrl.u32 %v17671_v18, 16 }
 0x2b5   : > { %11137 = vrot.lane.b32.xlu1 %v18031_v53, %s17048_s21  ;;  %11071 = vrot.lane.b32.xlu0 %v18041_v15, %s17046_s18  ;;  %v18184_v53 = vpack.c.bf16 %v1421_v5, %v1420_v45  ;;  %v1566_v35 = vpack.i.b16 %v1565_v8, %v22109_v25  ;;  %v1822_v24 = vcombine.high %v1562_v49, %v22112_v44 }
 0x2b6   : > { %v18232_v41 = vpack.c.bf16 %v1389_v56, %v1386_v47 }
 0x2b7   : > { %v1489_v43 = vpop.permute.xlu0 %1488  ;;  %22107 = vst [vmem:[#allocation18_spill] sm:$0xff] %v18184_v53  ;;  %v1888_v7 = vcombine.high %v1566_v35, %v22112_v44 }
 0x2b8   : > { %v1763_v14 = vshrl.u32 %v1489_v43, 16  ;;  %v1760_v8 = vpack.i.b16 %v1489_v43, %v17664_v51  ;;  %v18224_v51 = vpack.c.bf16 %v1423_v39, %v1422_v30  ;;  %v18230_v43 = vpack.c.bf16 %v1397_v57, %v1394_v38  ;;  %22118 = vst [vmem:[#allocation42_spill] sm:$0xff] %v18232_v41 }
 0x2b9   : > { %11077 = vrot.lane.b32.xlu1 %v18057_v29, %s17046_s18  ;;  %11103 = vrot.lane.b32.xlu0 %v18041_v15, %s17047_s19  ;;  %v18241_v39 = vrot.slane %v1566_v35, %v22119_v0  ;;  %v18244_v10 = vrot.slane %v1888_v7, %v22119_v0 }
 0x2ba   : > { %v1467_v16 = vpop.permute.xlu1 %1466  ;;  %v1764_v9 = vpack.i.b16 %v1763_v14, %v22111_v27  ;;  %22114 = vst [vmem:[#allocation27_spill] sm:$0xff] %v18224_v51  ;;  %22117 = vst [vmem:[#allocation41_spill] sm:$0xff] %v18230_v43  ;;  %v1829_v14 = vrot.slane %v1562_v49, %v22119_v0  ;;  %v3406_v25 = vcombine.high %v1760_v8, %v22112_v44 }
 0x2bb   : > { %v1587_v62 = vshrl.u32 %v1467_v16, 16  ;;  %v1497_v5 = vpop.permute.xlu0 %1496  ;;  %v1584_v45 = vpack.i.b16 %v1467_v16, %v17671_v18  ;;  %v1836_v18 = vrot.slane %v1822_v24, %v22119_v0  ;;  %v18252_v57 = vrot.slane %v1760_v8, %v22119_v0 }
 0x2bc   : > { %v3472_v37 = vcombine.high %v1764_v9, %v22112_v44  ;;  %v18259_v47 = vrot.slane %v3406_v25, %v22119_v0  ;;  %v18262_v24 = vrot.slane %v1764_v9, %v22119_v0 }
 0x2bd   : > { %11109 = vrot.lane.b32.xlu1 %v18057_v29, %s17047_s19  ;;  %11135 = vrot.lane.b32.xlu0 %v18041_v15, %s17048_s21  ;;  %v1588_v48 = vpack.i.b16 %v1587_v62, %v22116_v17  ;;  %v1954_v30 = vcombine.high %v1584_v45, %v22112_v44  ;;  %v22120_v62 = vshrl.u32 %v17682_v12, 16  ;;  %v18265_v7 = vrot.slane %v1584_v45, %v22119_v0 }
 0x2be   : > { %v1572_v17 = vshrl.u32 %v1497_v5, 16  ;;  %v18270_v49 = vrot.slane %v3472_v37, %v22119_v0 }
 0x2bf   : > { %v1491_v16 = vpop.permute.xlu1 %1490  ;;  %v1521_v27 = vpop.permute.xlu0 %1520  ;;  %v2020_v56 = vcombine.high %v1588_v48, %v22112_v44 }
 0x2c0   : > { %v1776_v54 = vpack.i.b16 %v1491_v16, %v17682_v12  ;;  %v1779_v26 = vshrl.u32 %v1491_v16, 16  ;;  %v18273_v12 = vrot.slane %v1954_v30, %v22119_v0  ;;  %v1770_v9 = vshrl.u32 %v1521_v27, 16 }
 0x2c1   : > { %11141 = vrot.lane.b32.xlu1 %v18057_v29, %s17048_s21  ;;  %11075 = vrot.lane.b32.xlu0 %v18067_v61, %s17046_s18  ;;  %v18285_v37 = vrot.slane %v2020_v56, %v22119_v0 }
 0x2c2   : > { %v1780_v35 = vpack.i.b16 %v1779_v26, %v22120_v62  ;;  %v3538_v38 = vcombine.high %v1776_v54, %v22112_v44  ;;  %v18276_v26 = vrot.slane %v1588_v48, %v22119_v0  ;;  %v18288_v30 = vrot.slane %v1776_v54, %v22119_v0 }
 0x2c3   : > { %v18267_v16 = vpop.permute.xlu1 %1498  ;;  %v1529_v8 = vpop.permute.xlu0 %1528 }
 0x2c4   : > { %v3604_v25 = vcombine.high %v1780_v35, %v22112_v44  ;;  %v1570_v62 = vpack.i.b16 %v1529_v8, %v1497_v5  ;;  %v1573_v50 = vshrl.u32 %v1529_v8, 16  ;;  %v18291_v48 = vrot.slane %v3538_v38, %v22119_v0 }
 0x2c5   : > { %11107 = vrot.lane.b32.xlu0 %v18067_v61, %s17047_s19  ;;  %1474 = vrot.lane.b32.xlu1 %v18049_v6, %s17046_s18  ;;  %v18294_v5 = vrot.slane %v1780_v35, %v22119_v0 }
 0x2c6   : > { %v1574_v29 = vpack.i.b16 %v1573_v50, %v1572_v17  ;;  %v1837_v15 = vcombine.high %v1570_v62, %v22112_v44  ;;  %v1844_v13 = vrot.slane %v1570_v62, %v22119_v0  ;;  %v18302_v52 = vrot.slane %v3604_v25, %v22119_v0 }
 0x2c7   : > { %v18299_v45 = vpop.permute.xlu1 %1522  ;;  %v1553_v56 = vpop.permute.xlu0 %1552 }
 0x2c8   : > { %v1768_v38 = vpack.i.b16 %v1553_v56, %v1521_v27  ;;  %v1771_v59 = vshrl.u32 %v1553_v56, 16  ;;  %v1851_v35 = vrot.slane %v1837_v15, %v22119_v0  ;;  %v1852_v63 = vcombine.low %v1829_v14, %v1844_v13  ;;  %v22121_v27 = vld [vmem:[#allocation34_spill] sm:$0xff] }
 0x2c9   : > { %v1853_v51 = vcombine.high %v1829_v14, %v1844_v13  ;;  %v1903_v50 = vcombine.high %v1574_v29, %v22112_v44  ;;  %11139 = vrot.lane.b32.xlu0 %v18067_v61, %s17048_s21  ;;  %v1910_v17 = vrot.slane %v1574_v29, %v22119_v0  ;;  %1506 = vrot.lane.b32.xlu1 %v18049_v6, %s17047_s19 }
 0x2ca   : > { %v18310_v62 = vpack.i.b16 %v1771_v59, %v1770_v9  ;;  %v3421_v25 = vcombine.high %v1768_v38, %v22112_v44  ;;  %v3428_v8 = vrot.slane %v1768_v38, %v22119_v0  ;;  %v1860_v15 = vrot.slane %v1852_v63, %v22121_v27 }
 0x2cb   : > { %v1867_v13 = vrot.slane %v1853_v51, %v22121_v27  ;;  %v1868_v14 = vcombine.low %v1836_v18, %v1851_v35  ;;  %v1869_v56 = vcombine.high %v1836_v18, %v1851_v35  ;;  %v1917_v54 = vrot.slane %v1903_v50, %v22119_v0 }
 0x2cc   : > { %v1918_v61 = vcombine.low %v18241_v39, %v1910_v17  ;;  %v1919_v59 = vcombine.high %v18241_v39, %v1910_v17  ;;  %v3435_v29 = vrot.slane %v3421_v25, %v22119_v0 }
 0x2cd   : > { %v1876_v9 = vrot.slane %v1868_v14, %v22121_v27  ;;  %v1883_v38 = vrot.slane %v1869_v56, %v22121_v27  ;;  %v3934_v41 = vcombine.low %v1860_v15, %v1867_v13  ;;  %v16087_v43 = vcombine.high %v1860_v15, %v1867_v13  ;;  %1476 = vrot.lane.b32.xlu0 %v18083_v31, %s17046_s18 }
 0x2ce   : > { %v1926_v51 = vrot.slane %v1918_v61, %v22121_v27  ;;  %v1933_v63 = vrot.slane %v1919_v59, %v22121_v27  ;;  %v1934_v18 = vcombine.low %v18244_v10, %v1917_v54  ;;  %v1935_v39 = vcombine.high %v18244_v10, %v1917_v54  ;;  %1538 = vrot.lane.b32.xlu1 %v18049_v6, %s17048_s21 }
 0x2cf   : > { %v3941_v35 = vrot.slane %v3934_v41, %v22119_v0  ;;  %v3949_v50 = vrot.slane %v16087_v43, %v22119_v0  ;;  %v3950_v17 = vcombine.low %v1876_v9, %v1883_v38  ;;  %v16088_v25 = vcombine.high %v1876_v9, %v1883_v38 }
 0x2d0   : > { %v1942_v15 = vrot.slane %v1934_v18, %v22121_v27  ;;  %v1949_v61 = vrot.slane %v1935_v39, %v22121_v27  ;;  %v3984_v13 = vcombine.low %v1926_v51, %v1933_v63  ;;  %v16089_v14 = vcombine.high %v1926_v51, %v1933_v63 }
 0x2d1   : > { %v3957_v56 = vrot.slane %v3950_v17, %v22119_v0  ;;  %v3965_v59 = vrot.slane %v16088_v25, %v22119_v0  ;;  %v3966_v10 = vcombine.low %v3941_v35, %v3949_v50  ;;  %v3436_v54 = vcombine.low %v18252_v57, %v3428_v8  ;;  %1508 = vrot.lane.b32.xlu0 %v18083_v31, %s17047_s19 }
 0x2d2   : > { %v3991_v43 = vrot.slane %v3984_v13, %v22119_v0  ;;  %v3999_v41 = vrot.slane %v16089_v14, %v22119_v0  ;;  %v4000_v9 = vcombine.low %v1942_v15, %v1949_v61  ;;  %v16090_v38 = vcombine.high %v1942_v15, %v1949_v61  ;;  %6281 = vrot.lane.b32.xlu1 %v18051_v1, %s17046_s18 }
 0x2d3   : > { %v3973_v51 = vrot.slane %v3966_v10, %v22121_v27  ;;  %v3974_v63 = vcombine.low %v3957_v56, %v3965_v59  ;;  %v3437_v18 = vcombine.high %v18252_v57, %v3428_v8  ;;  %v3444_v39 = vrot.slane %v3436_v54, %v22121_v27 }
 0x2d4   : > { %v4007_v35 = vrot.slane %v4000_v9, %v22119_v0  ;;  %v4015_v50 = vrot.slane %v16090_v38, %v22119_v0  ;;  %v4016_v17 = vcombine.low %v3991_v43, %v3999_v41  ;;  %v3452_v25 = vcombine.low %v18259_v47, %v3435_v29 }
 0x2d5   : > { %v3981_v15 = vrot.slane %v3974_v63, %v22121_v27  ;;  %v3451_v61 = vrot.slane %v3437_v18, %v22121_v27  ;;  %v3453_v13 = vcombine.high %v18259_v47, %v3435_v29  ;;  %v3487_v14 = vcombine.high %v18310_v62, %v22112_v44  ;;  %1540 = vrot.lane.b32.xlu0 %v18083_v31, %s17048_s21 }
 0x2d6   : > { %v4023_v57 = vrot.slane %v4016_v17, %v22121_v27  ;;  %v4024_v8 = vcombine.low %v4007_v35, %v4015_v50  ;;  %v3460_v56 = vrot.slane %v3452_v25, %v22121_v27  ;;  %v3494_v59 = vrot.slane %v18310_v62, %v22119_v0  ;;  %6313 = vrot.lane.b32.xlu1 %v18051_v1, %s17047_s19 }
 0x2d7   : > { %v3982_v47 = vcombine.low %v3973_v51, %v3981_v15  ;;  %v3983_v29 = vcombine.high %v3973_v51, %v3981_v15  ;;  %v3467_v10 = vrot.slane %v3453_v13, %v22121_v27  ;;  %v3501_v54 = vrot.slane %v3487_v14, %v22119_v0 }
 0x2d8   : > { %v4031_v43 = vrot.slane %v4024_v8, %v22121_v27  ;;  %v3502_v41 = vcombine.low %v18262_v24, %v3494_v59  ;;  %v3503_v9 = vcombine.high %v18262_v24, %v3494_v59  ;;  %v5134_v38 = vcombine.low %v3444_v39, %v3451_v61 }
 0x2d9   : > { %v5537_v63 = vshrl.u32 %v3982_v47, 16  ;;  %v5543_v18 = vshrl.u32 %v3983_v29, 16  ;;  %v3518_v62 = vcombine.low %v18270_v49, %v3501_v54  ;;  %v3519_v35 = vcombine.high %v18270_v49, %v3501_v54  ;;  %6283 = vrot.lane.b32.xlu0 %v18085_v19, %s17046_s18 }
 0x2da   : > { %v4032_v51 = vcombine.low %v4023_v57, %v4031_v43  ;;  %v4033_v50 = vcombine.high %v4023_v57, %v4031_v43  ;;  %v3510_v17 = vrot.slane %v3502_v41, %v22121_v27  ;;  %v3517_v25 = vrot.slane %v3503_v9, %v22121_v27  ;;  %6345 = vrot.lane.b32.xlu1 %v18051_v1, %s17048_s21 }
 0x2db   : > { %v3526_v24 = vrot.slane %v3518_v62, %v22121_v27  ;;  %v3533_v15 = vrot.slane %v3519_v35, %v22121_v27  ;;  %v5141_v49 = vrot.slane %v5134_v38, %v22119_v0  ;;  %v16135_v13 = vcombine.high %v3444_v39, %v3451_v61 }
 0x2dc   : > { %v5536_v14 = vpack.i.b16 %v4032_v51, %v3982_v47  ;;  %v5538_v8 = vshrl.u32 %v4032_v51, 16  ;;  %v5542_v59 = vpack.i.b16 %v4033_v50, %v3983_v29  ;;  %v5544_v54 = vshrl.u32 %v4033_v50, 16 }
 0x2dd   : > { %v5149_v57 = vrot.slane %v16135_v13, %v22119_v0  ;;  %v5150_v43 = vcombine.low %v3460_v56, %v3467_v10  ;;  %v16136_v41 = vcombine.high %v3460_v56, %v3467_v10  ;;  %v5184_v9 = vcombine.low %v3510_v17, %v3517_v25  ;;  %6315 = vrot.lane.b32.xlu0 %v18085_v19, %s17047_s19  ;;  %v1531_v10 = vpop.permute.xlu1 %1530  ;;  %v18403_v13 = vpop.permute.xlu0 %6271 }
 0x2de   : > { %v5539_v39 = vpack.i.b16 %v5538_v8, %v5537_v63  ;;  %v5545_v61 = vpack.i.b16 %v5544_v54, %v5543_v18  ;;  %v16151_v47 = vcombine.low %v5536_v14, %v5536_v14  ;;  %v16152_v29 = vcombine.high %v5536_v14, %v5536_v14  ;;  %11081 = vrot.lane.b32.xlu1 %v18091_v21, %s17046_s18 }
 0x2df   : > { %v16215_v38 = vcombine.low %v5542_v59, %v5542_v59  ;;  %v16216_v62 = vcombine.high %v5542_v59, %v5542_v59  ;;  %v5157_v35 = vrot.slane %v5150_v43, %v22119_v0  ;;  %v5165_v56 = vrot.slane %v16136_v41, %v22119_v0 }
 0x2e0   : > { %v16183_v51 = vcombine.low %v5539_v39, %v5539_v39  ;;  %v16184_v63 = vcombine.high %v5539_v39, %v5539_v39  ;;  %v16247_v18 = vcombine.low %v5545_v61, %v5545_v61  ;;  %v16248_v50 = vcombine.high %v5545_v61, %v5545_v61  ;;  %6111 = vst.msk [vmem:[%s18390_s24] sm:$0xf] %vm6110_vm0, %v16151_v47 }
 0x2e1   : > { %6112 = vst.msk [vmem:[%s18390_s24 + $0x4] sm:$0xf] %vm6110_vm0, %v16152_v29  ;;  %6175 = vst.msk [vmem:[%s18390_s24 + $0x100] sm:$0xf] %vm6110_vm0, %v16215_v38  ;;  %v5166_v14 = vcombine.low %v5141_v49, %v5149_v57  ;;  %v5174_v8 = vcombine.low %v5157_v35, %v5165_v56  ;;  %v5191_v59 = vrot.slane %v5184_v9, %v22119_v0  ;;  %6347 = vrot.lane.b32.xlu0 %v18085_v19, %s17048_s21 }
 0x2e2   : > { %6176 = vst.msk [vmem:[%s18390_s24 + $0x104] sm:$0xf] %vm6110_vm0, %v16216_v62  ;;  %v16137_v54 = vcombine.high %v3510_v17, %v3517_v25  ;;  %6143 = vst.msk [vmem:[%s18390_s24 + $0x80] sm:$0xf] %vm6110_vm0, %v16183_v51  ;;  %v5200_v43 = vcombine.low %v3526_v24, %v3533_v15  ;;  %v16138_v41 = vcombine.high %v3526_v24, %v3533_v15  ;;  %v1595_v49 = vshrl.u32 %v1531_v10, 16 }
 0x2e3   : > { %6144 = vst.msk [vmem:[%s18390_s24 + $0x84] sm:$0xf] %vm6110_vm0, %v16184_v63  ;;  %6207 = vst.msk [vmem:[%s18390_s24 + $0x180] sm:$0xf] %vm6110_vm0, %v16247_v18  ;;  %v1592_v39 = vpack.i.b16 %v1531_v10, %v18267_v16  ;;  %11113 = vrot.lane.b32.xlu1 %v18091_v21, %s17047_s19  ;;  %v5173_v17 = vrot.slane %v5166_v14, %v22121_v27  ;;  %v5181_v25 = vrot.slane %v5174_v8, %v22121_v27 }
 0x2e4   : > { %6208 = vst.msk [vmem:[%s18390_s24 + $0x184] sm:$0xf] %vm6110_vm0, %v16248_v50  ;;  %v5199_v57 = vrot.slane %v16137_v54, %v22119_v0  ;;  %v18428_v9 = vpack.i.b16 %v18403_v13, %v17725_v28  ;;  %v5207_v61 = vrot.slane %v5200_v43, %v22119_v0  ;;  %v5215_v24 = vrot.slane %v16138_v41, %v22119_v0 }
 0x2e5   : > { %v22122_v15 = vshrl.u32 %v18267_v16, 16  ;;  %v1969_v29 = vcombine.high %v1592_v39, %v22112_v44  ;;  %v5182_v38 = vcombine.low %v5173_v17, %v5181_v25  ;;  %v5183_v62 = vcombine.high %v5173_v17, %v5181_v25  ;;  %11079 = vrot.lane.b32.xlu0 %v18099_v34, %s17046_s18 }
 0x2e6   : > { %v5216_v35 = vcombine.low %v5191_v59, %v5199_v57  ;;  %v1976_v56 = vrot.slane %v1592_v39, %v22119_v0  ;;  %v5224_v10 = vcombine.low %v5207_v61, %v5215_v24 }
 0x2e7   : > { %v1596_v47 = vpack.i.b16 %v1595_v49, %v22122_v15  ;;  %v1983_v51 = vrot.slane %v1969_v29, %v22119_v0  ;;  %11145 = vrot.lane.b32.xlu1 %v18091_v21, %s17048_s21  ;;  %v5681_v50 = vshrl.u32 %v5182_v38, 16  ;;  %v5687_v14 = vshrl.u32 %v5183_v62, 16 }
 0x2e8   : > { %v5223_v16 = vrot.slane %v5216_v35, %v22121_v27  ;;  %v1984_v8 = vcombine.low %v18265_v7, %v1976_v56  ;;  %v5231_v59 = vrot.slane %v5224_v10, %v22121_v27  ;;  %v1985_v54 = vcombine.high %v18265_v7, %v1976_v56 }
 0x2e9   : > { %v2035_v63 = vcombine.high %v1596_v47, %v22112_v44  ;;  %v2042_v18 = vrot.slane %v1596_v47, %v22119_v0  ;;  %v2000_v43 = vcombine.low %v18273_v12, %v1983_v51  ;;  %v2001_v41 = vcombine.high %v18273_v12, %v1983_v51  ;;  %11111 = vrot.lane.b32.xlu0 %v18099_v34, %s17047_s19 }
 0x2ea   : > { %v1992_v39 = vrot.slane %v1984_v8, %v22121_v27  ;;  %v5232_v57 = vcombine.low %v5223_v16, %v5231_v59  ;;  %v5233_v61 = vcombine.high %v5223_v16, %v5231_v59  ;;  %v1999_v24 = vrot.slane %v1985_v54, %v22121_v27 }
 0x2eb   : > { %v2049_v49 = vrot.slane %v2035_v63, %v22119_v0  ;;  %v2050_v17 = vcombine.low %v18276_v26, %v2042_v18  ;;  %v2051_v25 = vcombine.high %v18276_v26, %v2042_v18  ;;  %v2008_v7 = vrot.slane %v2000_v43, %v22121_v27  ;;  %11085 = vrot.lane.b32.xlu1 %v18117_v46, %s17046_s18 }
 0x2ec   : > { %v2015_v12 = vrot.slane %v2001_v41, %v22121_v27  ;;  %v5680_v29 = vpack.i.b16 %v5232_v57, %v5182_v38  ;;  %v5682_v35 = vshrl.u32 %v5232_v57, 16  ;;  %v5686_v56 = vpack.i.b16 %v5233_v61, %v5183_v62 }
 0x2ed   : > { %v2058_v15 = vrot.slane %v2050_v17, %v22121_v27  ;;  %v2065_v47 = vrot.slane %v2051_v25, %v22121_v27  ;;  %v2066_v26 = vcombine.low %v18285_v37, %v2049_v49  ;;  %v5688_v10 = vshrl.u32 %v5233_v61, 16  ;;  %11143 = vrot.lane.b32.xlu0 %v18099_v34, %s17048_s21 }
 0x2ee   : > { %v2067_v51 = vcombine.high %v18285_v37, %v2049_v49  ;;  %v4034_v18 = vcombine.low %v1992_v39, %v1999_v24  ;;  %v16091_v16 = vcombine.high %v1992_v39, %v1999_v24  ;;  %v5683_v8 = vpack.i.b16 %v5682_v35, %v5681_v50 }
 0x2ef   : > { %v2074_v63 = vrot.slane %v2066_v26, %v22121_v27  ;;  %v5689_v59 = vpack.i.b16 %v5688_v10, %v5687_v14  ;;  %v16175_v54 = vcombine.low %v5680_v29, %v5680_v29  ;;  %v16176_v38 = vcombine.high %v5680_v29, %v5680_v29  ;;  %11117 = vrot.lane.b32.xlu1 %v18117_v46, %s17047_s19 }
 0x2f0   : > { %v16239_v62 = vcombine.low %v5686_v56, %v5686_v56  ;;  %v16240_v37 = vcombine.high %v5686_v56, %v5686_v56  ;;  %v2081_v43 = vrot.slane %v2067_v51, %v22121_v27  ;;  %v4041_v41 = vrot.slane %v4034_v18, %v22119_v0 }
 0x2f1   : > { %v16207_v39 = vcombine.low %v5683_v8, %v5683_v8  ;;  %v16208_v49 = vcombine.high %v5683_v8, %v5683_v8  ;;  %v16271_v50 = vcombine.low %v5689_v59, %v5689_v59  ;;  %v16272_v17 = vcombine.high %v5689_v59, %v5689_v59  ;;  %6135 = vst.msk [vmem:[%s18390_s24 + $0x60] sm:$0xf] %vm6110_vm0, %v16175_v54 }
 0x2f2   : > { %6136 = vst.msk [vmem:[%s18390_s24 + $0x64] sm:$0xf] %vm6110_vm0, %v16176_v38  ;;  %6199 = vst.msk [vmem:[%s18390_s24 + $0x160] sm:$0xf] %vm6110_vm0, %v16239_v62  ;;  %v4049_v14 = vrot.slane %v16091_v16, %v22119_v0  ;;  %v4050_v25 = vcombine.low %v2008_v7, %v2015_v12  ;;  %v16092_v57 = vcombine.high %v2008_v7, %v2015_v12  ;;  %11083 = vrot.lane.b32.xlu0 %v18123_v23, %s17046_s18  ;;  %v18508_v38 = vpop.permute.xlu0 %6295 }
 0x2f3   : > { %6200 = vst.msk [vmem:[%s18390_s24 + $0x164] sm:$0xf] %vm6110_vm0, %v16240_v37  ;;  %v4084_v61 = vcombine.low %v2058_v15, %v2065_v47  ;;  %6167 = vst.msk [vmem:[%s18390_s24 + $0xe0] sm:$0xf] %vm6110_vm0, %v16207_v39  ;;  %v16093_v24 = vcombine.high %v2058_v15, %v2065_v47  ;;  %v4100_v26 = vcombine.low %v2074_v63, %v2081_v43  ;;  %v6372_v35 = vshrl.u32 %v18403_v13, 16  ;;  %v1555_v13 = vpop.permute.xlu1 %1554 }
 0x2f4   : > { %6168 = vst.msk [vmem:[%s18390_s24 + $0xe4] sm:$0xf] %vm6110_vm0, %v16208_v49  ;;  %6231 = vst.msk [vmem:[%s18390_s24 + $0x1e0] sm:$0xf] %vm6110_vm0, %v16271_v50  ;;  %v16094_v29 = vcombine.high %v2074_v63, %v2081_v43  ;;  %11149 = vrot.lane.b32.xlu1 %v18117_v46, %s17048_s21  ;;  %v4057_v7 = vrot.slane %v4050_v25, %v22119_v0  ;;  %v4065_v12 = vrot.slane %v16092_v57, %v22119_v0 }
 0x2f5   : > { %6232 = vst.msk [vmem:[%s18390_s24 + $0x1e4] sm:$0xf] %vm6110_vm0, %v16272_v17  ;;  %v4066_v56 = vcombine.low %v4041_v41, %v4049_v14  ;;  %v4091_v10 = vrot.slane %v4084_v61, %v22119_v0  ;;  %v4099_v51 = vrot.slane %v16093_v24, %v22119_v0  ;;  %v4107_v18 = vrot.slane %v4100_v26, %v22119_v0 }
 0x2f6   : > { %v4115_v15 = vrot.slane %v16094_v29, %v22119_v0  ;;  %v22123_v47 = vshrl.u32 %v17725_v28, 16  ;;  %v4074_v8 = vcombine.low %v4057_v7, %v4065_v12  ;;  %v6623_v59 = vcombine.high %v18428_v9, %v22112_v44  ;;  %11115 = vrot.lane.b32.xlu0 %v18123_v23, %s17047_s19 }
 0x2f7   : > { %v4073_v16 = vrot.slane %v4066_v56, %v22121_v27  ;;  %v18506_v54 = vrot.slane %v18428_v9, %v22119_v0  ;;  %v4116_v62 = vcombine.low %v4091_v10, %v4099_v51  ;;  %v1784_v39 = vpack.i.b16 %v1555_v13, %v18299_v45 }
 0x2f8   : > { %v6373_v63 = vpack.i.b16 %v6372_v35, %v22123_v47  ;;  %v4124_v37 = vcombine.low %v4107_v18, %v4115_v15  ;;  %1478 = vrot.lane.b32.xlu1 %v18109_v32, %s17046_s18  ;;  %v4081_v41 = vrot.slane %v4074_v8, %v22121_v27  ;;  %v18520_v9 = vrot.slane %v6623_v59, %v22119_v0  ;;  %v18545_v8 = vpop.permute.xlu0 %6303 }
 0x2f9   : > { %v1787_v49 = vshrl.u32 %v1555_v13, 16  ;;  %v4123_v50 = vrot.slane %v4116_v62, %v22121_v27  ;;  %v18530_v25 = vpack.i.b16 %v18508_v38, %v17742_v36  ;;  %v22124_v24 = vshrl.u32 %v18299_v45, 16 }
 0x2fa   : > { %v6689_v28 = vcombine.high %v6373_v63, %v22112_v44  ;;  %v18514_v43 = vrot.slane %v6373_v63, %v22119_v0  ;;  %v4131_v17 = vrot.slane %v4124_v37, %v22121_v27  ;;  %v4082_v57 = vcombine.low %v4073_v16, %v4081_v41  ;;  %11147 = vrot.lane.b32.xlu0 %v18123_v23, %s17048_s21 }
 0x2fb   : > { %v4083_v61 = vcombine.high %v4073_v16, %v4081_v41  ;;  %v1788_v26 = vpack.i.b16 %v1787_v49, %v22124_v24  ;;  %v3553_v29 = vcombine.high %v1784_v39, %v22112_v44  ;;  %v3560_v12 = vrot.slane %v1784_v39, %v22119_v0  ;;  %v18543_v16 = vpop.permute.xlu1 %6273 }
 0x2fc   : > { %v18526_v14 = vrot.slane %v6689_v28, %v22119_v0  ;;  %v4132_v35 = vcombine.low %v4123_v50, %v4131_v17  ;;  %v4133_v7 = vcombine.high %v4123_v50, %v4131_v17  ;;  %v6564_v56 = vshrl.u32 %v18508_v38, 16  ;;  %1510 = vrot.lane.b32.xlu1 %v18109_v32, %s17047_s19 }
 0x2fd   : > { %v5549_v10 = vshrl.u32 %v4082_v57, 16  ;;  %v5555_v51 = vshrl.u32 %v4083_v61, 16  ;;  %v3567_v18 = vrot.slane %v3553_v29, %v22119_v0  ;;  %v3619_v45 = vcombine.high %v1788_v26, %v22112_v44 }
 0x2fe   : > { %v5548_v15 = vpack.i.b16 %v4132_v35, %v4082_v57  ;;  %v5550_v47 = vshrl.u32 %v4132_v35, 16  ;;  %v5554_v63 = vpack.i.b16 %v4133_v7, %v4083_v61  ;;  %v5556_v13 = vshrl.u32 %v4133_v7, 16  ;;  %1480 = vrot.lane.b32.xlu0 %v18133_v4, %s17046_s18 }
 0x2ff   : > { %v3568_v59 = vcombine.low %v18288_v30, %v3560_v12  ;;  %v3569_v38 = vcombine.high %v18288_v30, %v3560_v12  ;;  %v3584_v62 = vcombine.low %v18291_v48, %v3567_v18  ;;  %v3585_v37 = vcombine.high %v18291_v48, %v3567_v18 }
 0x300   : > { %v5551_v28 = vpack.i.b16 %v5550_v47, %v5549_v10  ;;  %v5557_v41 = vpack.i.b16 %v5556_v13, %v5555_v51  ;;  %v16153_v39 = vcombine.low %v5548_v15, %v5548_v15  ;;  %v16154_v49 = vcombine.high %v5548_v15, %v5548_v15  ;;  %1542 = vrot.lane.b32.xlu1 %v18109_v32, %s17048_s21 }
 0x301   : > { %v16217_v50 = vcombine.low %v5554_v63, %v5554_v63  ;;  %v16218_v30 = vcombine.high %v5554_v63, %v5554_v63  ;;  %v3576_v17 = vrot.slane %v3568_v59, %v22121_v27  ;;  %v3583_v48 = vrot.slane %v3569_v38, %v22121_v27  ;;  %v18585_v63 = vpop.permute.xlu0 %6327 }
 0x302   : > { %v16185_v57 = vcombine.low %v5551_v28, %v5551_v28  ;;  %v16186_v61 = vcombine.high %v5551_v28, %v5551_v28  ;;  %v16249_v24 = vcombine.low %v5557_v41, %v5557_v41  ;;  %v16250_v29 = vcombine.high %v5557_v41, %v5557_v41  ;;  %6113 = vst.msk [vmem:[%s18390_s24 + $0x8] sm:$0xf] %vm6110_vm0, %v16153_v39 }
 0x303   : > { %6114 = vst.msk [vmem:[%s18390_s24 + $0xc] sm:$0xf] %vm6110_vm0, %v16154_v49  ;;  %6177 = vst.msk [vmem:[%s18390_s24 + $0x108] sm:$0xf] %vm6110_vm0, %v16217_v50  ;;  %v3592_v35 = vrot.slane %v3584_v62, %v22121_v27  ;;  %v3599_v7 = vrot.slane %v3585_v37, %v22121_v27  ;;  %v3626_v12 = vrot.slane %v1788_v26, %v22119_v0  ;;  %1512 = vrot.lane.b32.xlu0 %v18133_v4, %s17047_s19 }
 0x304   : > { %6178 = vst.msk [vmem:[%s18390_s24 + $0x10c] sm:$0xf] %vm6110_vm0, %v16218_v30  ;;  %v3633_v10 = vrot.slane %v3619_v45, %v22119_v0  ;;  %6145 = vst.msk [vmem:[%s18390_s24 + $0x88] sm:$0xf] %vm6110_vm0, %v16185_v57  ;;  %v5234_v51 = vcombine.low %v3576_v17, %v3583_v48  ;;  %v16139_v18 = vcombine.high %v3576_v17, %v3583_v48  ;;  %v22125_v15 = vshrl.u32 %v17742_v36, 16  ;;  %v18583_v45 = vpop.permute.xlu1 %6297 }
 0x305   : > { %6146 = vst.msk [vmem:[%s18390_s24 + $0x8c] sm:$0xf] %vm6110_vm0, %v16186_v61  ;;  %6209 = vst.msk [vmem:[%s18390_s24 + $0x188] sm:$0xf] %vm6110_vm0, %v16249_v24  ;;  %v8207_v26 = vcombine.high %v18530_v25, %v22112_v44  ;;  %6285 = vrot.lane.b32.xlu1 %v18111_v20, %s17046_s18  ;;  %v3634_v13 = vcombine.low %v18294_v5, %v3626_v12  ;;  %v3635_v59 = vcombine.high %v18294_v5, %v3626_v12 }
 0x306   : > { %6210 = vst.msk [vmem:[%s18390_s24 + $0x18c] sm:$0xf] %vm6110_vm0, %v16250_v29  ;;  %v6565_v47 = vpack.i.b16 %v6564_v56, %v22125_v15  ;;  %v3650_v38 = vcombine.low %v18302_v52, %v3633_v10  ;;  %v3651_v62 = vcombine.high %v18302_v52, %v3633_v10  ;;  %v5241_v36 = vrot.slane %v5234_v51, %v22119_v0  ;;  %v18616_v51 = vpop.permute.xlu0 %6335 }
 0x307   : > { %v5249_v56 = vrot.slane %v16139_v18, %v22119_v0  ;;  %v5250_v37 = vcombine.low %v3592_v35, %v3599_v7  ;;  %v16140_v28 = vcombine.high %v3592_v35, %v3599_v7  ;;  %v3642_v41 = vrot.slane %v3634_v13, %v22121_v27  ;;  %1544 = vrot.lane.b32.xlu0 %v18133_v4, %s17048_s21 }
 0x308   : > { %v3649_v39 = vrot.slane %v3635_v59, %v22121_v27  ;;  %v3658_v49 = vrot.slane %v3650_v38, %v22121_v27  ;;  %v3665_v50 = vrot.slane %v3651_v62, %v22121_v27  ;;  %v18605_v17 = vrot.slane %v18530_v25, %v22119_v0  ;;  %v18614_v10 = vpop.permute.xlu1 %6305  ;;  %v22126_v62 = vld [vmem:[#allocation8_spill] sm:$0xff] }
 0x309   : > { %v5257_v5 = vrot.slane %v5250_v37, %v22119_v0  ;;  %v5265_v52 = vrot.slane %v16140_v28, %v22119_v0  ;;  %v5266_v30 = vcombine.low %v5241_v36, %v5249_v56  ;;  %6317 = vrot.lane.b32.xlu1 %v18111_v20, %s17047_s19  ;;  %v18611_v7 = vrot.slane %v8207_v26, %v22119_v0 }
 0x30a   : > { %v5284_v48 = vcombine.low %v3642_v41, %v3649_v39  ;;  %v16141_v57 = vcombine.high %v3642_v41, %v3649_v39  ;;  %v5300_v61 = vcombine.low %v3658_v49, %v3665_v50  ;;  %v16142_v24 = vcombine.high %v3658_v49, %v3665_v50 }
 0x30b   : > { %v5273_v29 = vrot.slane %v5266_v30, %v22121_v27  ;;  %v5274_v35 = vcombine.low %v5257_v5, %v5265_v52  ;;  %v8273_v12 = vcombine.high %v6565_v47, %v22112_v44  ;;  %6287 = vrot.lane.b32.xlu0 %v18144_v40, %s17046_s18  ;;  %v18626_v59 = vrot.slane %v6565_v47, %v22119_v0 }
 0x30c   : > { %v5291_v25 = vrot.slane %v5284_v48, %v22119_v0  ;;  %v5299_v18 = vrot.slane %v16141_v57, %v22119_v0  ;;  %v5307_v15 = vrot.slane %v5300_v61, %v22119_v0  ;;  %v5315_v13 = vrot.slane %v16142_v24, %v22119_v0  ;;  %v22128_v57 = vld [vmem:[#allocation9_spill] sm:$0xff] }
 0x30d   : > { %v5281_v26 = vrot.slane %v5274_v35, %v22121_v27  ;;  %v18629_v38 = vrot.slane %v8273_v12, %v22119_v0  ;;  %v6385_v36 = vpack.i.b16 %v18543_v16, %v22126_v62  ;;  %6349 = vrot.lane.b32.xlu1 %v18111_v20, %s17048_s21  ;;  %v6388_v28 = vshrl.u32 %v18543_v16, 16  ;;  %v18653_v12 = vpop.permute.xlu1 %6329 }
 0x30e   : > { %v5316_v56 = vcombine.low %v5291_v25, %v5299_v18  ;;  %v5324_v37 = vcombine.low %v5307_v15, %v5315_v13  ;;  %v22127_v30 = vshrl.u32 %v22126_v62, 16  ;;  %v6577_v61 = vpack.i.b16 %v18583_v45, %v22128_v57  ;;  %v6360_v25 = vpop.permute.xlu0 %6359 }
 0x30f   : > { %v5282_v39 = vcombine.low %v5273_v29, %v5281_v26  ;;  %v5283_v49 = vcombine.high %v5273_v29, %v5281_v26  ;;  %v6755_v47 = vcombine.high %v6385_v36, %v22112_v44  ;;  %v18639_v50 = vrot.slane %v6385_v36, %v22119_v0  ;;  %6319 = vrot.lane.b32.xlu0 %v18144_v40, %s17047_s19 }
 0x310   : > { %v5323_v5 = vrot.slane %v5316_v56, %v22121_v27  ;;  %v5331_v52 = vrot.slane %v5324_v37, %v22121_v27  ;;  %v6389_v48 = vpack.i.b16 %v6388_v28, %v22127_v30  ;;  %v6580_v35 = vshrl.u32 %v18583_v45, 16 }
 0x311   : > { %v5693_v16 = vshrl.u32 %v5282_v39, 16  ;;  %v5699_v24 = vshrl.u32 %v5283_v49, 16  ;;  %v18650_v29 = vrot.slane %v6755_v47, %v22119_v0  ;;  %11089 = vrot.lane.b32.xlu1 %v18156_v2, %s17046_s18  ;;  %v22129_v62 = vshrl.u32 %v22128_v57, 16 }
 0x312   : > { %v5332_v18 = vcombine.low %v5323_v5, %v5331_v52  ;;  %v5333_v15 = vcombine.high %v5323_v5, %v5331_v52  ;;  %v6821_v13 = vcombine.high %v6389_v48, %v22112_v44  ;;  %v18659_v26 = vrot.slane %v6389_v48, %v22119_v0 }
 0x313   : > { %v6581_v36 = vpack.i.b16 %v6580_v35, %v22129_v62  ;;  %v8339_v56 = vcombine.high %v6577_v61, %v22112_v44  ;;  %v18665_v45 = vrot.slane %v6577_v61, %v22119_v0  ;;  %v6571_v37 = vshrl.u32 %v18585_v63, 16  ;;  %6351 = vrot.lane.b32.xlu0 %v18144_v40, %s17048_s21 }
 0x314   : > { %v5692_v28 = vpack.i.b16 %v5332_v18, %v5282_v39  ;;  %v5694_v47 = vshrl.u32 %v5332_v18, 16  ;;  %v5698_v30 = vpack.i.b16 %v5333_v15, %v5283_v49  ;;  %v5700_v41 = vshrl.u32 %v5333_v15, 16 }
 0x315   : > { %v18671_v5 = vrot.slane %v6821_v13, %v22119_v0  ;;  %v18674_v52 = vrot.slane %v8339_v56, %v22119_v0  ;;  %v8405_v48 = vcombine.high %v6581_v36, %v22112_v44  ;;  %v18678_v57 = vrot.slane %v6581_v36, %v22119_v0  ;;  %11121 = vrot.lane.b32.xlu1 %v18156_v2, %s17047_s19  ;;  %v6338_v36 = vpop.permute.xlu1 %6337  ;;  %v18686_v56 = vpop.permute.xlu0 %1492 }
 0x316   : > { %v5695_v39 = vpack.i.b16 %v5694_v47, %v5693_v16  ;;  %v5701_v49 = vpack.i.b16 %v5700_v41, %v5699_v24  ;;  %v16177_v61 = vcombine.low %v5692_v28, %v5692_v28  ;;  %v16178_v35 = vcombine.high %v5692_v28, %v5692_v28 }
 0x317   : > { %v16241_v18 = vcombine.low %v5698_v30, %v5698_v30  ;;  %v16242_v15 = vcombine.high %v5698_v30, %v5698_v30  ;;  %v18683_v13 = vrot.slane %v8405_v48, %v22119_v0  ;;  %v6395_v62 = vshrl.u32 %v18614_v10, 16  ;;  %11087 = vrot.lane.b32.xlu0 %v18158_v22, %s17046_s18 }
 0x318   : > { %v16209_v40 = vcombine.low %v5695_v39, %v5695_v39  ;;  %v16210_v16 = vcombine.high %v5695_v39, %v5695_v39  ;;  %v16273_v41 = vcombine.low %v5701_v49, %v5701_v49  ;;  %v16274_v24 = vcombine.high %v5701_v49, %v5701_v49  ;;  %6137 = vst.msk [vmem:[%s18390_s24 + $0x68] sm:$0xf] %vm6110_vm0, %v16177_v61  ;;  %v22130_v61 = vld [vmem:[#allocation10_spill] sm:$0xff] }
 0x319   : > { %6138 = vst.msk [vmem:[%s18390_s24 + $0x6c] sm:$0xf] %vm6110_vm0, %v16178_v35  ;;  %6201 = vst.msk [vmem:[%s18390_s24 + $0x168] sm:$0xf] %vm6110_vm0, %v16241_v18  ;;  %v6377_v28 = vpack.i.b16 %v18616_v51, %v18545_v8  ;;  %v6380_v47 = vshrl.u32 %v18616_v51, 16  ;;  %v6569_v48 = vpack.i.b16 %v6360_v25, %v18585_v63  ;;  %11153 = vrot.lane.b32.xlu1 %v18156_v2, %s17048_s21  ;;  %v6572_v39 = vshrl.u32 %v6360_v25, 16 }
 0x31a   : > { %6202 = vst.msk [vmem:[%s18390_s24 + $0x16c] sm:$0xf] %vm6110_vm0, %v16242_v15  ;;  %6169 = vst.msk [vmem:[%s18390_s24 + $0xe8] sm:$0xf] %vm6110_vm0, %v16209_v40  ;;  %v18714_v49 = vpack.i.b16 %v6338_v36, %v18614_v10  ;;  %v6396_v51 = vshrl.u32 %v6338_v36, 16  ;;  %v18718_v35 = vpack.i.b16 %v18686_v56, %v22130_v61  ;;  %v22131_v63 = vshrl.u32 %v18545_v8, 16 }
 0x31b   : > { %6170 = vst.msk [vmem:[%s18390_s24 + $0xec] sm:$0xf] %vm6110_vm0, %v16210_v16  ;;  %6233 = vst.msk [vmem:[%s18390_s24 + $0x1e8] sm:$0xf] %vm6110_vm0, %v16273_v41  ;;  %v6638_v40 = vcombine.high %v6377_v28, %v22112_v44  ;;  %v6645_v15 = vrot.slane %v6377_v28, %v22119_v0  ;;  %v8222_v16 = vcombine.high %v6569_v48, %v22112_v44  ;;  %11119 = vrot.lane.b32.xlu0 %v18158_v22, %s17047_s19 }
 0x31c   : > { %6234 = vst.msk [vmem:[%s18390_s24 + $0x1ec] sm:$0xf] %vm6110_vm0, %v16274_v24  ;;  %v6381_v18 = vpack.i.b16 %v6380_v47, %v22131_v63  ;;  %v18725_v41 = vpack.i.b16 %v6572_v39, %v6571_v37  ;;  %v8229_v25 = vrot.slane %v6569_v48, %v22119_v0  ;;  %v18728_v10 = vpack.i.b16 %v6396_v51, %v6395_v62 }
 0x31d   : > { %v6652_v8 = vrot.slane %v6638_v40, %v22119_v0  ;;  %v6653_v24 = vcombine.low %v18506_v54, %v6645_v15  ;;  %v6654_v28 = vcombine.high %v18506_v54, %v6645_v15  ;;  %11093 = vrot.lane.b32.xlu1 %v18176_v55, %s17046_s18  ;;  %v8236_v62 = vrot.slane %v8222_v16, %v22119_v0 }
 0x31e   : > { %v6704_v47 = vcombine.high %v6381_v18, %v22112_v44  ;;  %v6711_v37 = vrot.slane %v6381_v18, %v22119_v0  ;;  %v8237_v48 = vcombine.low %v18605_v17, %v8229_v25  ;;  %v8238_v39 = vcombine.high %v18605_v17, %v8229_v25 }
 0x31f   : > { %v6661_v51 = vrot.slane %v6653_v24, %v22121_v27  ;;  %v6668_v63 = vrot.slane %v6654_v28, %v22121_v27  ;;  %v6669_v40 = vcombine.low %v18520_v9, %v6652_v8  ;;  %v6670_v54 = vcombine.high %v18520_v9, %v6652_v8  ;;  %11151 = vrot.lane.b32.xlu0 %v18158_v22, %s17048_s21 }
 0x320   : > { %v6718_v15 = vrot.slane %v6704_v47, %v22119_v0  ;;  %v6719_v30 = vcombine.low %v18514_v43, %v6711_v37  ;;  %v6720_v18 = vcombine.high %v18514_v43, %v6711_v37  ;;  %v18752_v16 = vrot.slane %v8237_v48, %v22121_v27 }
 0x321   : > { %v6677_v17 = vrot.slane %v6669_v40, %v22121_v27  ;;  %v6684_v25 = vrot.slane %v6670_v54, %v22121_v27  ;;  %v8735_v24 = vcombine.low %v6661_v51, %v6668_v63  ;;  %v16279_v28 = vcombine.high %v6661_v51, %v6668_v63  ;;  %11125 = vrot.lane.b32.xlu1 %v18176_v55, %s17047_s19 }
 0x322   : > { %v6727_v9 = vrot.slane %v6719_v30, %v22121_v27  ;;  %v6734_v8 = vrot.slane %v6720_v18, %v22121_v27  ;;  %v6735_v43 = vcombine.low %v18526_v14, %v6718_v15  ;;  %v6736_v47 = vcombine.high %v18526_v14, %v6718_v15 }
 0x323   : > { %v8742_v37 = vrot.slane %v8735_v24, %v22119_v0  ;;  %v8750_v48 = vrot.slane %v16279_v28, %v22119_v0  ;;  %v8751_v40 = vcombine.low %v6677_v17, %v6684_v25  ;;  %v16280_v36 = vcombine.high %v6677_v17, %v6684_v25  ;;  %11091 = vrot.lane.b32.xlu0 %v18180_v11, %s17046_s18  ;;  %v18773_v24 = vpop.permute.xlu1 %6361 }
 0x324   : > { %v6743_v54 = vrot.slane %v6735_v43, %v22121_v27  ;;  %v6750_v51 = vrot.slane %v6736_v47, %v22121_v27  ;;  %v8785_v63 = vcombine.low %v6727_v9, %v6734_v8  ;;  %v16281_v22 = vcombine.high %v6727_v9, %v6734_v8 }
 0x325   : > { %v8758_v30 = vrot.slane %v8751_v40, %v22119_v0  ;;  %v8766_v18 = vrot.slane %v16280_v36, %v22119_v0  ;;  %v8767_v14 = vcombine.low %v8742_v37, %v8750_v48  ;;  %v8252_v15 = vrot.slane %v8238_v39, %v22121_v27  ;;  %11157 = vrot.lane.b32.xlu1 %v18176_v55, %s17048_s21 }
 0x326   : > { %v8792_v17 = vrot.slane %v8785_v63, %v22119_v0  ;;  %v8800_v25 = vrot.slane %v16281_v22, %v22119_v0  ;;  %v8801_v28 = vcombine.low %v6743_v54, %v6750_v51  ;;  %v16282_v9 = vcombine.high %v6743_v54, %v6750_v51 }
 0x327   : > { %v8774_v8 = vrot.slane %v8767_v14, %v22121_v27  ;;  %v8775_v43 = vcombine.low %v8758_v30, %v8766_v18  ;;  %v8253_v47 = vcombine.low %v18611_v7, %v8236_v62  ;;  %v8254_v36 = vcombine.high %v18611_v7, %v8236_v62  ;;  %11123 = vrot.lane.b32.xlu0 %v18180_v11, %s17047_s19 }
 0x328   : > { %v8808_v39 = vrot.slane %v8801_v28, %v22119_v0  ;;  %v8816_v37 = vrot.slane %v16282_v9, %v22119_v0  ;;  %v8817_v48 = vcombine.low %v8792_v17, %v8800_v25  ;;  %v8288_v40 = vcombine.high %v18725_v41, %v22112_v44  ;;  %v18800_v9 = vpop.permute.xlu1 %1468 }
 0x329   : > { %v8782_v22 = vrot.slane %v8775_v43, %v22121_v27  ;;  %v8261_v54 = vrot.slane %v8253_v47, %v22121_v27  ;;  %v8268_v51 = vrot.slane %v8254_v36, %v22121_v27  ;;  %v8295_v7 = vrot.slane %v18725_v41, %v22119_v0  ;;  %1482 = vrot.lane.b32.xlu1 %v18171_v3, %s17046_s18 }
 0x32a   : > { %v8824_v62 = vrot.slane %v8817_v48, %v22121_v27  ;;  %v8825_v63 = vcombine.low %v8808_v39, %v8816_v37  ;;  %v8302_v30 = vrot.slane %v8288_v40, %v22119_v0  ;;  %v9935_v18 = vcombine.low %v18752_v16, %v8252_v15  ;;  %v18806_v39 = vpop.permute.xlu0 %1500 }
 0x32b   : > { %v8783_v14 = vcombine.low %v8774_v8, %v8782_v22  ;;  %v8784_v17 = vcombine.high %v8774_v8, %v8782_v22  ;;  %v8303_v25 = vcombine.low %v18626_v59, %v8295_v7  ;;  %v8304_v28 = vcombine.high %v18626_v59, %v8295_v7  ;;  %11155 = vrot.lane.b32.xlu0 %v18180_v11, %s17048_s21 }
 0x32c   : > { %v8832_v41 = vrot.slane %v8825_v63, %v22121_v27  ;;  %v8319_v43 = vcombine.low %v18629_v38, %v8302_v30  ;;  %v8320_v47 = vcombine.high %v18629_v38, %v8302_v30  ;;  %v9942_v36 = vrot.slane %v9935_v18, %v22119_v0 }
 0x32d   : > { %v10338_v8 = vshrl.u32 %v8783_v14, 16  ;;  %v10344_v37 = vshrl.u32 %v8784_v17, 16  ;;  %v8311_v48 = vrot.slane %v8303_v25, %v22121_v27  ;;  %v8318_v59 = vrot.slane %v8304_v28, %v22121_v27  ;;  %1514 = vrot.lane.b32.xlu1 %v18171_v3, %s17047_s19 }
 0x32e   : > { %v8833_v40 = vcombine.low %v8824_v62, %v8832_v41  ;;  %v8834_v22 = vcombine.high %v8824_v62, %v8832_v41  ;;  %v8327_v38 = vrot.slane %v8319_v43, %v22121_v27  ;;  %v8334_v7 = vrot.slane %v8320_v47, %v22121_v27  ;;  %v18833_v43 = vpop.permute.xlu0 %1524 }
 0x32f   : > { %v16327_v63 = vcombine.high %v18752_v16, %v8252_v15  ;;  %v9951_v30 = vcombine.low %v8261_v54, %v8268_v51  ;;  %v16328_v18 = vcombine.high %v8261_v54, %v8268_v51  ;;  %v9985_v11 = vcombine.low %v8311_v48, %v8318_v59  ;;  %1484 = vrot.lane.b32.xlu0 %v18184_v53, %s17046_s18  ;;  %v18829_v54 = vpop.permute.xlu1 %1470 }
 0x330   : > { %v10337_v55 = vpack.i.b16 %v8833_v40, %v8783_v14  ;;  %v10339_v2 = vshrl.u32 %v8833_v40, 16  ;;  %v10343_v25 = vpack.i.b16 %v8834_v22, %v8784_v17  ;;  %v10345_v20 = vshrl.u32 %v8834_v22, 16 }
 0x331   : > { %v9950_v62 = vrot.slane %v16327_v63, %v22119_v0  ;;  %v9958_v28 = vrot.slane %v9951_v30, %v22119_v0  ;;  %v9966_v16 = vrot.slane %v16328_v18, %v22119_v0  ;;  %v9992_v15 = vrot.slane %v9985_v11, %v22119_v0  ;;  %1546 = vrot.lane.b32.xlu1 %v18171_v3, %s17048_s21 }
 0x332   : > { %v10340_v51 = vpack.i.b16 %v10339_v2, %v10338_v8  ;;  %v10346_v14 = vpack.i.b16 %v10345_v20, %v10344_v37  ;;  %v16343_v17 = vcombine.low %v10337_v55, %v10337_v55  ;;  %v16344_v41 = vcombine.high %v10337_v55, %v10337_v55 }
 0x333   : > { %v16407_v47 = vcombine.low %v10343_v25, %v10343_v25  ;;  %v16408_v40 = vcombine.high %v10343_v25, %v10343_v25  ;;  %v9967_v22 = vcombine.low %v9942_v36, %v9950_v62  ;;  %v9975_v11 = vcombine.low %v9958_v28, %v9966_v16  ;;  %1516 = vrot.lane.b32.xlu0 %v18184_v53, %s17047_s19 }
 0x334   : > { %v16375_v63 = vcombine.low %v10340_v51, %v10340_v51  ;;  %v16376_v30 = vcombine.high %v10340_v51, %v10340_v51  ;;  %v16439_v18 = vcombine.low %v10346_v14, %v10346_v14  ;;  %v16440_v3 = vcombine.high %v10346_v14, %v10346_v14  ;;  %10911 = vst.msk [vmem:[%s18823_s15] sm:$0xf] %vm6110_vm0, %v16343_v17  ;;  %v18867_v14 = vpop.permute.xlu1 %1494  ;;  %v18873_v17 = vpop.permute.xlu0 %1532 }
 0x335   : > { %10912 = vst.msk [vmem:[%s18823_s15 + $0x4] sm:$0xf] %vm6110_vm0, %v16344_v41  ;;  %10975 = vst.msk [vmem:[%s18823_s15 + $0x100] sm:$0xf] %vm6110_vm0, %v16407_v47  ;;  %v9974_v20 = vrot.slane %v9967_v22, %v22121_v27  ;;  %v9982_v2 = vrot.slane %v9975_v11, %v22121_v27  ;;  %v16329_v55 = vcombine.high %v8311_v48, %v8318_v59  ;;  %6289 = vrot.lane.b32.xlu1 %v18173_v33, %s17046_s18 }
 0x336   : > { %10976 = vst.msk [vmem:[%s18823_s15 + $0x104] sm:$0xf] %vm6110_vm0, %v16408_v40  ;;  %v10001_v36 = vcombine.low %v8327_v38, %v8334_v7  ;;  %10943 = vst.msk [vmem:[%s18823_s15 + $0x80] sm:$0xf] %vm6110_vm0, %v16375_v63  ;;  %v16330_v8 = vcombine.high %v8327_v38, %v8334_v7  ;;  %v6777_v37 = vrot.slane %v18714_v49, %v22119_v0 }
 0x337   : > { %10944 = vst.msk [vmem:[%s18823_s15 + $0x84] sm:$0xf] %vm6110_vm0, %v16376_v30  ;;  %11007 = vst.msk [vmem:[%s18823_s15 + $0x180] sm:$0xf] %vm6110_vm0, %v16439_v18  ;;  %v22132_v48 = vcombine.high %v18714_v49, %v22112_v44  ;;  %v6836_v25 = vcombine.high %v18728_v10, %v22112_v44  ;;  %v9983_v62 = vcombine.low %v9974_v20, %v9982_v2  ;;  %1548 = vrot.lane.b32.xlu0 %v18184_v53, %s17048_s21 }
 0x338   : > { %11008 = vst.msk [vmem:[%s18823_s15 + $0x184] sm:$0xf] %vm6110_vm0, %v16440_v3  ;;  %v9984_v28 = vcombine.high %v9974_v20, %v9982_v2  ;;  %v10000_v16 = vrot.slane %v16329_v55, %v22119_v0  ;;  %v10008_v51 = vrot.slane %v10001_v36, %v22119_v0  ;;  %v10016_v3 = vrot.slane %v16330_v8, %v22119_v0 }
 0x339   : > { %v6784_v59 = vrot.slane %v22132_v48, %v22119_v0  ;;  %v6785_v38 = vcombine.low %v18639_v50, %v6777_v37  ;;  %v6786_v7 = vcombine.high %v18639_v50, %v6777_v37  ;;  %v10482_v47 = vshrl.u32 %v9983_v62, 16  ;;  %6321 = vrot.lane.b32.xlu1 %v18173_v33, %s17047_s19 }
 0x33a   : > { %v10017_v41 = vcombine.low %v9992_v15, %v10000_v16  ;;  %v10488_v40 = vshrl.u32 %v9984_v28, 16  ;;  %v10025_v11 = vcombine.low %v10008_v51, %v10016_v3  ;;  %v6843_v15 = vrot.slane %v18728_v10, %v22119_v0  ;;  %v18896_v10 = vpop.permute.xlu1 %1502 }
 0x33b   : > { %v6801_v49 = vcombine.low %v18650_v29, %v6784_v59  ;;  %v6802_v22 = vcombine.high %v18650_v29, %v6784_v59  ;;  %v6793_v63 = vrot.slane %v6785_v38, %v22121_v27  ;;  %v6800_v50 = vrot.slane %v6786_v7, %v22121_v27  ;;  %6291 = vrot.lane.b32.xlu0 %v18190_v58, %s17046_s18  ;;  %v18902_v38 = vpop.permute.xlu0 %1556 }
 0x33c   : > { %v10024_v18 = vrot.slane %v10017_v41, %v22121_v27  ;;  %v6850_v2 = vrot.slane %v6836_v25, %v22119_v0  ;;  %v10032_v29 = vrot.slane %v10025_v11, %v22121_v27  ;;  %v1795_v8 = vshrl.u32 %v18686_v56, 16 }
 0x33d   : > { %v6809_v30 = vrot.slane %v6801_v49, %v22121_v27  ;;  %v6816_v20 = vrot.slane %v6802_v22, %v22121_v27  ;;  %v8835_v55 = vcombine.low %v6793_v63, %v6800_v50  ;;  %v16283_v36 = vcombine.high %v6793_v63, %v6800_v50  ;;  %6353 = vrot.lane.b32.xlu1 %v18173_v33, %s17048_s21 }
 0x33e   : > { %v6851_v37 = vcombine.low %v18659_v26, %v6843_v15  ;;  %v6852_v48 = vcombine.high %v18659_v26, %v6843_v15  ;;  %v6867_v59 = vcombine.low %v18671_v5, %v6850_v2  ;;  %v6868_v16 = vcombine.high %v18671_v5, %v6850_v2 }
 0x33f   : > { %v10033_v25 = vcombine.low %v10024_v18, %v10032_v29  ;;  %v10034_v51 = vcombine.high %v10024_v18, %v10032_v29  ;;  %v8842_v56 = vrot.slane %v8835_v55, %v22119_v0  ;;  %v8850_v3 = vrot.slane %v16283_v36, %v22119_v0  ;;  %6323 = vrot.lane.b32.xlu0 %v18190_v58, %s17047_s19 }
 0x340   : > { %v6859_v7 = vrot.slane %v6851_v37, %v22121_v27  ;;  %v6866_v26 = vrot.slane %v6852_v48, %v22121_v27  ;;  %v6875_v49 = vrot.slane %v6867_v59, %v22121_v27  ;;  %v6882_v5 = vrot.slane %v6868_v16, %v22121_v27 }
 0x341   : > { %v10481_v41 = vpack.i.b16 %v10033_v25, %v9983_v62  ;;  %v10483_v22 = vshrl.u32 %v10033_v25, 16  ;;  %v10487_v11 = vpack.i.b16 %v10034_v51, %v9984_v28  ;;  %v10489_v63 = vshrl.u32 %v10034_v51, 16  ;;  %11097 = vrot.lane.b32.xlu1 %v18206_v42, %s17046_s18 }
 0x342   : > { %v8851_v50 = vcombine.low %v6809_v30, %v6816_v20  ;;  %v16284_v18 = vcombine.high %v6809_v30, %v6816_v20  ;;  %v8867_v15 = vcombine.low %v8842_v56, %v8850_v3  ;;  %v8885_v2 = vcombine.low %v6859_v7, %v6866_v26  ;;  %v18914_v30 = vpop.permute.xlu1 %1526 }
 0x343   : > { %v10484_v29 = vpack.i.b16 %v10483_v22, %v10482_v47  ;;  %v10490_v55 = vpack.i.b16 %v10489_v63, %v10488_v40  ;;  %v16367_v36 = vcombine.low %v10481_v41, %v10481_v41  ;;  %v16368_v62 = vcombine.high %v10481_v41, %v10481_v41  ;;  %v18920_v40 = vpop.permute.xlu0 %6275  ;;  %6355 = vrot.lane.b32.xlu0 %v18190_v58, %s17048_s21 }
 0x344   : > { %v16431_v28 = vcombine.low %v10487_v11, %v10487_v11  ;;  %v16432_v37 = vcombine.high %v10487_v11, %v10487_v11  ;;  %v8858_v48 = vrot.slane %v8851_v50, %v22119_v0  ;;  %v8866_v59 = vrot.slane %v16284_v18, %v22119_v0 }
 0x345   : > { %v16399_v20 = vcombine.low %v10484_v29, %v10484_v29  ;;  %v16400_v16 = vcombine.high %v10484_v29, %v10484_v29  ;;  %v16463_v25 = vcombine.low %v10490_v55, %v10490_v55  ;;  %v16464_v47 = vcombine.high %v10490_v55, %v10490_v55  ;;  %10935 = vst.msk [vmem:[%s18823_s15 + $0x60] sm:$0xf] %vm6110_vm0, %v16367_v36 }
 0x346   : > { %10936 = vst.msk [vmem:[%s18823_s15 + $0x64] sm:$0xf] %vm6110_vm0, %v16368_v62  ;;  %10999 = vst.msk [vmem:[%s18823_s15 + $0x160] sm:$0xf] %vm6110_vm0, %v16431_v28  ;;  %v8874_v51 = vrot.slane %v8867_v15, %v22121_v27  ;;  %v8875_v56 = vcombine.low %v8858_v48, %v8866_v59  ;;  %v8892_v3 = vrot.slane %v8885_v2, %v22119_v0  ;;  %11129 = vrot.lane.b32.xlu1 %v18206_v42, %s17047_s19  ;;  %v18963_v62 = vpop.permute.xlu1 %1534 }
 0x347   : > { %11000 = vst.msk [vmem:[%s18823_s15 + $0x164] sm:$0xf] %vm6110_vm0, %v16432_v37  ;;  %v16285_v41 = vcombine.high %v6859_v7, %v6866_v26  ;;  %10967 = vst.msk [vmem:[%s18823_s15 + $0xe0] sm:$0xf] %vm6110_vm0, %v16399_v20  ;;  %v8901_v22 = vcombine.low %v6875_v49, %v6882_v5  ;;  %v16286_v11 = vcombine.high %v6875_v49, %v6882_v5  ;;  %v22133_v63 = vshrl.u32 %v22130_v61, 16  ;;  %v18972_v20 = vpop.permute.xlu0 %6299 }
 0x348   : > { %10968 = vst.msk [vmem:[%s18823_s15 + $0xe4] sm:$0xf] %vm6110_vm0, %v16400_v16  ;;  %11031 = vst.msk [vmem:[%s18823_s15 + $0x1e0] sm:$0xf] %vm6110_vm0, %v16463_v25  ;;  %v3670_v18 = vcombine.high %v18718_v35, %v22112_v44  ;;  %v8882_v7 = vrot.slane %v8875_v56, %v22121_v27  ;;  %v18948_v15 = vrot.slane %v18718_v35, %v22119_v0  ;;  %11095 = vrot.lane.b32.xlu0 %v18222_v60, %s17046_s18 }
 0x349   : > { %11032 = vst.msk [vmem:[%s18823_s15 + $0x1e4] sm:$0xf] %vm6110_vm0, %v16464_v47  ;;  %v1796_v50 = vpack.i.b16 %v1795_v8, %v22133_v63  ;;  %v8900_v26 = vrot.slane %v16285_v41, %v22119_v0  ;;  %v6585_v2 = vpack.i.b16 %v18773_v24, %v18653_v12  ;;  %v8908_v29 = vrot.slane %v8901_v22, %v22119_v0 }
 0x34a   : > { %v8916_v49 = vrot.slane %v16286_v11, %v22119_v0  ;;  %v18955_v61 = vrot.slane %v3670_v18, %v22119_v0  ;;  %v8883_v5 = vcombine.low %v8874_v51, %v8882_v7  ;;  %v8884_v55 = vcombine.high %v8874_v51, %v8882_v7  ;;  %11161 = vrot.lane.b32.xlu1 %v18206_v42, %s17048_s21 }
 0x34b   : > { %v3736_v8 = vcombine.high %v1796_v50, %v22112_v44  ;;  %v8917_v36 = vcombine.low %v8892_v3, %v8900_v26  ;;  %v18961_v35 = vrot.slane %v1796_v50, %v22119_v0  ;;  %v6588_v48 = vshrl.u32 %v18773_v24, 16  ;;  %v22135_v50 = vld [vmem:[#allocation12_spill] sm:$0xff]  ;;  %v19000_v11 = vpop.permute.xlu0 %6307 }
 0x34c   : > { %v8925_v28 = vcombine.low %v8908_v29, %v8916_v49  ;;  %v8354_v59 = vcombine.high %v6585_v2, %v22112_v44  ;;  %v10350_v25 = vshrl.u32 %v8883_v5, 16  ;;  %v10356_v47 = vshrl.u32 %v8884_v55, 16  ;;  %11127 = vrot.lane.b32.xlu0 %v18222_v60, %s17047_s19 }
 0x34d   : > { %v18968_v37 = vrot.slane %v3736_v8, %v22119_v0  ;;  %v8924_v16 = vrot.slane %v8917_v36, %v22121_v27  ;;  %v8361_v51 = vrot.slane %v6585_v2, %v22119_v0  ;;  %v22134_v3 = vshrl.u32 %v18653_v12, 16  ;;  %v22136_v12 = vld [vmem:[#allocation41_spill] sm:$0xff] }
 0x34e   : > { %v8932_v56 = vrot.slane %v8925_v28, %v22121_v27  ;;  %v8368_v22 = vrot.slane %v8354_v59, %v22119_v0  ;;  %v18987_v18 = vpack.i.b16 %v18800_v9, %v22135_v50  ;;  %v1603_v7 = vshrl.u32 %v18800_v9, 16  ;;  %11101 = vrot.lane.b32.xlu1 %v22136_v12, %s17046_s18 }
 0x34f   : > { %v6589_v41 = vpack.i.b16 %v6588_v48, %v22134_v3  ;;  %v8369_v24 = vcombine.low %v18665_v45, %v8361_v51  ;;  %v8370_v63 = vcombine.high %v18665_v45, %v8361_v51  ;;  %v18998_v48 = vpop.permute.xlu1 %1558 }
 0x350   : > { %v8933_v26 = vcombine.low %v8924_v16, %v8932_v56  ;;  %v8934_v2 = vcombine.high %v8924_v16, %v8932_v56  ;;  %v8385_v29 = vcombine.low %v18674_v52, %v8368_v22  ;;  %v8386_v49 = vcombine.high %v18674_v52, %v8368_v22  ;;  %11159 = vrot.lane.b32.xlu0 %v18222_v60, %s17048_s21 }
 0x351   : > { %v8377_v8 = vrot.slane %v8369_v24, %v22121_v27  ;;  %v8384_v36 = vrot.slane %v8370_v63, %v22121_v27  ;;  %v8420_v45 = vcombine.high %v6589_v41, %v22112_v44  ;;  %v8427_v28 = vrot.slane %v6589_v41, %v22119_v0 }
 0x352   : > { %v10349_v9 = vpack.i.b16 %v8933_v26, %v8883_v5  ;;  %v10351_v59 = vshrl.u32 %v8933_v26, 16  ;;  %v10355_v51 = vpack.i.b16 %v8934_v2, %v8884_v55  ;;  %v10357_v3 = vshrl.u32 %v8934_v2, 16  ;;  %11133 = vrot.lane.b32.xlu1 %v22136_v12, %s17047_s19 }
 0x353   : > { %v8393_v52 = vrot.slane %v8385_v29, %v22121_v27  ;;  %v8400_v16 = vrot.slane %v8386_v49, %v22121_v27  ;;  %v8434_v56 = vrot.slane %v8420_v45, %v22119_v0  ;;  %v8435_v41 = vcombine.low %v18678_v57, %v8427_v28 }
 0x354   : > { %v10352_v5 = vpack.i.b16 %v10351_v59, %v10350_v25  ;;  %v10358_v55 = vpack.i.b16 %v10357_v3, %v10356_v47  ;;  %v16345_v22 = vcombine.low %v10349_v9, %v10349_v9  ;;  %v16346_v24 = vcombine.high %v10349_v9, %v10349_v9  ;;  %v22137_v25 = vld [vmem:[#allocation42_spill] sm:$0xff]  ;;  %v19025_v59 = vpop.permute.xlu1 %6277 }
 0x355   : > { %v16409_v63 = vcombine.low %v10355_v51, %v10355_v51  ;;  %v16410_v26 = vcombine.high %v10355_v51, %v10355_v51  ;;  %v8436_v2 = vcombine.high %v18678_v57, %v8427_v28  ;;  %v8443_v29 = vrot.slane %v8435_v41, %v22121_v27  ;;  %11099 = vrot.lane.b32.xlu0 %v22137_v25, %s17046_s18  ;;  %v22138_v51 = vld [vmem:[#allocation27_spill] sm:$0xff] }
 0x356   : > { %v16377_v49 = vcombine.low %v10352_v5, %v10352_v5  ;;  %v16378_v45 = vcombine.high %v10352_v5, %v10352_v5  ;;  %v16441_v60 = vcombine.low %v10358_v55, %v10358_v55  ;;  %v16442_v42 = vcombine.high %v10358_v55, %v10358_v55  ;;  %10913 = vst.msk [vmem:[%s18823_s15 + $0x8] sm:$0xf] %vm6110_vm0, %v16345_v22 }
 0x357   : > { %10914 = vst.msk [vmem:[%s18823_s15 + $0xc] sm:$0xf] %vm6110_vm0, %v16346_v24  ;;  %10977 = vst.msk [vmem:[%s18823_s15 + $0x108] sm:$0xf] %vm6110_vm0, %v16409_v63  ;;  %v8450_v57 = vrot.slane %v8436_v2, %v22121_v27  ;;  %v8451_v47 = vcombine.low %v18683_v13, %v8434_v56  ;;  %v8452_v28 = vcombine.high %v18683_v13, %v8434_v56  ;;  %1486 = vrot.lane.b32.xlu1 %v22138_v51, %s17046_s18  ;;  %v19039_v56 = vpop.permute.xlu0 %6331 }
 0x358   : > { %10978 = vst.msk [vmem:[%s18823_s15 + $0x10c] sm:$0xf] %vm6110_vm0, %v16410_v26  ;;  %v10035_v9 = vcombine.low %v8377_v8, %v8384_v36  ;;  %10945 = vst.msk [vmem:[%s18823_s15 + $0x88] sm:$0xf] %vm6110_vm0, %v16377_v49  ;;  %v16331_v3 = vcombine.high %v8377_v8, %v8384_v36  ;;  %v10051_v41 = vcombine.low %v8393_v52, %v8400_v16  ;;  %v22139_v55 = vshrl.u32 %v22135_v50, 16 }
 0x359   : > { %10946 = vst.msk [vmem:[%s18823_s15 + $0x8c] sm:$0xf] %vm6110_vm0, %v16378_v45  ;;  %11009 = vst.msk [vmem:[%s18823_s15 + $0x188] sm:$0xf] %vm6110_vm0, %v16441_v60  ;;  %v16332_v5 = vcombine.high %v8393_v52, %v8400_v16  ;;  %v8459_v22 = vrot.slane %v8451_v47, %v22121_v27  ;;  %v8466_v24 = vrot.slane %v8452_v28, %v22121_v27  ;;  %11131 = vrot.lane.b32.xlu0 %v22137_v25, %s17047_s19 }
 0x35a   : > { %11010 = vst.msk [vmem:[%s18823_s15 + $0x18c] sm:$0xf] %vm6110_vm0, %v16442_v42  ;;  %v1604_v13 = vpack.i.b16 %v1603_v7, %v22139_v55  ;;  %v10042_v63 = vrot.slane %v10035_v9, %v22119_v0  ;;  %v10085_v26 = vcombine.low %v8443_v29, %v8450_v57  ;;  %v10050_v2 = vrot.slane %v16331_v3, %v22119_v0  ;;  %v19063_v3 = vpop.permute.xlu1 %6301 }
 0x35b   : > { %v10058_v60 = vrot.slane %v10051_v41, %v22119_v0  ;;  %v10066_v42 = vrot.slane %v16332_v5, %v22119_v0  ;;  %v16333_v8 = vcombine.high %v8443_v29, %v8450_v57  ;;  %v10101_v7 = vcombine.low %v8459_v22, %v8466_v24  ;;  %1518 = vrot.lane.b32.xlu1 %v22138_v51, %s17047_s19 }
 0x35c   : > { %v10092_v50 = vrot.slane %v10085_v26, %v22119_v0  ;;  %v16334_v36 = vcombine.high %v8459_v22, %v8466_v24  ;;  %v2086_v52 = vcombine.high %v18987_v18, %v22112_v44  ;;  %v10067_v16 = vcombine.low %v10042_v63, %v10050_v2  ;;  %v22140_v2 = vld [vmem:[#allocation14_spill] sm:$0xff] }
 0x35d   : > { %v10075_v49 = vcombine.low %v10058_v60, %v10066_v42  ;;  %v10100_v45 = vrot.slane %v16333_v8, %v22119_v0  ;;  %v2093_v29 = vrot.slane %v18987_v18, %v22119_v0  ;;  %v10108_v57 = vrot.slane %v10101_v7, %v22119_v0  ;;  %v19070_v18 = vpop.permute.xlu0 %6339  ;;  %11163 = vrot.lane.b32.xlu0 %v22137_v25, %s17048_s21 }
 0x35e   : > { %v10116_v47 = vrot.slane %v16334_v36, %v22119_v0  ;;  %v19060_v28 = vrot.slane %v2086_v52, %v22119_v0  ;;  %v2152_v9 = vcombine.high %v1604_v13, %v22112_v44  ;;  %v10074_v41 = vrot.slane %v10067_v16, %v22121_v27 }
 0x35f   : > { %v10082_v5 = vrot.slane %v10075_v49, %v22121_v27  ;;  %v10117_v55 = vcombine.low %v10092_v50, %v10100_v45  ;;  %v19068_v22 = vrot.slane %v1604_v13, %v22119_v0  ;;  %v1616_v60 = vpack.i.b16 %v18829_v54, %v22140_v2  ;;  %1550 = vrot.lane.b32.xlu1 %v22138_v51, %s17048_s21 }
 0x360   : > { %v10125_v24 = vcombine.low %v10108_v57, %v10116_v47  ;;  %v19075_v63 = vrot.slane %v2152_v9, %v22119_v0  ;;  %v1619_v50 = vshrl.u32 %v18829_v54, 16  ;;  %v1608_v16 = vpack.i.b16 %v18873_v17, %v18806_v39 }
 0x361   : > { %v10083_v42 = vcombine.low %v10074_v41, %v10082_v5  ;;  %v10084_v13 = vcombine.high %v10074_v41, %v10082_v5  ;;  %v10124_v8 = vrot.slane %v10117_v55, %v22121_v27  ;;  %v2218_v36 = vcombine.high %v1616_v60, %v22112_v44 }
 0x362   : > { %v10132_v7 = vrot.slane %v10125_v24, %v22121_v27  ;;  %v19087_v52 = vrot.slane %v1616_v60, %v22119_v0  ;;  %v22141_v57 = vshrl.u32 %v22140_v2, 16  ;;  %v1611_v9 = vshrl.u32 %v18873_v17, 16  ;;  %v19098_v24 = vpop.permute.xlu1 %6309  ;;  %v22142_v60 = vld [vmem:[#allocation35_spill] sm:$0xff] }
 0x363   : > { %v10494_v49 = vshrl.u32 %v10083_v42, 16  ;;  %v10500_v45 = vshrl.u32 %v10084_v13, 16  ;;  %v19095_v54 = vrot.slane %v2218_v36, %v22119_v0  ;;  %v2101_v55 = vcombine.high %v1608_v16, %v22112_v44  ;;  %6293 = vrot.lane.b32.xlu1 %v22142_v60, %s17046_s18 }
 0x364   : > { %v1620_v47 = vpack.i.b16 %v1619_v50, %v22141_v57  ;;  %v10133_v41 = vcombine.low %v10124_v8, %v10132_v7  ;;  %v10134_v5 = vcombine.high %v10124_v8, %v10132_v7  ;;  %v22143_v2 = vshrl.u32 %v18806_v39, 16 }
 0x365   : > { %v2108_v8 = vrot.slane %v1608_v16, %v22119_v0  ;;  %v2115_v58 = vrot.slane %v2101_v55, %v22119_v0 }
 0x366   : > { %v2284_v26 = vcombine.high %v1620_v47, %v22112_v44  ;;  %v19104_v25 = vrot.slane %v1620_v47, %v22119_v0  ;;  %v1612_v17 = vpack.i.b16 %v1611_v9, %v22143_v2  ;;  %v10493_v50 = vpack.i.b16 %v10133_v41, %v10083_v42 }
 0x367   : > { %v10495_v7 = vshrl.u32 %v10133_v41, 16  ;;  %v10499_v36 = vpack.i.b16 %v10134_v5, %v10084_v13  ;;  %v10501_v57 = vshrl.u32 %v10134_v5, 16  ;;  %v2116_v33 = vcombine.low %v2093_v29, %v2108_v8  ;;  %6325 = vrot.lane.b32.xlu1 %v22142_v60, %s17047_s19  ;;  %v19121_v5 = vpop.permute.xlu1 %6333 }
 0x368   : > { %v19110_v51 = vrot.slane %v2284_v26, %v22119_v0  ;;  %v2117_v53 = vcombine.high %v2093_v29, %v2108_v8  ;;  %v16369_v39 = vcombine.low %v10493_v50, %v10493_v50  ;;  %v16370_v9 = vcombine.high %v10493_v50, %v10493_v50  ;;  %v22144_v50 = vld [vmem:[#allocation16_spill] sm:$0xff] }
 0x369   : > { %v10496_v47 = vpack.i.b16 %v10495_v7, %v10494_v49  ;;  %v10502_v4 = vpack.i.b16 %v10501_v57, %v10500_v45  ;;  %v16433_v42 = vcombine.low %v10499_v36, %v10499_v36  ;;  %v16434_v13 = vcombine.high %v10499_v36, %v10499_v36 }
 0x36a   : > { %v2124_v26 = vrot.slane %v2116_v33, %v22121_v27  ;;  %v2131_v16 = vrot.slane %v2117_v53, %v22121_v27  ;;  %10937 = vst.msk [vmem:[%s18823_s15 + $0x68] sm:$0xf] %vm6110_vm0, %v16369_v39  ;;  %10938 = vst.msk [vmem:[%s18823_s15 + $0x6c] sm:$0xf] %vm6110_vm0, %v16370_v9  ;;  %v2132_v33 = vcombine.low %v19060_v28, %v2115_v58  ;;  %v1811_v36 = vshrl.u32 %v18867_v14, 16 }
 0x36b   : > { %v16401_v41 = vcombine.low %v10496_v47, %v10496_v47  ;;  %v16402_v29 = vcombine.high %v10496_v47, %v10496_v47  ;;  %v16465_v49 = vcombine.low %v10502_v4, %v10502_v4  ;;  %v16466_v45 = vcombine.high %v10502_v4, %v10502_v4  ;;  %11001 = vst.msk [vmem:[%s18823_s15 + $0x168] sm:$0xf] %vm6110_vm0, %v16433_v42 }
 0x36c   : > { %11002 = vst.msk [vmem:[%s18823_s15 + $0x16c] sm:$0xf] %vm6110_vm0, %v16434_v13  ;;  %v2133_v53 = vcombine.high %v19060_v28, %v2115_v58  ;;  %v2167_v55 = vcombine.high %v1612_v17, %v22112_v44  ;;  %v2174_v2 = vrot.slane %v1612_v17, %v22119_v0  ;;  %v4134_v4 = vcombine.low %v2124_v26, %v2131_v16 }
 0x36d   : > { %10969 = vst.msk [vmem:[%s18823_s15 + $0xe8] sm:$0xf] %vm6110_vm0, %v16401_v41  ;;  %10970 = vst.msk [vmem:[%s18823_s15 + $0xec] sm:$0xf] %vm6110_vm0, %v16402_v29  ;;  %v16095_v8 = vcombine.high %v2124_v26, %v2131_v16  ;;  %v1808_v7 = vpack.i.b16 %v18867_v14, %v22144_v50  ;;  %6357 = vrot.lane.b32.xlu1 %v22142_v60, %s17048_s21  ;;  %v2140_v58 = vrot.slane %v2132_v33, %v22121_v27  ;;  %v19158_v33 = vpop.permute.xlu1 %6341 }
 0x36e   : > { %11033 = vst.msk [vmem:[%s18823_s15 + $0x1e8] sm:$0xf] %vm6110_vm0, %v16465_v49  ;;  %11034 = vst.msk [vmem:[%s18823_s15 + $0x1ec] sm:$0xf] %vm6110_vm0, %v16466_v45  ;;  %v2147_v28 = vrot.slane %v2133_v53, %v22121_v27  ;;  %v2181_v17 = vrot.slane %v2167_v55, %v22119_v0  ;;  %v2182_v57 = vcombine.low %v19068_v22, %v2174_v2  ;;  %v22145_v42 = vshrl.u32 %v22144_v50, 16 }
 0x36f   : > { %v2183_v47 = vcombine.high %v19068_v22, %v2174_v2  ;;  %v4141_v39 = vrot.slane %v4134_v4, %v22119_v0  ;;  %v4149_v9 = vrot.slane %v16095_v8, %v22119_v0  ;;  %v3802_v22 = vcombine.high %v1808_v7, %v22112_v44 }
 0x370   : > { %v1812_v14 = vpack.i.b16 %v1811_v36, %v22145_v42  ;;  %v2190_v13 = vrot.slane %v2182_v57, %v22121_v27  ;;  %v2198_v26 = vcombine.low %v19075_v63, %v2181_v17  ;;  %v2199_v16 = vcombine.high %v19075_v63, %v2181_v17 }
 0x371   : > { %v4150_v41 = vcombine.low %v2140_v58, %v2147_v28  ;;  %v2197_v29 = vrot.slane %v2183_v47, %v22121_v27  ;;  %v16096_v49 = vcombine.high %v2140_v58, %v2147_v28  ;;  %v4166_v45 = vcombine.low %v4141_v39, %v4149_v9  ;;  %11165 = vrot.lane.b32.xlu1 %v22136_v12, %s17048_s21 }
 0x372   : > { %v2206_v53 = vrot.slane %v2198_v26, %v22121_v27  ;;  %v2213_v55 = vrot.slane %v2199_v16, %v22121_v27  ;;  %v19166_v63 = vrot.slane %v1808_v7, %v22119_v0  ;;  %v19171_v17 = vrot.slane %v3802_v22, %v22119_v0 }
 0x373   : > { %v4157_v2 = vrot.slane %v4150_v41, %v22119_v0  ;;  %v4165_v4 = vrot.slane %v16096_v49, %v22119_v0  ;;  %v4173_v8 = vrot.slane %v4166_v45, %v22121_v27  ;;  %v4184_v50 = vcombine.low %v2190_v13, %v2197_v29 }
 0x374   : > { %v16097_v36 = vcombine.high %v2190_v13, %v2197_v29  ;;  %v4200_v58 = vcombine.low %v2206_v53, %v2213_v55  ;;  %v16098_v28 = vcombine.high %v2206_v53, %v2213_v55  ;;  %v3868_v57 = vcombine.high %v1812_v14, %v22112_v44  ;;  %v22146_v55 = vld [vmem:[#allocation19_spill] sm:$0xff] }
 0x375   : > { %v4174_v47 = vcombine.low %v4157_v2, %v4165_v4  ;;  %v4191_v39 = vrot.slane %v4184_v50, %v22119_v0  ;;  %v19177_v7 = vrot.slane %v1812_v14, %v22119_v0  ;;  %v1800_v16 = vpack.i.b16 %v18902_v38, %v18833_v43 }
 0x376   : > { %v4199_v9 = vrot.slane %v16097_v36, %v22119_v0  ;;  %v4207_v42 = vrot.slane %v4200_v58, %v22119_v0  ;;  %v4215_v26 = vrot.slane %v16098_v28, %v22119_v0  ;;  %v19182_v13 = vrot.slane %v3868_v57, %v22119_v0 }
 0x377   : > { %v4181_v41 = vrot.slane %v4174_v47, %v22121_v27  ;;  %v1803_v49 = vshrl.u32 %v18902_v38, 16  ;;  %v3685_v14 = vcombine.high %v1800_v16, %v22112_v44  ;;  %v3692_v53 = vrot.slane %v1800_v16, %v22119_v0 }
 0x378   : > { %v4216_v29 = vcombine.low %v4191_v39, %v4199_v9  ;;  %v4224_v22 = vcombine.low %v4207_v42, %v4215_v26  ;;  %v19193_v2 = vpack.i.b16 %v18920_v40, %v22146_v55  ;;  %v22147_v58 = vshrl.u32 %v18833_v43, 16 }
 0x379   : > { %v4182_v4 = vcombine.low %v4173_v8, %v4181_v41  ;;  %v4183_v50 = vcombine.high %v4173_v8, %v4181_v41  ;;  %v3699_v57 = vrot.slane %v3685_v14, %v22119_v0  ;;  %v3700_v47 = vcombine.low %v18948_v15, %v3692_v53 }
 0x37a   : > { %v4223_v36 = vrot.slane %v4216_v29, %v22121_v27  ;;  %v1804_v28 = vpack.i.b16 %v1803_v49, %v22147_v58  ;;  %v4231_v38 = vrot.slane %v4224_v22, %v22121_v27  ;;  %v3701_v39 = vcombine.high %v18948_v15, %v3692_v53 }
 0x37b   : > { %v5561_v9 = vshrl.u32 %v4182_v4, 16  ;;  %v5567_v42 = vshrl.u32 %v4183_v50, 16  ;;  %v3708_v29 = vrot.slane %v3700_v47, %v22121_v27  ;;  %v3716_v49 = vcombine.low %v18955_v61, %v3699_v57 }
 0x37c   : > { %v3751_v26 = vcombine.high %v1804_v28, %v22112_v44  ;;  %v3758_v16 = vrot.slane %v1804_v28, %v22119_v0  ;;  %v4232_v8 = vcombine.low %v4223_v36, %v4231_v38  ;;  %v4233_v41 = vcombine.high %v4223_v36, %v4231_v38 }
 0x37d   : > { %v3715_v43 = vrot.slane %v3701_v39, %v22121_v27  ;;  %v3717_v22 = vcombine.high %v18955_v61, %v3699_v57  ;;  %v3724_v28 = vrot.slane %v3716_v49, %v22121_v27 }
 0x37e   : > { %v3765_v14 = vrot.slane %v3751_v26, %v22119_v0  ;;  %v3766_v15 = vcombine.low %v18961_v35, %v3758_v16  ;;  %v5560_v53 = vpack.i.b16 %v4232_v8, %v4182_v4  ;;  %v5562_v58 = vshrl.u32 %v4232_v8, 16 }
 0x37f   : > { %v5566_v45 = vpack.i.b16 %v4233_v41, %v4183_v50  ;;  %v5568_v60 = vshrl.u32 %v4233_v41, 16  ;;  %v3731_v36 = vrot.slane %v3717_v22, %v22121_v27  ;;  %v3767_v38 = vcombine.high %v18961_v35, %v3758_v16 }
 0x380   : > { %v3774_v47 = vrot.slane %v3766_v15, %v22121_v27  ;;  %v5563_v61 = vpack.i.b16 %v5562_v58, %v5561_v9  ;;  %v16155_v39 = vcombine.low %v5560_v53, %v5560_v53  ;;  %v16156_v26 = vcombine.high %v5560_v53, %v5560_v53 }
 0x381   : > { %v5569_v57 = vpack.i.b16 %v5568_v60, %v5567_v42  ;;  %v16219_v4 = vcombine.low %v5566_v45, %v5566_v45  ;;  %v16220_v50 = vcombine.high %v5566_v45, %v5566_v45  ;;  %v3781_v8 = vrot.slane %v3767_v38, %v22121_v27 }
 0x382   : > { %v3782_v41 = vcombine.low %v18968_v37, %v3765_v14  ;;  %v16187_v49 = vcombine.low %v5563_v61, %v5563_v61  ;;  %v16188_v35 = vcombine.high %v5563_v61, %v5563_v61  ;;  %6115 = vst.msk [vmem:[%s18390_s24 + $0x10] sm:$0xf] %vm6110_vm0, %v16155_v39  ;;  %6116 = vst.msk [vmem:[%s18390_s24 + $0x14] sm:$0xf] %vm6110_vm0, %v16156_v26 }
 0x383   : > { %v16251_v16 = vcombine.low %v5569_v57, %v5569_v57  ;;  %v16252_v22 = vcombine.high %v5569_v57, %v5569_v57  ;;  %6179 = vst.msk [vmem:[%s18390_s24 + $0x110] sm:$0xf] %vm6110_vm0, %v16219_v4  ;;  %6180 = vst.msk [vmem:[%s18390_s24 + $0x114] sm:$0xf] %vm6110_vm0, %v16220_v50  ;;  %v3783_v60 = vcombine.high %v18968_v37, %v3765_v14 }
 0x384   : > { %v3790_v45 = vrot.slane %v3782_v41, %v22121_v27  ;;  %v5334_v9 = vcombine.low %v3708_v29, %v3715_v43  ;;  %v16143_v42 = vcombine.high %v3708_v29, %v3715_v43  ;;  %6147 = vst.msk [vmem:[%s18390_s24 + $0x90] sm:$0xf] %vm6110_vm0, %v16187_v49  ;;  %6148 = vst.msk [vmem:[%s18390_s24 + $0x94] sm:$0xf] %vm6110_vm0, %v16188_v35  ;;  %v6404_v29 = vshrl.u32 %v18920_v40, 16 }
 0x385   : > { %6211 = vst.msk [vmem:[%s18390_s24 + $0x190] sm:$0xf] %vm6110_vm0, %v16251_v16  ;;  %6212 = vst.msk [vmem:[%s18390_s24 + $0x194] sm:$0xf] %vm6110_vm0, %v16252_v22  ;;  %v5350_v15 = vcombine.low %v3724_v28, %v3731_v36  ;;  %v16144_v53 = vcombine.high %v3724_v28, %v3731_v36  ;;  %v5384_v58 = vcombine.low %v3774_v47, %v3781_v8 }
 0x386   : > { %v16145_v38 = vcombine.high %v3774_v47, %v3781_v8  ;;  %v3797_v61 = vrot.slane %v3783_v60, %v22121_v27  ;;  %v5341_v37 = vrot.slane %v5334_v9, %v22119_v0  ;;  %v5349_v14 = vrot.slane %v16143_v42, %v22119_v0 }
 0x387   : > { %v5357_v43 = vrot.slane %v5350_v15, %v22119_v0  ;;  %v5365_v57 = vrot.slane %v16144_v53, %v22119_v0  ;;  %v5391_v39 = vrot.slane %v5384_v58, %v22119_v0  ;;  %v22148_v47 = vshrl.u32 %v22146_v55, 16  ;;  %v22149_v58 = vld [vmem:[#allocation21_spill] sm:$0xff] }
 0x388   : > { %v5399_v26 = vrot.slane %v16145_v38, %v22119_v0  ;;  %v5366_v4 = vcombine.low %v5341_v37, %v5349_v14  ;;  %v5400_v28 = vcombine.low %v3790_v45, %v3797_v61  ;;  %v16146_v36 = vcombine.high %v3790_v45, %v3797_v61 }
 0x389   : > { %v6405_v50 = vpack.i.b16 %v6404_v29, %v22148_v47  ;;  %v5374_v8 = vcombine.low %v5357_v43, %v5365_v57  ;;  %v6887_v49 = vcombine.high %v19193_v2, %v22112_v44  ;;  %v19248_v40 = vrot.slane %v19193_v2, %v22119_v0 }
 0x38a   : > { %v5416_v41 = vcombine.low %v5391_v39, %v5399_v26  ;;  %v5373_v35 = vrot.slane %v5366_v4, %v22121_v27  ;;  %v5407_v16 = vrot.slane %v5400_v28, %v22119_v0  ;;  %v5415_v22 = vrot.slane %v16146_v36, %v22119_v0 }
 0x38b   : > { %v6953_v60 = vcombine.high %v6405_v50, %v22112_v44  ;;  %v5381_v55 = vrot.slane %v5374_v8, %v22121_v27  ;;  %v19257_v9 = vrot.slane %v6887_v49, %v22119_v0  ;;  %v19260_v42 = vrot.slane %v6405_v50, %v22119_v0 }
 0x38c   : > { %v5423_v45 = vrot.slane %v5416_v41, %v22121_v27  ;;  %v5424_v2 = vcombine.low %v5407_v16, %v5415_v22  ;;  %v1818_v53 = vshrl.u32 %v18914_v30, 16  ;;  %v6593_v38 = vpack.i.b16 %v18972_v20, %v22149_v58 }
 0x38d   : > { %v19263_v15 = vrot.slane %v6953_v60, %v22119_v0  ;;  %v5382_v61 = vcombine.low %v5373_v35, %v5381_v55  ;;  %v5383_v37 = vcombine.high %v5373_v35, %v5381_v55  ;;  %v6596_v14 = vshrl.u32 %v18972_v20, 16 }
 0x38e   : > { %v1624_v29 = vpack.i.b16 %v18963_v62, %v18896_v10  ;;  %v5431_v43 = vrot.slane %v5424_v2, %v22121_v27  ;;  %v8471_v57 = vcombine.high %v6593_v38, %v22112_v44  ;;  %v19274_v39 = vrot.slane %v6593_v38, %v22119_v0 }
 0x38f   : > { %v1627_v26 = vshrl.u32 %v18963_v62, 16  ;;  %v5705_v4 = vshrl.u32 %v5382_v61, 16  ;;  %v5711_v28 = vshrl.u32 %v5383_v37, 16  ;;  %v22150_v36 = vshrl.u32 %v22149_v58, 16 }
 0x390   : > { %v2233_v50 = vcombine.high %v1624_v29, %v22112_v44  ;;  %v5432_v20 = vcombine.low %v5423_v45, %v5431_v43  ;;  %v5433_v8 = vcombine.high %v5423_v45, %v5431_v43  ;;  %v19281_v41 = vrot.slane %v8471_v57, %v22119_v0 }
 0x391   : > { %v6597_v47 = vpack.i.b16 %v6596_v14, %v22150_v36  ;;  %v22151_v49 = vshrl.u32 %v18896_v10, 16  ;;  %v2240_v62 = vrot.slane %v1624_v29, %v22119_v0 }
 0x392   : > { %v2247_v60 = vrot.slane %v2233_v50, %v22119_v0  ;;  %v5704_v55 = vpack.i.b16 %v5432_v20, %v5382_v61  ;;  %v5706_v2 = vshrl.u32 %v5432_v20, 16  ;;  %v5710_v58 = vpack.i.b16 %v5433_v8, %v5383_v37 }
 0x393   : > { %v1628_v35 = vpack.i.b16 %v1627_v26, %v22151_v49  ;;  %v8537_v16 = vcombine.high %v6597_v47, %v22112_v44  ;;  %v19287_v22 = vrot.slane %v6597_v47, %v22119_v0  ;;  %v5712_v38 = vshrl.u32 %v5433_v8, 16 }
 0x394   : > { %v2248_v10 = vcombine.low %v19087_v52, %v2240_v62  ;;  %v2249_v14 = vcombine.high %v19087_v52, %v2240_v62  ;;  %v2264_v43 = vcombine.low %v19095_v54, %v2247_v60  ;;  %v5707_v29 = vpack.i.b16 %v5706_v2, %v5705_v4 }
 0x395   : > { %v19292_v45 = vrot.slane %v8537_v16, %v22119_v0  ;;  %v5713_v57 = vpack.i.b16 %v5712_v38, %v5711_v28  ;;  %v16179_v26 = vcombine.low %v5704_v55, %v5704_v55  ;;  %v16180_v61 = vcombine.high %v5704_v55, %v5704_v55 }
 0x396   : > { %v16243_v36 = vcombine.low %v5710_v58, %v5710_v58  ;;  %v16244_v37 = vcombine.high %v5710_v58, %v5710_v58  ;;  %v2256_v47 = vrot.slane %v2248_v10, %v22121_v27  ;;  %v2263_v50 = vrot.slane %v2249_v14, %v22121_v27 }
 0x397   : > { %v16211_v20 = vcombine.low %v5707_v29, %v5707_v29  ;;  %v16212_v52 = vcombine.high %v5707_v29, %v5707_v29  ;;  %v16275_v8 = vcombine.low %v5713_v57, %v5713_v57  ;;  %v16276_v49 = vcombine.high %v5713_v57, %v5713_v57  ;;  %6139 = vst.msk [vmem:[%s18390_s24 + $0x70] sm:$0xf] %vm6110_vm0, %v16179_v26 }
 0x398   : > { %6140 = vst.msk [vmem:[%s18390_s24 + $0x74] sm:$0xf] %vm6110_vm0, %v16180_v61  ;;  %6203 = vst.msk [vmem:[%s18390_s24 + $0x170] sm:$0xf] %vm6110_vm0, %v16243_v36  ;;  %v2265_v4 = vcombine.high %v19095_v54, %v2247_v60  ;;  %v2272_v28 = vrot.slane %v2264_v43, %v22121_v27  ;;  %v2299_v16 = vcombine.high %v1628_v35, %v22112_v44  ;;  %v6411_v58 = vshrl.u32 %v19000_v11, 16 }
 0x399   : > { %6204 = vst.msk [vmem:[%s18390_s24 + $0x174] sm:$0xf] %vm6110_vm0, %v16244_v37  ;;  %v2306_v62 = vrot.slane %v1628_v35, %v22119_v0  ;;  %6171 = vst.msk [vmem:[%s18390_s24 + $0xf0] sm:$0xf] %vm6110_vm0, %v16211_v20  ;;  %v4234_v55 = vcombine.low %v2256_v47, %v2263_v50  ;;  %v16099_v2 = vcombine.high %v2256_v47, %v2263_v50  ;;  %v1819_v29 = vshrl.u32 %v18998_v48, 16 }
 0x39a   : > { %6172 = vst.msk [vmem:[%s18390_s24 + $0xf4] sm:$0xf] %vm6110_vm0, %v16212_v52  ;;  %6235 = vst.msk [vmem:[%s18390_s24 + $0x1f0] sm:$0xf] %vm6110_vm0, %v16275_v8  ;;  %v1816_v54 = vpack.i.b16 %v18998_v48, %v18914_v30  ;;  %v2279_v60 = vrot.slane %v2265_v4, %v22121_v27  ;;  %v2313_v38 = vrot.slane %v2299_v16, %v22119_v0 }
 0x39b   : > { %6236 = vst.msk [vmem:[%s18390_s24 + $0x1f4] sm:$0xf] %vm6110_vm0, %v16276_v49  ;;  %v2314_v35 = vcombine.low %v19104_v25, %v2306_v62  ;;  %v2315_v10 = vcombine.high %v19104_v25, %v2306_v62  ;;  %v4241_v14 = vrot.slane %v4234_v55, %v22119_v0  ;;  %v4249_v43 = vrot.slane %v16099_v2, %v22119_v0 }
 0x39c   : > { %v3817_v57 = vcombine.high %v1816_v54, %v22112_v44  ;;  %v2330_v36 = vcombine.low %v19110_v51, %v2313_v38  ;;  %v2331_v37 = vcombine.high %v19110_v51, %v2313_v38  ;;  %v4250_v47 = vcombine.low %v2272_v28, %v2279_v60 }
 0x39d   : > { %v2322_v26 = vrot.slane %v2314_v35, %v22121_v27  ;;  %v2329_v61 = vrot.slane %v2315_v10, %v22121_v27  ;;  %v16100_v50 = vcombine.high %v2272_v28, %v2279_v60  ;;  %v4266_v20 = vcombine.low %v4241_v14, %v4249_v43 }
 0x39e   : > { %v1820_v25 = vpack.i.b16 %v1819_v29, %v1818_v53  ;;  %v2338_v52 = vrot.slane %v2330_v36, %v22121_v27  ;;  %v2345_v48 = vrot.slane %v2331_v37, %v22121_v27  ;;  %v4257_v4 = vrot.slane %v4250_v47, %v22119_v0 }
 0x39f   : > { %v4284_v8 = vcombine.low %v2322_v26, %v2329_v61  ;;  %v16101_v49 = vcombine.high %v2322_v26, %v2329_v61  ;;  %v4265_v16 = vrot.slane %v16100_v50, %v22119_v0  ;;  %v4273_v62 = vrot.slane %v4266_v20, %v22121_v27 }
 0x3a0   : > { %v3824_v51 = vrot.slane %v1816_v54, %v22119_v0  ;;  %v4300_v30 = vcombine.low %v2338_v52, %v2345_v48  ;;  %v16102_v53 = vcombine.high %v2338_v52, %v2345_v48  ;;  %v3831_v60 = vrot.slane %v3817_v57, %v22119_v0 }
 0x3a1   : > { %v4291_v28 = vrot.slane %v4284_v8, %v22119_v0  ;;  %v4299_v55 = vrot.slane %v16101_v49, %v22119_v0  ;;  %v4274_v2 = vcombine.low %v4257_v4, %v4265_v16  ;;  %v3883_v54 = vcombine.high %v1820_v25, %v22112_v44 }
 0x3a2   : > { %v3832_v38 = vcombine.low %v19166_v63, %v3824_v51  ;;  %v3833_v35 = vcombine.high %v19166_v63, %v3824_v51  ;;  %v4307_v10 = vrot.slane %v4300_v30, %v22119_v0  ;;  %v4315_v14 = vrot.slane %v16102_v53, %v22119_v0 }
 0x3a3   : > { %v4316_v43 = vcombine.low %v4291_v28, %v4299_v55  ;;  %v4281_v29 = vrot.slane %v4274_v2, %v22121_v27  ;;  %v3848_v36 = vcombine.low %v19171_v17, %v3831_v60  ;;  %v3849_v63 = vcombine.high %v19171_v17, %v3831_v60 }
 0x3a4   : > { %v3840_v26 = vrot.slane %v3832_v38, %v22121_v27  ;;  %v3847_v61 = vrot.slane %v3833_v35, %v22121_v27  ;;  %v4324_v37 = vcombine.low %v4307_v10, %v4315_v14  ;;  %v3890_v47 = vrot.slane %v1820_v25, %v22119_v0 }
 0x3a5   : > { %v4323_v57 = vrot.slane %v4316_v43, %v22121_v27  ;;  %v4282_v50 = vcombine.low %v4273_v62, %v4281_v29  ;;  %v4283_v20 = vcombine.high %v4273_v62, %v4281_v29  ;;  %v3856_v52 = vrot.slane %v3848_v36, %v22121_v27 }
 0x3a6   : > { %v3897_v48 = vrot.slane %v3883_v54, %v22119_v0  ;;  %v4331_v8 = vrot.slane %v4324_v37, %v22121_v27  ;;  %v3863_v49 = vrot.slane %v3849_v63, %v22121_v27  ;;  %v3898_v4 = vcombine.low %v19177_v7, %v3890_v47 }
 0x3a7   : > { %v3899_v16 = vcombine.high %v19177_v7, %v3890_v47  ;;  %v5573_v51 = vshrl.u32 %v4282_v50, 16  ;;  %v5579_v28 = vshrl.u32 %v4283_v20, 16  ;;  %v5434_v38 = vcombine.low %v3840_v26, %v3847_v61 }
 0x3a8   : > { %v3914_v17 = vcombine.low %v19182_v13, %v3897_v48  ;;  %v3915_v25 = vcombine.high %v19182_v13, %v3897_v48  ;;  %v4332_v55 = vcombine.low %v4323_v57, %v4331_v8  ;;  %v4333_v62 = vcombine.high %v4323_v57, %v4331_v8 }
 0x3a9   : > { %v3906_v30 = vrot.slane %v3898_v4, %v22121_v27  ;;  %v3913_v53 = vrot.slane %v3899_v16, %v22121_v27  ;;  %v16147_v35 = vcombine.high %v3840_v26, %v3847_v61  ;;  %v5441_v54 = vrot.slane %v5434_v38, %v22119_v0 }
 0x3aa   : > { %v3922_v2 = vrot.slane %v3914_v17, %v22121_v27  ;;  %v3929_v60 = vrot.slane %v3915_v25, %v22121_v27  ;;  %v5572_v10 = vpack.i.b16 %v4332_v55, %v4282_v50  ;;  %v5574_v7 = vshrl.u32 %v4332_v55, 16 }
 0x3ab   : > { %v5578_v14 = vpack.i.b16 %v4333_v62, %v4283_v20  ;;  %v5580_v43 = vshrl.u32 %v4333_v62, 16  ;;  %v5449_v13 = vrot.slane %v16147_v35, %v22119_v0  ;;  %v5450_v29 = vcombine.low %v3856_v52, %v3863_v49  ;;  %v22152_v62 = vld [vmem:[#allocation28_spill] sm:$0xff] }
 0x3ac   : > { %v16148_v36 = vcombine.high %v3856_v52, %v3863_v49  ;;  %v5575_v57 = vpack.i.b16 %v5574_v7, %v5573_v51  ;;  %v16157_v63 = vcombine.low %v5572_v10, %v5572_v10  ;;  %v16158_v47 = vcombine.high %v5572_v10, %v5572_v10 }
 0x3ad   : > { %v5581_v37 = vpack.i.b16 %v5580_v43, %v5579_v28  ;;  %v16221_v48 = vcombine.low %v5578_v14, %v5578_v14  ;;  %v16222_v26 = vcombine.high %v5578_v14, %v5578_v14  ;;  %v5457_v61 = vrot.slane %v5450_v29, %v22119_v0 }
 0x3ae   : > { %v5465_v50 = vrot.slane %v16148_v36, %v22119_v0  ;;  %v16189_v20 = vcombine.low %v5575_v57, %v5575_v57  ;;  %v16190_v8 = vcombine.high %v5575_v57, %v5575_v57  ;;  %6117 = vst.msk [vmem:[%s18390_s24 + $0x18] sm:$0xf] %vm6110_vm0, %v16157_v63  ;;  %6118 = vst.msk [vmem:[%s18390_s24 + $0x1c] sm:$0xf] %vm6110_vm0, %v16158_v47  ;;  %v6603_v55 = vshrl.u32 %v19039_v56, 16 }
 0x3af   : > { %v16253_v4 = vcombine.low %v5581_v37, %v5581_v37  ;;  %v16254_v16 = vcombine.high %v5581_v37, %v5581_v37  ;;  %6181 = vst.msk [vmem:[%s18390_s24 + $0x118] sm:$0xf] %vm6110_vm0, %v16221_v48  ;;  %6182 = vst.msk [vmem:[%s18390_s24 + $0x11c] sm:$0xf] %vm6110_vm0, %v16222_v26  ;;  %v5466_v52 = vcombine.low %v5441_v54, %v5449_v13  ;;  %v6420_v43 = vshrl.u32 %v19025_v59, 16 }
 0x3b0   : > { %v5474_v49 = vcombine.low %v5457_v61, %v5465_v50  ;;  %v5484_v51 = vcombine.low %v3906_v30, %v3913_v53  ;;  %v16149_v28 = vcombine.high %v3906_v30, %v3913_v53  ;;  %6149 = vst.msk [vmem:[%s18390_s24 + $0x98] sm:$0xf] %vm6110_vm0, %v16189_v20  ;;  %6150 = vst.msk [vmem:[%s18390_s24 + $0x9c] sm:$0xf] %vm6110_vm0, %v16190_v8  ;;  %v22153_v57 = vshrl.u32 %v22152_v62, 16 }
 0x3b1   : > { %6213 = vst.msk [vmem:[%s18390_s24 + $0x198] sm:$0xf] %vm6110_vm0, %v16253_v4  ;;  %6214 = vst.msk [vmem:[%s18390_s24 + $0x19c] sm:$0xf] %vm6110_vm0, %v16254_v16  ;;  %v5500_v17 = vcombine.low %v3922_v2, %v3929_v60  ;;  %v16150_v25 = vcombine.high %v3922_v2, %v3929_v60  ;;  %v6417_v38 = vpack.i.b16 %v19025_v59, %v22152_v62  ;;  %v6412_v61 = vshrl.u32 %v19070_v18, 16 }
 0x3b2   : > { %v5473_v35 = vrot.slane %v5466_v52, %v22121_v27  ;;  %v5481_v10 = vrot.slane %v5474_v49, %v22121_v27  ;;  %v5491_v30 = vrot.slane %v5484_v51, %v22119_v0  ;;  %v5499_v53 = vrot.slane %v16149_v28, %v22119_v0  ;;  %v22154_v49 = vld [vmem:[#allocation31_spill] sm:$0xff] }
 0x3b3   : > { %v5507_v7 = vrot.slane %v5500_v17, %v22119_v0  ;;  %v5515_v14 = vrot.slane %v16150_v25, %v22119_v0  ;;  %v7019_v2 = vcombine.high %v6417_v38, %v22112_v44  ;;  %v19401_v29 = vrot.slane %v6417_v38, %v22119_v0 }
 0x3b4   : > { %v5482_v60 = vcombine.low %v5473_v35, %v5481_v10  ;;  %v5483_v54 = vcombine.high %v5473_v35, %v5481_v10  ;;  %v5516_v13 = vcombine.low %v5491_v30, %v5499_v53  ;;  %v6421_v37 = vpack.i.b16 %v6420_v43, %v22153_v57 }
 0x3b5   : > { %v5524_v36 = vcombine.low %v5507_v7, %v5515_v14  ;;  %v19406_v63 = vrot.slane %v7019_v2, %v22119_v0  ;;  %v6409_v47 = vpack.i.b16 %v19070_v18, %v19000_v11  ;;  %v6413_v16 = vpack.i.b16 %v6412_v61, %v6411_v58 }
 0x3b6   : > { %v5523_v59 = vrot.slane %v5516_v13, %v22121_v27  ;;  %v5717_v48 = vshrl.u32 %v5482_v60, 16  ;;  %v5723_v26 = vshrl.u32 %v5483_v54, 16  ;;  %v7085_v20 = vcombine.high %v6421_v37, %v22112_v44 }
 0x3b7   : > { %v5531_v50 = vrot.slane %v5524_v36, %v22121_v27  ;;  %v19415_v8 = vrot.slane %v6421_v37, %v22119_v0  ;;  %v6902_v4 = vcombine.high %v6409_v47, %v22112_v44  ;;  %v6909_v52 = vrot.slane %v6409_v47, %v22119_v0 }
 0x3b8   : > { %v19423_v51 = vpack.i.b16 %v19063_v3, %v22154_v49  ;;  %v6612_v18 = vshrl.u32 %v19063_v3, 16  ;;  %v19427_v25 = vrot.slane %v7085_v20, %v22119_v0  ;;  %v6968_v58 = vcombine.high %v6413_v16, %v22112_v44 }
 0x3b9   : > { %v5532_v28 = vcombine.low %v5523_v59, %v5531_v50  ;;  %v5533_v17 = vcombine.high %v5523_v59, %v5531_v50  ;;  %v6916_v62 = vrot.slane %v6902_v4, %v22119_v0  ;;  %v6917_v38 = vcombine.low %v19248_v40, %v6909_v52 }
 0x3ba   : > { %v6918_v11 = vcombine.high %v19248_v40, %v6909_v52  ;;  %v6975_v35 = vrot.slane %v6413_v16, %v22119_v0 }
 0x3bb   : > { %v5716_v10 = vpack.i.b16 %v5532_v28, %v5482_v60  ;;  %v5718_v30 = vshrl.u32 %v5532_v28, 16  ;;  %v5722_v53 = vpack.i.b16 %v5533_v17, %v5483_v54  ;;  %v5724_v7 = vshrl.u32 %v5533_v17, 16 }
 0x3bc   : > { %v6925_v3 = vrot.slane %v6917_v38, %v22121_v27  ;;  %v6932_v14 = vrot.slane %v6918_v11, %v22121_v27  ;;  %v6933_v43 = vcombine.low %v19257_v9, %v6916_v62  ;;  %v6934_v2 = vcombine.high %v19257_v9, %v6916_v62 }
 0x3bd   : > { %v5719_v40 = vpack.i.b16 %v5718_v30, %v5717_v48  ;;  %v5725_v13 = vpack.i.b16 %v5724_v7, %v5723_v26  ;;  %v16181_v36 = vcombine.low %v5716_v10, %v5716_v10  ;;  %v16182_v57 = vcombine.high %v5716_v10, %v5716_v10  ;;  %v6364_v7 = vpop.permute.xlu0 %6363 }
 0x3be   : > { %v16245_v60 = vcombine.low %v5722_v53, %v5722_v53  ;;  %v16246_v54 = vcombine.high %v5722_v53, %v5722_v53  ;;  %v6941_v37 = vrot.slane %v6933_v43, %v22121_v27  ;;  %v6948_v47 = vrot.slane %v6934_v2, %v22121_v27 }
 0x3bf   : > { %v16213_v59 = vcombine.low %v5719_v40, %v5719_v40  ;;  %v16214_v61 = vcombine.high %v5719_v40, %v5719_v40  ;;  %v16277_v50 = vcombine.low %v5725_v13, %v5725_v13  ;;  %v16278_v20 = vcombine.high %v5725_v13, %v5725_v13  ;;  %6141 = vst.msk [vmem:[%s18390_s24 + $0x78] sm:$0xf] %vm6110_vm0, %v16181_v36 }
 0x3c0   : > { %6142 = vst.msk [vmem:[%s18390_s24 + $0x7c] sm:$0xf] %vm6110_vm0, %v16182_v57  ;;  %6205 = vst.msk [vmem:[%s18390_s24 + $0x178] sm:$0xf] %vm6110_vm0, %v16245_v60  ;;  %v6982_v9 = vrot.slane %v6968_v58, %v22119_v0  ;;  %v6983_v48 = vcombine.low %v19260_v42, %v6975_v35  ;;  %v6984_v26 = vcombine.high %v19260_v42, %v6975_v35  ;;  %v22155_v17 = vshrl.u32 %v22154_v49, 16 }
 0x3c1   : > { %6206 = vst.msk [vmem:[%s18390_s24 + $0x17c] sm:$0xf] %vm6110_vm0, %v16246_v54  ;;  %v8935_v4 = vcombine.low %v6925_v3, %v6932_v14  ;;  %6173 = vst.msk [vmem:[%s18390_s24 + $0xf8] sm:$0xf] %vm6110_vm0, %v16213_v59  ;;  %v16287_v16 = vcombine.high %v6925_v3, %v6932_v14  ;;  %v8951_v52 = vcombine.low %v6941_v37, %v6948_v47 }
 0x3c2   : > { %6174 = vst.msk [vmem:[%s18390_s24 + $0xfc] sm:$0xf] %vm6110_vm0, %v16214_v61  ;;  %6237 = vst.msk [vmem:[%s18390_s24 + $0x1f8] sm:$0xf] %vm6110_vm0, %v16277_v50  ;;  %v16288_v28 = vcombine.high %v6941_v37, %v6948_v47  ;;  %v6613_v62 = vpack.i.b16 %v6612_v18, %v22155_v17  ;;  %v6991_v38 = vrot.slane %v6983_v48, %v22121_v27  ;;  %v6604_v17 = vshrl.u32 %v6364_v7, 16 }
 0x3c3   : > { %6238 = vst.msk [vmem:[%s18390_s24 + $0x1fc] sm:$0xf] %vm6110_vm0, %v16278_v20  ;;  %v6998_v11 = vrot.slane %v6984_v26, %v22121_v27  ;;  %v6999_v42 = vcombine.low %v19263_v15, %v6982_v9  ;;  %v7000_v58 = vcombine.high %v19263_v15, %v6982_v9  ;;  %v8942_v35 = vrot.slane %v8935_v4, %v22119_v0 }
 0x3c4   : > { %v8950_v10 = vrot.slane %v16287_v16, %v22119_v0  ;;  %v8958_v30 = vrot.slane %v8951_v52, %v22119_v0  ;;  %v8966_v53 = vrot.slane %v16288_v28, %v22119_v0  ;;  %v8603_v15 = vcombine.high %v19423_v51, %v22112_v44  ;;  %v1473_v16 = vpop.permute.xlu0 %1472 }
 0x3c5   : > { %v7007_v49 = vrot.slane %v6999_v42, %v22121_v27  ;;  %v7014_v18 = vrot.slane %v7000_v58, %v22121_v27  ;;  %v8985_v3 = vcombine.low %v6991_v38, %v6998_v11  ;;  %v16289_v14 = vcombine.high %v6991_v38, %v6998_v11 }
 0x3c6   : > { %v8967_v43 = vcombine.low %v8942_v35, %v8950_v10  ;;  %v8975_v2 = vcombine.low %v8958_v30, %v8966_v53  ;;  %v19475_v40 = vrot.slane %v19423_v51, %v22119_v0  ;;  %v19482_v47 = vrot.slane %v8603_v15, %v22119_v0  ;;  %v22156_v30 = vld [vmem:[#allocation32_spill] sm:$0xff] }
 0x3c7   : > { %v8992_v13 = vrot.slane %v8985_v3, %v22119_v0  ;;  %v9000_v36 = vrot.slane %v16289_v14, %v22119_v0  ;;  %v9001_v57 = vcombine.low %v7007_v49, %v7014_v18  ;;  %v16290_v60 = vcombine.high %v7007_v49, %v7014_v18 }
 0x3c8   : > { %v8974_v54 = vrot.slane %v8967_v43, %v22121_v27  ;;  %v8982_v37 = vrot.slane %v8975_v2, %v22121_v27  ;;  %v8669_v59 = vcombine.high %v6613_v62, %v22112_v44  ;;  %v19488_v20 = vrot.slane %v6613_v62, %v22119_v0 }
 0x3c9   : > { %v9008_v61 = vrot.slane %v9001_v57, %v22119_v0  ;;  %v9016_v51 = vrot.slane %v16290_v60, %v22119_v0  ;;  %v9017_v50 = vcombine.low %v8992_v13, %v9000_v36  ;;  %v6601_v4 = vpack.i.b16 %v6364_v7, %v19039_v56 }
 0x3ca   : > { %v8983_v9 = vcombine.low %v8974_v54, %v8982_v37  ;;  %v8984_v48 = vcombine.high %v8974_v54, %v8982_v37  ;;  %v19491_v26 = vrot.slane %v8669_v59, %v22119_v0  ;;  %v6427_v38 = vshrl.u32 %v19098_v24, 16 }
 0x3cb   : > { %v9024_v52 = vrot.slane %v9017_v50, %v22121_v27  ;;  %v9025_v28 = vcombine.low %v9008_v61, %v9016_v51  ;;  %v8486_v58 = vcombine.high %v6601_v4, %v22112_v44  ;;  %v8493_v62 = vrot.slane %v6601_v4, %v22119_v0 }
 0x3cc   : > { %v10362_v11 = vshrl.u32 %v8983_v9, 16  ;;  %v10368_v42 = vshrl.u32 %v8984_v48, 16  ;;  %v6605_v10 = vpack.i.b16 %v6604_v17, %v6603_v55  ;;  %v19502_v53 = vpack.i.b16 %v1473_v16, %v22156_v30 }
 0x3cd   : > { %v9032_v35 = vrot.slane %v9025_v28, %v22121_v27  ;;  %v1635_v49 = vshrl.u32 %v1473_v16, 16  ;;  %v8500_v18 = vrot.slane %v8486_v58, %v22119_v0  ;;  %v8501_v7 = vcombine.low %v19274_v39, %v8493_v62 }
 0x3ce   : > { %v8502_v3 = vcombine.high %v19274_v39, %v8493_v62  ;;  %v6619_v14 = vshrl.u32 %v19121_v5, 16  ;;  %v8552_v15 = vcombine.high %v6605_v10, %v22112_v44  ;;  %v8559_v13 = vrot.slane %v6605_v10, %v22119_v0 }
 0x3cf   : > { %v9033_v43 = vcombine.low %v9024_v52, %v9032_v35  ;;  %v9034_v2 = vcombine.high %v9024_v52, %v9032_v35  ;;  %v8509_v56 = vrot.slane %v8501_v7, %v22121_v27  ;;  %v8517_v36 = vcombine.low %v19281_v41, %v8500_v18 }
 0x3d0   : > { %v8516_v55 = vrot.slane %v8502_v3, %v22121_v27  ;;  %v8518_v57 = vcombine.high %v19281_v41, %v8500_v18  ;;  %v8566_v51 = vrot.slane %v8552_v15, %v22119_v0  ;;  %v8567_v50 = vcombine.low %v19287_v22, %v8559_v13 }
 0x3d1   : > { %v10361_v60 = vpack.i.b16 %v9033_v43, %v8983_v9  ;;  %v10363_v54 = vshrl.u32 %v9033_v43, 16  ;;  %v10367_v37 = vpack.i.b16 %v9034_v2, %v8984_v48  ;;  %v10369_v39 = vshrl.u32 %v9034_v2, 16 }
 0x3d2   : > { %v8525_v59 = vrot.slane %v8517_v36, %v22121_v27  ;;  %v8532_v61 = vrot.slane %v8518_v57, %v22121_v27  ;;  %v8568_v28 = vcombine.high %v19287_v22, %v8559_v13  ;;  %v8575_v17 = vrot.slane %v8567_v50, %v22121_v27  ;;  %v1505_v13 = vpop.permute.xlu0 %1504 }
 0x3d3   : > { %v10364_v4 = vpack.i.b16 %v10363_v54, %v10362_v11  ;;  %v10370_v16 = vpack.i.b16 %v10369_v39, %v10368_v42  ;;  %v16347_v52 = vcombine.low %v10361_v60, %v10361_v60  ;;  %v16348_v41 = vcombine.high %v10361_v60, %v10361_v60 }
 0x3d4   : > { %v16411_v9 = vcombine.low %v10367_v37, %v10367_v37  ;;  %v16412_v48 = vcombine.high %v10367_v37, %v10367_v37  ;;  %v8582_v11 = vrot.slane %v8568_v28, %v22121_v27  ;;  %v8583_v22 = vcombine.low %v19292_v45, %v8566_v51 }
 0x3d5   : > { %v16379_v58 = vcombine.low %v10364_v4, %v10364_v4  ;;  %v16380_v62 = vcombine.high %v10364_v4, %v10364_v4  ;;  %v16443_v35 = vcombine.low %v10370_v16, %v10370_v16  ;;  %v16444_v10 = vcombine.high %v10370_v16, %v10370_v16  ;;  %10915 = vst.msk [vmem:[%s18823_s15 + $0x10] sm:$0xf] %vm6110_vm0, %v16347_v52 }
 0x3d6   : > { %10916 = vst.msk [vmem:[%s18823_s15 + $0x14] sm:$0xf] %vm6110_vm0, %v16348_v41  ;;  %10979 = vst.msk [vmem:[%s18823_s15 + $0x110] sm:$0xf] %vm6110_vm0, %v16411_v9  ;;  %v8584_v42 = vcombine.high %v19292_v45, %v8566_v51  ;;  %v10135_v18 = vcombine.low %v8509_v56, %v8516_v55  ;;  %v16335_v7 = vcombine.high %v8509_v56, %v8516_v55  ;;  %v22157_v2 = vshrl.u32 %v22156_v30, 16 }
 0x3d7   : > { %10980 = vst.msk [vmem:[%s18823_s15 + $0x114] sm:$0xf] %vm6110_vm0, %v16412_v48  ;;  %10947 = vst.msk [vmem:[%s18823_s15 + $0x90] sm:$0xf] %vm6110_vm0, %v16379_v58  ;;  %v10151_v3 = vcombine.low %v8525_v59, %v8532_v61  ;;  %v16336_v43 = vcombine.high %v8525_v59, %v8532_v61  ;;  %v8591_v36 = vrot.slane %v8583_v22, %v22121_v27 }
 0x3d8   : > { %10948 = vst.msk [vmem:[%s18823_s15 + $0x94] sm:$0xf] %vm6110_vm0, %v16380_v62  ;;  %11011 = vst.msk [vmem:[%s18823_s15 + $0x190] sm:$0xf] %vm6110_vm0, %v16443_v35  ;;  %v1636_v15 = vpack.i.b16 %v1635_v49, %v22157_v2  ;;  %v8598_v45 = vrot.slane %v8584_v42, %v22121_v27  ;;  %v10142_v57 = vrot.slane %v10135_v18, %v22119_v0  ;;  %v1537_v62 = vpop.permute.xlu0 %1536 }
 0x3d9   : > { %11012 = vst.msk [vmem:[%s18823_s15 + $0x194] sm:$0xf] %vm6110_vm0, %v16444_v10  ;;  %v10185_v60 = vcombine.low %v8575_v17, %v8582_v11  ;;  %v10150_v54 = vrot.slane %v16335_v7, %v22119_v0  ;;  %v10158_v37 = vrot.slane %v10151_v3, %v22119_v0  ;;  %v10166_v39 = vrot.slane %v16336_v43, %v22119_v0 }
 0x3da   : > { %v16337_v56 = vcombine.high %v8575_v17, %v8582_v11  ;;  %v10201_v59 = vcombine.low %v8591_v36, %v8598_v45  ;;  %v16338_v30 = vcombine.high %v8591_v36, %v8598_v45  ;;  %v2350_v49 = vcombine.high %v19502_v53, %v22112_v44 }
 0x3db   : > { %v10192_v55 = vrot.slane %v10185_v60, %v22119_v0  ;;  %v10167_v61 = vcombine.low %v10142_v57, %v10150_v54  ;;  %v10175_v51 = vcombine.low %v10158_v37, %v10166_v39  ;;  %v19553_v4 = vrot.slane %v19502_v53, %v22119_v0 }
 0x3dc   : > { %v10200_v50 = vrot.slane %v16337_v56, %v22119_v0  ;;  %v10208_v16 = vrot.slane %v10201_v59, %v22119_v0  ;;  %v10216_v52 = vrot.slane %v16338_v30, %v22119_v0  ;;  %v19558_v41 = vrot.slane %v2350_v49, %v22119_v0 }
 0x3dd   : > { %v2416_v9 = vcombine.high %v1636_v15, %v22112_v44  ;;  %v10174_v48 = vrot.slane %v10167_v61, %v22121_v27  ;;  %v10182_v28 = vrot.slane %v10175_v51, %v22121_v27  ;;  %v19564_v58 = vrot.slane %v1636_v15, %v22119_v0 }
 0x3de   : > { %v10217_v17 = vcombine.low %v10192_v55, %v10200_v50  ;;  %v10225_v53 = vcombine.low %v10208_v16, %v10216_v52  ;;  %v1642_v10 = vshrl.u32 %v1505_v13, 16  ;;  %v6425_v11 = vpack.i.b16 %v19158_v33, %v19098_v24 }
 0x3df   : > { %v19567_v35 = vrot.slane %v2416_v9, %v22119_v0  ;;  %v10183_v22 = vcombine.low %v10174_v48, %v10182_v28  ;;  %v10184_v42 = vcombine.high %v10174_v48, %v10182_v28  ;;  %v6428_v7 = vshrl.u32 %v19158_v33, 16 }
 0x3e0   : > { %v10224_v18 = vrot.slane %v10217_v17, %v22121_v27  ;;  %v10232_v3 = vrot.slane %v10225_v53, %v22121_v27  ;;  %v7034_v43 = vcombine.high %v6425_v11, %v22112_v44  ;;  %v7041_v2 = vrot.slane %v6425_v11, %v22119_v0 }
 0x3e1   : > { %v19576_v15 = vpack.i.b16 %v1537_v62, %v1505_v13  ;;  %v10506_v36 = vshrl.u32 %v10183_v22, 16  ;;  %v10512_v45 = vshrl.u32 %v10184_v42, 16  ;;  %v6429_v57 = vpack.i.b16 %v6428_v7, %v6427_v38 }
 0x3e2   : > { %v1643_v60 = vshrl.u32 %v1537_v62, 16  ;;  %v10233_v54 = vcombine.low %v10224_v18, %v10232_v3  ;;  %v10234_v37 = vcombine.high %v10224_v18, %v10232_v3  ;;  %v7048_v39 = vrot.slane %v7034_v43, %v22119_v0 }
 0x3e3   : > { %v7049_v33 = vcombine.low %v19401_v29, %v7041_v2  ;;  %v7050_v56 = vcombine.high %v19401_v29, %v7041_v2  ;;  %v7100_v55 = vcombine.high %v6429_v57, %v22112_v44  ;;  %v7107_v59 = vrot.slane %v6429_v57, %v22119_v0 }
 0x3e4   : > { %v19585_v13 = vpack.i.b16 %v1643_v60, %v1642_v10  ;;  %v10505_v30 = vpack.i.b16 %v10233_v54, %v10183_v22  ;;  %v10507_v49 = vshrl.u32 %v10233_v54, 16  ;;  %v10511_v61 = vpack.i.b16 %v10234_v37, %v10184_v42 }
 0x3e5   : > { %v10513_v24 = vshrl.u32 %v10234_v37, 16  ;;  %v7057_v38 = vrot.slane %v7049_v33, %v22121_v27  ;;  %v7064_v51 = vrot.slane %v7050_v56, %v22121_v27  ;;  %v7065_v50 = vcombine.low %v19406_v63, %v7048_v39 }
 0x3e6   : > { %v7066_v29 = vcombine.high %v19406_v63, %v7048_v39  ;;  %v10508_v16 = vpack.i.b16 %v10507_v49, %v10506_v36  ;;  %v16371_v9 = vcombine.low %v10505_v30, %v10505_v30  ;;  %v16372_v48 = vcombine.high %v10505_v30, %v10505_v30 }
 0x3e7   : > { %v10514_v52 = vpack.i.b16 %v10513_v24, %v10512_v45  ;;  %v16435_v28 = vcombine.low %v10511_v61, %v10511_v61  ;;  %v16436_v17 = vcombine.high %v10511_v61, %v10511_v61  ;;  %v7073_v62 = vrot.slane %v7065_v50, %v22121_v27 }
 0x3e8   : > { %v7080_v53 = vrot.slane %v7066_v29, %v22121_v27  ;;  %v16403_v10 = vcombine.low %v10508_v16, %v10508_v16  ;;  %v16404_v11 = vcombine.high %v10508_v16, %v10508_v16  ;;  %10939 = vst.msk [vmem:[%s18823_s15 + $0x70] sm:$0xf] %vm6110_vm0, %v16371_v9  ;;  %10940 = vst.msk [vmem:[%s18823_s15 + $0x74] sm:$0xf] %vm6110_vm0, %v16372_v48 }
 0x3e9   : > { %v16467_v22 = vcombine.low %v10514_v52, %v10514_v52  ;;  %v16468_v42 = vcombine.high %v10514_v52, %v10514_v52  ;;  %11003 = vst.msk [vmem:[%s18823_s15 + $0x170] sm:$0xf] %vm6110_vm0, %v16435_v28  ;;  %11004 = vst.msk [vmem:[%s18823_s15 + $0x174] sm:$0xf] %vm6110_vm0, %v16436_v17  ;;  %v7114_v63 = vrot.slane %v7100_v55, %v22119_v0 }
 0x3ea   : > { %v7115_v18 = vcombine.low %v19415_v8, %v7107_v59  ;;  %v7116_v7 = vcombine.high %v19415_v8, %v7107_v59  ;;  %v9035_v3 = vcombine.low %v7057_v38, %v7064_v51  ;;  %10971 = vst.msk [vmem:[%s18823_s15 + $0xf0] sm:$0xf] %vm6110_vm0, %v16403_v10  ;;  %10972 = vst.msk [vmem:[%s18823_s15 + $0xf4] sm:$0xf] %vm6110_vm0, %v16404_v11 }
 0x3eb   : > { %11035 = vst.msk [vmem:[%s18823_s15 + $0x1f0] sm:$0xf] %vm6110_vm0, %v16467_v22  ;;  %11036 = vst.msk [vmem:[%s18823_s15 + $0x1f4] sm:$0xf] %vm6110_vm0, %v16468_v42  ;;  %v16291_v43 = vcombine.high %v7057_v38, %v7064_v51  ;;  %v9051_v2 = vcombine.low %v7073_v62, %v7080_v53  ;;  %v16292_v36 = vcombine.high %v7073_v62, %v7080_v53 }
 0x3ec   : > { %v2365_v45 = vcombine.high %v19576_v15, %v22112_v44  ;;  %v7123_v57 = vrot.slane %v7115_v18, %v22121_v27  ;;  %v7130_v60 = vrot.slane %v7116_v7, %v22121_v27  ;;  %v7131_v8 = vcombine.low %v19427_v25, %v7114_v63 }
 0x3ed   : > { %v7132_v54 = vcombine.high %v19427_v25, %v7114_v63  ;;  %v9042_v37 = vrot.slane %v9035_v3, %v22119_v0  ;;  %v9050_v39 = vrot.slane %v16291_v43, %v22119_v0  ;;  %v9058_v33 = vrot.slane %v9051_v2, %v22119_v0  ;;  %v19641_v3 = vpop.permute.xlu1 %6365 }
 0x3ee   : > { %v9066_v56 = vrot.slane %v16292_v36, %v22119_v0  ;;  %v7139_v55 = vrot.slane %v7131_v8, %v22121_v27  ;;  %v9085_v30 = vcombine.low %v7123_v57, %v7130_v60  ;;  %v16293_v49 = vcombine.high %v7123_v57, %v7130_v60 }
 0x3ef   : > { %v7146_v59 = vrot.slane %v7132_v54, %v22121_v27  ;;  %v9067_v61 = vcombine.low %v9042_v37, %v9050_v39  ;;  %v2372_v38 = vrot.slane %v19576_v15, %v22119_v0  ;;  %v2379_v25 = vrot.slane %v2365_v45, %v22119_v0 }
 0x3f0   : > { %v9075_v24 = vcombine.low %v9058_v33, %v9066_v56  ;;  %v9092_v51 = vrot.slane %v9085_v30, %v22119_v0  ;;  %v9100_v50 = vrot.slane %v16293_v49, %v22119_v0  ;;  %v2431_v36 = vcombine.high %v19585_v13, %v22112_v44 }
 0x3f1   : > { %v9101_v29 = vcombine.low %v7139_v55, %v7146_v59  ;;  %v16294_v16 = vcombine.high %v7139_v55, %v7146_v59  ;;  %v9074_v52 = vrot.slane %v9067_v61, %v22121_v27  ;;  %v2380_v48 = vcombine.low %v19553_v4, %v2372_v38 }
 0x3f2   : > { %v9082_v9 = vrot.slane %v9075_v24, %v22121_v27  ;;  %v2381_v28 = vcombine.high %v19553_v4, %v2372_v38  ;;  %v9117_v62 = vcombine.low %v9092_v51, %v9100_v50  ;;  %v2396_v53 = vcombine.low %v19558_v41, %v2379_v25 }
 0x3f3   : > { %v9108_v17 = vrot.slane %v9101_v29, %v22119_v0  ;;  %v9116_v15 = vrot.slane %v16294_v16, %v22119_v0  ;;  %v2388_v22 = vrot.slane %v2380_v48, %v22121_v27  ;;  %v2397_v7 = vcombine.high %v19558_v41, %v2379_v25 }
 0x3f4   : > { %v9083_v10 = vcombine.low %v9074_v52, %v9082_v9  ;;  %v9084_v11 = vcombine.high %v9074_v52, %v9082_v9  ;;  %v2395_v42 = vrot.slane %v2381_v28, %v22121_v27  ;;  %v9124_v63 = vrot.slane %v9117_v62, %v22121_v27 }
 0x3f5   : > { %v9125_v18 = vcombine.low %v9108_v17, %v9116_v15  ;;  %v2404_v4 = vrot.slane %v2396_v53, %v22121_v27  ;;  %v2438_v45 = vrot.slane %v19585_v13, %v22119_v0  ;;  %v2411_v60 = vrot.slane %v2397_v7, %v22121_v27 }
 0x3f6   : > { %v10374_v43 = vshrl.u32 %v9083_v10, 16  ;;  %v10380_v2 = vshrl.u32 %v9084_v11, 16  ;;  %v4334_v8 = vcombine.low %v2388_v22, %v2395_v42  ;;  %v16103_v54 = vcombine.high %v2388_v22, %v2395_v42 }
 0x3f7   : > { %v9132_v57 = vrot.slane %v9125_v18, %v22121_v27  ;;  %v2445_v41 = vrot.slane %v2431_v36, %v22119_v0  ;;  %v2446_v37 = vcombine.low %v19564_v58, %v2438_v45  ;;  %v2447_v39 = vcombine.high %v19564_v58, %v2438_v45 }
 0x3f8   : > { %v6617_v33 = vpack.i.b16 %v19641_v3, %v19121_v5  ;;  %v4341_v59 = vrot.slane %v4334_v8, %v22119_v0  ;;  %v4349_v13 = vrot.slane %v16103_v54, %v22119_v0  ;;  %v4350_v16 = vcombine.low %v2404_v4, %v2411_v60 }
 0x3f9   : > { %v9133_v56 = vcombine.low %v9124_v63, %v9132_v57  ;;  %v9134_v55 = vcombine.high %v9124_v63, %v9132_v57  ;;  %v2454_v30 = vrot.slane %v2446_v37, %v22121_v27  ;;  %v2461_v49 = vrot.slane %v2447_v39, %v22121_v27 }
 0x3fa   : > { %v2462_v61 = vcombine.low %v19567_v35, %v2445_v41  ;;  %v2463_v24 = vcombine.high %v19567_v35, %v2445_v41  ;;  %v16104_v52 = vcombine.high %v2404_v4, %v2411_v60  ;;  %v4357_v62 = vrot.slane %v4350_v16, %v22119_v0 }
 0x3fb   : > { %v10373_v38 = vpack.i.b16 %v9133_v56, %v9083_v10  ;;  %v10375_v25 = vshrl.u32 %v9133_v56, 16  ;;  %v10379_v58 = vpack.i.b16 %v9134_v55, %v9084_v11  ;;  %v10381_v51 = vshrl.u32 %v9134_v55, 16 }
 0x3fc   : > { %v2470_v50 = vrot.slane %v2462_v61, %v22121_v27  ;;  %v2477_v29 = vrot.slane %v2463_v24, %v22121_v27  ;;  %v4365_v53 = vrot.slane %v16104_v52, %v22119_v0  ;;  %v4366_v63 = vcombine.low %v4341_v59, %v4349_v13 }
 0x3fd   : > { %v10376_v9 = vpack.i.b16 %v10375_v25, %v10374_v43  ;;  %v10382_v48 = vpack.i.b16 %v10381_v51, %v10380_v2  ;;  %v16349_v28 = vcombine.low %v10373_v38, %v10373_v38  ;;  %v16350_v17 = vcombine.high %v10373_v38, %v10373_v38  ;;  %v19695_v38 = vpop.permute.xlu0 %6279 }
 0x3fe   : > { %v16413_v15 = vcombine.low %v10379_v58, %v10379_v58  ;;  %v16414_v35 = vcombine.high %v10379_v58, %v10379_v58  ;;  %v4374_v18 = vcombine.low %v4357_v62, %v4365_v53  ;;  %v4384_v7 = vcombine.low %v2454_v30, %v2461_v49 }
 0x3ff   : > { %v16381_v10 = vcombine.low %v10376_v9, %v10376_v9  ;;  %v16382_v11 = vcombine.high %v10376_v9, %v10376_v9  ;;  %v16445_v22 = vcombine.low %v10382_v48, %v10382_v48  ;;  %v16446_v42 = vcombine.high %v10382_v48, %v10382_v48  ;;  %10917 = vst.msk [vmem:[%s18823_s15 + $0x18] sm:$0xf] %vm6110_vm0, %v16349_v28  ;;  %v22158_v9 = vld [vmem:[#allocation36_spill] sm:$0xff] }
 0x400   : > { %10918 = vst.msk [vmem:[%s18823_s15 + $0x1c] sm:$0xf] %vm6110_vm0, %v16350_v17  ;;  %10981 = vst.msk [vmem:[%s18823_s15 + $0x118] sm:$0xf] %vm6110_vm0, %v16413_v15  ;;  %v16105_v4 = vcombine.high %v2454_v30, %v2461_v49  ;;  %v4400_v43 = vcombine.low %v2470_v50, %v2477_v29  ;;  %v16106_v2 = vcombine.high %v2470_v50, %v2477_v29  ;;  %v6620_v36 = vshrl.u32 %v19641_v3, 16 }
 0x401   : > { %10982 = vst.msk [vmem:[%s18823_s15 + $0x11c] sm:$0xf] %vm6110_vm0, %v16414_v35  ;;  %10949 = vst.msk [vmem:[%s18823_s15 + $0x98] sm:$0xf] %vm6110_vm0, %v16381_v10  ;;  %v8618_v45 = vcombine.high %v6617_v33, %v22112_v44  ;;  %v4373_v57 = vrot.slane %v4366_v63, %v22121_v27  ;;  %v4381_v60 = vrot.slane %v4374_v18, %v22121_v27 }
 0x402   : > { %10950 = vst.msk [vmem:[%s18823_s15 + $0x9c] sm:$0xf] %vm6110_vm0, %v16382_v11  ;;  %11013 = vst.msk [vmem:[%s18823_s15 + $0x198] sm:$0xf] %vm6110_vm0, %v16445_v22  ;;  %v4391_v8 = vrot.slane %v4384_v7, %v22119_v0  ;;  %v4399_v54 = vrot.slane %v16105_v4, %v22119_v0  ;;  %v4407_v41 = vrot.slane %v4400_v43, %v22119_v0 }
 0x403   : > { %11014 = vst.msk [vmem:[%s18823_s15 + $0x19c] sm:$0xf] %vm6110_vm0, %v16446_v42  ;;  %v4415_v37 = vrot.slane %v16106_v2, %v22119_v0  ;;  %v6621_v39 = vpack.i.b16 %v6620_v36, %v6619_v14  ;;  %v8625_v56 = vrot.slane %v6617_v33, %v22119_v0  ;;  %v4382_v3 = vcombine.low %v4373_v57, %v4381_v60 }
 0x404   : > { %v4383_v55 = vcombine.high %v4373_v57, %v4381_v60  ;;  %v4416_v59 = vcombine.low %v4391_v8, %v4399_v54  ;;  %v8632_v13 = vrot.slane %v8618_v45, %v22119_v0  ;;  %v19708_v48 = vpack.i.b16 %v19695_v38, %v22158_v9 }
 0x405   : > { %v4424_v30 = vcombine.low %v4407_v41, %v4415_v37  ;;  %v8633_v49 = vcombine.low %v19475_v40, %v8625_v56  ;;  %v8634_v61 = vcombine.high %v19475_v40, %v8625_v56  ;;  %v8684_v24 = vcombine.high %v6621_v39, %v22112_v44 }
 0x406   : > { %v4423_v25 = vrot.slane %v4416_v59, %v22121_v27  ;;  %v5585_v5 = vshrl.u32 %v4382_v3, 16  ;;  %v5591_v14 = vshrl.u32 %v4383_v55, 16  ;;  %v8649_v33 = vcombine.low %v19482_v47, %v8632_v13 }
 0x407   : > { %v4431_v58 = vrot.slane %v4424_v30, %v22121_v27  ;;  %v8641_v51 = vrot.slane %v8633_v49, %v22121_v27  ;;  %v8648_v50 = vrot.slane %v8634_v61, %v22121_v27  ;;  %v8650_v29 = vcombine.high %v19482_v47, %v8632_v13 }
 0x408   : > { %v8657_v40 = vrot.slane %v8649_v33, %v22121_v27  ;;  %v8691_v16 = vrot.slane %v6621_v39, %v22119_v0  ;;  %v8698_v52 = vrot.slane %v8684_v24, %v22119_v0  ;;  %v6436_v61 = vshrl.u32 %v19695_v38, 16  ;;  %v11074_v24 = vpop.permute.xlu1 %11073 }
 0x409   : > { %v4432_v28 = vcombine.low %v4423_v25, %v4431_v58  ;;  %v4433_v17 = vcombine.high %v4423_v25, %v4431_v58  ;;  %v8664_v15 = vrot.slane %v8650_v29, %v22121_v27  ;;  %v10235_v35 = vcombine.low %v8641_v51, %v8648_v50  ;;  %v6312_v58 = vpop.permute.xlu0 %6311 }
 0x40a   : > { %v8699_v62 = vcombine.low %v19488_v20, %v8691_v16  ;;  %v8700_v53 = vcombine.high %v19488_v20, %v8691_v16  ;;  %v8715_v47 = vcombine.low %v19491_v26, %v8698_v52  ;;  %v8716_v10 = vcombine.high %v19491_v26, %v8698_v52 }
 0x40b   : > { %v5584_v11 = vpack.i.b16 %v4432_v28, %v4382_v3  ;;  %v5586_v22 = vshrl.u32 %v4432_v28, 16  ;;  %v5590_v42 = vpack.i.b16 %v4433_v17, %v4383_v55  ;;  %v5592_v63 = vshrl.u32 %v4433_v17, 16 }
 0x40c   : > { %v8707_v18 = vrot.slane %v8699_v62, %v22121_v27  ;;  %v8714_v7 = vrot.slane %v8700_v53, %v22121_v27  ;;  %v8723_v4 = vrot.slane %v8715_v47, %v22121_v27  ;;  %v8730_v43 = vrot.slane %v8716_v10, %v22121_v27  ;;  %v22160_v10 = vld [vmem:[#allocation37_spill] sm:$0xff] }
 0x40d   : > { %v5587_v20 = vpack.i.b16 %v5586_v22, %v5585_v5  ;;  %v5593_v2 = vpack.i.b16 %v5592_v63, %v5591_v14  ;;  %v16159_v36 = vcombine.low %v5584_v11, %v5584_v11  ;;  %v16160_v26 = vcombine.high %v5584_v11, %v5584_v11 }
 0x40e   : > { %v16223_v45 = vcombine.low %v5590_v42, %v5590_v42  ;;  %v16224_v57 = vcombine.high %v5590_v42, %v5590_v42  ;;  %v10242_v60 = vrot.slane %v10235_v35, %v22119_v0  ;;  %v16339_v8 = vcombine.high %v8641_v51, %v8648_v50 }
 0x40f   : > { %v16191_v54 = vcombine.low %v5587_v20, %v5587_v20  ;;  %v16192_v41 = vcombine.high %v5587_v20, %v5587_v20  ;;  %v16255_v37 = vcombine.low %v5593_v2, %v5593_v2  ;;  %v16256_v39 = vcombine.high %v5593_v2, %v5593_v2  ;;  %6119 = vst.msk [vmem:[%s18390_s24 + $0x20] sm:$0xf] %vm6110_vm0, %v16159_v36  ;;  %v6344_v36 = vpop.permute.xlu0 %6343 }
 0x410   : > { %6120 = vst.msk [vmem:[%s18390_s24 + $0x24] sm:$0xf] %vm6110_vm0, %v16160_v26  ;;  %6183 = vst.msk [vmem:[%s18390_s24 + $0x120] sm:$0xf] %vm6110_vm0, %v16223_v45  ;;  %v10250_v56 = vrot.slane %v16339_v8, %v22119_v0  ;;  %v10251_v3 = vcombine.low %v8657_v40, %v8664_v15  ;;  %v16340_v55 = vcombine.high %v8657_v40, %v8664_v15  ;;  %v22159_v40 = vshrl.u32 %v22158_v9, 16 }
 0x411   : > { %6184 = vst.msk [vmem:[%s18390_s24 + $0x124] sm:$0xf] %vm6110_vm0, %v16224_v57  ;;  %v10285_v59 = vcombine.low %v8707_v18, %v8714_v7  ;;  %6151 = vst.msk [vmem:[%s18390_s24 + $0xa0] sm:$0xf] %vm6110_vm0, %v16191_v54  ;;  %v16341_v13 = vcombine.high %v8707_v18, %v8714_v7  ;;  %v10301_v30 = vcombine.low %v8723_v4, %v8730_v43  ;;  %v11187_v11 = vshrl.u32 %v22160_v10, 16  ;;  %v11106_v7 = vpop.permute.xlu1 %11105 }
 0x412   : > { %6152 = vst.msk [vmem:[%s18390_s24 + $0xa4] sm:$0xf] %vm6110_vm0, %v16192_v41  ;;  %6215 = vst.msk [vmem:[%s18390_s24 + $0x1a0] sm:$0xf] %vm6110_vm0, %v16255_v37  ;;  %v16342_v49 = vcombine.high %v8723_v4, %v8730_v43  ;;  %v10258_v25 = vrot.slane %v10251_v3, %v22119_v0  ;;  %v10266_v5 = vrot.slane %v16340_v55, %v22119_v0  ;;  %v11188_v18 = vshrl.u32 %v11074_v24, 16 }
 0x413   : > { %6216 = vst.msk [vmem:[%s18390_s24 + $0x1a4] sm:$0xf] %vm6110_vm0, %v16256_v39  ;;  %v10267_v14 = vcombine.low %v10242_v60, %v10250_v56  ;;  %v10292_v33 = vrot.slane %v10285_v59, %v22119_v0  ;;  %v10300_v51 = vrot.slane %v16341_v13, %v22119_v0  ;;  %v10308_v50 = vrot.slane %v10301_v30, %v22119_v0 }
 0x414   : > { %v10316_v29 = vrot.slane %v16342_v49, %v22119_v0  ;;  %v6437_v16 = vpack.i.b16 %v6436_v61, %v22159_v40  ;;  %v10275_v52 = vcombine.low %v10258_v25, %v10266_v5  ;;  %v7151_v28 = vcombine.high %v19708_v48, %v22112_v44 }
 0x415   : > { %v10274_v38 = vrot.slane %v10267_v14, %v22121_v27  ;;  %v19751_v17 = vrot.slane %v19708_v48, %v22119_v0  ;;  %v10317_v15 = vcombine.low %v10292_v33, %v10300_v51  ;;  %v11185_v22 = vpack.i.b16 %v11074_v24, %v22160_v10 }
 0x416   : > { %v10325_v35 = vcombine.low %v10308_v50, %v10316_v29  ;;  %v7217_v62 = vcombine.high %v6437_v16, %v22112_v44  ;;  %v19755_v53 = vrot.slane %v6437_v16, %v22119_v0  ;;  %v10282_v9 = vrot.slane %v10275_v52, %v22121_v27  ;;  %v11138_v29 = vpop.permute.xlu1 %11137 }
 0x417   : > { %v19759_v47 = vrot.slane %v7151_v28, %v22119_v0  ;;  %v10324_v42 = vrot.slane %v10317_v15, %v22121_v27  ;;  %v11555_v20 = vcombine.high %v11185_v22, %v22112_v44  ;;  %v19770_v2 = vrot.slane %v11185_v22, %v22119_v0 }
 0x418   : > { %v10332_v48 = vrot.slane %v10325_v35, %v22121_v27  ;;  %v19766_v63 = vrot.slane %v7217_v62, %v22119_v0  ;;  %v10283_v4 = vcombine.low %v10274_v38, %v10282_v9  ;;  %v10284_v43 = vcombine.high %v10274_v38, %v10282_v9 }
 0x419   : > { %v11189_v57 = vpack.i.b16 %v11188_v18, %v11187_v11  ;;  %v6443_v60 = vshrl.u32 %v6312_v58, 16  ;;  %v19773_v41 = vrot.slane %v11555_v20, %v22119_v0  ;;  %v11195_v37 = vshrl.u32 %v11106_v7, 16  ;;  %v22161_v11 = vld [vmem:[#allocation38_spill] sm:$0xff] }
 0x41a   : > { %v10333_v26 = vcombine.low %v10324_v42, %v10332_v48  ;;  %v10334_v45 = vcombine.high %v10324_v42, %v10332_v48  ;;  %v10518_v8 = vshrl.u32 %v10283_v4, 16  ;;  %v10524_v54 = vshrl.u32 %v10284_v43, 16 }
 0x41b   : > { %v11621_v59 = vcombine.high %v11189_v57, %v22112_v44  ;;  %v19777_v13 = vrot.slane %v11189_v57, %v22119_v0  ;;  %v6441_v30 = vpack.i.b16 %v6344_v36, %v6312_v58  ;;  %v6444_v49 = vshrl.u32 %v6344_v36, 16  ;;  %v19782_v58 = vpop.permute.xlu0 %11071 }
 0x41c   : > { %v10517_v39 = vpack.i.b16 %v10333_v26, %v10283_v4  ;;  %v10519_v56 = vshrl.u32 %v10333_v26, 16  ;;  %v10523_v3 = vpack.i.b16 %v10334_v45, %v10284_v43  ;;  %v10525_v55 = vshrl.u32 %v10334_v45, 16 }
 0x41d   : > { %v19780_v51 = vrot.slane %v11621_v59, %v22119_v0  ;;  %v6445_v50 = vpack.i.b16 %v6444_v49, %v6443_v60  ;;  %v7166_v28 = vcombine.high %v6441_v30, %v22112_v44  ;;  %v7173_v15 = vrot.slane %v6441_v30, %v22119_v0 }
 0x41e   : > { %v10520_v61 = vpack.i.b16 %v10519_v56, %v10518_v8  ;;  %v10526_v24 = vpack.i.b16 %v10525_v55, %v10524_v54  ;;  %v16373_v25 = vcombine.low %v10517_v39, %v10517_v39  ;;  %v16374_v5 = vcombine.high %v10517_v39, %v10517_v39 }
 0x41f   : > { %v16437_v14 = vcombine.low %v10523_v3, %v10523_v3  ;;  %v16438_v33 = vcombine.high %v10523_v3, %v10523_v3  ;;  %v7232_v35 = vcombine.high %v6445_v50, %v22112_v44  ;;  %v7239_v62 = vrot.slane %v6445_v50, %v22119_v0 }
 0x420   : > { %v16405_v40 = vcombine.low %v10520_v61, %v10520_v61  ;;  %v16406_v16 = vcombine.high %v10520_v61, %v10520_v61  ;;  %v16469_v38 = vcombine.low %v10526_v24, %v10526_v24  ;;  %v16470_v52 = vcombine.high %v10526_v24, %v10526_v24  ;;  %10941 = vst.msk [vmem:[%s18823_s15 + $0x78] sm:$0xf] %vm6110_vm0, %v16373_v25 }
 0x421   : > { %10942 = vst.msk [vmem:[%s18823_s15 + $0x7c] sm:$0xf] %vm6110_vm0, %v16374_v5  ;;  %11005 = vst.msk [vmem:[%s18823_s15 + $0x178] sm:$0xf] %vm6110_vm0, %v16437_v14  ;;  %v11193_v9 = vpack.i.b16 %v11138_v29, %v11106_v7  ;;  %v11196_v10 = vshrl.u32 %v11138_v29, 16  ;;  %v11171_v22 = vshrl.u32 %v22161_v11, 16  ;;  %v19807_v42 = vpack.i.b16 %v19782_v58, %v22161_v11 }
 0x422   : > { %11006 = vst.msk [vmem:[%s18823_s15 + $0x17c] sm:$0xf] %vm6110_vm0, %v16438_v33  ;;  %10973 = vst.msk [vmem:[%s18823_s15 + $0xf8] sm:$0xf] %vm6110_vm0, %v16405_v40  ;;  %v7180_v48 = vrot.slane %v7166_v28, %v22119_v0  ;;  %v7181_v18 = vcombine.low %v19751_v17, %v7173_v15  ;;  %v7182_v4 = vcombine.high %v19751_v17, %v7173_v15 }
 0x423   : > { %10974 = vst.msk [vmem:[%s18823_s15 + $0xfc] sm:$0xf] %vm6110_vm0, %v16406_v16  ;;  %11037 = vst.msk [vmem:[%s18823_s15 + $0x1f8] sm:$0xf] %vm6110_vm0, %v16469_v38  ;;  %v7246_v43 = vrot.slane %v7232_v35, %v22119_v0  ;;  %v7247_v20 = vcombine.low %v19755_v53, %v7239_v62  ;;  %v7248_v36 = vcombine.high %v19755_v53, %v7239_v62 }
 0x424   : > { %11038 = vst.msk [vmem:[%s18823_s15 + $0x1fc] sm:$0xf] %vm6110_vm0, %v16470_v52  ;;  %v11197_v7 = vpack.i.b16 %v11196_v10, %v11195_v37  ;;  %v11570_v26 = vcombine.high %v11193_v9, %v22112_v44  ;;  %v7189_v45 = vrot.slane %v7181_v18, %v22121_v27  ;;  %v7196_v57 = vrot.slane %v7182_v4, %v22121_v27 }
 0x425   : > { %v7197_v60 = vcombine.low %v19759_v47, %v7180_v48  ;;  %v7198_v8 = vcombine.high %v19759_v47, %v7180_v48  ;;  %v7255_v54 = vrot.slane %v7247_v20, %v22121_v27  ;;  %v7262_v17 = vrot.slane %v7248_v36, %v22121_v27 }
 0x426   : > { %v7263_v39 = vcombine.low %v19766_v63, %v7246_v43  ;;  %v7264_v56 = vcombine.high %v19766_v63, %v7246_v43  ;;  %v9135_v3 = vcombine.low %v7189_v45, %v7196_v57  ;;  %v16295_v55 = vcombine.high %v7189_v45, %v7196_v57 }
 0x427   : > { %v7205_v53 = vrot.slane %v7197_v60, %v22121_v27  ;;  %v7212_v37 = vrot.slane %v7198_v8, %v22121_v27  ;;  %v9185_v49 = vcombine.low %v7255_v54, %v7262_v17  ;;  %v16297_v47 = vcombine.high %v7255_v54, %v7262_v17 }
 0x428   : > { %v7271_v59 = vrot.slane %v7263_v39, %v22121_v27  ;;  %v7278_v30 = vrot.slane %v7264_v56, %v22121_v27  ;;  %v9142_v61 = vrot.slane %v9135_v3, %v22119_v0  ;;  %v9150_v24 = vrot.slane %v16295_v55, %v22119_v0 }
 0x429   : > { %v9151_v25 = vcombine.low %v7205_v53, %v7212_v37  ;;  %v16296_v5 = vcombine.high %v7205_v53, %v7212_v37  ;;  %v9192_v63 = vrot.slane %v9185_v49, %v22119_v0  ;;  %v9200_v14 = vrot.slane %v16297_v47, %v22119_v0 }
 0x42a   : > { %v9201_v33 = vcombine.low %v7271_v59, %v7278_v30  ;;  %v16298_v50 = vcombine.high %v7271_v59, %v7278_v30  ;;  %v9167_v16 = vcombine.low %v9142_v61, %v9150_v24  ;;  %v11577_v38 = vrot.slane %v11193_v9, %v22119_v0 }
 0x42b   : > { %v9158_v29 = vrot.slane %v9151_v25, %v22119_v0  ;;  %v9166_v40 = vrot.slane %v16296_v5, %v22119_v0  ;;  %v9217_v15 = vcombine.low %v9192_v63, %v9200_v14  ;;  %v11584_v35 = vrot.slane %v11570_v26, %v22119_v0 }
 0x42c   : > { %v9208_v52 = vrot.slane %v9201_v33, %v22119_v0  ;;  %v9216_v28 = vrot.slane %v16298_v50, %v22119_v0  ;;  %v9174_v62 = vrot.slane %v9167_v16, %v22121_v27  ;;  %v11585_v48 = vcombine.low %v19770_v2, %v11577_v38 }
 0x42d   : > { %v9175_v10 = vcombine.low %v9158_v29, %v9166_v40  ;;  %v11586_v18 = vcombine.high %v19770_v2, %v11577_v38  ;;  %v9224_v4 = vrot.slane %v9217_v15, %v22121_v27  ;;  %v11601_v20 = vcombine.low %v19773_v41, %v11584_v35 }
 0x42e   : > { %v9225_v43 = vcombine.low %v9208_v52, %v9216_v28  ;;  %v11602_v9 = vcombine.high %v19773_v41, %v11584_v35  ;;  %v11593_v45 = vrot.slane %v11585_v48, %v22121_v27  ;;  %v11636_v57 = vcombine.high %v11197_v7, %v22112_v44 }
 0x42f   : > { %v9182_v36 = vrot.slane %v9175_v10, %v22121_v27  ;;  %v11600_v26 = vrot.slane %v11586_v18, %v22121_v27  ;;  %v11609_v8 = vrot.slane %v11601_v20, %v22121_v27  ;;  %v11643_v54 = vrot.slane %v11197_v7, %v22119_v0 }
 0x430   : > { %v9232_v60 = vrot.slane %v9225_v43, %v22121_v27  ;;  %v11616_v2 = vrot.slane %v11602_v9, %v22121_v27  ;;  %v11650_v41 = vrot.slane %v11636_v57, %v22119_v0 }
 0x431   : > { %v9183_v17 = vcombine.low %v9174_v62, %v9182_v36  ;;  %v9184_v39 = vcombine.high %v9174_v62, %v9182_v36  ;;  %v13635_v56 = vcombine.low %v11593_v45, %v11600_v26  ;;  %v11651_v3 = vcombine.low %v19777_v13, %v11643_v54 }
 0x432   : > { %v9233_v53 = vcombine.low %v9224_v4, %v9232_v60  ;;  %v9234_v37 = vcombine.high %v9224_v4, %v9232_v60  ;;  %v11652_v55 = vcombine.high %v19777_v13, %v11643_v54  ;;  %v11667_v49 = vcombine.low %v19780_v51, %v11650_v41 }
 0x433   : > { %v10386_v59 = vshrl.u32 %v9183_v17, 16  ;;  %v10392_v30 = vshrl.u32 %v9184_v39, 16  ;;  %v11668_v47 = vcombine.high %v19780_v51, %v11650_v41  ;;  %v11659_v5 = vrot.slane %v11651_v3, %v22121_v27 }
 0x434   : > { %v10385_v61 = vpack.i.b16 %v9233_v53, %v9183_v17  ;;  %v10387_v24 = vshrl.u32 %v9233_v53, 16  ;;  %v10391_v7 = vpack.i.b16 %v9234_v37, %v9184_v39  ;;  %v10393_v25 = vshrl.u32 %v9234_v37, 16 }
 0x435   : > { %v11666_v63 = vrot.slane %v11652_v55, %v22121_v27  ;;  %v11675_v14 = vrot.slane %v11667_v49, %v22121_v27  ;;  %v11682_v13 = vrot.slane %v11668_v47, %v22121_v27  ;;  %v13642_v38 = vrot.slane %v13635_v56, %v22119_v0  ;;  %v22162_v49 = vld [vmem:[#allocation39_spill] sm:$0xff] }
 0x436   : > { %v10388_v33 = vpack.i.b16 %v10387_v24, %v10386_v59  ;;  %v10394_v50 = vpack.i.b16 %v10393_v25, %v10392_v30  ;;  %v16351_v29 = vcombine.low %v10385_v61, %v10385_v61  ;;  %v16352_v51 = vcombine.high %v10385_v61, %v10385_v61 }
 0x437   : > { %v16415_v40 = vcombine.low %v10391_v7, %v10391_v7  ;;  %v16416_v16 = vcombine.high %v10391_v7, %v10391_v7  ;;  %v16475_v52 = vcombine.high %v11593_v45, %v11600_v26  ;;  %v13651_v48 = vcombine.low %v11609_v8, %v11616_v2  ;;  %v11078_v45 = vpop.permute.xlu1 %11077 }
 0x438   : > { %v16383_v28 = vcombine.low %v10388_v33, %v10388_v33  ;;  %v16384_v15 = vcombine.high %v10388_v33, %v10388_v33  ;;  %v16447_v35 = vcombine.low %v10394_v50, %v10394_v50  ;;  %v16448_v62 = vcombine.high %v10394_v50, %v10394_v50  ;;  %10919 = vst.msk [vmem:[%s18823_s15 + $0x20] sm:$0xf] %vm6110_vm0, %v16351_v29 }
 0x439   : > { %10920 = vst.msk [vmem:[%s18823_s15 + $0x24] sm:$0xf] %vm6110_vm0, %v16352_v51  ;;  %10983 = vst.msk [vmem:[%s18823_s15 + $0x120] sm:$0xf] %vm6110_vm0, %v16415_v40  ;;  %v13650_v10 = vrot.slane %v16475_v52, %v22119_v0  ;;  %v16476_v18 = vcombine.high %v11609_v8, %v11616_v2  ;;  %v13685_v4 = vcombine.low %v11659_v5, %v11666_v63  ;;  %v11172_v36 = vshrl.u32 %v19782_v58, 16  ;;  %v11104_v2 = vpop.permute.xlu0 %11103 }
 0x43a   : > { %10984 = vst.msk [vmem:[%s18823_s15 + $0x124] sm:$0xf] %vm6110_vm0, %v16416_v16  ;;  %10951 = vst.msk [vmem:[%s18823_s15 + $0xa0] sm:$0xf] %vm6110_vm0, %v16383_v28  ;;  %v16477_v43 = vcombine.high %v11659_v5, %v11666_v63  ;;  %v13701_v20 = vcombine.low %v11675_v14, %v11682_v13  ;;  %v16478_v9 = vcombine.high %v11675_v14, %v11682_v13  ;;  %v11219_v47 = vshrl.u32 %v22162_v49, 16 }
 0x43b   : > { %10952 = vst.msk [vmem:[%s18823_s15 + $0xa4] sm:$0xf] %vm6110_vm0, %v16384_v15  ;;  %11015 = vst.msk [vmem:[%s18823_s15 + $0x1a0] sm:$0xf] %vm6110_vm0, %v16447_v35  ;;  %v13658_v26 = vrot.slane %v13651_v48, %v22119_v0  ;;  %v13666_v57 = vrot.slane %v16476_v18, %v22119_v0  ;;  %v13667_v60 = vcombine.low %v13642_v38, %v13650_v10  ;;  %v11220_v25 = vshrl.u32 %v11078_v45, 16  ;;  %v11110_v5 = vpop.permute.xlu1 %11109 }
 0x43c   : > { %11016 = vst.msk [vmem:[%s18823_s15 + $0x1a4] sm:$0xf] %vm6110_vm0, %v16448_v62  ;;  %v13692_v8 = vrot.slane %v13685_v4, %v22119_v0  ;;  %v13700_v54 = vrot.slane %v16477_v43, %v22119_v0  ;;  %v13708_v17 = vrot.slane %v13701_v20, %v22119_v0  ;;  %v13716_v39 = vrot.slane %v16478_v9, %v22119_v0 }
 0x43d   : > { %v11173_v41 = vpack.i.b16 %v11172_v36, %v11171_v22  ;;  %v13674_v58 = vrot.slane %v13667_v60, %v22121_v27  ;;  %v13675_v56 = vcombine.low %v13658_v26, %v13666_v57  ;;  %v11423_v53 = vcombine.high %v19807_v42, %v22112_v44  ;;  %v11136_v50 = vpop.permute.xlu0 %11135 }
 0x43e   : > { %v19893_v37 = vrot.slane %v19807_v42, %v22119_v0  ;;  %v13717_v3 = vcombine.low %v13692_v8, %v13700_v54  ;;  %v13725_v55 = vcombine.low %v13708_v17, %v13716_v39  ;;  %v11217_v61 = vpack.i.b16 %v11078_v45, %v22162_v49 }
 0x43f   : > { %v11489_v59 = vcombine.high %v11173_v41, %v22112_v44  ;;  %v19897_v30 = vrot.slane %v11173_v41, %v22119_v0  ;;  %v13682_v11 = vrot.slane %v13675_v56, %v22121_v27  ;;  %v19901_v22 = vrot.slane %v11423_v53, %v22119_v0  ;;  %v11142_v17 = vpop.permute.xlu1 %11141 }
 0x440   : > { %v13724_v24 = vrot.slane %v13717_v3, %v22121_v27  ;;  %v13732_v42 = vrot.slane %v13725_v55, %v22121_v27  ;;  %v11819_v13 = vcombine.high %v11217_v61, %v22112_v44  ;;  %v19912_v33 = vrot.slane %v11217_v61, %v22119_v0 }
 0x441   : > { %v19908_v7 = vrot.slane %v11489_v59, %v22119_v0  ;;  %v13683_v63 = vcombine.low %v13674_v58, %v13682_v11  ;;  %v13684_v14 = vcombine.high %v13674_v58, %v13682_v11  ;;  %v11221_v40 = vpack.i.b16 %v11220_v25, %v11219_v47  ;;  %v22163_v47 = vld [vmem:[#allocation40_spill] sm:$0xff] }
 0x442   : > { %v13733_v29 = vcombine.low %v13724_v24, %v13732_v42  ;;  %v13734_v51 = vcombine.high %v13724_v24, %v13732_v42  ;;  %v11179_v16 = vshrl.u32 %v11104_v2, 16  ;;  %v19915_v28 = vrot.slane %v11819_v13, %v22119_v0 }
 0x443   : > { %v15150_v38 = vshrl.u32 %v13683_v63, 16  ;;  %v15156_v52 = vshrl.u32 %v13684_v14, 16  ;;  %v11227_v15 = vshrl.u32 %v11110_v5, 16  ;;  %v11885_v18 = vcombine.high %v11221_v40, %v22112_v44 }
 0x444   : > { %v15149_v35 = vpack.i.b16 %v13733_v29, %v13683_v63  ;;  %v15151_v62 = vshrl.u32 %v13733_v29, 16  ;;  %v15155_v10 = vpack.i.b16 %v13734_v51, %v13684_v14  ;;  %v15157_v48 = vshrl.u32 %v13734_v51, 16 }
 0x445   : > { %v19925_v4 = vrot.slane %v11221_v40, %v22119_v0  ;;  %v11177_v43 = vpack.i.b16 %v11136_v50, %v11104_v2  ;;  %v11180_v20 = vshrl.u32 %v11136_v50, 16  ;;  %v19928_v8 = vrot.slane %v11885_v18, %v22119_v0  ;;  %v19930_v2 = vpop.permute.xlu0 %11075 }
 0x446   : > { %v15152_v9 = vpack.i.b16 %v15151_v62, %v15150_v38  ;;  %v15158_v36 = vpack.i.b16 %v15157_v48, %v15156_v52  ;;  %v16537_v45 = vcombine.low %v15149_v35, %v15149_v35  ;;  %v16538_v26 = vcombine.high %v15149_v35, %v15149_v35 }
 0x447   : > { %v16601_v57 = vcombine.low %v15155_v10, %v15155_v10  ;;  %v16602_v60 = vcombine.high %v15155_v10, %v15155_v10  ;;  %v11181_v54 = vpack.i.b16 %v11180_v20, %v11179_v16  ;;  %v11438_v53 = vcombine.high %v11177_v43, %v22112_v44 }
 0x448   : > { %v16569_v39 = vcombine.low %v15152_v9, %v15152_v9  ;;  %v16570_v41 = vcombine.high %v15152_v9, %v15152_v9  ;;  %v16633_v58 = vcombine.low %v15158_v36, %v15158_v36  ;;  %v16634_v56 = vcombine.high %v15158_v36, %v15158_v36  ;;  %15713 = vst.msk [vmem:[%s19921_s9 + $0x8] sm:$0xf] %vm6110_vm0, %v16537_v45 }
 0x449   : > { %15714 = vst.msk [vmem:[%s19921_s9 + $0xc] sm:$0xf] %vm6110_vm0, %v16538_v26  ;;  %15777 = vst.msk [vmem:[%s19921_s9 + $0x108] sm:$0xf] %vm6110_vm0, %v16601_v57  ;;  %v11445_v3 = vrot.slane %v11177_v43, %v22119_v0  ;;  %v11504_v55 = vcombine.high %v11181_v54, %v22112_v44  ;;  %v11511_v59 = vrot.slane %v11181_v54, %v22119_v0  ;;  %v11228_v49 = vshrl.u32 %v11142_v17, 16 }
 0x44a   : > { %15778 = vst.msk [vmem:[%s19921_s9 + $0x10c] sm:$0xf] %vm6110_vm0, %v16602_v60  ;;  %15745 = vst.msk [vmem:[%s19921_s9 + $0x88] sm:$0xf] %vm6110_vm0, %v16569_v39  ;;  %v11225_v11 = vpack.i.b16 %v11142_v17, %v11110_v5  ;;  %v11203_v61 = vshrl.u32 %v22163_v47, 16  ;;  %v19955_v24 = vpack.i.b16 %v19930_v2, %v22163_v47  ;;  %v11452_v42 = vrot.slane %v11438_v53, %v22119_v0 }
 0x44b   : > { %15746 = vst.msk [vmem:[%s19921_s9 + $0x8c] sm:$0xf] %vm6110_vm0, %v16570_v41  ;;  %15809 = vst.msk [vmem:[%s19921_s9 + $0x188] sm:$0xf] %vm6110_vm0, %v16633_v58  ;;  %v11453_v25 = vcombine.low %v19893_v37, %v11445_v3  ;;  %v11454_v63 = vcombine.high %v19893_v37, %v11445_v3  ;;  %v11518_v14 = vrot.slane %v11504_v55, %v22119_v0 }
 0x44c   : > { %15810 = vst.msk [vmem:[%s19921_s9 + $0x18c] sm:$0xf] %vm6110_vm0, %v16634_v56  ;;  %v11519_v13 = vcombine.low %v19897_v30, %v11511_v59  ;;  %v11520_v50 = vcombine.high %v19897_v30, %v11511_v59  ;;  %v11229_v5 = vpack.i.b16 %v11228_v49, %v11227_v15  ;;  %v11834_v29 = vcombine.high %v11225_v11, %v22112_v44 }
 0x44d   : > { %v11461_v51 = vrot.slane %v11453_v25, %v22121_v27  ;;  %v11468_v40 = vrot.slane %v11454_v63, %v22121_v27  ;;  %v11469_v16 = vcombine.low %v19901_v22, %v11452_v42  ;;  %v11470_v38 = vcombine.high %v19901_v22, %v11452_v42 }
 0x44e   : > { %v11527_v52 = vrot.slane %v11519_v13, %v22121_v27  ;;  %v11534_v37 = vrot.slane %v11520_v50, %v22121_v27  ;;  %v11535_v35 = vcombine.low %v19908_v7, %v11518_v14  ;;  %v11536_v62 = vcombine.high %v19908_v7, %v11518_v14 }
 0x44f   : > { %v11477_v30 = vrot.slane %v11469_v16, %v22121_v27  ;;  %v11484_v15 = vrot.slane %v11470_v38, %v22121_v27  ;;  %v13535_v10 = vcombine.low %v11461_v51, %v11468_v40  ;;  %v16471_v48 = vcombine.high %v11461_v51, %v11468_v40 }
 0x450   : > { %v11543_v18 = vrot.slane %v11535_v35, %v22121_v27  ;;  %v11550_v43 = vrot.slane %v11536_v62, %v22121_v27  ;;  %v13585_v20 = vcombine.low %v11527_v52, %v11534_v37  ;;  %v16473_v22 = vcombine.high %v11527_v52, %v11534_v37 }
 0x451   : > { %v13542_v9 = vrot.slane %v13535_v10, %v22119_v0  ;;  %v13550_v36 = vrot.slane %v16471_v48, %v22119_v0  ;;  %v13551_v45 = vcombine.low %v11477_v30, %v11484_v15  ;;  %v16472_v26 = vcombine.high %v11477_v30, %v11484_v15 }
 0x452   : > { %v13592_v7 = vrot.slane %v13585_v20, %v22119_v0  ;;  %v13600_v57 = vrot.slane %v16473_v22, %v22119_v0  ;;  %v13601_v60 = vcombine.low %v11543_v18, %v11550_v43  ;;  %v16474_v54 = vcombine.high %v11543_v18, %v11550_v43 }
 0x453   : > { %v13558_v17 = vrot.slane %v13551_v45, %v22119_v0  ;;  %v13566_v39 = vrot.slane %v16472_v26, %v22119_v0  ;;  %v13567_v41 = vcombine.low %v13542_v9, %v13550_v36  ;;  %v11841_v58 = vrot.slane %v11225_v11, %v22119_v0 }
 0x454   : > { %v13608_v56 = vrot.slane %v13601_v60, %v22119_v0  ;;  %v13616_v53 = vrot.slane %v16474_v54, %v22119_v0  ;;  %v13617_v3 = vcombine.low %v13592_v7, %v13600_v57  ;;  %v11848_v55 = vrot.slane %v11834_v29, %v22119_v0 }
 0x455   : > { %v13574_v59 = vrot.slane %v13567_v41, %v22121_v27  ;;  %v13575_v49 = vcombine.low %v13558_v17, %v13566_v39  ;;  %v11849_v42 = vcombine.low %v19912_v33, %v11841_v58  ;;  %v11850_v25 = vcombine.high %v19912_v33, %v11841_v58 }
 0x456   : > { %v13624_v63 = vrot.slane %v13617_v3, %v22121_v27  ;;  %v13625_v14 = vcombine.low %v13608_v56, %v13616_v53  ;;  %v11865_v13 = vcombine.low %v19915_v28, %v11848_v55  ;;  %v11866_v11 = vcombine.high %v19915_v28, %v11848_v55 }
 0x457   : > { %v13582_v50 = vrot.slane %v13575_v49, %v22121_v27  ;;  %v11857_v51 = vrot.slane %v11849_v42, %v22121_v27  ;;  %v11864_v29 = vrot.slane %v11850_v25, %v22121_v27  ;;  %v11900_v40 = vcombine.high %v11229_v5, %v22112_v44 }
 0x458   : > { %v13632_v16 = vrot.slane %v13625_v14, %v22121_v27  ;;  %v11873_v38 = vrot.slane %v11865_v13, %v22121_v27  ;;  %v11880_v33 = vrot.slane %v11866_v11, %v22121_v27  ;;  %v11907_v52 = vrot.slane %v11229_v5, %v22119_v0 }
 0x459   : > { %v13583_v37 = vcombine.low %v13574_v59, %v13582_v50  ;;  %v13584_v35 = vcombine.high %v13574_v59, %v13582_v50  ;;  %v11914_v28 = vrot.slane %v11900_v40, %v22119_v0  ;;  %v13835_v62 = vcombine.low %v11857_v51, %v11864_v29 }
 0x45a   : > { %v13633_v30 = vcombine.low %v13624_v63, %v13632_v16  ;;  %v13634_v15 = vcombine.high %v13624_v63, %v13632_v16  ;;  %v11915_v10 = vcombine.low %v19925_v4, %v11907_v52  ;;  %v11916_v48 = vcombine.high %v19925_v4, %v11907_v52 }
 0x45b   : > { %v15138_v18 = vshrl.u32 %v13583_v37, 16  ;;  %v15144_v43 = vshrl.u32 %v13584_v35, 16  ;;  %v11931_v20 = vcombine.low %v19928_v8, %v11914_v28  ;;  %v11932_v22 = vcombine.high %v19928_v8, %v11914_v28 }
 0x45c   : > { %v15137_v9 = vpack.i.b16 %v13633_v30, %v13583_v37  ;;  %v15139_v36 = vshrl.u32 %v13633_v30, 16  ;;  %v15143_v5 = vpack.i.b16 %v13634_v15, %v13584_v35  ;;  %v15145_v45 = vshrl.u32 %v13634_v15, 16 }
 0x45d   : > { %v11923_v26 = vrot.slane %v11915_v10, %v22121_v27  ;;  %v11930_v7 = vrot.slane %v11916_v48, %v22121_v27  ;;  %v11939_v57 = vrot.slane %v11931_v20, %v22121_v27  ;;  %v11946_v4 = vrot.slane %v11932_v22, %v22121_v27 }
 0x45e   : > { %v15140_v60 = vpack.i.b16 %v15139_v36, %v15138_v18  ;;  %v15146_v54 = vpack.i.b16 %v15145_v45, %v15144_v43  ;;  %v16535_v17 = vcombine.low %v15137_v9, %v15137_v9  ;;  %v16536_v8 = vcombine.high %v15137_v9, %v15137_v9 }
 0x45f   : > { %v16599_v39 = vcombine.low %v15143_v5, %v15143_v5  ;;  %v16600_v41 = vcombine.high %v15143_v5, %v15143_v5  ;;  %v13842_v58 = vrot.slane %v13835_v62, %v22119_v0  ;;  %v16483_v56 = vcombine.high %v11857_v51, %v11864_v29  ;;  %v1475_v51 = vpop.permute.xlu1 %1474 }
 0x460   : > { %v16567_v53 = vcombine.low %v15140_v60, %v15140_v60  ;;  %v16568_v3 = vcombine.high %v15140_v60, %v15140_v60  ;;  %v16631_v55 = vcombine.low %v15146_v54, %v15146_v54  ;;  %v16632_v59 = vcombine.high %v15146_v54, %v15146_v54  ;;  %15711 = vst.msk [vmem:[%s19921_s9] sm:$0xf] %vm6110_vm0, %v16535_v17 }
 0x461   : > { %15712 = vst.msk [vmem:[%s19921_s9 + $0x4] sm:$0xf] %vm6110_vm0, %v16536_v8  ;;  %15775 = vst.msk [vmem:[%s19921_s9 + $0x100] sm:$0xf] %vm6110_vm0, %v16599_v39  ;;  %v13850_v49 = vrot.slane %v16483_v56, %v22119_v0  ;;  %v13851_v42 = vcombine.low %v11873_v38, %v11880_v33  ;;  %v16484_v25 = vcombine.high %v11873_v38, %v11880_v33  ;;  %v11204_v50 = vshrl.u32 %v19930_v2, 16  ;;  %v11108_v33 = vpop.permute.xlu0 %11107 }
 0x462   : > { %15776 = vst.msk [vmem:[%s19921_s9 + $0x104] sm:$0xf] %vm6110_vm0, %v16600_v41  ;;  %v13885_v63 = vcombine.low %v11923_v26, %v11930_v7  ;;  %15743 = vst.msk [vmem:[%s19921_s9 + $0x80] sm:$0xf] %vm6110_vm0, %v16567_v53  ;;  %v16485_v14 = vcombine.high %v11923_v26, %v11930_v7  ;;  %v13901_v13 = vcombine.low %v11939_v57, %v11946_v4  ;;  %v1650_v22 = vshrl.u32 %v18049_v6, 16 }
 0x463   : > { %15744 = vst.msk [vmem:[%s19921_s9 + $0x84] sm:$0xf] %vm6110_vm0, %v16568_v3  ;;  %15807 = vst.msk [vmem:[%s19921_s9 + $0x180] sm:$0xf] %vm6110_vm0, %v16631_v55  ;;  %v16486_v11 = vcombine.high %v11939_v57, %v11946_v4  ;;  %v13858_v29 = vrot.slane %v13851_v42, %v22119_v0  ;;  %v13866_v40 = vrot.slane %v16484_v25, %v22119_v0  ;;  %v1651_v5 = vshrl.u32 %v1475_v51, 16  ;;  %v1507_v45 = vpop.permute.xlu1 %1506 }
 0x464   : > { %15808 = vst.msk [vmem:[%s19921_s9 + $0x184] sm:$0xf] %vm6110_vm0, %v16632_v59  ;;  %v13867_v16 = vcombine.low %v13842_v58, %v13850_v49  ;;  %v13892_v38 = vrot.slane %v13885_v63, %v22119_v0  ;;  %v13900_v52 = vrot.slane %v16485_v14, %v22119_v0  ;;  %v13908_v37 = vrot.slane %v13901_v13, %v22119_v0 }
 0x465   : > { %v13916_v35 = vrot.slane %v16486_v11, %v22119_v0  ;;  %v11205_v28 = vpack.i.b16 %v11204_v50, %v11203_v61  ;;  %v13875_v62 = vcombine.low %v13858_v29, %v13866_v40  ;;  %v11687_v30 = vcombine.high %v19955_v24, %v22112_v44  ;;  %v11140_v60 = vpop.permute.xlu0 %11139 }
 0x466   : > { %v13874_v2 = vrot.slane %v13867_v16, %v22121_v27  ;;  %v20041_v15 = vrot.slane %v19955_v24, %v22119_v0  ;;  %v13917_v10 = vcombine.low %v13892_v38, %v13900_v52  ;;  %v1648_v20 = vpack.i.b16 %v1475_v51, %v18049_v6 }
 0x467   : > { %v13925_v48 = vcombine.low %v13908_v37, %v13916_v35  ;;  %v11753_v18 = vcombine.high %v11205_v28, %v22112_v44  ;;  %v20045_v43 = vrot.slane %v11205_v28, %v22119_v0  ;;  %v13882_v47 = vrot.slane %v13875_v62, %v22121_v27  ;;  %v1539_v38 = vpop.permute.xlu1 %1538 }
 0x468   : > { %v20049_v61 = vrot.slane %v11687_v30, %v22119_v0  ;;  %v13924_v9 = vrot.slane %v13917_v10, %v22121_v27  ;;  %v2482_v57 = vcombine.high %v1648_v20, %v22112_v44  ;;  %v20060_v4 = vrot.slane %v1648_v20, %v22119_v0 }
 0x469   : > { %v13932_v24 = vrot.slane %v13925_v48, %v22121_v27  ;;  %v20056_v36 = vrot.slane %v11753_v18, %v22119_v0  ;;  %v13883_v26 = vcombine.low %v13874_v2, %v13882_v47  ;;  %v13884_v7 = vcombine.high %v13874_v2, %v13882_v47 }
 0x46a   : > { %v1652_v6 = vpack.i.b16 %v1651_v5, %v1650_v22  ;;  %v11211_v8 = vshrl.u32 %v11108_v33, 16  ;;  %v20063_v58 = vrot.slane %v2482_v57, %v22119_v0  ;;  %v1658_v56 = vshrl.u32 %v1507_v45, 16 }
 0x46b   : > { %v13933_v54 = vcombine.low %v13924_v9, %v13932_v24  ;;  %v13934_v17 = vcombine.high %v13924_v9, %v13932_v24  ;;  %v15174_v39 = vshrl.u32 %v13883_v26, 16  ;;  %v15180_v41 = vshrl.u32 %v13884_v7, 16 }
 0x46c   : > { %v2548_v49 = vcombine.high %v1652_v6, %v22112_v44  ;;  %v20067_v42 = vrot.slane %v1652_v6, %v22119_v0  ;;  %v11209_v25 = vpack.i.b16 %v11140_v60, %v11108_v33  ;;  %v11212_v63 = vshrl.u32 %v11140_v60, 16  ;;  %v20072_v33 = vpop.permute.xlu0 %1476 }
 0x46d   : > { %v15173_v53 = vpack.i.b16 %v13933_v54, %v13883_v26  ;;  %v15175_v3 = vshrl.u32 %v13933_v54, 16  ;;  %v15179_v55 = vpack.i.b16 %v13934_v17, %v13884_v7  ;;  %v15181_v59 = vshrl.u32 %v13934_v17, 16 }
 0x46e   : > { %v20070_v40 = vrot.slane %v2548_v49, %v22119_v0  ;;  %v11213_v16 = vpack.i.b16 %v11212_v63, %v11211_v8  ;;  %v11702_v2 = vcombine.high %v11209_v25, %v22112_v44  ;;  %v11709_v62 = vrot.slane %v11209_v25, %v22119_v0 }
 0x46f   : > { %v15176_v14 = vpack.i.b16 %v15175_v3, %v15174_v39  ;;  %v15182_v13 = vpack.i.b16 %v15181_v59, %v15180_v41  ;;  %v16541_v11 = vcombine.low %v15173_v53, %v15173_v53  ;;  %v16542_v50 = vcombine.high %v15173_v53, %v15173_v53 }
 0x470   : > { %v16605_v51 = vcombine.low %v15179_v55, %v15179_v55  ;;  %v16606_v29 = vcombine.high %v15179_v55, %v15179_v55  ;;  %v11768_v30 = vcombine.high %v11213_v16, %v22112_v44  ;;  %v11775_v10 = vrot.slane %v11213_v16, %v22119_v0 }
 0x471   : > { %v16573_v52 = vcombine.low %v15176_v14, %v15176_v14  ;;  %v16574_v37 = vcombine.high %v15176_v14, %v15176_v14  ;;  %v16637_v35 = vcombine.low %v15182_v13, %v15182_v13  ;;  %v16638_v28 = vcombine.high %v15182_v13, %v15182_v13  ;;  %15717 = vst.msk [vmem:[%s19921_s9 + $0x18] sm:$0xf] %vm6110_vm0, %v16541_v11 }
 0x472   : > { %15718 = vst.msk [vmem:[%s19921_s9 + $0x1c] sm:$0xf] %vm6110_vm0, %v16542_v50  ;;  %15781 = vst.msk [vmem:[%s19921_s9 + $0x118] sm:$0xf] %vm6110_vm0, %v16605_v51  ;;  %v1656_v48 = vpack.i.b16 %v1539_v38, %v1507_v45  ;;  %v1659_v18 = vshrl.u32 %v1539_v38, 16  ;;  %v1666_v47 = vshrl.u32 %v18083_v31, 16  ;;  %v20097_v20 = vpack.i.b16 %v20072_v33, %v18083_v31 }
 0x473   : > { %15782 = vst.msk [vmem:[%s19921_s9 + $0x11c] sm:$0xf] %vm6110_vm0, %v16606_v29  ;;  %15749 = vst.msk [vmem:[%s19921_s9 + $0x98] sm:$0xf] %vm6110_vm0, %v16573_v52  ;;  %v11716_v22 = vrot.slane %v11702_v2, %v22119_v0  ;;  %v11717_v9 = vcombine.low %v20041_v15, %v11709_v62  ;;  %v11718_v24 = vcombine.high %v20041_v15, %v11709_v62 }
 0x474   : > { %15750 = vst.msk [vmem:[%s19921_s9 + $0x9c] sm:$0xf] %vm6110_vm0, %v16574_v37  ;;  %15813 = vst.msk [vmem:[%s19921_s9 + $0x198] sm:$0xf] %vm6110_vm0, %v16637_v35  ;;  %v11782_v5 = vrot.slane %v11768_v30, %v22119_v0  ;;  %v11783_v26 = vcombine.low %v20045_v43, %v11775_v10  ;;  %v11784_v7 = vcombine.high %v20045_v43, %v11775_v10 }
 0x475   : > { %15814 = vst.msk [vmem:[%s19921_s9 + $0x19c] sm:$0xf] %vm6110_vm0, %v16638_v28  ;;  %v1660_v45 = vpack.i.b16 %v1659_v18, %v1658_v56  ;;  %v2497_v57 = vcombine.high %v1656_v48, %v22112_v44  ;;  %v11725_v60 = vrot.slane %v11717_v9, %v22121_v27  ;;  %v11732_v54 = vrot.slane %v11718_v24, %v22121_v27 }
 0x476   : > { %v11733_v17 = vcombine.low %v20049_v61, %v11716_v22  ;;  %v11734_v6 = vcombine.high %v20049_v61, %v11716_v22  ;;  %v11791_v8 = vrot.slane %v11783_v26, %v22121_v27  ;;  %v11798_v15 = vrot.slane %v11784_v7, %v22121_v27 }
 0x477   : > { %v11799_v39 = vcombine.low %v20056_v36, %v11782_v5  ;;  %v11800_v41 = vcombine.high %v20056_v36, %v11782_v5  ;;  %v13735_v53 = vcombine.low %v11725_v60, %v11732_v54  ;;  %v16479_v3 = vcombine.high %v11725_v60, %v11732_v54 }
 0x478   : > { %v11741_v43 = vrot.slane %v11733_v17, %v22121_v27  ;;  %v11748_v56 = vrot.slane %v11734_v6, %v22121_v27  ;;  %v13785_v49 = vcombine.low %v11791_v8, %v11798_v15  ;;  %v16481_v61 = vcombine.high %v11791_v8, %v11798_v15 }
 0x479   : > { %v11807_v55 = vrot.slane %v11799_v39, %v22121_v27  ;;  %v11814_v59 = vrot.slane %v11800_v41, %v22121_v27  ;;  %v13742_v25 = vrot.slane %v13735_v53, %v22119_v0  ;;  %v13750_v63 = vrot.slane %v16479_v3, %v22119_v0 }
 0x47a   : > { %v13751_v14 = vcombine.low %v11741_v43, %v11748_v56  ;;  %v16480_v13 = vcombine.high %v11741_v43, %v11748_v56  ;;  %v13792_v36 = vrot.slane %v13785_v49, %v22119_v0  ;;  %v13800_v11 = vrot.slane %v16481_v61, %v22119_v0 }
 0x47b   : > { %v13801_v50 = vcombine.low %v11807_v55, %v11814_v59  ;;  %v16482_v51 = vcombine.high %v11807_v55, %v11814_v59  ;;  %v13767_v38 = vcombine.low %v13742_v25, %v13750_v63  ;;  %v2504_v52 = vrot.slane %v1656_v48, %v22119_v0 }
 0x47c   : > { %v13758_v29 = vrot.slane %v13751_v14, %v22119_v0  ;;  %v13766_v16 = vrot.slane %v16480_v13, %v22119_v0  ;;  %v13817_v28 = vcombine.low %v13792_v36, %v13800_v11  ;;  %v2511_v2 = vrot.slane %v2497_v57, %v22119_v0 }
 0x47d   : > { %v13808_v37 = vrot.slane %v13801_v50, %v22119_v0  ;;  %v13816_v35 = vrot.slane %v16482_v51, %v22119_v0  ;;  %v13774_v62 = vrot.slane %v13767_v38, %v22121_v27  ;;  %v2512_v10 = vcombine.low %v20060_v4, %v2504_v52 }
 0x47e   : > { %v13775_v30 = vcombine.low %v13758_v29, %v13766_v16  ;;  %v2513_v18 = vcombine.high %v20060_v4, %v2504_v52  ;;  %v13824_v22 = vrot.slane %v13817_v28, %v22121_v27  ;;  %v2528_v24 = vcombine.low %v20063_v58, %v2511_v2 }
 0x47f   : > { %v13825_v9 = vcombine.low %v13808_v37, %v13816_v35  ;;  %v2529_v48 = vcombine.high %v20063_v58, %v2511_v2  ;;  %v2520_v26 = vrot.slane %v2512_v10, %v22121_v27  ;;  %v2563_v57 = vcombine.high %v1660_v45, %v22112_v44 }
 0x480   : > { %v13782_v5 = vrot.slane %v13775_v30, %v22121_v27  ;;  %v2527_v7 = vrot.slane %v2513_v18, %v22121_v27  ;;  %v2536_v54 = vrot.slane %v2528_v24, %v22121_v27  ;;  %v2570_v17 = vrot.slane %v1660_v45, %v22119_v0 }
 0x481   : > { %v13832_v60 = vrot.slane %v13825_v9, %v22121_v27  ;;  %v2543_v4 = vrot.slane %v2529_v48, %v22121_v27  ;;  %v2577_v58 = vrot.slane %v2563_v57, %v22119_v0  ;;  %v1667_v24 = vshrl.u32 %v20072_v33, 16  ;;  %v6282_v48 = vpop.permute.xlu1 %6281 }
 0x482   : > { %v13783_v6 = vcombine.low %v13774_v62, %v13782_v5  ;;  %v13784_v8 = vcombine.high %v13774_v62, %v13782_v5  ;;  %v4434_v15 = vcombine.low %v2520_v26, %v2527_v7  ;;  %v2578_v43 = vcombine.low %v20067_v42, %v2570_v17 }
 0x483   : > { %v13833_v39 = vcombine.low %v13824_v22, %v13832_v60  ;;  %v13834_v41 = vcombine.high %v13824_v22, %v13832_v60  ;;  %v2579_v56 = vcombine.high %v20067_v42, %v2570_v17  ;;  %v2594_v55 = vcombine.low %v20070_v40, %v2577_v58  ;;  %v1509_v60 = vpop.permute.xlu0 %1508 }
 0x484   : > { %v15162_v53 = vshrl.u32 %v13783_v6, 16  ;;  %v15168_v3 = vshrl.u32 %v13784_v8, 16  ;;  %v2595_v59 = vcombine.high %v20070_v40, %v2577_v58  ;;  %v2586_v63 = vrot.slane %v2578_v43, %v22121_v27 }
 0x485   : > { %v15161_v49 = vpack.i.b16 %v13833_v39, %v13783_v6  ;;  %v15163_v61 = vshrl.u32 %v13833_v39, 16  ;;  %v15167_v45 = vpack.i.b16 %v13834_v41, %v13784_v8  ;;  %v15169_v25 = vshrl.u32 %v13834_v41, 16 }
 0x486   : > { %v2593_v14 = vrot.slane %v2579_v56, %v22121_v27  ;;  %v2602_v13 = vrot.slane %v2594_v55, %v22121_v27  ;;  %v2609_v42 = vrot.slane %v2595_v59, %v22121_v27  ;;  %v4441_v16 = vrot.slane %v4434_v15, %v22119_v0 }
 0x487   : > { %v15164_v36 = vpack.i.b16 %v15163_v61, %v15162_v53  ;;  %v15170_v11 = vpack.i.b16 %v15169_v25, %v15168_v3  ;;  %v16539_v50 = vcombine.low %v15161_v49, %v15161_v49  ;;  %v16540_v40 = vcombine.high %v15161_v49, %v15161_v49  ;;  %v6314_v61 = vpop.permute.xlu1 %6313 }
 0x488   : > { %v16603_v51 = vcombine.low %v15167_v45, %v15167_v45  ;;  %v16604_v29 = vcombine.high %v15167_v45, %v15167_v45  ;;  %v16107_v38 = vcombine.high %v2520_v26, %v2527_v7  ;;  %v4450_v62 = vcombine.low %v2536_v54, %v2543_v4 }
 0x489   : > { %v16571_v52 = vcombine.low %v15164_v36, %v15164_v36  ;;  %v16572_v37 = vcombine.high %v15164_v36, %v15164_v36  ;;  %v16635_v35 = vcombine.low %v15170_v11, %v15170_v11  ;;  %v16636_v28 = vcombine.high %v15170_v11, %v15170_v11  ;;  %15715 = vst.msk [vmem:[%s19921_s9 + $0x10] sm:$0xf] %vm6110_vm0, %v16539_v50 }
 0x48a   : > { %15716 = vst.msk [vmem:[%s19921_s9 + $0x14] sm:$0xf] %vm6110_vm0, %v16540_v40  ;;  %15779 = vst.msk [vmem:[%s19921_s9 + $0x110] sm:$0xf] %vm6110_vm0, %v16603_v51  ;;  %v4449_v2 = vrot.slane %v16107_v38, %v22119_v0  ;;  %v16108_v30 = vcombine.high %v2536_v54, %v2543_v4  ;;  %v4484_v10 = vcombine.low %v2586_v63, %v2593_v14  ;;  %v6451_v53 = vshrl.u32 %v18051_v1, 16 }
 0x48b   : > { %15780 = vst.msk [vmem:[%s19921_s9 + $0x114] sm:$0xf] %vm6110_vm0, %v16604_v29  ;;  %15747 = vst.msk [vmem:[%s19921_s9 + $0x90] sm:$0xf] %vm6110_vm0, %v16571_v52  ;;  %v16109_v18 = vcombine.high %v2586_v63, %v2593_v14  ;;  %v4500_v22 = vcombine.low %v2602_v13, %v2609_v42  ;;  %v16110_v9 = vcombine.high %v2602_v13, %v2609_v42  ;;  %v6452_v49 = vshrl.u32 %v6282_v48, 16  ;;  %v1541_v13 = vpop.permute.xlu0 %1540 }
 0x48c   : > { %15748 = vst.msk [vmem:[%s19921_s9 + $0x94] sm:$0xf] %vm6110_vm0, %v16572_v37  ;;  %15811 = vst.msk [vmem:[%s19921_s9 + $0x190] sm:$0xf] %vm6110_vm0, %v16635_v35  ;;  %v4457_v5 = vrot.slane %v4450_v62, %v22119_v0  ;;  %v4465_v26 = vrot.slane %v16108_v30, %v22119_v0  ;;  %v4466_v7 = vcombine.low %v4441_v16, %v4449_v2  ;;  %v1674_v11 = vshrl.u32 %v1509_v60, 16 }
 0x48d   : > { %15812 = vst.msk [vmem:[%s19921_s9 + $0x194] sm:$0xf] %vm6110_vm0, %v16636_v28  ;;  %v4491_v57 = vrot.slane %v4484_v10, %v22119_v0  ;;  %v4499_v54 = vrot.slane %v16109_v18, %v22119_v0  ;;  %v4507_v4 = vrot.slane %v4500_v22, %v22119_v0  ;;  %v4515_v17 = vrot.slane %v16110_v9, %v22119_v0 }
 0x48e   : > { %v1668_v6 = vpack.i.b16 %v1667_v24, %v1666_v47  ;;  %v4473_v33 = vrot.slane %v4466_v7, %v22121_v27  ;;  %v4474_v8 = vcombine.low %v4457_v5, %v4465_v26  ;;  %v2614_v58 = vcombine.high %v20097_v20, %v22112_v44  ;;  %v6346_v26 = vpop.permute.xlu1 %6345 }
 0x48f   : > { %v20183_v15 = vrot.slane %v20097_v20, %v22119_v0  ;;  %v4516_v39 = vcombine.low %v4491_v57, %v4499_v54  ;;  %v4524_v41 = vcombine.low %v4507_v4, %v4515_v17  ;;  %v6449_v3 = vpack.i.b16 %v6282_v48, %v18051_v1  ;;  %v20214_v7 = vpop.permute.xlu0 %6283 }
 0x490   : > { %v2680_v43 = vcombine.high %v1668_v6, %v22112_v44  ;;  %v20187_v56 = vrot.slane %v1668_v6, %v22119_v0  ;;  %v4481_v31 = vrot.slane %v4474_v8, %v22121_v27  ;;  %v20191_v47 = vrot.slane %v2614_v58, %v22119_v0 }
 0x491   : > { %v4523_v55 = vrot.slane %v4516_v39, %v22121_v27  ;;  %v4531_v20 = vrot.slane %v4524_v41, %v22121_v27  ;;  %v7283_v63 = vcombine.high %v6449_v3, %v22112_v44  ;;  %v20202_v14 = vrot.slane %v6449_v3, %v22119_v0 }
 0x492   : > { %v20198_v59 = vrot.slane %v2680_v43, %v22119_v0  ;;  %v4482_v45 = vcombine.low %v4473_v33, %v4481_v31  ;;  %v4483_v25 = vcombine.high %v4473_v33, %v4481_v31  ;;  %v6453_v1 = vpack.i.b16 %v6452_v49, %v6451_v53 }
 0x493   : > { %v4532_v42 = vcombine.low %v4523_v55, %v4531_v20  ;;  %v4533_v36 = vcombine.high %v4523_v55, %v4531_v20  ;;  %v20205_v51 = vrot.slane %v7283_v63, %v22119_v0  ;;  %v6459_v29 = vshrl.u32 %v6314_v61, 16 }
 0x494   : > { %v5597_v50 = vshrl.u32 %v4482_v45, 16  ;;  %v5603_v40 = vshrl.u32 %v4483_v25, 16  ;;  %v7349_v35 = vcombine.high %v6453_v1, %v22112_v44  ;;  %v20209_v28 = vrot.slane %v6453_v1, %v22119_v0 }
 0x495   : > { %v5596_v16 = vpack.i.b16 %v4532_v42, %v4482_v45  ;;  %v5598_v38 = vshrl.u32 %v4532_v42, 16  ;;  %v5602_v52 = vpack.i.b16 %v4533_v36, %v4483_v25  ;;  %v5604_v37 = vshrl.u32 %v4533_v36, 16 }
 0x496   : > { %v1672_v2 = vpack.i.b16 %v1541_v13, %v1509_v60  ;;  %v1675_v62 = vshrl.u32 %v1541_v13, 16  ;;  %v20212_v48 = vrot.slane %v7349_v35, %v22119_v0  ;;  %v6457_v58 = vpack.i.b16 %v6346_v26, %v6314_v61 }
 0x497   : > { %v5599_v30 = vpack.i.b16 %v5598_v38, %v5597_v50  ;;  %v5605_v10 = vpack.i.b16 %v5604_v37, %v5603_v40  ;;  %v16161_v18 = vcombine.low %v5596_v16, %v5596_v16  ;;  %v16162_v22 = vcombine.high %v5596_v16, %v5596_v16 }
 0x498   : > { %v16225_v9 = vcombine.low %v5602_v52, %v5602_v52  ;;  %v16226_v24 = vcombine.high %v5602_v52, %v5602_v52  ;;  %v1676_v5 = vpack.i.b16 %v1675_v62, %v1674_v11  ;;  %v2629_v17 = vcombine.high %v1672_v2, %v22112_v44 }
 0x499   : > { %v16193_v57 = vcombine.low %v5599_v30, %v5599_v30  ;;  %v16194_v60 = vcombine.high %v5599_v30, %v5599_v30  ;;  %v16257_v54 = vcombine.low %v5605_v10, %v5605_v10  ;;  %v16258_v4 = vcombine.high %v5605_v10, %v5605_v10  ;;  %6121 = vst.msk [vmem:[%s18390_s24 + $0x28] sm:$0xf] %vm6110_vm0, %v16161_v18 }
 0x49a   : > { %6122 = vst.msk [vmem:[%s18390_s24 + $0x2c] sm:$0xf] %vm6110_vm0, %v16162_v22  ;;  %6185 = vst.msk [vmem:[%s18390_s24 + $0x128] sm:$0xf] %vm6110_vm0, %v16225_v9  ;;  %v2636_v6 = vrot.slane %v1672_v2, %v22119_v0  ;;  %v2695_v33 = vcombine.high %v1676_v5, %v22112_v44  ;;  %v2702_v8 = vrot.slane %v1676_v5, %v22119_v0  ;;  %v6460_v39 = vshrl.u32 %v6346_v26, 16 }
 0x49b   : > { %6186 = vst.msk [vmem:[%s18390_s24 + $0x12c] sm:$0xf] %vm6110_vm0, %v16226_v24  ;;  %6153 = vst.msk [vmem:[%s18390_s24 + $0xa8] sm:$0xf] %vm6110_vm0, %v16193_v57  ;;  %v6467_v41 = vshrl.u32 %v18085_v19, 16  ;;  %v20239_v43 = vpack.i.b16 %v20214_v7, %v18085_v19  ;;  %v2643_v31 = vrot.slane %v2629_v17, %v22119_v0  ;;  %v7298_v45 = vcombine.high %v6457_v58, %v22112_v44 }
 0x49c   : > { %6154 = vst.msk [vmem:[%s18390_s24 + $0xac] sm:$0xf] %vm6110_vm0, %v16194_v60  ;;  %6217 = vst.msk [vmem:[%s18390_s24 + $0x1a8] sm:$0xf] %vm6110_vm0, %v16257_v54  ;;  %v2644_v53 = vcombine.low %v20183_v15, %v2636_v6  ;;  %v2645_v3 = vcombine.high %v20183_v15, %v2636_v6  ;;  %v2709_v55 = vrot.slane %v2695_v33, %v22119_v0 }
 0x49d   : > { %6218 = vst.msk [vmem:[%s18390_s24 + $0x1ac] sm:$0xf] %vm6110_vm0, %v16258_v4  ;;  %v2710_v20 = vcombine.low %v20187_v56, %v2702_v8  ;;  %v2711_v49 = vcombine.high %v20187_v56, %v2702_v8  ;;  %v6461_v61 = vpack.i.b16 %v6460_v39, %v6459_v29  ;;  %v2660_v13 = vcombine.low %v20191_v47, %v2643_v31 }
 0x49e   : > { %v2652_v25 = vrot.slane %v2644_v53, %v22121_v27  ;;  %v2659_v63 = vrot.slane %v2645_v3, %v22121_v27  ;;  %v2661_v42 = vcombine.high %v20191_v47, %v2643_v31  ;;  %v2726_v1 = vcombine.low %v20198_v59, %v2709_v55 }
 0x49f   : > { %v2718_v36 = vrot.slane %v2710_v20, %v22121_v27  ;;  %v2725_v15 = vrot.slane %v2711_v49, %v22121_v27  ;;  %v2727_v11 = vcombine.high %v20198_v59, %v2709_v55  ;;  %v2668_v56 = vrot.slane %v2660_v13, %v22121_v27 }
 0x4a0   : > { %v2675_v50 = vrot.slane %v2661_v42, %v22121_v27  ;;  %v4534_v40 = vcombine.low %v2652_v25, %v2659_v63  ;;  %v16111_v29 = vcombine.high %v2652_v25, %v2659_v63  ;;  %v2734_v16 = vrot.slane %v2726_v1, %v22121_v27 }
 0x4a1   : > { %v2741_v38 = vrot.slane %v2727_v11, %v22121_v27  ;;  %v4584_v52 = vcombine.low %v2718_v36, %v2725_v15  ;;  %v16113_v47 = vcombine.high %v2718_v36, %v2725_v15  ;;  %v7305_v5 = vrot.slane %v6457_v58, %v22119_v0 }
 0x4a2   : > { %v4541_v37 = vrot.slane %v4534_v40, %v22119_v0  ;;  %v4549_v35 = vrot.slane %v16111_v29, %v22119_v0  ;;  %v4550_v2 = vcombine.low %v2668_v56, %v2675_v50  ;;  %v16112_v62 = vcombine.high %v2668_v56, %v2675_v50 }
 0x4a3   : > { %v4591_v59 = vrot.slane %v4584_v52, %v22119_v0  ;;  %v4599_v30 = vrot.slane %v16113_v47, %v22119_v0  ;;  %v4600_v10 = vcombine.low %v2734_v16, %v2741_v38  ;;  %v16114_v18 = vcombine.high %v2734_v16, %v2741_v38 }
 0x4a4   : > { %v4557_v22 = vrot.slane %v4550_v2, %v22119_v0  ;;  %v4565_v9 = vrot.slane %v16112_v62, %v22119_v0  ;;  %v4566_v24 = vcombine.low %v4541_v37, %v4549_v35  ;;  %v7312_v54 = vrot.slane %v7298_v45, %v22119_v0 }
 0x4a5   : > { %v4607_v26 = vrot.slane %v4600_v10, %v22119_v0  ;;  %v4615_v57 = vrot.slane %v16114_v18, %v22119_v0  ;;  %v4616_v60 = vcombine.low %v4591_v59, %v4599_v30  ;;  %v7313_v6 = vcombine.low %v20202_v14, %v7305_v5 }
 0x4a6   : > { %v4573_v4 = vrot.slane %v4566_v24, %v22121_v27  ;;  %v4574_v17 = vcombine.low %v4557_v22, %v4565_v9  ;;  %v7314_v33 = vcombine.high %v20202_v14, %v7305_v5  ;;  %v7329_v31 = vcombine.low %v20205_v51, %v7312_v54 }
 0x4a7   : > { %v4623_v8 = vrot.slane %v4616_v60, %v22121_v27  ;;  %v4624_v39 = vcombine.low %v4607_v26, %v4615_v57  ;;  %v7330_v58 = vcombine.high %v20205_v51, %v7312_v54  ;;  %v7321_v3 = vrot.slane %v7313_v6, %v22121_v27 }
 0x4a8   : > { %v4581_v53 = vrot.slane %v4574_v17, %v22121_v27  ;;  %v7328_v55 = vrot.slane %v7314_v33, %v22121_v27  ;;  %v7364_v20 = vcombine.high %v6461_v61, %v22112_v44  ;;  %v7337_v45 = vrot.slane %v7329_v31, %v22121_v27 }
 0x4a9   : > { %v4631_v49 = vrot.slane %v4624_v39, %v22121_v27  ;;  %v7344_v14 = vrot.slane %v7330_v58, %v22121_v27  ;;  %v7371_v25 = vrot.slane %v6461_v61, %v22119_v0  ;;  %v11082_v39 = vpop.permute.xlu1 %11081 }
 0x4aa   : > { %v4582_v63 = vcombine.low %v4573_v4, %v4581_v53  ;;  %v4583_v13 = vcombine.high %v4573_v4, %v4581_v53  ;;  %v7378_v51 = vrot.slane %v7364_v20, %v22119_v0  ;;  %v9235_v42 = vcombine.low %v7321_v3, %v7328_v55 }
 0x4ab   : > { %v4632_v36 = vcombine.low %v4623_v8, %v4631_v49  ;;  %v4633_v15 = vcombine.high %v4623_v8, %v4631_v49  ;;  %v7379_v1 = vcombine.low %v20209_v28, %v7371_v25  ;;  %v7380_v11 = vcombine.high %v20209_v28, %v7371_v25 }
 0x4ac   : > { %v5609_v56 = vshrl.u32 %v4582_v63, 16  ;;  %v5615_v50 = vshrl.u32 %v4583_v13, 16  ;;  %v7395_v40 = vcombine.low %v20212_v48, %v7378_v51  ;;  %v7396_v29 = vcombine.high %v20212_v48, %v7378_v51 }
 0x4ad   : > { %v5608_v16 = vpack.i.b16 %v4632_v36, %v4582_v63  ;;  %v5610_v38 = vshrl.u32 %v4632_v36, 16  ;;  %v5614_v61 = vpack.i.b16 %v4633_v15, %v4583_v13  ;;  %v5616_v52 = vshrl.u32 %v4633_v15, 16 }
 0x4ae   : > { %v7387_v47 = vrot.slane %v7379_v1, %v22121_v27  ;;  %v7394_v37 = vrot.slane %v7380_v11, %v22121_v27  ;;  %v7403_v35 = vrot.slane %v7395_v40, %v22121_v27  ;;  %v7410_v28 = vrot.slane %v7396_v29, %v22121_v27  ;;  %v11114_v29 = vpop.permute.xlu1 %11113 }
 0x4af   : > { %v5611_v2 = vpack.i.b16 %v5610_v38, %v5609_v56  ;;  %v5617_v62 = vpack.i.b16 %v5616_v52, %v5615_v50  ;;  %v16163_v59 = vcombine.low %v5608_v16, %v5608_v16  ;;  %v16164_v48 = vcombine.high %v5608_v16, %v5608_v16 }
 0x4b0   : > { %v16227_v30 = vcombine.low %v5614_v61, %v5614_v61  ;;  %v16228_v10 = vcombine.high %v5614_v61, %v5614_v61  ;;  %v9242_v18 = vrot.slane %v9235_v42, %v22119_v0  ;;  %v16299_v22 = vcombine.high %v7321_v3, %v7328_v55  ;;  %v6316_v55 = vpop.permute.xlu0 %6315 }
 0x4b1   : > { %v16195_v9 = vcombine.low %v5611_v2, %v5611_v2  ;;  %v16196_v24 = vcombine.high %v5611_v2, %v5611_v2  ;;  %v16259_v5 = vcombine.low %v5617_v62, %v5617_v62  ;;  %v16260_v26 = vcombine.high %v5617_v62, %v5617_v62  ;;  %6123 = vst.msk [vmem:[%s18390_s24 + $0x30] sm:$0xf] %vm6110_vm0, %v16163_v59 }
 0x4b2   : > { %6124 = vst.msk [vmem:[%s18390_s24 + $0x34] sm:$0xf] %vm6110_vm0, %v16164_v48  ;;  %6187 = vst.msk [vmem:[%s18390_s24 + $0x130] sm:$0xf] %vm6110_vm0, %v16227_v30  ;;  %v9250_v57 = vrot.slane %v16299_v22, %v22119_v0  ;;  %v9251_v60 = vcombine.low %v7337_v45, %v7344_v14  ;;  %v16300_v54 = vcombine.high %v7337_v45, %v7344_v14  ;;  %v6468_v8 = vshrl.u32 %v20214_v7, 16 }
 0x4b3   : > { %6188 = vst.msk [vmem:[%s18390_s24 + $0x134] sm:$0xf] %vm6110_vm0, %v16228_v10  ;;  %v9285_v4 = vcombine.low %v7387_v47, %v7394_v37  ;;  %6155 = vst.msk [vmem:[%s18390_s24 + $0xb0] sm:$0xf] %vm6110_vm0, %v16195_v9  ;;  %v16301_v17 = vcombine.high %v7387_v47, %v7394_v37  ;;  %v9301_v6 = vcombine.low %v7403_v35, %v7410_v28  ;;  %v11251_v1 = vshrl.u32 %v18091_v21, 16 }
 0x4b4   : > { %6156 = vst.msk [vmem:[%s18390_s24 + $0xb4] sm:$0xf] %vm6110_vm0, %v16196_v24  ;;  %6219 = vst.msk [vmem:[%s18390_s24 + $0x1b0] sm:$0xf] %vm6110_vm0, %v16259_v5  ;;  %v16302_v33 = vcombine.high %v7403_v35, %v7410_v28  ;;  %v9258_v31 = vrot.slane %v9251_v60, %v22119_v0  ;;  %v9266_v58 = vrot.slane %v16300_v54, %v22119_v0  ;;  %v11252_v40 = vshrl.u32 %v11082_v39, 16  ;;  %v6348_v47 = vpop.permute.xlu0 %6347 }
 0x4b5   : > { %6220 = vst.msk [vmem:[%s18390_s24 + $0x1b4] sm:$0xf] %vm6110_vm0, %v16260_v26  ;;  %v9267_v53 = vcombine.low %v9242_v18, %v9250_v57  ;;  %v9292_v3 = vrot.slane %v9285_v4, %v22119_v0  ;;  %v9300_v20 = vrot.slane %v16301_v17, %v22119_v0  ;;  %v9308_v49 = vrot.slane %v9301_v6, %v22119_v0 }
 0x4b6   : > { %v9316_v45 = vrot.slane %v16302_v33, %v22119_v0  ;;  %v6469_v14 = vpack.i.b16 %v6468_v8, %v6467_v41  ;;  %v9275_v25 = vcombine.low %v9258_v31, %v9266_v58  ;;  %v7415_v63 = vcombine.high %v20239_v43, %v22112_v44 }
 0x4b7   : > { %v9274_v7 = vrot.slane %v9267_v53, %v22121_v27  ;;  %v20325_v13 = vrot.slane %v20239_v43, %v22119_v0  ;;  %v9317_v51 = vcombine.low %v9292_v3, %v9300_v20  ;;  %v11249_v11 = vpack.i.b16 %v11082_v39, %v18091_v21  ;;  %v11146_v39 = vpop.permute.xlu1 %11145 }
 0x4b8   : > { %v9325_v42 = vcombine.low %v9308_v49, %v9316_v45  ;;  %v7481_v36 = vcombine.high %v6469_v14, %v22112_v44  ;;  %v20329_v15 = vrot.slane %v6469_v14, %v22119_v0  ;;  %v9282_v19 = vrot.slane %v9275_v25, %v22121_v27  ;;  %v20356_v31 = vpop.permute.xlu0 %11079 }
 0x4b9   : > { %v20333_v41 = vrot.slane %v7415_v63, %v22119_v0  ;;  %v9324_v56 = vrot.slane %v9317_v51, %v22121_v27  ;;  %v12083_v61 = vcombine.high %v11249_v11, %v22112_v44  ;;  %v20344_v52 = vrot.slane %v11249_v11, %v22119_v0 }
 0x4ba   : > { %v9332_v43 = vrot.slane %v9325_v42, %v22121_v27  ;;  %v20340_v50 = vrot.slane %v7481_v36, %v22119_v0  ;;  %v9283_v16 = vcombine.low %v9274_v7, %v9282_v19  ;;  %v9284_v38 = vcombine.high %v9274_v7, %v9282_v19 }
 0x4bb   : > { %v11253_v21 = vpack.i.b16 %v11252_v40, %v11251_v1  ;;  %v6475_v28 = vshrl.u32 %v6316_v55, 16  ;;  %v20347_v59 = vrot.slane %v12083_v61, %v22119_v0  ;;  %v11259_v48 = vshrl.u32 %v11114_v29, 16 }
 0x4bc   : > { %v9333_v37 = vcombine.low %v9324_v56, %v9332_v43  ;;  %v9334_v35 = vcombine.high %v9324_v56, %v9332_v43  ;;  %v10398_v2 = vshrl.u32 %v9283_v16, 16  ;;  %v10404_v62 = vshrl.u32 %v9284_v38, 16 }
 0x4bd   : > { %v12149_v9 = vcombine.high %v11253_v21, %v22112_v44  ;;  %v20351_v24 = vrot.slane %v11253_v21, %v22119_v0  ;;  %v6473_v5 = vpack.i.b16 %v6348_v47, %v6316_v55  ;;  %v6476_v26 = vshrl.u32 %v6348_v47, 16 }
 0x4be   : > { %v10397_v30 = vpack.i.b16 %v9333_v37, %v9283_v16  ;;  %v10399_v10 = vshrl.u32 %v9333_v37, 16  ;;  %v10403_v18 = vpack.i.b16 %v9334_v35, %v9284_v38  ;;  %v10405_v22 = vshrl.u32 %v9334_v35, 16 }
 0x4bf   : > { %v20354_v33 = vrot.slane %v12149_v9, %v22119_v0  ;;  %v6477_v8 = vpack.i.b16 %v6476_v26, %v6475_v28  ;;  %v7430_v20 = vcombine.high %v6473_v5, %v22112_v44  ;;  %v7437_v49 = vrot.slane %v6473_v5, %v22119_v0 }
 0x4c0   : > { %v10400_v57 = vpack.i.b16 %v10399_v10, %v10398_v2  ;;  %v10406_v60 = vpack.i.b16 %v10405_v22, %v10404_v62  ;;  %v16353_v54 = vcombine.low %v10397_v30, %v10397_v30  ;;  %v16354_v4 = vcombine.high %v10397_v30, %v10397_v30 }
 0x4c1   : > { %v16417_v17 = vcombine.low %v10403_v18, %v10403_v18  ;;  %v16418_v6 = vcombine.high %v10403_v18, %v10403_v18  ;;  %v7496_v45 = vcombine.high %v6477_v8, %v22112_v44  ;;  %v7503_v14 = vrot.slane %v6477_v8, %v22119_v0 }
 0x4c2   : > { %v16385_v58 = vcombine.low %v10400_v57, %v10400_v57  ;;  %v16386_v53 = vcombine.high %v10400_v57, %v10400_v57  ;;  %v16449_v3 = vcombine.low %v10406_v60, %v10406_v60  ;;  %v16450_v55 = vcombine.high %v10406_v60, %v10406_v60  ;;  %10921 = vst.msk [vmem:[%s18823_s15 + $0x28] sm:$0xf] %vm6110_vm0, %v16353_v54 }
 0x4c3   : > { %10922 = vst.msk [vmem:[%s18823_s15 + $0x2c] sm:$0xf] %vm6110_vm0, %v16354_v4  ;;  %10985 = vst.msk [vmem:[%s18823_s15 + $0x128] sm:$0xf] %vm6110_vm0, %v16417_v17  ;;  %v11257_v7 = vpack.i.b16 %v11146_v39, %v11114_v29  ;;  %v11260_v25 = vshrl.u32 %v11146_v39, 16  ;;  %v11235_v63 = vshrl.u32 %v18099_v34, 16  ;;  %v20381_v51 = vpack.i.b16 %v20356_v31, %v18099_v34 }
 0x4c4   : > { %10986 = vst.msk [vmem:[%s18823_s15 + $0x12c] sm:$0xf] %vm6110_vm0, %v16418_v6  ;;  %10953 = vst.msk [vmem:[%s18823_s15 + $0xa8] sm:$0xf] %vm6110_vm0, %v16385_v58  ;;  %v7444_v42 = vrot.slane %v7430_v20, %v22119_v0  ;;  %v7445_v36 = vcombine.low %v20325_v13, %v7437_v49  ;;  %v7446_v19 = vcombine.high %v20325_v13, %v7437_v49 }
 0x4c5   : > { %10954 = vst.msk [vmem:[%s18823_s15 + $0xac] sm:$0xf] %vm6110_vm0, %v16386_v53  ;;  %11017 = vst.msk [vmem:[%s18823_s15 + $0x1a8] sm:$0xf] %vm6110_vm0, %v16449_v3  ;;  %v7510_v1 = vrot.slane %v7496_v45, %v22119_v0  ;;  %v7511_v11 = vcombine.low %v20329_v15, %v7503_v14  ;;  %v7512_v56 = vcombine.high %v20329_v15, %v7503_v14 }
 0x4c6   : > { %11018 = vst.msk [vmem:[%s18823_s15 + $0x1ac] sm:$0xf] %vm6110_vm0, %v16450_v55  ;;  %v11261_v43 = vpack.i.b16 %v11260_v25, %v11259_v48  ;;  %v12098_v40 = vcombine.high %v11257_v7, %v22112_v44  ;;  %v7453_v29 = vrot.slane %v7445_v36, %v22121_v27  ;;  %v7460_v16 = vrot.slane %v7446_v19, %v22121_v27 }
 0x4c7   : > { %v7461_v38 = vcombine.low %v20333_v41, %v7444_v42  ;;  %v7462_v61 = vcombine.high %v20333_v41, %v7444_v42  ;;  %v7519_v47 = vrot.slane %v7511_v11, %v22121_v27  ;;  %v7526_v13 = vrot.slane %v7512_v56, %v22121_v27 }
 0x4c8   : > { %v7527_v37 = vcombine.low %v20340_v50, %v7510_v1  ;;  %v7528_v35 = vcombine.high %v20340_v50, %v7510_v1  ;;  %v9335_v28 = vcombine.low %v7453_v29, %v7460_v16  ;;  %v16303_v2 = vcombine.high %v7453_v29, %v7460_v16 }
 0x4c9   : > { %v7469_v15 = vrot.slane %v7461_v38, %v22121_v27  ;;  %v7476_v21 = vrot.slane %v7462_v61, %v22121_v27  ;;  %v9385_v30 = vcombine.low %v7519_v47, %v7526_v13  ;;  %v16305_v41 = vcombine.high %v7519_v47, %v7526_v13 }
 0x4ca   : > { %v7535_v62 = vrot.slane %v7527_v37, %v22121_v27  ;;  %v7542_v48 = vrot.slane %v7528_v35, %v22121_v27  ;;  %v9342_v10 = vrot.slane %v9335_v28, %v22119_v0  ;;  %v9350_v18 = vrot.slane %v16303_v2, %v22119_v0 }
 0x4cb   : > { %v9351_v22 = vcombine.low %v7469_v15, %v7476_v21  ;;  %v16304_v9 = vcombine.high %v7469_v15, %v7476_v21  ;;  %v9392_v50 = vrot.slane %v9385_v30, %v22119_v0  ;;  %v9400_v5 = vrot.slane %v16305_v41, %v22119_v0 }
 0x4cc   : > { %v9401_v26 = vcombine.low %v7535_v62, %v7542_v48  ;;  %v16306_v57 = vcombine.high %v7535_v62, %v7542_v48  ;;  %v9367_v4 = vcombine.low %v9342_v10, %v9350_v18  ;;  %v12105_v17 = vrot.slane %v11257_v7, %v22119_v0 }
 0x4cd   : > { %v9358_v60 = vrot.slane %v9351_v22, %v22119_v0  ;;  %v9366_v54 = vrot.slane %v16304_v9, %v22119_v0  ;;  %v9417_v39 = vcombine.low %v9392_v50, %v9400_v5  ;;  %v12112_v58 = vrot.slane %v12098_v40, %v22119_v0 }
 0x4ce   : > { %v9408_v6 = vrot.slane %v9401_v26, %v22119_v0  ;;  %v9416_v8 = vrot.slane %v16306_v57, %v22119_v0  ;;  %v9374_v53 = vrot.slane %v9367_v4, %v22121_v27  ;;  %v12113_v55 = vcombine.low %v20344_v52, %v12105_v17 }
 0x4cf   : > { %v9375_v3 = vcombine.low %v9358_v60, %v9366_v54  ;;  %v12114_v20 = vcombine.high %v20344_v52, %v12105_v17  ;;  %v9424_v49 = vrot.slane %v9417_v39, %v22121_v27  ;;  %v12129_v14 = vcombine.low %v20347_v59, %v12112_v58 }
 0x4d0   : > { %v9425_v45 = vcombine.low %v9408_v6, %v9416_v8  ;;  %v12130_v7 = vcombine.high %v20347_v59, %v12112_v58  ;;  %v12121_v42 = vrot.slane %v12113_v55, %v22121_v27  ;;  %v12164_v19 = vcombine.high %v11261_v43, %v22112_v44 }
 0x4d1   : > { %v9382_v25 = vrot.slane %v9375_v3, %v22121_v27  ;;  %v12128_v36 = vrot.slane %v12114_v20, %v22121_v27  ;;  %v12137_v11 = vrot.slane %v12129_v14, %v22121_v27  ;;  %v12171_v56 = vrot.slane %v11261_v43, %v22119_v0  ;;  %v11086_v20 = vpop.permute.xlu1 %11085 }
 0x4d2   : > { %v9432_v1 = vrot.slane %v9425_v45, %v22121_v27  ;;  %v12144_v52 = vrot.slane %v12130_v7, %v22121_v27  ;;  %v12178_v59 = vrot.slane %v12164_v19, %v22119_v0  ;;  %v11236_v55 = vshrl.u32 %v20356_v31, 16 }
 0x4d3   : > { %v9383_v40 = vcombine.low %v9374_v53, %v9382_v25  ;;  %v9384_v29 = vcombine.high %v9374_v53, %v9382_v25  ;;  %v14035_v16 = vcombine.low %v12121_v42, %v12128_v36  ;;  %v12179_v47 = vcombine.low %v20351_v24, %v12171_v56  ;;  %v11112_v25 = vpop.permute.xlu0 %11111 }
 0x4d4   : > { %v9433_v38 = vcombine.low %v9424_v49, %v9432_v1  ;;  %v9434_v61 = vcombine.high %v9424_v49, %v9432_v1  ;;  %v12180_v13 = vcombine.high %v20351_v24, %v12171_v56  ;;  %v12195_v15 = vcombine.low %v20354_v33, %v12178_v59 }
 0x4d5   : > { %v10410_v37 = vshrl.u32 %v9383_v40, 16  ;;  %v10416_v35 = vshrl.u32 %v9384_v29, 16  ;;  %v12196_v21 = vcombine.high %v20354_v33, %v12178_v59  ;;  %v12187_v48 = vrot.slane %v12179_v47, %v22121_v27 }
 0x4d6   : > { %v10409_v28 = vpack.i.b16 %v9433_v38, %v9383_v40  ;;  %v10411_v2 = vshrl.u32 %v9433_v38, 16  ;;  %v10415_v43 = vpack.i.b16 %v9434_v61, %v9384_v29  ;;  %v10417_v62 = vshrl.u32 %v9434_v61, 16 }
 0x4d7   : > { %v12194_v30 = vrot.slane %v12180_v13, %v22121_v27  ;;  %v12203_v41 = vrot.slane %v12195_v15, %v22121_v27  ;;  %v12210_v24 = vrot.slane %v12196_v21, %v22121_v27  ;;  %v14042_v5 = vrot.slane %v14035_v16, %v22119_v0 }
 0x4d8   : > { %v10412_v10 = vpack.i.b16 %v10411_v2, %v10410_v37  ;;  %v10418_v18 = vpack.i.b16 %v10417_v62, %v10416_v35  ;;  %v16355_v22 = vcombine.low %v10409_v28, %v10409_v28  ;;  %v16356_v33 = vcombine.high %v10409_v28, %v10409_v28  ;;  %v11118_v35 = vpop.permute.xlu1 %11117 }
 0x4d9   : > { %v16419_v9 = vcombine.low %v10415_v43, %v10415_v43  ;;  %v16420_v50 = vcombine.high %v10415_v43, %v10415_v43  ;;  %v16491_v26 = vcombine.high %v12121_v42, %v12128_v36  ;;  %v14051_v6 = vcombine.low %v12137_v11, %v12144_v52  ;;  %v11144_v43 = vpop.permute.xlu0 %11143 }
 0x4da   : > { %v16387_v57 = vcombine.low %v10412_v10, %v10412_v10  ;;  %v16388_v60 = vcombine.high %v10412_v10, %v10412_v10  ;;  %v16451_v54 = vcombine.low %v10418_v18, %v10418_v18  ;;  %v16452_v4 = vcombine.high %v10418_v18, %v10418_v18  ;;  %10923 = vst.msk [vmem:[%s18823_s15 + $0x30] sm:$0xf] %vm6110_vm0, %v16355_v22 }
 0x4db   : > { %10924 = vst.msk [vmem:[%s18823_s15 + $0x34] sm:$0xf] %vm6110_vm0, %v16356_v33  ;;  %10987 = vst.msk [vmem:[%s18823_s15 + $0x130] sm:$0xf] %vm6110_vm0, %v16419_v9  ;;  %v14050_v17 = vrot.slane %v16491_v26, %v22119_v0  ;;  %v16492_v8 = vcombine.high %v12137_v11, %v12144_v52  ;;  %v14085_v39 = vcombine.low %v12187_v48, %v12194_v30  ;;  %v11283_v61 = vshrl.u32 %v18117_v46, 16 }
 0x4dc   : > { %10988 = vst.msk [vmem:[%s18823_s15 + $0x134] sm:$0xf] %vm6110_vm0, %v16420_v50  ;;  %10955 = vst.msk [vmem:[%s18823_s15 + $0xb0] sm:$0xf] %vm6110_vm0, %v16387_v57  ;;  %v16493_v58 = vcombine.high %v12187_v48, %v12194_v30  ;;  %v14101_v53 = vcombine.low %v12203_v41, %v12210_v24  ;;  %v16494_v3 = vcombine.high %v12203_v41, %v12210_v24  ;;  %v11284_v37 = vshrl.u32 %v11086_v20, 16 }
 0x4dd   : > { %10956 = vst.msk [vmem:[%s18823_s15 + $0xb4] sm:$0xf] %vm6110_vm0, %v16388_v60  ;;  %11019 = vst.msk [vmem:[%s18823_s15 + $0x1b0] sm:$0xf] %vm6110_vm0, %v16451_v54  ;;  %v14058_v49 = vrot.slane %v14051_v6, %v22119_v0  ;;  %v14066_v45 = vrot.slane %v16492_v8, %v22119_v0  ;;  %v14067_v14 = vcombine.low %v14042_v5, %v14050_v17  ;;  %v11243_v30 = vshrl.u32 %v11112_v25, 16 }
 0x4de   : > { %11020 = vst.msk [vmem:[%s18823_s15 + $0x1b4] sm:$0xf] %vm6110_vm0, %v16452_v4  ;;  %v14092_v7 = vrot.slane %v14085_v39, %v22119_v0  ;;  %v14100_v42 = vrot.slane %v16493_v58, %v22119_v0  ;;  %v14108_v36 = vrot.slane %v14101_v53, %v22119_v0  ;;  %v14116_v19 = vrot.slane %v16494_v3, %v22119_v0  ;;  %v11150_v3 = vpop.permute.xlu1 %11149 }
 0x4df   : > { %v11237_v1 = vpack.i.b16 %v11236_v55, %v11235_v63  ;;  %v14074_v31 = vrot.slane %v14067_v14, %v22121_v27  ;;  %v14075_v11 = vcombine.low %v14058_v49, %v14066_v45  ;;  %v11951_v52 = vcombine.high %v20381_v51, %v22112_v44  ;;  %v20498_v55 = vpop.permute.xlu0 %11083 }
 0x4e0   : > { %v20467_v56 = vrot.slane %v20381_v51, %v22119_v0  ;;  %v14117_v40 = vcombine.low %v14092_v7, %v14100_v42  ;;  %v14125_v29 = vcombine.low %v14108_v36, %v14116_v19  ;;  %v11281_v38 = vpack.i.b16 %v11086_v20, %v18117_v46 }
 0x4e1   : > { %v12017_v59 = vcombine.high %v11237_v1, %v22112_v44  ;;  %v20471_v16 = vrot.slane %v11237_v1, %v22119_v0  ;;  %v14082_v34 = vrot.slane %v14075_v11, %v22121_v27  ;;  %v20475_v63 = vrot.slane %v11951_v52, %v22119_v0 }
 0x4e2   : > { %v14124_v47 = vrot.slane %v14117_v40, %v22121_v27  ;;  %v14132_v51 = vrot.slane %v14125_v29, %v22121_v27  ;;  %v12347_v28 = vcombine.high %v11281_v38, %v22112_v44  ;;  %v20486_v2 = vrot.slane %v11281_v38, %v22119_v0 }
 0x4e3   : > { %v20482_v13 = vrot.slane %v12017_v59, %v22119_v0  ;;  %v14083_v15 = vcombine.low %v14074_v31, %v14082_v34  ;;  %v14084_v21 = vcombine.high %v14074_v31, %v14082_v34  ;;  %v11285_v46 = vpack.i.b16 %v11284_v37, %v11283_v61 }
 0x4e4   : > { %v14133_v62 = vcombine.low %v14124_v47, %v14132_v51  ;;  %v14134_v48 = vcombine.high %v14124_v47, %v14132_v51  ;;  %v20489_v10 = vrot.slane %v12347_v28, %v22119_v0  ;;  %v11291_v18 = vshrl.u32 %v11118_v35, 16 }
 0x4e5   : > { %v15198_v41 = vshrl.u32 %v14083_v15, 16  ;;  %v15204_v24 = vshrl.u32 %v14084_v21, 16  ;;  %v12413_v5 = vcombine.high %v11285_v46, %v22112_v44  ;;  %v20493_v26 = vrot.slane %v11285_v46, %v22119_v0 }
 0x4e6   : > { %v15197_v22 = vpack.i.b16 %v14133_v62, %v14083_v15  ;;  %v15199_v33 = vshrl.u32 %v14133_v62, 16  ;;  %v15203_v9 = vpack.i.b16 %v14134_v48, %v14084_v21  ;;  %v15205_v50 = vshrl.u32 %v14134_v48, 16 }
 0x4e7   : > { %v11241_v57 = vpack.i.b16 %v11144_v43, %v11112_v25  ;;  %v11244_v60 = vshrl.u32 %v11144_v43, 16  ;;  %v20496_v58 = vrot.slane %v12413_v5, %v22119_v0  ;;  %v11289_v19 = vpack.i.b16 %v11150_v3, %v11118_v35 }
 0x4e8   : > { %v15200_v54 = vpack.i.b16 %v15199_v33, %v15198_v41  ;;  %v15206_v4 = vpack.i.b16 %v15205_v50, %v15204_v24  ;;  %v16545_v17 = vcombine.low %v15197_v22, %v15197_v22  ;;  %v16546_v6 = vcombine.high %v15197_v22, %v15197_v22 }
 0x4e9   : > { %v16609_v8 = vcombine.low %v15203_v9, %v15203_v9  ;;  %v16610_v39 = vcombine.high %v15203_v9, %v15203_v9  ;;  %v11245_v53 = vpack.i.b16 %v11244_v60, %v11243_v30  ;;  %v11966_v7 = vcombine.high %v11241_v57, %v22112_v44 }
 0x4ea   : > { %v16577_v20 = vcombine.low %v15200_v54, %v15200_v54  ;;  %v16578_v49 = vcombine.high %v15200_v54, %v15200_v54  ;;  %v16641_v45 = vcombine.low %v15206_v4, %v15206_v4  ;;  %v16642_v14 = vcombine.high %v15206_v4, %v15206_v4  ;;  %15721 = vst.msk [vmem:[%s19921_s9 + $0x28] sm:$0xf] %vm6110_vm0, %v16545_v17 }
 0x4eb   : > { %15722 = vst.msk [vmem:[%s19921_s9 + $0x2c] sm:$0xf] %vm6110_vm0, %v16546_v6  ;;  %15785 = vst.msk [vmem:[%s19921_s9 + $0x128] sm:$0xf] %vm6110_vm0, %v16609_v8  ;;  %v11973_v25 = vrot.slane %v11241_v57, %v22119_v0  ;;  %v12032_v42 = vcombine.high %v11245_v53, %v22112_v44  ;;  %v12039_v36 = vrot.slane %v11245_v53, %v22119_v0  ;;  %v11292_v1 = vshrl.u32 %v11150_v3, 16 }
 0x4ec   : > { %15786 = vst.msk [vmem:[%s19921_s9 + $0x12c] sm:$0xf] %vm6110_vm0, %v16610_v39  ;;  %15753 = vst.msk [vmem:[%s19921_s9 + $0xa8] sm:$0xf] %vm6110_vm0, %v16577_v20  ;;  %v11267_v31 = vshrl.u32 %v18123_v23, 16  ;;  %v20523_v11 = vpack.i.b16 %v20498_v55, %v18123_v23  ;;  %v11980_v52 = vrot.slane %v11966_v7, %v22119_v0  ;;  %v12362_v47 = vcombine.high %v11289_v19, %v22112_v44 }
 0x4ed   : > { %15754 = vst.msk [vmem:[%s19921_s9 + $0xac] sm:$0xf] %vm6110_vm0, %v16578_v49  ;;  %15817 = vst.msk [vmem:[%s19921_s9 + $0x1a8] sm:$0xf] %vm6110_vm0, %v16641_v45  ;;  %v11981_v40 = vcombine.low %v20467_v56, %v11973_v25  ;;  %v11982_v29 = vcombine.high %v20467_v56, %v11973_v25  ;;  %v12046_v59 = vrot.slane %v12032_v42, %v22119_v0 }
 0x4ee   : > { %15818 = vst.msk [vmem:[%s19921_s9 + $0x1ac] sm:$0xf] %vm6110_vm0, %v16642_v14  ;;  %v12047_v34 = vcombine.low %v20471_v16, %v12039_v36  ;;  %v12048_v38 = vcombine.high %v20471_v16, %v12039_v36  ;;  %v11293_v61 = vpack.i.b16 %v11292_v1, %v11291_v18  ;;  %v11997_v35 = vcombine.low %v20475_v63, %v11980_v52 }
 0x4ef   : > { %v11989_v51 = vrot.slane %v11981_v40, %v22121_v27  ;;  %v11996_v37 = vrot.slane %v11982_v29, %v22121_v27  ;;  %v11998_v15 = vcombine.high %v20475_v63, %v11980_v52  ;;  %v12063_v28 = vcombine.low %v20482_v13, %v12046_v59 }
 0x4f0   : > { %v12055_v21 = vrot.slane %v12047_v34, %v22121_v27  ;;  %v12062_v56 = vrot.slane %v12048_v38, %v22121_v27  ;;  %v12064_v43 = vcombine.high %v20482_v13, %v12046_v59  ;;  %v12005_v16 = vrot.slane %v11997_v35, %v22121_v27 }
 0x4f1   : > { %v12012_v62 = vrot.slane %v11998_v15, %v22121_v27  ;;  %v13935_v48 = vcombine.low %v11989_v51, %v11996_v37  ;;  %v16487_v46 = vcombine.high %v11989_v51, %v11996_v37  ;;  %v12071_v30 = vrot.slane %v12063_v28, %v22121_v27 }
 0x4f2   : > { %v12078_v41 = vrot.slane %v12064_v43, %v22121_v27  ;;  %v13985_v24 = vcombine.low %v12055_v21, %v12062_v56  ;;  %v16489_v63 = vcombine.high %v12055_v21, %v12062_v56  ;;  %v12369_v17 = vrot.slane %v11289_v19, %v22119_v0 }
 0x4f3   : > { %v13942_v18 = vrot.slane %v13935_v48, %v22119_v0  ;;  %v13950_v22 = vrot.slane %v16487_v46, %v22119_v0  ;;  %v13951_v33 = vcombine.low %v12005_v16, %v12012_v62  ;;  %v16488_v9 = vcombine.high %v12005_v16, %v12012_v62 }
 0x4f4   : > { %v13992_v13 = vrot.slane %v13985_v24, %v22119_v0  ;;  %v14000_v50 = vrot.slane %v16489_v63, %v22119_v0  ;;  %v14001_v5 = vcombine.low %v12071_v30, %v12078_v41  ;;  %v16490_v57 = vcombine.high %v12071_v30, %v12078_v41 }
 0x4f5   : > { %v13958_v60 = vrot.slane %v13951_v33, %v22119_v0  ;;  %v13966_v54 = vrot.slane %v16488_v9, %v22119_v0  ;;  %v13967_v4 = vcombine.low %v13942_v18, %v13950_v22  ;;  %v12376_v53 = vrot.slane %v12362_v47, %v22119_v0 }
 0x4f6   : > { %v14008_v6 = vrot.slane %v14001_v5, %v22119_v0  ;;  %v14016_v8 = vrot.slane %v16490_v57, %v22119_v0  ;;  %v14017_v39 = vcombine.low %v13992_v13, %v14000_v50  ;;  %v12377_v49 = vcombine.low %v20486_v2, %v12369_v17 }
 0x4f7   : > { %v13974_v3 = vrot.slane %v13967_v4, %v22121_v27  ;;  %v13975_v20 = vcombine.low %v13958_v60, %v13966_v54  ;;  %v12378_v45 = vcombine.high %v20486_v2, %v12369_v17  ;;  %v12393_v25 = vcombine.low %v20489_v10, %v12376_v53 }
 0x4f8   : > { %v14024_v14 = vrot.slane %v14017_v39, %v22121_v27  ;;  %v14025_v7 = vcombine.low %v14008_v6, %v14016_v8  ;;  %v12394_v42 = vcombine.high %v20489_v10, %v12376_v53  ;;  %v12385_v19 = vrot.slane %v12377_v49, %v22121_v27 }
 0x4f9   : > { %v13982_v36 = vrot.slane %v13975_v20, %v22121_v27  ;;  %v12392_v1 = vrot.slane %v12378_v45, %v22121_v27  ;;  %v12428_v52 = vcombine.high %v11293_v61, %v22112_v44  ;;  %v12401_v29 = vrot.slane %v12393_v25, %v22121_v27  ;;  %v1479_v20 = vpop.permute.xlu1 %1478  ;;  %v11116_v25 = vpop.permute.xlu0 %11115 }
 0x4fa   : > { %v14032_v40 = vrot.slane %v14025_v7, %v22121_v27  ;;  %v12408_v2 = vrot.slane %v12394_v42, %v22121_v27  ;;  %v12435_v59 = vrot.slane %v11293_v61, %v22119_v0 }
 0x4fb   : > { %v13983_v34 = vcombine.low %v13974_v3, %v13982_v36  ;;  %v13984_v38 = vcombine.high %v13974_v3, %v13982_v36  ;;  %v12442_v10 = vrot.slane %v12428_v52, %v22119_v0  ;;  %v14235_v47 = vcombine.low %v12385_v19, %v12392_v1 }
 0x4fc   : > { %v14033_v51 = vcombine.low %v14024_v14, %v14032_v40  ;;  %v14034_v37 = vcombine.high %v14024_v14, %v14032_v40  ;;  %v12443_v35 = vcombine.low %v20493_v26, %v12435_v59  ;;  %v12444_v15 = vcombine.high %v20493_v26, %v12435_v59 }
 0x4fd   : > { %v15186_v21 = vshrl.u32 %v13983_v34, 16  ;;  %v15192_v56 = vshrl.u32 %v13984_v38, 16  ;;  %v12459_v28 = vcombine.low %v20496_v58, %v12442_v10  ;;  %v12460_v43 = vcombine.high %v20496_v58, %v12442_v10 }
 0x4fe   : > { %v15185_v16 = vpack.i.b16 %v14033_v51, %v13983_v34  ;;  %v15187_v62 = vshrl.u32 %v14033_v51, 16  ;;  %v15191_v61 = vpack.i.b16 %v14034_v37, %v13984_v38  ;;  %v15193_v48 = vshrl.u32 %v14034_v37, 16 }
 0x4ff   : > { %v12451_v46 = vrot.slane %v12443_v35, %v22121_v27  ;;  %v12458_v30 = vrot.slane %v12444_v15, %v22121_v27  ;;  %v12467_v41 = vrot.slane %v12459_v28, %v22121_v27  ;;  %v12474_v26 = vrot.slane %v12460_v43, %v22121_v27  ;;  %v1511_v15 = vpop.permute.xlu1 %1510 }
 0x500   : > { %v15188_v24 = vpack.i.b16 %v15187_v62, %v15186_v21  ;;  %v15194_v63 = vpack.i.b16 %v15193_v48, %v15192_v56  ;;  %v16543_v18 = vcombine.low %v15185_v16, %v15185_v16  ;;  %v16544_v58 = vcombine.high %v15185_v16, %v15185_v16  ;;  %v11148_v16 = vpop.permute.xlu0 %11147 }
 0x501   : > { %v16607_v22 = vcombine.low %v15191_v61, %v15191_v61  ;;  %v16608_v33 = vcombine.high %v15191_v61, %v15191_v61  ;;  %v14242_v9 = vrot.slane %v14235_v47, %v22119_v0  ;;  %v16499_v13 = vcombine.high %v12385_v19, %v12392_v1 }
 0x502   : > { %v16575_v50 = vcombine.low %v15188_v24, %v15188_v24  ;;  %v16576_v5 = vcombine.high %v15188_v24, %v15188_v24  ;;  %v16639_v57 = vcombine.low %v15194_v63, %v15194_v63  ;;  %v16640_v60 = vcombine.high %v15194_v63, %v15194_v63  ;;  %15719 = vst.msk [vmem:[%s19921_s9 + $0x20] sm:$0xf] %vm6110_vm0, %v16543_v18 }
 0x503   : > { %15720 = vst.msk [vmem:[%s19921_s9 + $0x24] sm:$0xf] %vm6110_vm0, %v16544_v58  ;;  %15783 = vst.msk [vmem:[%s19921_s9 + $0x120] sm:$0xf] %vm6110_vm0, %v16607_v22  ;;  %v14250_v54 = vrot.slane %v16499_v13, %v22119_v0  ;;  %v14251_v4 = vcombine.low %v12401_v29, %v12408_v2  ;;  %v16500_v17 = vcombine.high %v12401_v29, %v12408_v2  ;;  %v11268_v3 = vshrl.u32 %v20498_v55, 16 }
 0x504   : > { %15784 = vst.msk [vmem:[%s19921_s9 + $0x124] sm:$0xf] %vm6110_vm0, %v16608_v33  ;;  %v14285_v6 = vcombine.low %v12451_v46, %v12458_v30  ;;  %15751 = vst.msk [vmem:[%s19921_s9 + $0xa0] sm:$0xf] %vm6110_vm0, %v16575_v50  ;;  %v16501_v8 = vcombine.high %v12451_v46, %v12458_v30  ;;  %v14301_v39 = vcombine.low %v12467_v41, %v12474_v26  ;;  %v1682_v47 = vshrl.u32 %v18109_v32, 16 }
 0x505   : > { %15752 = vst.msk [vmem:[%s19921_s9 + $0xa4] sm:$0xf] %vm6110_vm0, %v16576_v5  ;;  %15815 = vst.msk [vmem:[%s19921_s9 + $0x1a0] sm:$0xf] %vm6110_vm0, %v16639_v57  ;;  %v16502_v53 = vcombine.high %v12467_v41, %v12474_v26  ;;  %v14258_v49 = vrot.slane %v14251_v4, %v22119_v0  ;;  %v14266_v45 = vrot.slane %v16500_v17, %v22119_v0  ;;  %v1683_v35 = vshrl.u32 %v1479_v20, 16 }
 0x506   : > { %15816 = vst.msk [vmem:[%s19921_s9 + $0x1a4] sm:$0xf] %vm6110_vm0, %v16640_v60  ;;  %v14267_v14 = vcombine.low %v14242_v9, %v14250_v54  ;;  %v14292_v7 = vrot.slane %v14285_v6, %v22119_v0  ;;  %v14300_v42 = vrot.slane %v16501_v8, %v22119_v0  ;;  %v14308_v36 = vrot.slane %v14301_v39, %v22119_v0  ;;  %v1543_v8 = vpop.permute.xlu1 %1542  ;;  %v20640_v39 = vpop.permute.xlu0 %1480 }
 0x507   : > { %v14316_v19 = vrot.slane %v16502_v53, %v22119_v0  ;;  %v11269_v1 = vpack.i.b16 %v11268_v3, %v11267_v31  ;;  %v14275_v52 = vcombine.low %v14258_v49, %v14266_v45  ;;  %v12215_v40 = vcombine.high %v20523_v11, %v22112_v44 }
 0x508   : > { %v14274_v55 = vrot.slane %v14267_v14, %v22121_v27  ;;  %v20609_v29 = vrot.slane %v20523_v11, %v22119_v0  ;;  %v14317_v2 = vcombine.low %v14292_v7, %v14300_v42  ;;  %v1680_v10 = vpack.i.b16 %v1479_v20, %v18109_v32 }
 0x509   : > { %v14325_v59 = vcombine.low %v14308_v36, %v14316_v19  ;;  %v12281_v34 = vcombine.high %v11269_v1, %v22112_v44  ;;  %v20613_v38 = vrot.slane %v11269_v1, %v22119_v0  ;;  %v14282_v23 = vrot.slane %v14275_v52, %v22121_v27  ;;  %v22164_v19 = vld [vmem:[#allocation13_spill] sm:$0xff] }
 0x50a   : > { %v20617_v31 = vrot.slane %v12215_v40, %v22119_v0  ;;  %v14324_v51 = vrot.slane %v14317_v2, %v22121_v27  ;;  %v2746_v28 = vcombine.high %v1680_v10, %v22112_v44  ;;  %v20628_v43 = vrot.slane %v1680_v10, %v22119_v0 }
 0x50b   : > { %v14332_v11 = vrot.slane %v14325_v59, %v22121_v27  ;;  %v20624_v37 = vrot.slane %v12281_v34, %v22119_v0  ;;  %v14283_v21 = vcombine.low %v14274_v55, %v14282_v23  ;;  %v14284_v56 = vcombine.high %v14274_v55, %v14282_v23 }
 0x50c   : > { %v1684_v32 = vpack.i.b16 %v1683_v35, %v1682_v47  ;;  %v11275_v48 = vshrl.u32 %v11116_v25, 16  ;;  %v20631_v41 = vrot.slane %v2746_v28, %v22119_v0  ;;  %v1690_v26 = vshrl.u32 %v1511_v15, 16 }
 0x50d   : > { %v14333_v62 = vcombine.low %v14324_v51, %v14332_v11  ;;  %v14334_v61 = vcombine.high %v14324_v51, %v14332_v11  ;;  %v15222_v46 = vshrl.u32 %v14283_v21, 16  ;;  %v15228_v30 = vshrl.u32 %v14284_v56, 16 }
 0x50e   : > { %v2812_v22 = vcombine.high %v1684_v32, %v22112_v44  ;;  %v20635_v33 = vrot.slane %v1684_v32, %v22119_v0  ;;  %v11273_v9 = vpack.i.b16 %v11148_v16, %v11116_v25  ;;  %v11276_v13 = vshrl.u32 %v11148_v16, 16 }
 0x50f   : > { %v15221_v24 = vpack.i.b16 %v14333_v62, %v14283_v21  ;;  %v15223_v63 = vshrl.u32 %v14333_v62, 16  ;;  %v15227_v18 = vpack.i.b16 %v14334_v61, %v14284_v56  ;;  %v15229_v58 = vshrl.u32 %v14334_v61, 16 }
 0x510   : > { %v20638_v17 = vrot.slane %v2812_v22, %v22119_v0  ;;  %v11277_v6 = vpack.i.b16 %v11276_v13, %v11275_v48  ;;  %v12230_v45 = vcombine.high %v11273_v9, %v22112_v44  ;;  %v12237_v14 = vrot.slane %v11273_v9, %v22119_v0 }
 0x511   : > { %v15224_v50 = vpack.i.b16 %v15223_v63, %v15222_v46  ;;  %v15230_v5 = vpack.i.b16 %v15229_v58, %v15228_v30  ;;  %v16549_v57 = vcombine.low %v15221_v24, %v15221_v24  ;;  %v16550_v60 = vcombine.high %v15221_v24, %v15221_v24 }
 0x512   : > { %v16613_v54 = vcombine.low %v15227_v18, %v15227_v18  ;;  %v16614_v4 = vcombine.high %v15227_v18, %v15227_v18  ;;  %v12296_v7 = vcombine.high %v11277_v6, %v22112_v44  ;;  %v12303_v25 = vrot.slane %v11277_v6, %v22119_v0 }
 0x513   : > { %v16581_v53 = vcombine.low %v15224_v50, %v15224_v50  ;;  %v16582_v3 = vcombine.high %v15224_v50, %v15224_v50  ;;  %v16645_v20 = vcombine.low %v15230_v5, %v15230_v5  ;;  %v16646_v49 = vcombine.high %v15230_v5, %v15230_v5  ;;  %15725 = vst.msk [vmem:[%s19921_s9 + $0x38] sm:$0xf] %vm6110_vm0, %v16549_v57 }
 0x514   : > { %15726 = vst.msk [vmem:[%s19921_s9 + $0x3c] sm:$0xf] %vm6110_vm0, %v16550_v60  ;;  %15789 = vst.msk [vmem:[%s19921_s9 + $0x138] sm:$0xf] %vm6110_vm0, %v16613_v54  ;;  %v1688_v42 = vpack.i.b16 %v1543_v8, %v1511_v15  ;;  %v1691_v36 = vshrl.u32 %v1543_v8, 16  ;;  %v1698_v1 = vshrl.u32 %v22164_v19, 16  ;;  %v20665_v55 = vpack.i.b16 %v20640_v39, %v22164_v19 }
 0x515   : > { %15790 = vst.msk [vmem:[%s19921_s9 + $0x13c] sm:$0xf] %vm6110_vm0, %v16614_v4  ;;  %15757 = vst.msk [vmem:[%s19921_s9 + $0xb8] sm:$0xf] %vm6110_vm0, %v16581_v53  ;;  %v12244_v52 = vrot.slane %v12230_v45, %v22119_v0  ;;  %v12245_v40 = vcombine.low %v20609_v29, %v12237_v14  ;;  %v12246_v2 = vcombine.high %v20609_v29, %v12237_v14 }
 0x516   : > { %15758 = vst.msk [vmem:[%s19921_s9 + $0xbc] sm:$0xf] %vm6110_vm0, %v16582_v3  ;;  %15821 = vst.msk [vmem:[%s19921_s9 + $0x1b8] sm:$0xf] %vm6110_vm0, %v16645_v20  ;;  %v12310_v59 = vrot.slane %v12296_v7, %v22119_v0  ;;  %v12311_v34 = vcombine.low %v20613_v38, %v12303_v25  ;;  %v12312_v23 = vcombine.high %v20613_v38, %v12303_v25 }
 0x517   : > { %15822 = vst.msk [vmem:[%s19921_s9 + $0x1bc] sm:$0xf] %vm6110_vm0, %v16646_v49  ;;  %v1692_v10 = vpack.i.b16 %v1691_v36, %v1690_v26  ;;  %v2761_v47 = vcombine.high %v1688_v42, %v22112_v44  ;;  %v12253_v51 = vrot.slane %v12245_v40, %v22121_v27  ;;  %v12260_v11 = vrot.slane %v12246_v2, %v22121_v27 }
 0x518   : > { %v12261_v35 = vcombine.low %v20617_v31, %v12244_v52  ;;  %v12262_v15 = vcombine.high %v20617_v31, %v12244_v52  ;;  %v12319_v21 = vrot.slane %v12311_v34, %v22121_v27  ;;  %v12326_v29 = vrot.slane %v12312_v23, %v22121_v27 }
 0x519   : > { %v12327_v56 = vcombine.low %v20624_v37, %v12310_v59  ;;  %v12328_v28 = vcombine.high %v20624_v37, %v12310_v59  ;;  %v14135_v62 = vcombine.low %v12253_v51, %v12260_v11  ;;  %v16495_v61 = vcombine.high %v12253_v51, %v12260_v11 }
 0x51a   : > { %v12269_v38 = vrot.slane %v12261_v35, %v22121_v27  ;;  %v12276_v16 = vrot.slane %v12262_v15, %v22121_v27  ;;  %v14185_v46 = vcombine.low %v12319_v21, %v12326_v29  ;;  %v16497_v31 = vcombine.high %v12319_v21, %v12326_v29 }
 0x51b   : > { %v12335_v32 = vrot.slane %v12327_v56, %v22121_v27  ;;  %v12342_v48 = vrot.slane %v12328_v28, %v22121_v27  ;;  %v14142_v30 = vrot.slane %v14135_v62, %v22119_v0  ;;  %v14150_v26 = vrot.slane %v16495_v61, %v22119_v0 }
 0x51c   : > { %v14151_v24 = vcombine.low %v12269_v38, %v12276_v16  ;;  %v16496_v63 = vcombine.high %v12269_v38, %v12276_v16  ;;  %v14192_v37 = vrot.slane %v14185_v46, %v22119_v0  ;;  %v14200_v18 = vrot.slane %v16497_v31, %v22119_v0 }
 0x51d   : > { %v14201_v58 = vcombine.low %v12335_v32, %v12342_v48  ;;  %v16498_v22 = vcombine.high %v12335_v32, %v12342_v48  ;;  %v14167_v50 = vcombine.low %v14142_v30, %v14150_v26  ;;  %v2768_v5 = vrot.slane %v1688_v42, %v22119_v0 }
 0x51e   : > { %v14158_v9 = vrot.slane %v14151_v24, %v22119_v0  ;;  %v14166_v13 = vrot.slane %v16496_v63, %v22119_v0  ;;  %v14217_v54 = vcombine.low %v14192_v37, %v14200_v18  ;;  %v2775_v4 = vrot.slane %v2761_v47, %v22119_v0 }
 0x51f   : > { %v14208_v57 = vrot.slane %v14201_v58, %v22119_v0  ;;  %v14216_v60 = vrot.slane %v16498_v22, %v22119_v0  ;;  %v14174_v6 = vrot.slane %v14167_v50, %v22121_v27  ;;  %v2776_v53 = vcombine.low %v20628_v43, %v2768_v5 }
 0x520   : > { %v14175_v8 = vcombine.low %v14158_v9, %v14166_v13  ;;  %v2777_v3 = vcombine.high %v20628_v43, %v2768_v5  ;;  %v14224_v20 = vrot.slane %v14217_v54, %v22121_v27  ;;  %v2792_v45 = vcombine.low %v20631_v41, %v2775_v4 }
 0x521   : > { %v14225_v49 = vcombine.low %v14208_v57, %v14216_v60  ;;  %v2793_v14 = vcombine.high %v20631_v41, %v2775_v4  ;;  %v2784_v25 = vrot.slane %v2776_v53, %v22121_v27  ;;  %v2827_v36 = vcombine.high %v1692_v10, %v22112_v44 }
 0x522   : > { %v14182_v7 = vrot.slane %v14175_v8, %v22121_v27  ;;  %v2791_v42 = vrot.slane %v2777_v3, %v22121_v27  ;;  %v2800_v40 = vrot.slane %v2792_v45, %v22121_v27  ;;  %v2834_v2 = vrot.slane %v1692_v10, %v22119_v0 }
 0x523   : > { %v14232_v52 = vrot.slane %v14225_v49, %v22121_v27  ;;  %v2807_v43 = vrot.slane %v2793_v14, %v22121_v27  ;;  %v2841_v41 = vrot.slane %v2827_v36, %v22119_v0  ;;  %v1699_v4 = vshrl.u32 %v20640_v39, 16  ;;  %v1513_v49 = vpop.permute.xlu0 %1512 }
 0x524   : > { %v14183_v59 = vcombine.low %v14174_v6, %v14182_v7  ;;  %v14184_v34 = vcombine.high %v14174_v6, %v14182_v7  ;;  %v4634_v23 = vcombine.low %v2784_v25, %v2791_v42  ;;  %v2842_v11 = vcombine.low %v20635_v33, %v2834_v2  ;;  %v6286_v6 = vpop.permute.xlu1 %6285 }
 0x525   : > { %v14233_v47 = vcombine.low %v14224_v20, %v14232_v52  ;;  %v14234_v51 = vcombine.high %v14224_v20, %v14232_v52  ;;  %v2843_v35 = vcombine.high %v20635_v33, %v2834_v2  ;;  %v2858_v29 = vcombine.low %v20638_v17, %v2841_v41 }
 0x526   : > { %v15210_v15 = vshrl.u32 %v14183_v59, 16  ;;  %v15216_v21 = vshrl.u32 %v14184_v34, 16  ;;  %v2859_v56 = vcombine.high %v20638_v17, %v2841_v41  ;;  %v2850_v62 = vrot.slane %v2842_v11, %v22121_v27 }
 0x527   : > { %v15209_v28 = vpack.i.b16 %v14233_v47, %v14183_v59  ;;  %v15211_v38 = vshrl.u32 %v14233_v47, 16  ;;  %v15215_v10 = vpack.i.b16 %v14234_v51, %v14184_v34  ;;  %v15217_v16 = vshrl.u32 %v14234_v51, 16  ;;  %v22165_v34 = vld [vmem:[#allocation11_spill] sm:$0xff] }
 0x528   : > { %v2857_v61 = vrot.slane %v2843_v35, %v22121_v27  ;;  %v2866_v32 = vrot.slane %v2858_v29, %v22121_v27  ;;  %v2873_v33 = vrot.slane %v2859_v56, %v22121_v27  ;;  %v4641_v24 = vrot.slane %v4634_v23, %v22119_v0  ;;  %v6318_v35 = vpop.permute.xlu1 %6317 }
 0x529   : > { %v15212_v48 = vpack.i.b16 %v15211_v38, %v15210_v15  ;;  %v15218_v46 = vpack.i.b16 %v15217_v16, %v15216_v21  ;;  %v16547_v31 = vcombine.low %v15209_v28, %v15209_v28  ;;  %v16548_v17 = vcombine.high %v15209_v28, %v15209_v28  ;;  %v1545_v28 = vpop.permute.xlu0 %1544 }
 0x52a   : > { %v16611_v30 = vcombine.low %v15215_v10, %v15215_v10  ;;  %v16612_v26 = vcombine.high %v15215_v10, %v15215_v10  ;;  %v16115_v63 = vcombine.high %v2784_v25, %v2791_v42  ;;  %v4650_v13 = vcombine.low %v2800_v40, %v2807_v43 }
 0x52b   : > { %v16579_v37 = vcombine.low %v15212_v48, %v15212_v48  ;;  %v16580_v18 = vcombine.high %v15212_v48, %v15212_v48  ;;  %v16643_v58 = vcombine.low %v15218_v46, %v15218_v46  ;;  %v16644_v22 = vcombine.high %v15218_v46, %v15218_v46  ;;  %15723 = vst.msk [vmem:[%s19921_s9 + $0x30] sm:$0xf] %vm6110_vm0, %v16547_v31 }
 0x52c   : > { %15724 = vst.msk [vmem:[%s19921_s9 + $0x34] sm:$0xf] %vm6110_vm0, %v16548_v17  ;;  %15787 = vst.msk [vmem:[%s19921_s9 + $0x130] sm:$0xf] %vm6110_vm0, %v16611_v30  ;;  %v4649_v9 = vrot.slane %v16115_v63, %v22119_v0  ;;  %v16116_v50 = vcombine.high %v2800_v40, %v2807_v43  ;;  %v4684_v5 = vcombine.low %v2850_v62, %v2857_v61  ;;  %v6483_v41 = vshrl.u32 %v22165_v34, 16 }
 0x52d   : > { %15788 = vst.msk [vmem:[%s19921_s9 + $0x134] sm:$0xf] %vm6110_vm0, %v16612_v26  ;;  %15755 = vst.msk [vmem:[%s19921_s9 + $0xb0] sm:$0xf] %vm6110_vm0, %v16579_v37  ;;  %v16117_v57 = vcombine.high %v2850_v62, %v2857_v61  ;;  %v4700_v60 = vcombine.low %v2866_v32, %v2873_v33  ;;  %v16118_v54 = vcombine.high %v2866_v32, %v2873_v33  ;;  %v6484_v11 = vshrl.u32 %v6286_v6, 16 }
 0x52e   : > { %15756 = vst.msk [vmem:[%s19921_s9 + $0xb4] sm:$0xf] %vm6110_vm0, %v16580_v18  ;;  %15819 = vst.msk [vmem:[%s19921_s9 + $0x1b0] sm:$0xf] %vm6110_vm0, %v16643_v58  ;;  %v4657_v8 = vrot.slane %v4650_v13, %v22119_v0  ;;  %v4665_v53 = vrot.slane %v16116_v50, %v22119_v0  ;;  %v4666_v3 = vcombine.low %v4641_v24, %v4649_v9  ;;  %v1706_v62 = vshrl.u32 %v1513_v49, 16 }
 0x52f   : > { %15820 = vst.msk [vmem:[%s19921_s9 + $0x1b4] sm:$0xf] %vm6110_vm0, %v16644_v22  ;;  %v4691_v20 = vrot.slane %v4684_v5, %v22119_v0  ;;  %v4699_v45 = vrot.slane %v16117_v57, %v22119_v0  ;;  %v4707_v14 = vrot.slane %v4700_v60, %v22119_v0  ;;  %v4715_v7 = vrot.slane %v16118_v54, %v22119_v0  ;;  %v6350_v60 = vpop.permute.xlu1 %6349  ;;  %v20782_v54 = vpop.permute.xlu0 %6287 }
 0x530   : > { %v1700_v25 = vpack.i.b16 %v1699_v4, %v1698_v1  ;;  %v4673_v39 = vrot.slane %v4666_v3, %v22121_v27  ;;  %v4674_v42 = vcombine.low %v4657_v8, %v4665_v53  ;;  %v2878_v36 = vcombine.high %v20665_v55, %v22112_v44 }
 0x531   : > { %v20751_v52 = vrot.slane %v20665_v55, %v22119_v0  ;;  %v4716_v40 = vcombine.low %v4691_v20, %v4699_v45  ;;  %v4724_v43 = vcombine.low %v4707_v14, %v4715_v7  ;;  %v6481_v23 = vpack.i.b16 %v6286_v6, %v22165_v34 }
 0x532   : > { %v2944_v2 = vcombine.high %v1700_v25, %v22112_v44  ;;  %v20755_v59 = vrot.slane %v1700_v25, %v22119_v0  ;;  %v4681_v19 = vrot.slane %v4674_v42, %v22121_v27  ;;  %v20759_v1 = vrot.slane %v2878_v36, %v22119_v0  ;;  %v22166_v25 = vld [vmem:[#allocation22_spill] sm:$0xff] }
 0x533   : > { %v4723_v47 = vrot.slane %v4716_v40, %v22121_v27  ;;  %v4731_v55 = vrot.slane %v4724_v43, %v22121_v27  ;;  %v7547_v29 = vcombine.high %v6481_v23, %v22112_v44  ;;  %v20770_v56 = vrot.slane %v6481_v23, %v22119_v0 }
 0x534   : > { %v20766_v51 = vrot.slane %v2944_v2, %v22119_v0  ;;  %v4682_v15 = vcombine.low %v4673_v39, %v4681_v19  ;;  %v4683_v21 = vcombine.high %v4673_v39, %v4681_v19  ;;  %v6485_v16 = vpack.i.b16 %v6484_v11, %v6483_v41 }
 0x535   : > { %v4732_v38 = vcombine.low %v4723_v47, %v4731_v55  ;;  %v4733_v10 = vcombine.high %v4723_v47, %v4731_v55  ;;  %v20773_v33 = vrot.slane %v7547_v29, %v22119_v0  ;;  %v6491_v48 = vshrl.u32 %v6318_v35, 16 }
 0x536   : > { %v5621_v61 = vshrl.u32 %v4682_v15, 16  ;;  %v5627_v32 = vshrl.u32 %v4683_v21, 16  ;;  %v7613_v26 = vcombine.high %v6485_v16, %v22112_v44  ;;  %v20777_v24 = vrot.slane %v6485_v16, %v22119_v0 }
 0x537   : > { %v5620_v46 = vpack.i.b16 %v4732_v38, %v4682_v15  ;;  %v5622_v31 = vshrl.u32 %v4732_v38, 16  ;;  %v5626_v17 = vpack.i.b16 %v4733_v10, %v4683_v21  ;;  %v5628_v30 = vshrl.u32 %v4733_v10, 16 }
 0x538   : > { %v1704_v63 = vpack.i.b16 %v1545_v28, %v1513_v49  ;;  %v1707_v37 = vshrl.u32 %v1545_v28, 16  ;;  %v20780_v5 = vrot.slane %v7613_v26, %v22119_v0  ;;  %v6489_v14 = vpack.i.b16 %v6350_v60, %v6318_v35 }
 0x539   : > { %v5623_v18 = vpack.i.b16 %v5622_v31, %v5621_v61  ;;  %v5629_v58 = vpack.i.b16 %v5628_v30, %v5627_v32  ;;  %v16165_v22 = vcombine.low %v5620_v46, %v5620_v46  ;;  %v16166_v9 = vcombine.high %v5620_v46, %v5620_v46 }
 0x53a   : > { %v16229_v13 = vcombine.low %v5626_v17, %v5626_v17  ;;  %v16230_v50 = vcombine.high %v5626_v17, %v5626_v17  ;;  %v1708_v57 = vpack.i.b16 %v1707_v37, %v1706_v62  ;;  %v2893_v3 = vcombine.high %v1704_v63, %v22112_v44 }
 0x53b   : > { %v16197_v4 = vcombine.low %v5623_v18, %v5623_v18  ;;  %v16198_v6 = vcombine.high %v5623_v18, %v5623_v18  ;;  %v16261_v8 = vcombine.low %v5629_v58, %v5629_v58  ;;  %v16262_v53 = vcombine.high %v5629_v58, %v5629_v58  ;;  %6125 = vst.msk [vmem:[%s18390_s24 + $0x38] sm:$0xf] %vm6110_vm0, %v16165_v22 }
 0x53c   : > { %6126 = vst.msk [vmem:[%s18390_s24 + $0x3c] sm:$0xf] %vm6110_vm0, %v16166_v9  ;;  %6189 = vst.msk [vmem:[%s18390_s24 + $0x138] sm:$0xf] %vm6110_vm0, %v16229_v13  ;;  %v2900_v20 = vrot.slane %v1704_v63, %v22119_v0  ;;  %v2959_v49 = vcombine.high %v1708_v57, %v22112_v44  ;;  %v2966_v45 = vrot.slane %v1708_v57, %v22119_v0  ;;  %v6492_v7 = vshrl.u32 %v6350_v60, 16 }
 0x53d   : > { %6190 = vst.msk [vmem:[%s18390_s24 + $0x13c] sm:$0xf] %vm6110_vm0, %v16230_v50  ;;  %6157 = vst.msk [vmem:[%s18390_s24 + $0xb8] sm:$0xf] %vm6110_vm0, %v16197_v4  ;;  %v6499_v39 = vshrl.u32 %v22166_v25, 16  ;;  %v20807_v42 = vpack.i.b16 %v20782_v54, %v22166_v25  ;;  %v2907_v36 = vrot.slane %v2893_v3, %v22119_v0  ;;  %v7562_v23 = vcombine.high %v6489_v14, %v22112_v44 }
 0x53e   : > { %6158 = vst.msk [vmem:[%s18390_s24 + $0xbc] sm:$0xf] %vm6110_vm0, %v16198_v6  ;;  %6221 = vst.msk [vmem:[%s18390_s24 + $0x1b8] sm:$0xf] %vm6110_vm0, %v16261_v8  ;;  %v2908_v40 = vcombine.low %v20751_v52, %v2900_v20  ;;  %v2909_v43 = vcombine.high %v20751_v52, %v2900_v20  ;;  %v2973_v2 = vrot.slane %v2959_v49, %v22119_v0 }
 0x53f   : > { %6222 = vst.msk [vmem:[%s18390_s24 + $0x1bc] sm:$0xf] %vm6110_vm0, %v16262_v53  ;;  %v2974_v19 = vcombine.low %v20755_v59, %v2966_v45  ;;  %v2975_v34 = vcombine.high %v20755_v59, %v2966_v45  ;;  %v6493_v41 = vpack.i.b16 %v6492_v7, %v6491_v48  ;;  %v2924_v11 = vcombine.low %v20759_v1, %v2907_v36 }
 0x540   : > { %v2916_v47 = vrot.slane %v2908_v40, %v22121_v27  ;;  %v2923_v55 = vrot.slane %v2909_v43, %v22121_v27  ;;  %v2925_v35 = vcombine.high %v20759_v1, %v2907_v36  ;;  %v2990_v21 = vcombine.low %v20766_v51, %v2973_v2 }
 0x541   : > { %v2982_v15 = vrot.slane %v2974_v19, %v22121_v27  ;;  %v2989_v52 = vrot.slane %v2975_v34, %v22121_v27  ;;  %v2991_v29 = vcombine.high %v20766_v51, %v2973_v2  ;;  %v2932_v59 = vrot.slane %v2924_v11, %v22121_v27 }
 0x542   : > { %v2939_v28 = vrot.slane %v2925_v35, %v22121_v27  ;;  %v4734_v38 = vcombine.low %v2916_v47, %v2923_v55  ;;  %v16119_v10 = vcombine.high %v2916_v47, %v2923_v55  ;;  %v2998_v16 = vrot.slane %v2990_v21, %v22121_v27 }
 0x543   : > { %v3005_v62 = vrot.slane %v2991_v29, %v22121_v27  ;;  %v4784_v61 = vcombine.low %v2982_v15, %v2989_v52  ;;  %v16121_v1 = vcombine.high %v2982_v15, %v2989_v52  ;;  %v7569_v58 = vrot.slane %v6489_v14, %v22119_v0 }
 0x544   : > { %v4741_v32 = vrot.slane %v4734_v38, %v22119_v0  ;;  %v4749_v48 = vrot.slane %v16119_v10, %v22119_v0  ;;  %v4750_v46 = vcombine.low %v2932_v59, %v2939_v28  ;;  %v16120_v31 = vcombine.high %v2932_v59, %v2939_v28 }
 0x545   : > { %v4791_v51 = vrot.slane %v4784_v61, %v22119_v0  ;;  %v4799_v17 = vrot.slane %v16121_v1, %v22119_v0  ;;  %v4800_v30 = vcombine.low %v2998_v16, %v3005_v62  ;;  %v16122_v26 = vcombine.high %v2998_v16, %v3005_v62 }
 0x546   : > { %v4757_v63 = vrot.slane %v4750_v46, %v22119_v0  ;;  %v4765_v37 = vrot.slane %v16120_v31, %v22119_v0  ;;  %v4766_v18 = vcombine.low %v4741_v32, %v4749_v48  ;;  %v7576_v50 = vrot.slane %v7562_v23, %v22119_v0 }
 0x547   : > { %v4807_v22 = vrot.slane %v4800_v30, %v22119_v0  ;;  %v4815_v9 = vrot.slane %v16122_v26, %v22119_v0  ;;  %v4816_v13 = vcombine.low %v4791_v51, %v4799_v17  ;;  %v7577_v4 = vcombine.low %v20770_v56, %v7569_v58 }
 0x548   : > { %v4773_v57 = vrot.slane %v4766_v18, %v22121_v27  ;;  %v4774_v60 = vcombine.low %v4757_v63, %v4765_v37  ;;  %v7578_v6 = vcombine.high %v20770_v56, %v7569_v58  ;;  %v7593_v3 = vcombine.low %v20773_v33, %v7576_v50 }
 0x549   : > { %v4823_v8 = vrot.slane %v4816_v13, %v22121_v27  ;;  %v4824_v53 = vcombine.low %v4807_v22, %v4815_v9  ;;  %v7594_v20 = vcombine.high %v20773_v33, %v7576_v50  ;;  %v7585_v45 = vrot.slane %v7577_v4, %v22121_v27 }
 0x54a   : > { %v4781_v49 = vrot.slane %v4774_v60, %v22121_v27  ;;  %v7592_v14 = vrot.slane %v7578_v6, %v22121_v27  ;;  %v7628_v7 = vcombine.high %v6493_v41, %v22112_v44  ;;  %v7601_v40 = vrot.slane %v7593_v3, %v22121_v27 }
 0x54b   : > { %v4831_v36 = vrot.slane %v4824_v53, %v22121_v27  ;;  %v7608_v56 = vrot.slane %v7594_v20, %v22121_v27  ;;  %v7635_v43 = vrot.slane %v6493_v41, %v22119_v0  ;;  %v6500_v50 = vshrl.u32 %v20782_v54, 16  ;;  %v6320_v53 = vpop.permute.xlu0 %6319 }
 0x54c   : > { %v4782_v2 = vcombine.low %v4773_v57, %v4781_v49  ;;  %v4783_v19 = vcombine.high %v4773_v57, %v4781_v49  ;;  %v7642_v33 = vrot.slane %v7628_v7, %v22119_v0  ;;  %v9435_v34 = vcombine.low %v7585_v45, %v7592_v14  ;;  %v11090_v57 = vpop.permute.xlu1 %11089 }
 0x54d   : > { %v4832_v23 = vcombine.low %v4823_v8, %v4831_v36  ;;  %v4833_v47 = vcombine.high %v4823_v8, %v4831_v36  ;;  %v7643_v55 = vcombine.low %v20777_v24, %v7635_v43  ;;  %v7644_v11 = vcombine.high %v20777_v24, %v7635_v43 }
 0x54e   : > { %v5633_v35 = vshrl.u32 %v4782_v2, 16  ;;  %v5639_v15 = vshrl.u32 %v4783_v19, 16  ;;  %v7659_v52 = vcombine.low %v20780_v5, %v7642_v33  ;;  %v7660_v21 = vcombine.high %v20780_v5, %v7642_v33 }
 0x54f   : > { %v5632_v29 = vpack.i.b16 %v4832_v23, %v4782_v2  ;;  %v5634_v59 = vshrl.u32 %v4832_v23, 16  ;;  %v5638_v41 = vpack.i.b16 %v4833_v47, %v4783_v19  ;;  %v5640_v28 = vshrl.u32 %v4833_v47, 16  ;;  %v22167_v19 = vld [vmem:[#allocation29_spill] sm:$0xff] }
 0x550   : > { %v7651_v38 = vrot.slane %v7643_v55, %v22121_v27  ;;  %v7658_v10 = vrot.slane %v7644_v11, %v22121_v27  ;;  %v7667_v16 = vrot.slane %v7659_v52, %v22121_v27  ;;  %v7674_v24 = vrot.slane %v7660_v21, %v22121_v27  ;;  %v11122_v11 = vpop.permute.xlu1 %11121 }
 0x551   : > { %v5635_v62 = vpack.i.b16 %v5634_v59, %v5633_v35  ;;  %v5641_v61 = vpack.i.b16 %v5640_v28, %v5639_v15  ;;  %v16167_v1 = vcombine.low %v5632_v29, %v5632_v29  ;;  %v16168_v5 = vcombine.high %v5632_v29, %v5632_v29  ;;  %v6352_v29 = vpop.permute.xlu0 %6351 }
 0x552   : > { %v16231_v32 = vcombine.low %v5638_v41, %v5638_v41  ;;  %v16232_v48 = vcombine.high %v5638_v41, %v5638_v41  ;;  %v9442_v46 = vrot.slane %v9435_v34, %v22119_v0  ;;  %v16307_v31 = vcombine.high %v7585_v45, %v7592_v14 }
 0x553   : > { %v16199_v51 = vcombine.low %v5635_v62, %v5635_v62  ;;  %v16200_v17 = vcombine.high %v5635_v62, %v5635_v62  ;;  %v16263_v30 = vcombine.low %v5641_v61, %v5641_v61  ;;  %v16264_v26 = vcombine.high %v5641_v61, %v5641_v61  ;;  %6127 = vst.msk [vmem:[%s18390_s24 + $0x40] sm:$0xf] %vm6110_vm0, %v16167_v1 }
 0x554   : > { %6128 = vst.msk [vmem:[%s18390_s24 + $0x44] sm:$0xf] %vm6110_vm0, %v16168_v5  ;;  %6191 = vst.msk [vmem:[%s18390_s24 + $0x140] sm:$0xf] %vm6110_vm0, %v16231_v32  ;;  %v9450_v63 = vrot.slane %v16307_v31, %v22119_v0  ;;  %v9451_v37 = vcombine.low %v7601_v40, %v7608_v56  ;;  %v16308_v18 = vcombine.high %v7601_v40, %v7608_v56  ;;  %v11315_v34 = vshrl.u32 %v22167_v19, 16 }
 0x555   : > { %6192 = vst.msk [vmem:[%s18390_s24 + $0x144] sm:$0xf] %vm6110_vm0, %v16232_v48  ;;  %v9485_v58 = vcombine.low %v7651_v38, %v7658_v10  ;;  %6159 = vst.msk [vmem:[%s18390_s24 + $0xc0] sm:$0xf] %vm6110_vm0, %v16199_v51  ;;  %v16309_v22 = vcombine.high %v7651_v38, %v7658_v10  ;;  %v9501_v9 = vcombine.low %v7667_v16, %v7674_v24  ;;  %v11316_v55 = vshrl.u32 %v11090_v57, 16 }
 0x556   : > { %6160 = vst.msk [vmem:[%s18390_s24 + $0xc4] sm:$0xf] %vm6110_vm0, %v16200_v17  ;;  %6223 = vst.msk [vmem:[%s18390_s24 + $0x1c0] sm:$0xf] %vm6110_vm0, %v16263_v30  ;;  %v16310_v13 = vcombine.high %v7667_v16, %v7674_v24  ;;  %v9458_v60 = vrot.slane %v9451_v37, %v22119_v0  ;;  %v9466_v4 = vrot.slane %v16308_v18, %v22119_v0  ;;  %v6507_v38 = vshrl.u32 %v6320_v53, 16 }
 0x557   : > { %6224 = vst.msk [vmem:[%s18390_s24 + $0x1c4] sm:$0xf] %vm6110_vm0, %v16264_v26  ;;  %v9467_v6 = vcombine.low %v9442_v46, %v9450_v63  ;;  %v9492_v8 = vrot.slane %v9485_v58, %v22119_v0  ;;  %v9500_v3 = vrot.slane %v16309_v22, %v22119_v0  ;;  %v9508_v20 = vrot.slane %v9501_v9, %v22119_v0  ;;  %v11154_v9 = vpop.permute.xlu1 %11153 }
 0x558   : > { %v9516_v49 = vrot.slane %v16310_v13, %v22119_v0  ;;  %v6501_v45 = vpack.i.b16 %v6500_v50, %v6499_v39  ;;  %v9475_v14 = vcombine.low %v9458_v60, %v9466_v4  ;;  %v7679_v7 = vcombine.high %v20807_v42, %v22112_v44  ;;  %v20924_v13 = vpop.permute.xlu0 %11087 }
 0x559   : > { %v9474_v54 = vrot.slane %v9467_v6, %v22121_v27  ;;  %v20893_v36 = vrot.slane %v20807_v42, %v22119_v0  ;;  %v9517_v40 = vcombine.low %v9492_v8, %v9500_v3  ;;  %v11313_v33 = vpack.i.b16 %v11090_v57, %v22167_v19 }
 0x55a   : > { %v9525_v56 = vcombine.low %v9508_v20, %v9516_v49  ;;  %v7745_v43 = vcombine.high %v6501_v45, %v22112_v44  ;;  %v20897_v2 = vrot.slane %v6501_v45, %v22119_v0  ;;  %v9482_v25 = vrot.slane %v9475_v14, %v22121_v27  ;;  %v22168_v45 = vld [vmem:[#allocation17_spill] sm:$0xff] }
 0x55b   : > { %v20901_v39 = vrot.slane %v7679_v7, %v22119_v0  ;;  %v9524_v23 = vrot.slane %v9517_v40, %v22121_v27  ;;  %v12611_v52 = vcombine.high %v11313_v33, %v22112_v44  ;;  %v20912_v21 = vrot.slane %v11313_v33, %v22119_v0 }
 0x55c   : > { %v9532_v42 = vrot.slane %v9525_v56, %v22121_v27  ;;  %v20908_v47 = vrot.slane %v7745_v43, %v22119_v0  ;;  %v9483_v35 = vcombine.low %v9474_v54, %v9482_v25  ;;  %v9484_v15 = vcombine.high %v9474_v54, %v9482_v25 }
 0x55d   : > { %v11317_v28 = vpack.i.b16 %v11316_v55, %v11315_v34  ;;  %v20915_v24 = vrot.slane %v12611_v52, %v22119_v0  ;;  %v11323_v62 = vshrl.u32 %v11122_v11, 16  ;;  %v6505_v31 = vpack.i.b16 %v6352_v29, %v6320_v53 }
 0x55e   : > { %v9533_v59 = vcombine.low %v9524_v23, %v9532_v42  ;;  %v9534_v41 = vcombine.high %v9524_v23, %v9532_v42  ;;  %v10422_v10 = vshrl.u32 %v9483_v35, 16  ;;  %v10428_v16 = vshrl.u32 %v9484_v15, 16 }
 0x55f   : > { %v12677_v48 = vcombine.high %v11317_v28, %v22112_v44  ;;  %v20919_v46 = vrot.slane %v11317_v28, %v22119_v0  ;;  %v6508_v51 = vshrl.u32 %v6352_v29, 16  ;;  %v7694_v6 = vcombine.high %v6505_v31, %v22112_v44 }
 0x560   : > { %v10421_v61 = vpack.i.b16 %v9533_v59, %v9483_v35  ;;  %v10423_v1 = vshrl.u32 %v9533_v59, 16  ;;  %v10427_v5 = vpack.i.b16 %v9534_v41, %v9484_v15  ;;  %v10429_v32 = vshrl.u32 %v9534_v41, 16 }
 0x561   : > { %v20922_v58 = vrot.slane %v12677_v48, %v22119_v0  ;;  %v6509_v22 = vpack.i.b16 %v6508_v51, %v6507_v38  ;;  %v7701_v8 = vrot.slane %v6505_v31, %v22119_v0  ;;  %v11321_v20 = vpack.i.b16 %v11154_v9, %v11122_v11 }
 0x562   : > { %v10424_v17 = vpack.i.b16 %v10423_v1, %v10422_v10  ;;  %v10430_v30 = vpack.i.b16 %v10429_v32, %v10428_v16  ;;  %v16357_v26 = vcombine.low %v10421_v61, %v10421_v61  ;;  %v16358_v63 = vcombine.high %v10421_v61, %v10421_v61 }
 0x563   : > { %v16421_v37 = vcombine.low %v10427_v5, %v10427_v5  ;;  %v16422_v18 = vcombine.high %v10427_v5, %v10427_v5  ;;  %v7760_v53 = vcombine.high %v6509_v22, %v22112_v44  ;;  %v7767_v3 = vrot.slane %v6509_v22, %v22119_v0 }
 0x564   : > { %v16389_v50 = vcombine.low %v10424_v17, %v10424_v17  ;;  %v16390_v57 = vcombine.high %v10424_v17, %v10424_v17  ;;  %v16453_v60 = vcombine.low %v10430_v30, %v10430_v30  ;;  %v16454_v4 = vcombine.high %v10430_v30, %v10430_v30  ;;  %10925 = vst.msk [vmem:[%s18823_s15 + $0x38] sm:$0xf] %vm6110_vm0, %v16357_v26 }
 0x565   : > { %10926 = vst.msk [vmem:[%s18823_s15 + $0x3c] sm:$0xf] %vm6110_vm0, %v16358_v63  ;;  %10989 = vst.msk [vmem:[%s18823_s15 + $0x138] sm:$0xf] %vm6110_vm0, %v16421_v37  ;;  %v11324_v49 = vshrl.u32 %v11154_v9, 16  ;;  %v11299_v54 = vshrl.u32 %v22168_v45, 16  ;;  %v20949_v14 = vpack.i.b16 %v20924_v13, %v22168_v45  ;;  %v7708_v7 = vrot.slane %v7694_v6, %v22119_v0 }
 0x566   : > { %10990 = vst.msk [vmem:[%s18823_s15 + $0x13c] sm:$0xf] %vm6110_vm0, %v16422_v18  ;;  %10957 = vst.msk [vmem:[%s18823_s15 + $0xb8] sm:$0xf] %vm6110_vm0, %v16389_v50  ;;  %v7709_v40 = vcombine.low %v20893_v36, %v7701_v8  ;;  %v7710_v56 = vcombine.high %v20893_v36, %v7701_v8  ;;  %v7774_v43 = vrot.slane %v7760_v53, %v22119_v0 }
 0x567   : > { %10958 = vst.msk [vmem:[%s18823_s15 + $0xbc] sm:$0xf] %vm6110_vm0, %v16390_v57  ;;  %11021 = vst.msk [vmem:[%s18823_s15 + $0x1b8] sm:$0xf] %vm6110_vm0, %v16453_v60  ;;  %v7775_v25 = vcombine.low %v20897_v2, %v7767_v3  ;;  %v7776_v19 = vcombine.high %v20897_v2, %v7767_v3  ;;  %v11325_v33 = vpack.i.b16 %v11324_v49, %v11323_v62 }
 0x568   : > { %11022 = vst.msk [vmem:[%s18823_s15 + $0x1bc] sm:$0xf] %vm6110_vm0, %v16454_v4  ;;  %v12626_v34 = vcombine.high %v11321_v20, %v22112_v44  ;;  %v7717_v23 = vrot.slane %v7709_v40, %v22121_v27  ;;  %v7724_v42 = vrot.slane %v7710_v56, %v22121_v27  ;;  %v7725_v55 = vcombine.low %v20901_v39, %v7708_v7 }
 0x569   : > { %v7726_v11 = vcombine.high %v20901_v39, %v7708_v7  ;;  %v7783_v35 = vrot.slane %v7775_v25, %v22121_v27  ;;  %v7790_v36 = vrot.slane %v7776_v19, %v22121_v27  ;;  %v7791_v15 = vcombine.low %v20908_v47, %v7774_v43 }
 0x56a   : > { %v7792_v52 = vcombine.high %v20908_v47, %v7774_v43  ;;  %v7733_v2 = vrot.slane %v7725_v55, %v22121_v27  ;;  %v9535_v59 = vcombine.low %v7717_v23, %v7724_v42  ;;  %v16311_v41 = vcombine.high %v7717_v23, %v7724_v42 }
 0x56b   : > { %v7740_v29 = vrot.slane %v7726_v11, %v22121_v27  ;;  %v7799_v28 = vrot.slane %v7791_v15, %v22121_v27  ;;  %v9585_v10 = vcombine.low %v7783_v35, %v7790_v36  ;;  %v16313_v39 = vcombine.high %v7783_v35, %v7790_v36 }
 0x56c   : > { %v7806_v38 = vrot.slane %v7792_v52, %v22121_v27  ;;  %v9542_v16 = vrot.slane %v9535_v59, %v22119_v0  ;;  %v9550_v62 = vrot.slane %v16311_v41, %v22119_v0  ;;  %v12633_v30 = vrot.slane %v11321_v20, %v22119_v0 }
 0x56d   : > { %v9551_v61 = vcombine.low %v7733_v2, %v7740_v29  ;;  %v16312_v1 = vcombine.high %v7733_v2, %v7740_v29  ;;  %v9592_v47 = vrot.slane %v9585_v10, %v22119_v0  ;;  %v9600_v5 = vrot.slane %v16313_v39, %v22119_v0 }
 0x56e   : > { %v9601_v32 = vcombine.low %v7799_v28, %v7806_v38  ;;  %v16314_v48 = vcombine.high %v7799_v28, %v7806_v38  ;;  %v9567_v17 = vcombine.low %v9542_v16, %v9550_v62  ;;  %v12640_v18 = vrot.slane %v12626_v34, %v22119_v0 }
 0x56f   : > { %v9558_v31 = vrot.slane %v9551_v61, %v22119_v0  ;;  %v9566_v51 = vrot.slane %v16312_v1, %v22119_v0  ;;  %v9617_v37 = vcombine.low %v9592_v47, %v9600_v5  ;;  %v12641_v50 = vcombine.low %v20912_v21, %v12633_v30 }
 0x570   : > { %v9608_v26 = vrot.slane %v9601_v32, %v22119_v0  ;;  %v9616_v63 = vrot.slane %v16314_v48, %v22119_v0  ;;  %v9574_v22 = vrot.slane %v9567_v17, %v22121_v27  ;;  %v12642_v57 = vcombine.high %v20912_v21, %v12633_v30 }
 0x571   : > { %v9575_v9 = vcombine.low %v9558_v31, %v9566_v51  ;;  %v9624_v60 = vrot.slane %v9617_v37, %v22121_v27  ;;  %v12657_v6 = vcombine.low %v20915_v24, %v12640_v18  ;;  %v12658_v8 = vcombine.high %v20915_v24, %v12640_v18 }
 0x572   : > { %v9625_v4 = vcombine.low %v9608_v26, %v9616_v63  ;;  %v12649_v3 = vrot.slane %v12641_v50, %v22121_v27  ;;  %v12656_v20 = vrot.slane %v12642_v57, %v22121_v27  ;;  %v12692_v49 = vcombine.high %v11325_v33, %v22112_v44 }
 0x573   : > { %v9582_v53 = vrot.slane %v9575_v9, %v22121_v27  ;;  %v12665_v40 = vrot.slane %v12657_v6, %v22121_v27  ;;  %v12672_v21 = vrot.slane %v12658_v8, %v22121_v27  ;;  %v12699_v56 = vrot.slane %v11325_v33, %v22119_v0 }
 0x574   : > { %v9632_v7 = vrot.slane %v9625_v4, %v22121_v27  ;;  %v12706_v24 = vrot.slane %v12692_v49, %v22119_v0  ;;  %v14435_v19 = vcombine.low %v12649_v3, %v12656_v20  ;;  %v16507_v1 = vcombine.high %v12649_v3, %v12656_v20  ;;  %v11120_v4 = vpop.permute.xlu0 %11119 }
 0x575   : > { %v9583_v43 = vcombine.low %v9574_v22, %v9582_v53  ;;  %v9584_v25 = vcombine.high %v9574_v22, %v9582_v53  ;;  %v12707_v42 = vcombine.low %v20919_v46, %v12699_v56  ;;  %v12708_v55 = vcombine.high %v20919_v46, %v12699_v56  ;;  %v11094_v22 = vpop.permute.xlu1 %11093 }
 0x576   : > { %v9633_v34 = vcombine.low %v9624_v60, %v9632_v7  ;;  %v9634_v23 = vcombine.high %v9624_v60, %v9632_v7  ;;  %v12723_v36 = vcombine.low %v20922_v58, %v12706_v24  ;;  %v12724_v15 = vcombine.high %v20922_v58, %v12706_v24 }
 0x577   : > { %v10434_v11 = vshrl.u32 %v9583_v43, 16  ;;  %v10440_v35 = vshrl.u32 %v9584_v25, 16  ;;  %v12715_v59 = vrot.slane %v12707_v42, %v22121_v27  ;;  %v12722_v41 = vrot.slane %v12708_v55, %v22121_v27 }
 0x578   : > { %v10433_v52 = vpack.i.b16 %v9633_v34, %v9583_v43  ;;  %v10435_v2 = vshrl.u32 %v9633_v34, 16  ;;  %v10439_v33 = vpack.i.b16 %v9634_v23, %v9584_v25  ;;  %v10441_v29 = vshrl.u32 %v9634_v23, 16  ;;  %v22169_v25 = vld [vmem:[#allocation23_spill] sm:$0xff] }
 0x579   : > { %v12731_v28 = vrot.slane %v12723_v36, %v22121_v27  ;;  %v12738_v46 = vrot.slane %v12724_v15, %v22121_v27  ;;  %v14442_v61 = vrot.slane %v14435_v19, %v22119_v0  ;;  %v14450_v31 = vrot.slane %v16507_v1, %v22119_v0  ;;  %v11126_v55 = vpop.permute.xlu1 %11125 }
 0x57a   : > { %v10436_v38 = vpack.i.b16 %v10435_v2, %v10434_v11  ;;  %v10442_v10 = vpack.i.b16 %v10441_v29, %v10440_v35  ;;  %v16359_v39 = vcombine.low %v10433_v52, %v10433_v52  ;;  %v16360_v58 = vcombine.high %v10433_v52, %v10433_v52  ;;  %v11152_v52 = vpop.permute.xlu0 %11151 }
 0x57b   : > { %v16423_v16 = vcombine.low %v10439_v33, %v10439_v33  ;;  %v16424_v62 = vcombine.high %v10439_v33, %v10439_v33  ;;  %v14451_v51 = vcombine.low %v12665_v40, %v12672_v21  ;;  %v16508_v17 = vcombine.high %v12665_v40, %v12672_v21 }
 0x57c   : > { %v16391_v47 = vcombine.low %v10436_v38, %v10436_v38  ;;  %v16392_v5 = vcombine.high %v10436_v38, %v10436_v38  ;;  %v16455_v32 = vcombine.low %v10442_v10, %v10442_v10  ;;  %v16456_v48 = vcombine.high %v10442_v10, %v10442_v10  ;;  %10927 = vst.msk [vmem:[%s18823_s15 + $0x40] sm:$0xf] %vm6110_vm0, %v16359_v39 }
 0x57d   : > { %10928 = vst.msk [vmem:[%s18823_s15 + $0x44] sm:$0xf] %vm6110_vm0, %v16360_v58  ;;  %10991 = vst.msk [vmem:[%s18823_s15 + $0x140] sm:$0xf] %vm6110_vm0, %v16423_v16  ;;  %v14485_v30 = vcombine.low %v12715_v59, %v12722_v41  ;;  %v16509_v26 = vcombine.high %v12715_v59, %v12722_v41  ;;  %v14501_v63 = vcombine.low %v12731_v28, %v12738_v46  ;;  %v11300_v18 = vshrl.u32 %v20924_v13, 16 }
 0x57e   : > { %10992 = vst.msk [vmem:[%s18823_s15 + $0x144] sm:$0xf] %vm6110_vm0, %v16424_v62  ;;  %10959 = vst.msk [vmem:[%s18823_s15 + $0xc0] sm:$0xf] %vm6110_vm0, %v16391_v47  ;;  %v16510_v37 = vcombine.high %v12731_v28, %v12738_v46  ;;  %v14458_v9 = vrot.slane %v14451_v51, %v22119_v0  ;;  %v14466_v50 = vrot.slane %v16508_v17, %v22119_v0  ;;  %v11347_v19 = vshrl.u32 %v22169_v25, 16 }
 0x57f   : > { %10960 = vst.msk [vmem:[%s18823_s15 + $0xc4] sm:$0xf] %vm6110_vm0, %v16392_v5  ;;  %11023 = vst.msk [vmem:[%s18823_s15 + $0x1c0] sm:$0xf] %vm6110_vm0, %v16455_v32  ;;  %v14467_v57 = vcombine.low %v14442_v61, %v14450_v31  ;;  %v14492_v60 = vrot.slane %v14485_v30, %v22119_v0  ;;  %v14500_v6 = vrot.slane %v16509_v26, %v22119_v0  ;;  %v11348_v42 = vshrl.u32 %v11094_v22, 16 }
 0x580   : > { %11024 = vst.msk [vmem:[%s18823_s15 + $0x1c4] sm:$0xf] %vm6110_vm0, %v16456_v48  ;;  %v14508_v8 = vrot.slane %v14501_v63, %v22119_v0  ;;  %v14516_v53 = vrot.slane %v16510_v37, %v22119_v0  ;;  %v11301_v3 = vpack.i.b16 %v11300_v18, %v11299_v54  ;;  %v14475_v20 = vcombine.low %v14458_v9, %v14466_v50  ;;  %v11158_v63 = vpop.permute.xlu1 %11157  ;;  %v21066_v37 = vpop.permute.xlu0 %11091 }
 0x581   : > { %v14474_v13 = vrot.slane %v14467_v57, %v22121_v27  ;;  %v12479_v49 = vcombine.high %v20949_v14, %v22112_v44  ;;  %v21035_v7 = vrot.slane %v20949_v14, %v22119_v0  ;;  %v14517_v40 = vcombine.low %v14492_v60, %v14500_v6 }
 0x582   : > { %v14525_v21 = vcombine.low %v14508_v8, %v14516_v53  ;;  %v12545_v56 = vcombine.high %v11301_v3, %v22112_v44  ;;  %v21039_v43 = vrot.slane %v11301_v3, %v22119_v0  ;;  %v14482_v45 = vrot.slane %v14475_v20, %v22121_v27  ;;  %v22170_v3 = vld [vmem:[#allocation15_spill] sm:$0xff] }
 0x583   : > { %v21043_v54 = vrot.slane %v12479_v49, %v22119_v0  ;;  %v11345_v24 = vpack.i.b16 %v11094_v22, %v22169_v25  ;;  %v14524_v34 = vrot.slane %v14517_v40, %v22121_v27  ;;  %v11349_v29 = vpack.i.b16 %v11348_v42, %v11347_v19 }
 0x584   : > { %v14532_v14 = vrot.slane %v14525_v21, %v22121_v27  ;;  %v21050_v23 = vrot.slane %v12545_v56, %v22119_v0  ;;  %v14483_v11 = vcombine.low %v14474_v13, %v14482_v45  ;;  %v14484_v35 = vcombine.high %v14474_v13, %v14482_v45 }
 0x585   : > { %v12875_v36 = vcombine.high %v11345_v24, %v22112_v44  ;;  %v21054_v15 = vrot.slane %v11345_v24, %v22119_v0  ;;  %v11307_v59 = vshrl.u32 %v11120_v4, 16  ;;  %v11355_v38 = vshrl.u32 %v11126_v55, 16 }
 0x586   : > { %v14533_v2 = vcombine.low %v14524_v34, %v14532_v14  ;;  %v14534_v33 = vcombine.high %v14524_v34, %v14532_v14  ;;  %v15246_v41 = vshrl.u32 %v14483_v11, 16  ;;  %v15252_v28 = vshrl.u32 %v14484_v35, 16 }
 0x587   : > { %v21057_v46 = vrot.slane %v12875_v36, %v22119_v0  ;;  %v12941_v62 = vcombine.high %v11349_v29, %v22112_v44  ;;  %v21061_v61 = vrot.slane %v11349_v29, %v22119_v0  ;;  %v11305_v1 = vpack.i.b16 %v11152_v52, %v11120_v4 }
 0x588   : > { %v15245_v10 = vpack.i.b16 %v14533_v2, %v14483_v11  ;;  %v15247_v39 = vshrl.u32 %v14533_v2, 16  ;;  %v15251_v58 = vpack.i.b16 %v14534_v33, %v14484_v35  ;;  %v15253_v16 = vshrl.u32 %v14534_v33, 16 }
 0x589   : > { %v11308_v47 = vshrl.u32 %v11152_v52, 16  ;;  %v21064_v30 = vrot.slane %v12941_v62, %v22119_v0  ;;  %v12494_v57 = vcombine.high %v11305_v1, %v22112_v44  ;;  %v12501_v60 = vrot.slane %v11305_v1, %v22119_v0 }
 0x58a   : > { %v15248_v5 = vpack.i.b16 %v15247_v39, %v15246_v41  ;;  %v15254_v32 = vpack.i.b16 %v15253_v16, %v15252_v28  ;;  %v16553_v48 = vcombine.low %v15245_v10, %v15245_v10  ;;  %v16554_v31 = vcombine.high %v15245_v10, %v15245_v10 }
 0x58b   : > { %v16617_v51 = vcombine.low %v15251_v58, %v15251_v58  ;;  %v16618_v17 = vcombine.high %v15251_v58, %v15251_v58  ;;  %v11309_v26 = vpack.i.b16 %v11308_v47, %v11307_v59  ;;  %v11353_v8 = vpack.i.b16 %v11158_v63, %v11126_v55 }
 0x58c   : > { %v16585_v18 = vcombine.low %v15248_v5, %v15248_v5  ;;  %v16586_v22 = vcombine.high %v15248_v5, %v15248_v5  ;;  %v16649_v9 = vcombine.low %v15254_v32, %v15254_v32  ;;  %v16650_v50 = vcombine.high %v15254_v32, %v15254_v32  ;;  %15729 = vst.msk [vmem:[%s19921_s9 + $0x48] sm:$0xf] %vm6110_vm0, %v16553_v48 }
 0x58d   : > { %15730 = vst.msk [vmem:[%s19921_s9 + $0x4c] sm:$0xf] %vm6110_vm0, %v16554_v31  ;;  %15793 = vst.msk [vmem:[%s19921_s9 + $0x148] sm:$0xf] %vm6110_vm0, %v16617_v51  ;;  %v12560_v4 = vcombine.high %v11309_v26, %v22112_v44  ;;  %v12567_v6 = vrot.slane %v11309_v26, %v22119_v0  ;;  %v11356_v53 = vshrl.u32 %v11158_v63, 16  ;;  %v11331_v13 = vshrl.u32 %v22170_v3, 16 }
 0x58e   : > { %15794 = vst.msk [vmem:[%s19921_s9 + $0x14c] sm:$0xf] %vm6110_vm0, %v16618_v17  ;;  %15761 = vst.msk [vmem:[%s19921_s9 + $0xc8] sm:$0xf] %vm6110_vm0, %v16585_v18  ;;  %v21091_v20 = vpack.i.b16 %v21066_v37, %v22170_v3  ;;  %v12508_v49 = vrot.slane %v12494_v57, %v22119_v0  ;;  %v12509_v40 = vcombine.low %v21035_v7, %v12501_v60 }
 0x58f   : > { %15762 = vst.msk [vmem:[%s19921_s9 + $0xcc] sm:$0xf] %vm6110_vm0, %v16586_v22  ;;  %15825 = vst.msk [vmem:[%s19921_s9 + $0x1c8] sm:$0xf] %vm6110_vm0, %v16649_v9  ;;  %v12510_v21 = vcombine.high %v21035_v7, %v12501_v60  ;;  %v12574_v56 = vrot.slane %v12560_v4, %v22119_v0  ;;  %v12575_v45 = vcombine.low %v21039_v43, %v12567_v6 }
 0x590   : > { %15826 = vst.msk [vmem:[%s19921_s9 + $0x1cc] sm:$0xf] %vm6110_vm0, %v16650_v50  ;;  %v12576_v25 = vcombine.high %v21039_v43, %v12567_v6  ;;  %v11357_v24 = vpack.i.b16 %v11356_v53, %v11355_v38  ;;  %v12890_v19 = vcombine.high %v11353_v8, %v22112_v44  ;;  %v12517_v34 = vrot.slane %v12509_v40, %v22121_v27 }
 0x591   : > { %v12524_v14 = vrot.slane %v12510_v21, %v22121_v27  ;;  %v12525_v42 = vcombine.low %v21043_v54, %v12508_v49  ;;  %v12526_v55 = vcombine.high %v21043_v54, %v12508_v49  ;;  %v12583_v11 = vrot.slane %v12575_v45, %v22121_v27 }
 0x592   : > { %v12590_v7 = vrot.slane %v12576_v25, %v22121_v27  ;;  %v12591_v35 = vcombine.low %v21050_v23, %v12574_v56  ;;  %v12592_v36 = vcombine.high %v21050_v23, %v12574_v56  ;;  %v12897_v32 = vrot.slane %v11353_v8, %v22119_v0 }
 0x593   : > { %v12533_v43 = vrot.slane %v12525_v42, %v22121_v27  ;;  %v12540_v52 = vrot.slane %v12526_v55, %v22121_v27  ;;  %v14335_v2 = vcombine.low %v12517_v34, %v12524_v14  ;;  %v16503_v33 = vcombine.high %v12517_v34, %v12524_v14 }
 0x594   : > { %v12599_v29 = vrot.slane %v12591_v35, %v22121_v27  ;;  %v12606_v59 = vrot.slane %v12592_v36, %v22121_v27  ;;  %v14385_v41 = vcombine.low %v12583_v11, %v12590_v7  ;;  %v16505_v54 = vcombine.high %v12583_v11, %v12590_v7 }
 0x595   : > { %v14342_v28 = vrot.slane %v14335_v2, %v22119_v0  ;;  %v14350_v38 = vrot.slane %v16503_v33, %v22119_v0  ;;  %v14351_v10 = vcombine.low %v12533_v43, %v12540_v52  ;;  %v16504_v39 = vcombine.high %v12533_v43, %v12540_v52 }
 0x596   : > { %v14392_v23 = vrot.slane %v14385_v41, %v22119_v0  ;;  %v14400_v58 = vrot.slane %v16505_v54, %v22119_v0  ;;  %v14401_v16 = vcombine.low %v12599_v29, %v12606_v59  ;;  %v16506_v62 = vcombine.high %v12599_v29, %v12606_v59 }
 0x597   : > { %v14358_v1 = vrot.slane %v14351_v10, %v22119_v0  ;;  %v14366_v47 = vrot.slane %v16504_v39, %v22119_v0  ;;  %v14367_v5 = vcombine.low %v14342_v28, %v14350_v38  ;;  %v12904_v17 = vrot.slane %v12890_v19, %v22119_v0 }
 0x598   : > { %v14408_v48 = vrot.slane %v14401_v16, %v22119_v0  ;;  %v14416_v31 = vrot.slane %v16506_v62, %v22119_v0  ;;  %v14417_v51 = vcombine.low %v14392_v23, %v14400_v58  ;;  %v12905_v18 = vcombine.low %v21054_v15, %v12897_v32 }
 0x599   : > { %v14374_v26 = vrot.slane %v14367_v5, %v22121_v27  ;;  %v14375_v63 = vcombine.low %v14358_v1, %v14366_v47  ;;  %v12906_v22 = vcombine.high %v21054_v15, %v12897_v32  ;;  %v12921_v57 = vcombine.low %v21057_v46, %v12904_v17 }
 0x59a   : > { %v14424_v9 = vrot.slane %v14417_v51, %v22121_v27  ;;  %v14425_v50 = vcombine.low %v14408_v48, %v14416_v31  ;;  %v12922_v60 = vcombine.high %v21057_v46, %v12904_v17  ;;  %v12913_v6 = vrot.slane %v12905_v18, %v22121_v27 }
 0x59b   : > { %v14382_v4 = vrot.slane %v14375_v63, %v22121_v27  ;;  %v12920_v8 = vrot.slane %v12906_v22, %v22121_v27  ;;  %v12956_v53 = vcombine.high %v11357_v24, %v22112_v44  ;;  %v12929_v40 = vrot.slane %v12921_v57, %v22121_v27 }
 0x59c   : > { %v14432_v49 = vrot.slane %v14425_v50, %v22121_v27  ;;  %v12936_v15 = vrot.slane %v12922_v60, %v22121_v27  ;;  %v12963_v21 = vrot.slane %v11357_v24, %v22119_v0  ;;  %v11332_v17 = vshrl.u32 %v21066_v37, 16  ;;  %v11124_v50 = vpop.permute.xlu0 %11123 }
 0x59d   : > { %v14383_v56 = vcombine.low %v14374_v26, %v14382_v4  ;;  %v14384_v45 = vcombine.high %v14374_v26, %v14382_v4  ;;  %v12970_v46 = vrot.slane %v12956_v53, %v22119_v0  ;;  %v14635_v25 = vcombine.low %v12913_v6, %v12920_v8  ;;  %v1483_v26 = vpop.permute.xlu1 %1482 }
 0x59e   : > { %v14433_v19 = vcombine.low %v14424_v9, %v14432_v49  ;;  %v14434_v34 = vcombine.high %v14424_v9, %v14432_v49  ;;  %v12971_v14 = vcombine.low %v21061_v61, %v12963_v21  ;;  %v12972_v42 = vcombine.high %v21061_v61, %v12963_v21 }
 0x59f   : > { %v15234_v55 = vshrl.u32 %v14383_v56, 16  ;;  %v15240_v11 = vshrl.u32 %v14384_v45, 16  ;;  %v12987_v7 = vcombine.low %v21064_v30, %v12970_v46  ;;  %v12988_v35 = vcombine.high %v21064_v30, %v12970_v46 }
 0x5a0   : > { %v15233_v36 = vpack.i.b16 %v14433_v19, %v14383_v56  ;;  %v15235_v43 = vshrl.u32 %v14433_v19, 16  ;;  %v15239_v24 = vpack.i.b16 %v14434_v34, %v14384_v45  ;;  %v15241_v52 = vshrl.u32 %v14434_v34, 16  ;;  %v22171_v45 = vld [vmem:[#allocation24_spill] sm:$0xff] }
 0x5a1   : > { %v12979_v2 = vrot.slane %v12971_v14, %v22121_v27  ;;  %v12986_v33 = vrot.slane %v12972_v42, %v22121_v27  ;;  %v12995_v29 = vrot.slane %v12987_v7, %v22121_v27  ;;  %v13002_v61 = vrot.slane %v12988_v35, %v22121_v27  ;;  %v1515_v42 = vpop.permute.xlu1 %1514 }
 0x5a2   : > { %v15236_v59 = vpack.i.b16 %v15235_v43, %v15234_v55  ;;  %v15242_v41 = vpack.i.b16 %v15241_v52, %v15240_v11  ;;  %v16551_v54 = vcombine.low %v15233_v36, %v15233_v36  ;;  %v16552_v30 = vcombine.high %v15233_v36, %v15233_v36  ;;  %v11156_v36 = vpop.permute.xlu0 %11155 }
 0x5a3   : > { %v16615_v28 = vcombine.low %v15239_v24, %v15239_v24  ;;  %v16616_v38 = vcombine.high %v15239_v24, %v15239_v24  ;;  %v14642_v10 = vrot.slane %v14635_v25, %v22119_v0  ;;  %v16515_v39 = vcombine.high %v12913_v6, %v12920_v8 }
 0x5a4   : > { %v16583_v23 = vcombine.low %v15236_v59, %v15236_v59  ;;  %v16584_v58 = vcombine.high %v15236_v59, %v15236_v59  ;;  %v16647_v16 = vcombine.low %v15242_v41, %v15242_v41  ;;  %v16648_v62 = vcombine.high %v15242_v41, %v15242_v41  ;;  %15727 = vst.msk [vmem:[%s19921_s9 + $0x40] sm:$0xf] %vm6110_vm0, %v16551_v54 }
 0x5a5   : > { %15728 = vst.msk [vmem:[%s19921_s9 + $0x44] sm:$0xf] %vm6110_vm0, %v16552_v30  ;;  %15791 = vst.msk [vmem:[%s19921_s9 + $0x140] sm:$0xf] %vm6110_vm0, %v16615_v28  ;;  %v14650_v1 = vrot.slane %v16515_v39, %v22119_v0  ;;  %v14651_v47 = vcombine.low %v12929_v40, %v12936_v15  ;;  %v16516_v5 = vcombine.high %v12929_v40, %v12936_v15  ;;  %v1714_v46 = vshrl.u32 %v22171_v45, 16 }
 0x5a6   : > { %15792 = vst.msk [vmem:[%s19921_s9 + $0x144] sm:$0xf] %vm6110_vm0, %v16616_v38  ;;  %v14685_v32 = vcombine.low %v12979_v2, %v12986_v33  ;;  %15759 = vst.msk [vmem:[%s19921_s9 + $0xc0] sm:$0xf] %vm6110_vm0, %v16583_v23  ;;  %v16517_v48 = vcombine.high %v12979_v2, %v12986_v33  ;;  %v14701_v31 = vcombine.low %v12995_v29, %v13002_v61  ;;  %v1715_v14 = vshrl.u32 %v1483_v26, 16 }
 0x5a7   : > { %15760 = vst.msk [vmem:[%s19921_s9 + $0xc4] sm:$0xf] %vm6110_vm0, %v16584_v58  ;;  %15823 = vst.msk [vmem:[%s19921_s9 + $0x1c0] sm:$0xf] %vm6110_vm0, %v16647_v16  ;;  %v16518_v51 = vcombine.high %v12995_v29, %v13002_v61  ;;  %v14658_v63 = vrot.slane %v14651_v47, %v22119_v0  ;;  %v14666_v18 = vrot.slane %v16516_v5, %v22119_v0  ;;  %v11339_v2 = vshrl.u32 %v11124_v50, 16 }
 0x5a8   : > { %15824 = vst.msk [vmem:[%s19921_s9 + $0x1c4] sm:$0xf] %vm6110_vm0, %v16648_v62  ;;  %v14667_v22 = vcombine.low %v14642_v10, %v14650_v1  ;;  %v14692_v9 = vrot.slane %v14685_v32, %v22119_v0  ;;  %v14700_v57 = vrot.slane %v16517_v48, %v22119_v0  ;;  %v14708_v60 = vrot.slane %v14701_v31, %v22119_v0  ;;  %v1547_v31 = vpop.permute.xlu1 %1546 }
 0x5a9   : > { %v14716_v4 = vrot.slane %v16518_v51, %v22119_v0  ;;  %v11333_v6 = vpack.i.b16 %v11332_v17, %v11331_v13  ;;  %v14675_v8 = vcombine.low %v14658_v63, %v14666_v18  ;;  %v12743_v53 = vcombine.high %v21091_v20, %v22112_v44  ;;  %v21208_v51 = vpop.permute.xlu0 %1484 }
 0x5aa   : > { %v14674_v37 = vrot.slane %v14667_v22, %v22121_v27  ;;  %v21177_v49 = vrot.slane %v21091_v20, %v22119_v0  ;;  %v14717_v40 = vcombine.low %v14692_v9, %v14700_v57  ;;  %v1712_v25 = vpack.i.b16 %v1483_v26, %v22171_v45 }
 0x5ab   : > { %v14725_v15 = vcombine.low %v14708_v60, %v14716_v4  ;;  %v12809_v21 = vcombine.high %v11333_v6, %v22112_v44  ;;  %v21181_v56 = vrot.slane %v11333_v6, %v22119_v0  ;;  %v14682_v3 = vrot.slane %v14675_v8, %v22121_v27  ;;  %v22172_v6 = vld [vmem:[#allocation18_spill] sm:$0xff] }
 0x5ac   : > { %v21185_v13 = vrot.slane %v12743_v53, %v22119_v0  ;;  %v14724_v19 = vrot.slane %v14717_v40, %v22121_v27  ;;  %v3010_v7 = vcombine.high %v1712_v25, %v22112_v44  ;;  %v21196_v35 = vrot.slane %v1712_v25, %v22119_v0 }
 0x5ad   : > { %v14732_v20 = vrot.slane %v14725_v15, %v22121_v27  ;;  %v21192_v34 = vrot.slane %v12809_v21, %v22119_v0  ;;  %v14683_v55 = vcombine.low %v14674_v37, %v14682_v3  ;;  %v14684_v11 = vcombine.high %v14674_v37, %v14682_v3 }
 0x5ae   : > { %v1716_v52 = vpack.i.b16 %v1715_v14, %v1714_v46  ;;  %v21199_v61 = vrot.slane %v3010_v7, %v22119_v0  ;;  %v1722_v59 = vshrl.u32 %v1515_v42, 16  ;;  %v11337_v39 = vpack.i.b16 %v11156_v36, %v11124_v50 }
 0x5af   : > { %v14733_v43 = vcombine.low %v14724_v19, %v14732_v20  ;;  %v14734_v24 = vcombine.high %v14724_v19, %v14732_v20  ;;  %v15270_v33 = vshrl.u32 %v14683_v55, 16  ;;  %v15276_v29 = vshrl.u32 %v14684_v11, 16 }
 0x5b0   : > { %v3076_v38 = vcombine.high %v1716_v52, %v22112_v44  ;;  %v21203_v10 = vrot.slane %v1716_v52, %v22119_v0  ;;  %v11340_v23 = vshrl.u32 %v11156_v36, 16  ;;  %v12758_v22 = vcombine.high %v11337_v39, %v22112_v44 }
 0x5b1   : > { %v15269_v41 = vpack.i.b16 %v14733_v43, %v14683_v55  ;;  %v15271_v54 = vshrl.u32 %v14733_v43, 16  ;;  %v15275_v30 = vpack.i.b16 %v14734_v24, %v14684_v11  ;;  %v15277_v28 = vshrl.u32 %v14734_v24, 16 }
 0x5b2   : > { %v21206_v32 = vrot.slane %v3076_v38, %v22119_v0  ;;  %v11341_v48 = vpack.i.b16 %v11340_v23, %v11339_v2  ;;  %v12765_v9 = vrot.slane %v11337_v39, %v22119_v0  ;;  %v1720_v60 = vpack.i.b16 %v1547_v31, %v1515_v42 }
 0x5b3   : > { %v15272_v58 = vpack.i.b16 %v15271_v54, %v15270_v33  ;;  %v15278_v16 = vpack.i.b16 %v15277_v28, %v15276_v29  ;;  %v16557_v62 = vcombine.low %v15269_v41, %v15269_v41  ;;  %v16558_v1 = vcombine.high %v15269_v41, %v15269_v41 }
 0x5b4   : > { %v16621_v47 = vcombine.low %v15275_v30, %v15275_v30  ;;  %v16622_v5 = vcombine.high %v15275_v30, %v15275_v30  ;;  %v12824_v50 = vcombine.high %v11341_v48, %v22112_v44  ;;  %v12831_v57 = vrot.slane %v11341_v48, %v22119_v0 }
 0x5b5   : > { %v16589_v17 = vcombine.low %v15272_v58, %v15272_v58  ;;  %v16590_v26 = vcombine.high %v15272_v58, %v15272_v58  ;;  %v16653_v63 = vcombine.low %v15278_v16, %v15278_v16  ;;  %v16654_v18 = vcombine.high %v15278_v16, %v15278_v16  ;;  %15733 = vst.msk [vmem:[%s19921_s9 + $0x58] sm:$0xf] %vm6110_vm0, %v16557_v62 }
 0x5b6   : > { %15734 = vst.msk [vmem:[%s19921_s9 + $0x5c] sm:$0xf] %vm6110_vm0, %v16558_v1  ;;  %15797 = vst.msk [vmem:[%s19921_s9 + $0x158] sm:$0xf] %vm6110_vm0, %v16621_v47  ;;  %v1723_v4 = vshrl.u32 %v1547_v31, 16  ;;  %v1730_v37 = vshrl.u32 %v22172_v6, 16  ;;  %v21233_v8 = vpack.i.b16 %v21208_v51, %v22172_v6  ;;  %v12772_v53 = vrot.slane %v12758_v22, %v22119_v0 }
 0x5b7   : > { %15798 = vst.msk [vmem:[%s19921_s9 + $0x15c] sm:$0xf] %vm6110_vm0, %v16622_v5  ;;  %15765 = vst.msk [vmem:[%s19921_s9 + $0xd8] sm:$0xf] %vm6110_vm0, %v16589_v17  ;;  %v12773_v40 = vcombine.low %v21177_v49, %v12765_v9  ;;  %v12774_v15 = vcombine.high %v21177_v49, %v12765_v9  ;;  %v12838_v21 = vrot.slane %v12824_v50, %v22119_v0 }
 0x5b8   : > { %15766 = vst.msk [vmem:[%s19921_s9 + $0xdc] sm:$0xf] %vm6110_vm0, %v16590_v26  ;;  %15829 = vst.msk [vmem:[%s19921_s9 + $0x1d8] sm:$0xf] %vm6110_vm0, %v16653_v63  ;;  %v12839_v3 = vcombine.low %v21181_v56, %v12831_v57  ;;  %v12840_v45 = vcombine.high %v21181_v56, %v12831_v57  ;;  %v1724_v46 = vpack.i.b16 %v1723_v4, %v1722_v59 }
 0x5b9   : > { %15830 = vst.msk [vmem:[%s19921_s9 + $0x1dc] sm:$0xf] %vm6110_vm0, %v16654_v18  ;;  %v3025_v25 = vcombine.high %v1720_v60, %v22112_v44  ;;  %v12781_v19 = vrot.slane %v12773_v40, %v22121_v27  ;;  %v12788_v20 = vrot.slane %v12774_v15, %v22121_v27  ;;  %v12789_v14 = vcombine.low %v21185_v13, %v12772_v53 }
 0x5ba   : > { %v12790_v42 = vcombine.high %v21185_v13, %v12772_v53  ;;  %v12847_v55 = vrot.slane %v12839_v3, %v22121_v27  ;;  %v12854_v49 = vrot.slane %v12840_v45, %v22121_v27  ;;  %v12855_v11 = vcombine.low %v21192_v34, %v12838_v21 }
 0x5bb   : > { %v12856_v7 = vcombine.high %v21192_v34, %v12838_v21  ;;  %v12797_v56 = vrot.slane %v12789_v14, %v22121_v27  ;;  %v14535_v43 = vcombine.low %v12781_v19, %v12788_v20  ;;  %v16511_v24 = vcombine.high %v12781_v19, %v12788_v20 }
 0x5bc   : > { %v12804_v36 = vrot.slane %v12790_v42, %v22121_v27  ;;  %v12863_v52 = vrot.slane %v12855_v11, %v22121_v27  ;;  %v14585_v33 = vcombine.low %v12847_v55, %v12854_v49  ;;  %v16513_v13 = vcombine.high %v12847_v55, %v12854_v49 }
 0x5bd   : > { %v12870_v2 = vrot.slane %v12856_v7, %v22121_v27  ;;  %v14542_v29 = vrot.slane %v14535_v43, %v22119_v0  ;;  %v14550_v59 = vrot.slane %v16511_v24, %v22119_v0  ;;  %v3032_v16 = vrot.slane %v1720_v60, %v22119_v0 }
 0x5be   : > { %v14551_v41 = vcombine.low %v12797_v56, %v12804_v36  ;;  %v16512_v54 = vcombine.high %v12797_v56, %v12804_v36  ;;  %v14592_v34 = vrot.slane %v14585_v33, %v22119_v0  ;;  %v14600_v30 = vrot.slane %v16513_v13, %v22119_v0 }
 0x5bf   : > { %v14601_v28 = vcombine.low %v12863_v52, %v12870_v2  ;;  %v16514_v38 = vcombine.high %v12863_v52, %v12870_v2  ;;  %v14567_v58 = vcombine.low %v14542_v29, %v14550_v59  ;;  %v3039_v5 = vrot.slane %v3025_v25, %v22119_v0 }
 0x5c0   : > { %v14558_v39 = vrot.slane %v14551_v41, %v22119_v0  ;;  %v14566_v23 = vrot.slane %v16512_v54, %v22119_v0  ;;  %v14617_v47 = vcombine.low %v14592_v34, %v14600_v30  ;;  %v3040_v17 = vcombine.low %v21196_v35, %v3032_v16 }
 0x5c1   : > { %v14608_v62 = vrot.slane %v14601_v28, %v22119_v0  ;;  %v14616_v1 = vrot.slane %v16514_v38, %v22119_v0  ;;  %v14574_v48 = vrot.slane %v14567_v58, %v22121_v27  ;;  %v3041_v26 = vcombine.high %v21196_v35, %v3032_v16 }
 0x5c2   : > { %v14575_v31 = vcombine.low %v14558_v39, %v14566_v23  ;;  %v14624_v63 = vrot.slane %v14617_v47, %v22121_v27  ;;  %v3056_v22 = vcombine.low %v21199_v61, %v3039_v5  ;;  %v3057_v9 = vcombine.high %v21199_v61, %v3039_v5 }
 0x5c3   : > { %v14625_v18 = vcombine.low %v14608_v62, %v14616_v1  ;;  %v3048_v57 = vrot.slane %v3040_v17, %v22121_v27  ;;  %v3055_v60 = vrot.slane %v3041_v26, %v22121_v27  ;;  %v3091_v4 = vcombine.high %v1724_v46, %v22112_v44 }
 0x5c4   : > { %v14582_v50 = vrot.slane %v14575_v31, %v22121_v27  ;;  %v3064_v40 = vrot.slane %v3056_v22, %v22121_v27  ;;  %v3071_v35 = vrot.slane %v3057_v9, %v22121_v27  ;;  %v3098_v15 = vrot.slane %v1724_v46, %v22119_v0 }
 0x5c5   : > { %v14632_v53 = vrot.slane %v14625_v18, %v22121_v27  ;;  %v3105_v61 = vrot.slane %v3091_v4, %v22119_v0  ;;  %v4834_v45 = vcombine.low %v3048_v57, %v3055_v60  ;;  %v16123_v54 = vcombine.high %v3048_v57, %v3055_v60  ;;  %v1517_v18 = vpop.permute.xlu0 %1516 }
 0x5c6   : > { %v14583_v21 = vcombine.low %v14574_v48, %v14582_v50  ;;  %v14584_v3 = vcombine.high %v14574_v48, %v14582_v50  ;;  %v3106_v20 = vcombine.low %v21203_v10, %v3098_v15  ;;  %v3107_v14 = vcombine.high %v21203_v10, %v3098_v15  ;;  %v6290_v48 = vpop.permute.xlu1 %6289 }
 0x5c7   : > { %v14633_v25 = vcombine.low %v14624_v63, %v14632_v53  ;;  %v14634_v19 = vcombine.high %v14624_v63, %v14632_v53  ;;  %v3122_v49 = vcombine.low %v21206_v32, %v3105_v61  ;;  %v3123_v11 = vcombine.high %v21206_v32, %v3105_v61 }
 0x5c8   : > { %v15258_v42 = vshrl.u32 %v14583_v21, 16  ;;  %v15264_v55 = vshrl.u32 %v14584_v3, 16  ;;  %v3114_v43 = vrot.slane %v3106_v20, %v22121_v27  ;;  %v3121_v24 = vrot.slane %v3107_v14, %v22121_v27 }
 0x5c9   : > { %v15257_v7 = vpack.i.b16 %v14633_v25, %v14583_v21  ;;  %v15259_v56 = vshrl.u32 %v14633_v25, 16  ;;  %v15263_v46 = vpack.i.b16 %v14634_v19, %v14584_v3  ;;  %v15265_v36 = vshrl.u32 %v14634_v19, 16  ;;  %v22173_v3 = vld [vmem:[#allocation20_spill] sm:$0xff] }
 0x5ca   : > { %v3130_v52 = vrot.slane %v3122_v49, %v22121_v27  ;;  %v3137_v10 = vrot.slane %v3123_v11, %v22121_v27  ;;  %v4841_v41 = vrot.slane %v4834_v45, %v22119_v0  ;;  %v4849_v39 = vrot.slane %v16123_v54, %v22119_v0  ;;  %v6322_v14 = vpop.permute.xlu1 %6321 }
 0x5cb   : > { %v15260_v2 = vpack.i.b16 %v15259_v56, %v15258_v42  ;;  %v15266_v33 = vpack.i.b16 %v15265_v36, %v15264_v55  ;;  %v16555_v13 = vcombine.low %v15257_v7, %v15257_v7  ;;  %v16556_v32 = vcombine.high %v15257_v7, %v15257_v7  ;;  %v1549_v7 = vpop.permute.xlu0 %1548 }
 0x5cc   : > { %v16619_v29 = vcombine.low %v15263_v46, %v15263_v46  ;;  %v16620_v59 = vcombine.high %v15263_v46, %v15263_v46  ;;  %v4850_v23 = vcombine.low %v3064_v40, %v3071_v35  ;;  %v16124_v58 = vcombine.high %v3064_v40, %v3071_v35 }
 0x5cd   : > { %v16587_v34 = vcombine.low %v15260_v2, %v15260_v2  ;;  %v16588_v30 = vcombine.high %v15260_v2, %v15260_v2  ;;  %v16651_v28 = vcombine.low %v15266_v33, %v15266_v33  ;;  %v16652_v38 = vcombine.high %v15266_v33, %v15266_v33  ;;  %15731 = vst.msk [vmem:[%s19921_s9 + $0x50] sm:$0xf] %vm6110_vm0, %v16555_v13 }
 0x5ce   : > { %15732 = vst.msk [vmem:[%s19921_s9 + $0x54] sm:$0xf] %vm6110_vm0, %v16556_v32  ;;  %15795 = vst.msk [vmem:[%s19921_s9 + $0x150] sm:$0xf] %vm6110_vm0, %v16619_v29  ;;  %v4884_v16 = vcombine.low %v3114_v43, %v3121_v24  ;;  %v16125_v62 = vcombine.high %v3114_v43, %v3121_v24  ;;  %v4900_v1 = vcombine.low %v3130_v52, %v3137_v10  ;;  %v1731_v5 = vshrl.u32 %v21208_v51, 16 }
 0x5cf   : > { %15796 = vst.msk [vmem:[%s19921_s9 + $0x154] sm:$0xf] %vm6110_vm0, %v16620_v59  ;;  %15763 = vst.msk [vmem:[%s19921_s9 + $0xd0] sm:$0xf] %vm6110_vm0, %v16587_v34  ;;  %v16126_v47 = vcombine.high %v3130_v52, %v3137_v10  ;;  %v4857_v31 = vrot.slane %v4850_v23, %v22119_v0  ;;  %v4865_v17 = vrot.slane %v16124_v58, %v22119_v0  ;;  %v6515_v61 = vshrl.u32 %v22173_v3, 16 }
 0x5d0   : > { %15764 = vst.msk [vmem:[%s19921_s9 + $0xd4] sm:$0xf] %vm6110_vm0, %v16588_v30  ;;  %15827 = vst.msk [vmem:[%s19921_s9 + $0x1d0] sm:$0xf] %vm6110_vm0, %v16651_v28  ;;  %v4866_v26 = vcombine.low %v4841_v41, %v4849_v39  ;;  %v4891_v63 = vrot.slane %v4884_v16, %v22119_v0  ;;  %v4899_v22 = vrot.slane %v16125_v62, %v22119_v0  ;;  %v6516_v20 = vshrl.u32 %v6290_v48, 16 }
 0x5d1   : > { %15828 = vst.msk [vmem:[%s19921_s9 + $0x1d4] sm:$0xf] %vm6110_vm0, %v16652_v38  ;;  %v4907_v9 = vrot.slane %v4900_v1, %v22119_v0  ;;  %v4915_v50 = vrot.slane %v16126_v47, %v22119_v0  ;;  %v1732_v57 = vpack.i.b16 %v1731_v5, %v1730_v37  ;;  %v4874_v60 = vcombine.low %v4857_v31, %v4865_v17  ;;  %v6354_v1 = vpop.permute.xlu1 %6353  ;;  %v21350_v47 = vpop.permute.xlu0 %6291 }
 0x5d2   : > { %v4873_v51 = vrot.slane %v4866_v26, %v22121_v27  ;;  %v3142_v4 = vcombine.high %v21233_v8, %v22112_v44  ;;  %v21319_v53 = vrot.slane %v21233_v8, %v22119_v0  ;;  %v4916_v40 = vcombine.low %v4891_v63, %v4899_v22 }
 0x5d3   : > { %v4924_v35 = vcombine.low %v4907_v9, %v4915_v50  ;;  %v3208_v15 = vcombine.high %v1732_v57, %v22112_v44  ;;  %v21323_v21 = vrot.slane %v1732_v57, %v22119_v0  ;;  %v4881_v6 = vrot.slane %v4874_v60, %v22121_v27  ;;  %v22174_v57 = vld [vmem:[#allocation26_spill] sm:$0xff] }
 0x5d4   : > { %v21327_v37 = vrot.slane %v3142_v4, %v22119_v0  ;;  %v6513_v45 = vpack.i.b16 %v6290_v48, %v22173_v3  ;;  %v4923_v25 = vrot.slane %v4916_v40, %v22121_v27  ;;  %v6517_v36 = vpack.i.b16 %v6516_v20, %v6515_v61 }
 0x5d5   : > { %v4931_v8 = vrot.slane %v4924_v35, %v22121_v27  ;;  %v21334_v19 = vrot.slane %v3208_v15, %v22119_v0  ;;  %v4882_v42 = vcombine.low %v4873_v51, %v4881_v6  ;;  %v4883_v55 = vcombine.high %v4873_v51, %v4881_v6 }
 0x5d6   : > { %v7811_v49 = vcombine.high %v6513_v45, %v22112_v44  ;;  %v21338_v11 = vrot.slane %v6513_v45, %v22119_v0  ;;  %v1738_v43 = vshrl.u32 %v1517_v18, 16  ;;  %v6523_v2 = vshrl.u32 %v6322_v14, 16 }
 0x5d7   : > { %v4932_v56 = vcombine.low %v4923_v25, %v4931_v8  ;;  %v4933_v46 = vcombine.high %v4923_v25, %v4931_v8  ;;  %v5645_v24 = vshrl.u32 %v4882_v42, 16  ;;  %v5651_v52 = vshrl.u32 %v4883_v55, 16 }
 0x5d8   : > { %v21341_v10 = vrot.slane %v7811_v49, %v22119_v0  ;;  %v7877_v59 = vcombine.high %v6517_v36, %v22112_v44  ;;  %v21345_v41 = vrot.slane %v6517_v36, %v22119_v0  ;;  %v1736_v54 = vpack.i.b16 %v1549_v7, %v1517_v18 }
 0x5d9   : > { %v5644_v33 = vpack.i.b16 %v4932_v56, %v4882_v42  ;;  %v5646_v13 = vshrl.u32 %v4932_v56, 16  ;;  %v5650_v32 = vpack.i.b16 %v4933_v46, %v4883_v55  ;;  %v5652_v29 = vshrl.u32 %v4933_v46, 16 }
 0x5da   : > { %v1739_v34 = vshrl.u32 %v1549_v7, 16  ;;  %v21348_v16 = vrot.slane %v7877_v59, %v22119_v0  ;;  %v3157_v26 = vcombine.high %v1736_v54, %v22112_v44  ;;  %v3164_v63 = vrot.slane %v1736_v54, %v22119_v0 }
 0x5db   : > { %v5647_v30 = vpack.i.b16 %v5646_v13, %v5645_v24  ;;  %v5653_v28 = vpack.i.b16 %v5652_v29, %v5651_v52  ;;  %v16169_v38 = vcombine.low %v5644_v33, %v5644_v33  ;;  %v16170_v39 = vcombine.high %v5644_v33, %v5644_v33 }
 0x5dc   : > { %v16233_v23 = vcombine.low %v5650_v32, %v5650_v32  ;;  %v16234_v58 = vcombine.high %v5650_v32, %v5650_v32  ;;  %v1740_v62 = vpack.i.b16 %v1739_v34, %v1738_v43  ;;  %v6521_v9 = vpack.i.b16 %v6354_v1, %v6322_v14 }
 0x5dd   : > { %v16201_v5 = vcombine.low %v5647_v30, %v5647_v30  ;;  %v16202_v48 = vcombine.high %v5647_v30, %v5647_v30  ;;  %v16265_v31 = vcombine.low %v5653_v28, %v5653_v28  ;;  %v16266_v17 = vcombine.high %v5653_v28, %v5653_v28  ;;  %6129 = vst.msk [vmem:[%s18390_s24 + $0x48] sm:$0xf] %vm6110_vm0, %v16169_v38 }
 0x5de   : > { %6130 = vst.msk [vmem:[%s18390_s24 + $0x4c] sm:$0xf] %vm6110_vm0, %v16170_v39  ;;  %6193 = vst.msk [vmem:[%s18390_s24 + $0x148] sm:$0xf] %vm6110_vm0, %v16233_v23  ;;  %v3223_v18 = vcombine.high %v1740_v62, %v22112_v44  ;;  %v3230_v22 = vrot.slane %v1740_v62, %v22119_v0  ;;  %v6524_v50 = vshrl.u32 %v6354_v1, 16  ;;  %v6531_v51 = vshrl.u32 %v22174_v57, 16 }
 0x5df   : > { %6194 = vst.msk [vmem:[%s18390_s24 + $0x14c] sm:$0xf] %vm6110_vm0, %v16234_v58  ;;  %6161 = vst.msk [vmem:[%s18390_s24 + $0xc8] sm:$0xf] %vm6110_vm0, %v16201_v5  ;;  %v21375_v60 = vpack.i.b16 %v21350_v47, %v22174_v57  ;;  %v3171_v4 = vrot.slane %v3157_v26, %v22119_v0  ;;  %v3172_v40 = vcombine.low %v21319_v53, %v3164_v63 }
 0x5e0   : > { %6162 = vst.msk [vmem:[%s18390_s24 + $0xcc] sm:$0xf] %vm6110_vm0, %v16202_v48  ;;  %6225 = vst.msk [vmem:[%s18390_s24 + $0x1c8] sm:$0xf] %vm6110_vm0, %v16265_v31  ;;  %v3173_v35 = vcombine.high %v21319_v53, %v3164_v63  ;;  %v3237_v15 = vrot.slane %v3223_v18, %v22119_v0  ;;  %v3238_v6 = vcombine.low %v21323_v21, %v3230_v22 }
 0x5e1   : > { %6226 = vst.msk [vmem:[%s18390_s24 + $0x1cc] sm:$0xf] %vm6110_vm0, %v16266_v17  ;;  %v3239_v3 = vcombine.high %v21323_v21, %v3230_v22  ;;  %v6525_v61 = vpack.i.b16 %v6524_v50, %v6523_v2  ;;  %v7826_v45 = vcombine.high %v6521_v9, %v22112_v44  ;;  %v3180_v25 = vrot.slane %v3172_v40, %v22121_v27 }
 0x5e2   : > { %v3187_v8 = vrot.slane %v3173_v35, %v22121_v27  ;;  %v3188_v20 = vcombine.low %v21327_v37, %v3171_v4  ;;  %v3189_v14 = vcombine.high %v21327_v37, %v3171_v4  ;;  %v3246_v42 = vrot.slane %v3238_v6, %v22121_v27 }
 0x5e3   : > { %v3253_v53 = vrot.slane %v3239_v3, %v22121_v27  ;;  %v3254_v55 = vcombine.low %v21334_v19, %v3237_v15  ;;  %v3255_v49 = vcombine.high %v21334_v19, %v3237_v15  ;;  %v7833_v28 = vrot.slane %v6521_v9, %v22119_v0 }
 0x5e4   : > { %v3196_v21 = vrot.slane %v3188_v20, %v22121_v27  ;;  %v3203_v7 = vrot.slane %v3189_v14, %v22121_v27  ;;  %v4934_v56 = vcombine.low %v3180_v25, %v3187_v8  ;;  %v16127_v46 = vcombine.high %v3180_v25, %v3187_v8 }
 0x5e5   : > { %v3262_v36 = vrot.slane %v3254_v55, %v22121_v27  ;;  %v3269_v43 = vrot.slane %v3255_v49, %v22121_v27  ;;  %v4984_v24 = vcombine.low %v3246_v42, %v3253_v53  ;;  %v16129_v37 = vcombine.high %v3246_v42, %v3253_v53 }
 0x5e6   : > { %v4941_v52 = vrot.slane %v4934_v56, %v22119_v0  ;;  %v4949_v2 = vrot.slane %v16127_v46, %v22119_v0  ;;  %v4950_v33 = vcombine.low %v3196_v21, %v3203_v7  ;;  %v16128_v13 = vcombine.high %v3196_v21, %v3203_v7 }
 0x5e7   : > { %v4991_v19 = vrot.slane %v4984_v24, %v22119_v0  ;;  %v4999_v32 = vrot.slane %v16129_v37, %v22119_v0  ;;  %v5000_v29 = vcombine.low %v3262_v36, %v3269_v43  ;;  %v16130_v59 = vcombine.high %v3262_v36, %v3269_v43 }
 0x5e8   : > { %v4957_v54 = vrot.slane %v4950_v33, %v22119_v0  ;;  %v4965_v34 = vrot.slane %v16128_v13, %v22119_v0  ;;  %v4966_v30 = vcombine.low %v4941_v52, %v4949_v2  ;;  %v7840_v58 = vrot.slane %v7826_v45, %v22119_v0 }
 0x5e9   : > { %v5007_v38 = vrot.slane %v5000_v29, %v22119_v0  ;;  %v5015_v39 = vrot.slane %v16130_v59, %v22119_v0  ;;  %v5016_v23 = vcombine.low %v4991_v19, %v4999_v32  ;;  %v7841_v5 = vcombine.low %v21338_v11, %v7833_v28 }
 0x5ea   : > { %v4973_v62 = vrot.slane %v4966_v30, %v22121_v27  ;;  %v4974_v1 = vcombine.low %v4957_v54, %v4965_v34  ;;  %v7842_v48 = vcombine.high %v21338_v11, %v7833_v28  ;;  %v7857_v26 = vcombine.low %v21341_v10, %v7840_v58 }
 0x5eb   : > { %v5023_v31 = vrot.slane %v5016_v23, %v22121_v27  ;;  %v5024_v17 = vcombine.low %v5007_v38, %v5015_v39  ;;  %v7858_v63 = vcombine.high %v21341_v10, %v7840_v58  ;;  %v7849_v22 = vrot.slane %v7841_v5, %v22121_v27 }
 0x5ec   : > { %v4981_v18 = vrot.slane %v4974_v1, %v22121_v27  ;;  %v7856_v9 = vrot.slane %v7842_v48, %v22121_v27  ;;  %v7892_v50 = vcombine.high %v6525_v61, %v22112_v44  ;;  %v7865_v40 = vrot.slane %v7857_v26, %v22121_v27 }
 0x5ed   : > { %v5031_v4 = vrot.slane %v5024_v17, %v22121_v27  ;;  %v7872_v11 = vrot.slane %v7858_v63, %v22121_v27  ;;  %v7899_v35 = vrot.slane %v6525_v61, %v22119_v0  ;;  %v6532_v58 = vshrl.u32 %v21350_v47, 16  ;;  %v6324_v17 = vpop.permute.xlu0 %6323 }
 0x5ee   : > { %v4982_v15 = vcombine.low %v4973_v62, %v4981_v18  ;;  %v4983_v6 = vcombine.high %v4973_v62, %v4981_v18  ;;  %v7906_v10 = vrot.slane %v7892_v50, %v22119_v0  ;;  %v9635_v3 = vcombine.low %v7849_v22, %v7856_v9  ;;  %v11098_v62 = vpop.permute.xlu1 %11097 }
 0x5ef   : > { %v5032_v45 = vcombine.low %v5023_v31, %v5031_v4  ;;  %v5033_v25 = vcombine.high %v5023_v31, %v5031_v4  ;;  %v7907_v8 = vcombine.low %v21345_v41, %v7899_v35  ;;  %v7908_v20 = vcombine.high %v21345_v41, %v7899_v35 }
 0x5f0   : > { %v5657_v14 = vshrl.u32 %v4982_v15, 16  ;;  %v5663_v42 = vshrl.u32 %v4983_v6, 16  ;;  %v7923_v53 = vcombine.low %v21348_v16, %v7906_v10  ;;  %v7924_v55 = vcombine.high %v21348_v16, %v7906_v10 }
 0x5f1   : > { %v5656_v49 = vpack.i.b16 %v5032_v45, %v4982_v15  ;;  %v5658_v21 = vshrl.u32 %v5032_v45, 16  ;;  %v5662_v61 = vpack.i.b16 %v5033_v25, %v4983_v6  ;;  %v5664_v7 = vshrl.u32 %v5033_v25, 16  ;;  %v22175_v6 = vld [vmem:[#allocation30_spill] sm:$0xff] }
 0x5f2   : > { %v7915_v56 = vrot.slane %v7907_v8, %v22121_v27  ;;  %v7922_v46 = vrot.slane %v7908_v20, %v22121_v27  ;;  %v7931_v36 = vrot.slane %v7923_v53, %v22121_v27  ;;  %v7938_v41 = vrot.slane %v7924_v55, %v22121_v27  ;;  %v11130_v20 = vpop.permute.xlu1 %11129 }
 0x5f3   : > { %v5659_v43 = vpack.i.b16 %v5658_v21, %v5657_v14  ;;  %v5665_v24 = vpack.i.b16 %v5664_v7, %v5663_v42  ;;  %v16171_v37 = vcombine.low %v5656_v49, %v5656_v49  ;;  %v16172_v16 = vcombine.high %v5656_v49, %v5656_v49  ;;  %v6356_v49 = vpop.permute.xlu0 %6355 }
 0x5f4   : > { %v16235_v52 = vcombine.low %v5662_v61, %v5662_v61  ;;  %v16236_v2 = vcombine.high %v5662_v61, %v5662_v61  ;;  %v9642_v33 = vrot.slane %v9635_v3, %v22119_v0  ;;  %v16315_v13 = vcombine.high %v7849_v22, %v7856_v9 }
 0x5f5   : > { %v16203_v19 = vcombine.low %v5659_v43, %v5659_v43  ;;  %v16204_v32 = vcombine.high %v5659_v43, %v5659_v43  ;;  %v16267_v29 = vcombine.low %v5665_v24, %v5665_v24  ;;  %v16268_v59 = vcombine.high %v5665_v24, %v5665_v24  ;;  %6131 = vst.msk [vmem:[%s18390_s24 + $0x50] sm:$0xf] %vm6110_vm0, %v16171_v37 }
 0x5f6   : > { %6132 = vst.msk [vmem:[%s18390_s24 + $0x54] sm:$0xf] %vm6110_vm0, %v16172_v16  ;;  %6195 = vst.msk [vmem:[%s18390_s24 + $0x150] sm:$0xf] %vm6110_vm0, %v16235_v52  ;;  %v9650_v54 = vrot.slane %v16315_v13, %v22119_v0  ;;  %v9651_v34 = vcombine.low %v7865_v40, %v7872_v11  ;;  %v16316_v30 = vcombine.high %v7865_v40, %v7872_v11  ;;  %v11379_v3 = vshrl.u32 %v22175_v6, 16 }
 0x5f7   : > { %6196 = vst.msk [vmem:[%s18390_s24 + $0x154] sm:$0xf] %vm6110_vm0, %v16236_v2  ;;  %v9685_v28 = vcombine.low %v7915_v56, %v7922_v46  ;;  %6163 = vst.msk [vmem:[%s18390_s24 + $0xd0] sm:$0xf] %vm6110_vm0, %v16203_v19  ;;  %v16317_v38 = vcombine.high %v7915_v56, %v7922_v46  ;;  %v9701_v39 = vcombine.low %v7931_v36, %v7938_v41  ;;  %v11380_v8 = vshrl.u32 %v11098_v62, 16 }
 0x5f8   : > { %6164 = vst.msk [vmem:[%s18390_s24 + $0xd4] sm:$0xf] %vm6110_vm0, %v16204_v32  ;;  %6227 = vst.msk [vmem:[%s18390_s24 + $0x1d0] sm:$0xf] %vm6110_vm0, %v16267_v29  ;;  %v16318_v23 = vcombine.high %v7931_v36, %v7938_v41  ;;  %v9658_v1 = vrot.slane %v9651_v34, %v22119_v0  ;;  %v9666_v5 = vrot.slane %v16316_v30, %v22119_v0  ;;  %v6539_v56 = vshrl.u32 %v6324_v17, 16 }
 0x5f9   : > { %6228 = vst.msk [vmem:[%s18390_s24 + $0x1d4] sm:$0xf] %vm6110_vm0, %v16268_v59  ;;  %v9667_v48 = vcombine.low %v9642_v33, %v9650_v54  ;;  %v9692_v31 = vrot.slane %v9685_v28, %v22119_v0  ;;  %v9700_v26 = vrot.slane %v16317_v38, %v22119_v0  ;;  %v9708_v63 = vrot.slane %v9701_v39, %v22119_v0  ;;  %v11162_v39 = vpop.permute.xlu1 %11161 }
 0x5fa   : > { %v9716_v18 = vrot.slane %v16318_v23, %v22119_v0  ;;  %v6533_v22 = vpack.i.b16 %v6532_v58, %v6531_v51  ;;  %v9675_v9 = vcombine.low %v9658_v1, %v9666_v5  ;;  %v7943_v50 = vcombine.high %v21375_v60, %v22112_v44  ;;  %v21492_v23 = vpop.permute.xlu0 %11095 }
 0x5fb   : > { %v9674_v47 = vrot.slane %v9667_v48, %v22121_v27  ;;  %v21461_v4 = vrot.slane %v21375_v60, %v22119_v0  ;;  %v9717_v40 = vcombine.low %v9692_v31, %v9700_v26  ;;  %v11377_v10 = vpack.i.b16 %v11098_v62, %v22175_v6 }
 0x5fc   : > { %v9725_v11 = vcombine.low %v9708_v63, %v9716_v18  ;;  %v8009_v35 = vcombine.high %v6533_v22, %v22112_v44  ;;  %v21465_v15 = vrot.slane %v6533_v22, %v22119_v0  ;;  %v9682_v57 = vrot.slane %v9675_v9, %v22121_v27  ;;  %v22176_v22 = vld [vmem:[#allocation25_spill] sm:$0xff] }
 0x5fd   : > { %v21469_v51 = vrot.slane %v7943_v50, %v22119_v0  ;;  %v9724_v45 = vrot.slane %v9717_v40, %v22121_v27  ;;  %v13139_v53 = vcombine.high %v11377_v10, %v22112_v44  ;;  %v21480_v55 = vrot.slane %v11377_v10, %v22119_v0 }
 0x5fe   : > { %v9732_v60 = vrot.slane %v9725_v11, %v22121_v27  ;;  %v21476_v25 = vrot.slane %v8009_v35, %v22119_v0  ;;  %v9683_v14 = vcombine.low %v9674_v47, %v9682_v57  ;;  %v9684_v42 = vcombine.high %v9674_v47, %v9682_v57 }
 0x5ff   : > { %v11381_v7 = vpack.i.b16 %v11380_v8, %v11379_v3  ;;  %v21483_v41 = vrot.slane %v13139_v53, %v22119_v0  ;;  %v11387_v43 = vshrl.u32 %v11130_v20, 16  ;;  %v6537_v13 = vpack.i.b16 %v6356_v49, %v6324_v17 }
 0x600   : > { %v9733_v21 = vcombine.low %v9724_v45, %v9732_v60  ;;  %v9734_v61 = vcombine.high %v9724_v45, %v9732_v60  ;;  %v10446_v46 = vshrl.u32 %v9683_v14, 16  ;;  %v10452_v36 = vshrl.u32 %v9684_v42, 16 }
 0x601   : > { %v13205_v2 = vcombine.high %v11381_v7, %v22112_v44  ;;  %v21487_v33 = vrot.slane %v11381_v7, %v22119_v0  ;;  %v6540_v19 = vshrl.u32 %v6356_v49, 16  ;;  %v7958_v48 = vcombine.high %v6537_v13, %v22112_v44 }
 0x602   : > { %v10445_v24 = vpack.i.b16 %v9733_v21, %v9683_v14  ;;  %v10447_v37 = vshrl.u32 %v9733_v21, 16  ;;  %v10451_v16 = vpack.i.b16 %v9734_v61, %v9684_v42  ;;  %v10453_v52 = vshrl.u32 %v9734_v61, 16 }
 0x603   : > { %v21490_v28 = vrot.slane %v13205_v2, %v22119_v0  ;;  %v6541_v38 = vpack.i.b16 %v6540_v19, %v6539_v56  ;;  %v7965_v31 = vrot.slane %v6537_v13, %v22119_v0  ;;  %v11385_v63 = vpack.i.b16 %v11162_v39, %v11130_v20 }
 0x604   : > { %v10448_v32 = vpack.i.b16 %v10447_v37, %v10446_v46  ;;  %v10454_v29 = vpack.i.b16 %v10453_v52, %v10452_v36  ;;  %v16361_v59 = vcombine.low %v10445_v24, %v10445_v24  ;;  %v16362_v54 = vcombine.high %v10445_v24, %v10445_v24 }
 0x605   : > { %v16425_v34 = vcombine.low %v10451_v16, %v10451_v16  ;;  %v16426_v30 = vcombine.high %v10451_v16, %v10451_v16  ;;  %v8024_v17 = vcombine.high %v6541_v38, %v22112_v44  ;;  %v8031_v26 = vrot.slane %v6541_v38, %v22119_v0 }
 0x606   : > { %v16393_v58 = vcombine.low %v10448_v32, %v10448_v32  ;;  %v16394_v62 = vcombine.high %v10448_v32, %v10448_v32  ;;  %v16457_v1 = vcombine.low %v10454_v29, %v10454_v29  ;;  %v16458_v5 = vcombine.high %v10454_v29, %v10454_v29  ;;  %10929 = vst.msk [vmem:[%s18823_s15 + $0x48] sm:$0xf] %vm6110_vm0, %v16361_v59 }
 0x607   : > { %10930 = vst.msk [vmem:[%s18823_s15 + $0x4c] sm:$0xf] %vm6110_vm0, %v16362_v54  ;;  %10993 = vst.msk [vmem:[%s18823_s15 + $0x148] sm:$0xf] %vm6110_vm0, %v16425_v34  ;;  %v11388_v18 = vshrl.u32 %v11162_v39, 16  ;;  %v11363_v47 = vshrl.u32 %v22176_v22, 16  ;;  %v21517_v9 = vpack.i.b16 %v21492_v23, %v22176_v22  ;;  %v7972_v50 = vrot.slane %v7958_v48, %v22119_v0 }
 0x608   : > { %10994 = vst.msk [vmem:[%s18823_s15 + $0x14c] sm:$0xf] %vm6110_vm0, %v16426_v30  ;;  %10961 = vst.msk [vmem:[%s18823_s15 + $0xc8] sm:$0xf] %vm6110_vm0, %v16393_v58  ;;  %v7973_v40 = vcombine.low %v21461_v4, %v7965_v31  ;;  %v7974_v11 = vcombine.high %v21461_v4, %v7965_v31  ;;  %v8038_v35 = vrot.slane %v8024_v17, %v22119_v0 }
 0x609   : > { %10962 = vst.msk [vmem:[%s18823_s15 + $0xcc] sm:$0xf] %vm6110_vm0, %v16394_v62  ;;  %11025 = vst.msk [vmem:[%s18823_s15 + $0x1c8] sm:$0xf] %vm6110_vm0, %v16457_v1  ;;  %v8039_v57 = vcombine.low %v21465_v15, %v8031_v26  ;;  %v8040_v6 = vcombine.high %v21465_v15, %v8031_v26  ;;  %v11389_v10 = vpack.i.b16 %v11388_v18, %v11387_v43 }
 0x60a   : > { %11026 = vst.msk [vmem:[%s18823_s15 + $0x1cc] sm:$0xf] %vm6110_vm0, %v16458_v5  ;;  %v13154_v3 = vcombine.high %v11385_v63, %v22112_v44  ;;  %v7981_v45 = vrot.slane %v7973_v40, %v22121_v27  ;;  %v7988_v60 = vrot.slane %v7974_v11, %v22121_v27  ;;  %v7989_v8 = vcombine.low %v21469_v51, %v7972_v50 }
 0x60b   : > { %v7990_v20 = vcombine.high %v21469_v51, %v7972_v50  ;;  %v8047_v14 = vrot.slane %v8039_v57, %v22121_v27  ;;  %v8054_v4 = vrot.slane %v8040_v6, %v22121_v27  ;;  %v8055_v42 = vcombine.low %v21476_v25, %v8038_v35 }
 0x60c   : > { %v8056_v53 = vcombine.high %v21476_v25, %v8038_v35  ;;  %v7997_v15 = vrot.slane %v7989_v8, %v22121_v27  ;;  %v9735_v21 = vcombine.low %v7981_v45, %v7988_v60  ;;  %v16319_v61 = vcombine.high %v7981_v45, %v7988_v60 }
 0x60d   : > { %v8004_v49 = vrot.slane %v7990_v20, %v22121_v27  ;;  %v8063_v7 = vrot.slane %v8055_v42, %v22121_v27  ;;  %v9785_v46 = vcombine.low %v8047_v14, %v8054_v4  ;;  %v16321_v51 = vcombine.high %v8047_v14, %v8054_v4 }
 0x60e   : > { %v8070_v56 = vrot.slane %v8056_v53, %v22121_v27  ;;  %v9742_v36 = vrot.slane %v9735_v21, %v22119_v0  ;;  %v9750_v43 = vrot.slane %v16319_v61, %v22119_v0  ;;  %v13161_v29 = vrot.slane %v11385_v63, %v22119_v0 }
 0x60f   : > { %v9751_v24 = vcombine.low %v7997_v15, %v8004_v49  ;;  %v16320_v37 = vcombine.high %v7997_v15, %v8004_v49  ;;  %v9792_v25 = vrot.slane %v9785_v46, %v22119_v0  ;;  %v9800_v16 = vrot.slane %v16321_v51, %v22119_v0 }
 0x610   : > { %v9801_v52 = vcombine.low %v8063_v7, %v8070_v56  ;;  %v16322_v2 = vcombine.high %v8063_v7, %v8070_v56  ;;  %v9767_v32 = vcombine.low %v9742_v36, %v9750_v43  ;;  %v13168_v30 = vrot.slane %v13154_v3, %v22119_v0 }
 0x611   : > { %v9758_v13 = vrot.slane %v9751_v24, %v22119_v0  ;;  %v9766_v19 = vrot.slane %v16320_v37, %v22119_v0  ;;  %v9817_v34 = vcombine.low %v9792_v25, %v9800_v16  ;;  %v13169_v58 = vcombine.low %v21480_v55, %v13161_v29 }
 0x612   : > { %v9808_v59 = vrot.slane %v9801_v52, %v22119_v0  ;;  %v9816_v54 = vrot.slane %v16322_v2, %v22119_v0  ;;  %v9774_v38 = vrot.slane %v9767_v32, %v22121_v27  ;;  %v13170_v62 = vcombine.high %v21480_v55, %v13161_v29 }
 0x613   : > { %v9775_v39 = vcombine.low %v9758_v13, %v9766_v19  ;;  %v9824_v1 = vrot.slane %v9817_v34, %v22121_v27  ;;  %v13185_v48 = vcombine.low %v21483_v41, %v13168_v30  ;;  %v13186_v31 = vcombine.high %v21483_v41, %v13168_v30 }
 0x614   : > { %v9825_v5 = vcombine.low %v9808_v59, %v9816_v54  ;;  %v13177_v26 = vrot.slane %v13169_v58, %v22121_v27  ;;  %v13184_v63 = vrot.slane %v13170_v62, %v22121_v27  ;;  %v13220_v18 = vcombine.high %v11389_v10, %v22112_v44 }
 0x615   : > { %v9782_v17 = vrot.slane %v9775_v39, %v22121_v27  ;;  %v13193_v40 = vrot.slane %v13185_v48, %v22121_v27  ;;  %v13200_v55 = vrot.slane %v13186_v31, %v22121_v27  ;;  %v13227_v11 = vrot.slane %v11389_v10, %v22119_v0 }
 0x616   : > { %v9832_v50 = vrot.slane %v9825_v5, %v22121_v27  ;;  %v13234_v41 = vrot.slane %v13220_v18, %v22119_v0  ;;  %v14835_v6 = vcombine.low %v13177_v26, %v13184_v63  ;;  %v16523_v37 = vcombine.high %v13177_v26, %v13184_v63  ;;  %v11128_v26 = vpop.permute.xlu0 %11127 }
 0x617   : > { %v9783_v35 = vcombine.low %v9774_v38, %v9782_v17  ;;  %v9784_v57 = vcombine.high %v9774_v38, %v9782_v17  ;;  %v13235_v60 = vcombine.low %v21487_v33, %v13227_v11  ;;  %v13236_v8 = vcombine.high %v21487_v33, %v13227_v11  ;;  %v11102_v38 = vpop.permute.xlu1 %11101 }
 0x618   : > { %v9833_v3 = vcombine.low %v9824_v1, %v9832_v50  ;;  %v9834_v45 = vcombine.high %v9824_v1, %v9832_v50  ;;  %v13251_v4 = vcombine.low %v21490_v28, %v13234_v41  ;;  %v13252_v42 = vcombine.high %v21490_v28, %v13234_v41 }
 0x619   : > { %v10458_v20 = vshrl.u32 %v9783_v35, 16  ;;  %v10464_v14 = vshrl.u32 %v9784_v57, 16  ;;  %v13243_v21 = vrot.slane %v13235_v60, %v22121_v27  ;;  %v13250_v61 = vrot.slane %v13236_v8, %v22121_v27 }
 0x61a   : > { %v10457_v53 = vpack.i.b16 %v9833_v3, %v9783_v35  ;;  %v10459_v15 = vshrl.u32 %v9833_v3, 16  ;;  %v10463_v10 = vpack.i.b16 %v9834_v45, %v9784_v57  ;;  %v10465_v49 = vshrl.u32 %v9834_v45, 16 }
 0x61b   : > { %v13259_v7 = vrot.slane %v13251_v4, %v22121_v27  ;;  %v13266_v33 = vrot.slane %v13252_v42, %v22121_v27  ;;  %v14842_v24 = vrot.slane %v14835_v6, %v22119_v0  ;;  %v14850_v13 = vrot.slane %v16523_v37, %v22119_v0  ;;  %v21620_v60 = vpop.permute.xlu1 %11133 }
 0x61c   : > { %v10460_v56 = vpack.i.b16 %v10459_v15, %v10458_v20  ;;  %v10466_v46 = vpack.i.b16 %v10465_v49, %v10464_v14  ;;  %v16363_v51 = vcombine.low %v10457_v53, %v10457_v53  ;;  %v16364_v28 = vcombine.high %v10457_v53, %v10457_v53 }
 0x61d   : > { %v16427_v36 = vcombine.low %v10463_v10, %v10463_v10  ;;  %v16428_v43 = vcombine.high %v10463_v10, %v10463_v10  ;;  %v14851_v19 = vcombine.low %v13193_v40, %v13200_v55  ;;  %v16524_v32 = vcombine.high %v13193_v40, %v13200_v55  ;;  %v11160_v10 = vpop.permute.xlu0 %11159 }
 0x61e   : > { %v16395_v25 = vcombine.low %v10460_v56, %v10460_v56  ;;  %v16396_v16 = vcombine.high %v10460_v56, %v10460_v56  ;;  %v16459_v52 = vcombine.low %v10466_v46, %v10466_v46  ;;  %v16460_v2 = vcombine.high %v10466_v46, %v10466_v46  ;;  %10931 = vst.msk [vmem:[%s18823_s15 + $0x50] sm:$0xf] %vm6110_vm0, %v16363_v51 }
 0x61f   : > { %10932 = vst.msk [vmem:[%s18823_s15 + $0x54] sm:$0xf] %vm6110_vm0, %v16364_v28  ;;  %10995 = vst.msk [vmem:[%s18823_s15 + $0x150] sm:$0xf] %vm6110_vm0, %v16427_v36  ;;  %v14885_v29 = vcombine.low %v13243_v21, %v13250_v61  ;;  %v16525_v59 = vcombine.high %v13243_v21, %v13250_v61  ;;  %v14901_v54 = vcombine.low %v13259_v7, %v13266_v33  ;;  %v11364_v30 = vshrl.u32 %v21492_v23, 16 }
 0x620   : > { %10996 = vst.msk [vmem:[%s18823_s15 + $0x154] sm:$0xf] %vm6110_vm0, %v16428_v43  ;;  %10963 = vst.msk [vmem:[%s18823_s15 + $0xd0] sm:$0xf] %vm6110_vm0, %v16395_v25  ;;  %v16526_v34 = vcombine.high %v13259_v7, %v13266_v33  ;;  %v14858_v39 = vrot.slane %v14851_v19, %v22119_v0  ;;  %v14866_v58 = vrot.slane %v16524_v32, %v22119_v0  ;;  %v11411_v41 = vshrl.u32 %v22136_v12, 16 }
 0x621   : > { %10964 = vst.msk [vmem:[%s18823_s15 + $0xd4] sm:$0xf] %vm6110_vm0, %v16396_v16  ;;  %11027 = vst.msk [vmem:[%s18823_s15 + $0x1d0] sm:$0xf] %vm6110_vm0, %v16459_v52  ;;  %v14867_v62 = vcombine.low %v14842_v24, %v14850_v13  ;;  %v14892_v1 = vrot.slane %v14885_v29, %v22119_v0  ;;  %v14900_v5 = vrot.slane %v16525_v59, %v22119_v0  ;;  %v11412_v45 = vshrl.u32 %v11102_v38, 16  ;;  %v1487_v29 = vpop.permute.xlu1 %1486 }
 0x622   : > { %11028 = vst.msk [vmem:[%s18823_s15 + $0x1d4] sm:$0xf] %vm6110_vm0, %v16460_v2  ;;  %v14908_v48 = vrot.slane %v14901_v54, %v22119_v0  ;;  %v14916_v31 = vrot.slane %v16526_v34, %v22119_v0  ;;  %v11365_v17 = vpack.i.b16 %v11364_v30, %v11363_v47  ;;  %v14875_v63 = vcombine.low %v14858_v39, %v14866_v58 }
 0x623   : > { %v14874_v23 = vrot.slane %v14867_v62, %v22121_v27  ;;  %v13007_v18 = vcombine.high %v21517_v9, %v22112_v44  ;;  %v21603_v50 = vrot.slane %v21517_v9, %v22119_v0  ;;  %v14917_v40 = vcombine.low %v14892_v1, %v14900_v5  ;;  %v22177_v1 = vld [vmem:[#allocation27_spill] sm:$0xff] }
 0x624   : > { %v14925_v55 = vcombine.low %v14908_v48, %v14916_v31  ;;  %v13073_v11 = vcombine.high %v11365_v17, %v22112_v44  ;;  %v21607_v35 = vrot.slane %v11365_v17, %v22119_v0  ;;  %v14882_v22 = vrot.slane %v14875_v63, %v22121_v27  ;;  %v22178_v17 = vld [vmem:[#allocation42_spill] sm:$0xff] }
 0x625   : > { %v21611_v47 = vrot.slane %v13007_v18, %v22119_v0  ;;  %v11409_v57 = vpack.i.b16 %v11102_v38, %v22136_v12  ;;  %v14924_v6 = vrot.slane %v14917_v40, %v22121_v27  ;;  %v11413_v12 = vpack.i.b16 %v11412_v45, %v11411_v41 }
 0x626   : > { %v14932_v9 = vrot.slane %v14925_v55, %v22121_v27  ;;  %v21618_v3 = vrot.slane %v13073_v11, %v22119_v0  ;;  %v14883_v8 = vcombine.low %v14874_v23, %v14882_v22  ;;  %v14884_v20 = vcombine.high %v14874_v23, %v14882_v22 }
 0x627   : > { %v13403_v14 = vcombine.high %v11409_v57, %v22112_v44  ;;  %v21624_v4 = vrot.slane %v11409_v57, %v22119_v0  ;;  %v11371_v15 = vshrl.u32 %v11128_v26, 16  ;;  %v11419_v7 = vshrl.u32 %v21620_v60, 16 }
 0x628   : > { %v14933_v42 = vcombine.low %v14924_v6, %v14932_v9  ;;  %v14934_v53 = vcombine.high %v14924_v6, %v14932_v9  ;;  %v15294_v49 = vshrl.u32 %v14883_v8, 16  ;;  %v15300_v21 = vshrl.u32 %v14884_v20, 16 }
 0x629   : > { %v21627_v61 = vrot.slane %v13403_v14, %v22119_v0  ;;  %v13469_v28 = vcombine.high %v11413_v12, %v22112_v44  ;;  %v21632_v36 = vrot.slane %v11413_v12, %v22119_v0  ;;  %v11369_v43 = vpack.i.b16 %v11160_v10, %v11128_v26 }
 0x62a   : > { %v15293_v33 = vpack.i.b16 %v14933_v42, %v14883_v8  ;;  %v15295_v56 = vshrl.u32 %v14933_v42, 16  ;;  %v15299_v46 = vpack.i.b16 %v14934_v53, %v14884_v20  ;;  %v15301_v51 = vshrl.u32 %v14934_v53, 16 }
 0x62b   : > { %v11372_v24 = vshrl.u32 %v11160_v10, 16  ;;  %v21635_v19 = vrot.slane %v13469_v28, %v22119_v0  ;;  %v13022_v38 = vcombine.high %v11369_v43, %v22112_v44  ;;  %v13029_v39 = vrot.slane %v11369_v43, %v22119_v0 }
 0x62c   : > { %v15296_v37 = vpack.i.b16 %v15295_v56, %v15294_v49  ;;  %v15302_v25 = vpack.i.b16 %v15301_v51, %v15300_v21  ;;  %v16561_v16 = vcombine.low %v15293_v33, %v15293_v33  ;;  %v16562_v52 = vcombine.high %v15293_v33, %v15293_v33  ;;  %v1519_v33 = vpop.permute.xlu1 %1518 }
 0x62d   : > { %v16625_v2 = vcombine.low %v15299_v46, %v15299_v46  ;;  %v16626_v13 = vcombine.high %v15299_v46, %v15299_v46  ;;  %v11373_v32 = vpack.i.b16 %v11372_v24, %v11371_v15  ;;  %v1744_v5 = vpack.i.b16 %v1487_v29, %v22177_v1 }
 0x62e   : > { %v16593_v59 = vcombine.low %v15296_v37, %v15296_v37  ;;  %v16594_v54 = vcombine.high %v15296_v37, %v15296_v37  ;;  %v16657_v34 = vcombine.low %v15302_v25, %v15302_v25  ;;  %v16658_v30 = vcombine.high %v15302_v25, %v15302_v25  ;;  %15737 = vst.msk [vmem:[%s19921_s9 + $0x68] sm:$0xf] %vm6110_vm0, %v16561_v16 }
 0x62f   : > { %15738 = vst.msk [vmem:[%s19921_s9 + $0x6c] sm:$0xf] %vm6110_vm0, %v16562_v52  ;;  %15801 = vst.msk [vmem:[%s19921_s9 + $0x168] sm:$0xf] %vm6110_vm0, %v16625_v2  ;;  %v13088_v58 = vcombine.high %v11373_v32, %v22112_v44  ;;  %v13095_v62 = vrot.slane %v11373_v32, %v22119_v0  ;;  %v1746_v48 = vshrl.u32 %v22177_v1, 16  ;;  %v1747_v31 = vshrl.u32 %v1487_v29, 16 }
 0x630   : > { %15802 = vst.msk [vmem:[%s19921_s9 + $0x16c] sm:$0xf] %vm6110_vm0, %v16626_v13  ;;  %15769 = vst.msk [vmem:[%s19921_s9 + $0xe8] sm:$0xf] %vm6110_vm0, %v16593_v59  ;;  %v11395_v26 = vshrl.u32 %v22178_v17, 16  ;;  %v13036_v23 = vrot.slane %v13022_v38, %v22119_v0  ;;  %v13037_v63 = vcombine.low %v21603_v50, %v13029_v39  ;;  %v13038_v18 = vcombine.high %v21603_v50, %v13029_v39 }
 0x631   : > { %15770 = vst.msk [vmem:[%s19921_s9 + $0xec] sm:$0xf] %vm6110_vm0, %v16594_v54  ;;  %15833 = vst.msk [vmem:[%s19921_s9 + $0x1e8] sm:$0xf] %vm6110_vm0, %v16657_v34  ;;  %v13102_v40 = vrot.slane %v13088_v58, %v22119_v0  ;;  %v13103_v55 = vcombine.low %v21607_v35, %v13095_v62  ;;  %v13104_v11 = vcombine.high %v21607_v35, %v13095_v62  ;;  %v11100_v35 = vpop.permute.xlu0 %11099 }
 0x632   : > { %15834 = vst.msk [vmem:[%s19921_s9 + $0x1ec] sm:$0xf] %vm6110_vm0, %v16658_v30  ;;  %v1748_v22 = vpack.i.b16 %v1747_v31, %v1746_v48  ;;  %v3274_v57 = vcombine.high %v1744_v5, %v22112_v44  ;;  %v13045_v41 = vrot.slane %v13037_v63, %v22121_v27  ;;  %v13052_v6 = vrot.slane %v13038_v18, %v22121_v27  ;;  %v1551_v48 = vpop.permute.xlu1 %1550 }
 0x633   : > { %v13053_v9 = vcombine.low %v21611_v47, %v13036_v23  ;;  %v13054_v45 = vcombine.high %v21611_v47, %v13036_v23  ;;  %v13111_v8 = vrot.slane %v13103_v55, %v22121_v27  ;;  %v13118_v50 = vrot.slane %v13104_v11, %v22121_v27 }
 0x634   : > { %v13119_v20 = vcombine.low %v21618_v3, %v13102_v40  ;;  %v13120_v14 = vcombine.high %v21618_v3, %v13102_v40  ;;  %v14735_v12 = vcombine.low %v13045_v41, %v13052_v6  ;;  %v16519_v15 = vcombine.high %v13045_v41, %v13052_v6 }
 0x635   : > { %v13061_v42 = vrot.slane %v13053_v9, %v22121_v27  ;;  %v13068_v53 = vrot.slane %v13054_v45, %v22121_v27  ;;  %v14785_v47 = vcombine.low %v13111_v8, %v13118_v50  ;;  %v16521_v21 = vcombine.high %v13111_v8, %v13118_v50  ;;  %v21693_v54 = vpop.permute.xlu0 %11131 }
 0x636   : > { %v13127_v10 = vrot.slane %v13119_v20, %v22121_v27  ;;  %v13134_v49 = vrot.slane %v13120_v14, %v22121_v27  ;;  %v14742_v56 = vrot.slane %v14735_v12, %v22119_v0  ;;  %v14750_v46 = vrot.slane %v16519_v15, %v22119_v0 }
 0x637   : > { %v14751_v51 = vcombine.low %v13061_v42, %v13068_v53  ;;  %v16520_v3 = vcombine.high %v13061_v42, %v13068_v53  ;;  %v14792_v28 = vrot.slane %v14785_v47, %v22119_v0  ;;  %v14800_v43 = vrot.slane %v16521_v21, %v22119_v0 }
 0x638   : > { %v14801_v24 = vcombine.low %v13127_v10, %v13134_v49  ;;  %v16522_v37 = vcombine.high %v13127_v10, %v13134_v49  ;;  %v14767_v52 = vcombine.low %v14742_v56, %v14750_v46  ;;  %v21686_v2 = vrot.slane %v1744_v5, %v22119_v0 }
 0x639   : > { %v14758_v25 = vrot.slane %v14751_v51, %v22119_v0  ;;  %v14766_v16 = vrot.slane %v16520_v3, %v22119_v0  ;;  %v14817_v29 = vcombine.low %v14792_v28, %v14800_v43  ;;  %v21691_v59 = vrot.slane %v3274_v57, %v22119_v0 }
 0x63a   : > { %v14808_v13 = vrot.slane %v14801_v24, %v22119_v0  ;;  %v14816_v32 = vrot.slane %v16522_v37, %v22119_v0  ;;  %v14774_v34 = vrot.slane %v14767_v52, %v22121_v27  ;;  %v3340_v38 = vcombine.high %v1748_v22, %v22112_v44  ;;  %v11164_v37 = vpop.permute.xlu0 %11163 }
 0x63b   : > { %v14775_v30 = vcombine.low %v14758_v25, %v14766_v16  ;;  %v21698_v39 = vrot.slane %v1748_v22, %v22119_v0  ;;  %v14824_v58 = vrot.slane %v14817_v29, %v22121_v27  ;;  %v11393_v1 = vpack.i.b16 %v11100_v35, %v22178_v17 }
 0x63c   : > { %v14825_v62 = vcombine.low %v14808_v13, %v14816_v32  ;;  %v11396_v5 = vshrl.u32 %v11100_v35, 16  ;;  %v21704_v23 = vrot.slane %v3340_v38, %v22119_v0  ;;  %v1754_v63 = vshrl.u32 %v1519_v33, 16 }
 0x63d   : > { %v14782_v31 = vrot.slane %v14775_v30, %v22121_v27  ;;  %v11403_v18 = vshrl.u32 %v21693_v54, 16  ;;  %v13271_v11 = vcombine.high %v11393_v1, %v22112_v44  ;;  %v21710_v22 = vrot.slane %v11393_v1, %v22119_v0 }
 0x63e   : > { %v14832_v40 = vrot.slane %v14825_v62, %v22121_v27  ;;  %v11397_v55 = vpack.i.b16 %v11396_v5, %v11395_v26  ;;  %v1752_v41 = vpack.i.b16 %v1551_v48, %v1519_v33  ;;  %v1755_v6 = vshrl.u32 %v1551_v48, 16  ;;  %v22179_v48 = vld [vmem:[#allocation35_spill] sm:$0xff] }
 0x63f   : > { %v14783_v57 = vcombine.low %v14774_v34, %v14782_v31  ;;  %v14784_v17 = vcombine.high %v14774_v34, %v14782_v31  ;;  %v21713_v8 = vrot.slane %v13271_v11, %v22119_v0  ;;  %v11404_v62 = vshrl.u32 %v11164_v37, 16 }
 0x640   : > { %v14833_v9 = vcombine.low %v14824_v58, %v14832_v40  ;;  %v14834_v45 = vcombine.high %v14824_v58, %v14832_v40  ;;  %v13337_v50 = vcombine.high %v11397_v55, %v22112_v44  ;;  %v21717_v26 = vrot.slane %v11397_v55, %v22119_v0 }
 0x641   : > { %v15282_v20 = vshrl.u32 %v14783_v57, 16  ;;  %v15288_v14 = vshrl.u32 %v14784_v17, 16  ;;  %v1756_v35 = vpack.i.b16 %v1755_v6, %v1754_v63  ;;  %v3289_v49 = vcombine.high %v1752_v41, %v22112_v44 }
 0x642   : > { %v15281_v42 = vpack.i.b16 %v14833_v9, %v14783_v57  ;;  %v15283_v53 = vshrl.u32 %v14833_v9, 16  ;;  %v15287_v12 = vpack.i.b16 %v14834_v45, %v14784_v17  ;;  %v15289_v15 = vshrl.u32 %v14834_v45, 16 }
 0x643   : > { %v21720_v10 = vrot.slane %v13337_v50, %v22119_v0  ;;  %v3296_v47 = vrot.slane %v1752_v41, %v22119_v0  ;;  %v3355_v21 = vcombine.high %v1756_v35, %v22112_v44  ;;  %v3303_v43 = vrot.slane %v3289_v49, %v22119_v0 }
 0x644   : > { %v15284_v33 = vpack.i.b16 %v15283_v53, %v15282_v20  ;;  %v15290_v56 = vpack.i.b16 %v15289_v15, %v15288_v14  ;;  %v16559_v46 = vcombine.low %v15281_v42, %v15281_v42  ;;  %v16560_v51 = vcombine.high %v15281_v42, %v15281_v42 }
 0x645   : > { %v16623_v3 = vcombine.low %v15287_v12, %v15287_v12  ;;  %v16624_v28 = vcombine.high %v15287_v12, %v15287_v12  ;;  %v3304_v24 = vcombine.low %v21686_v2, %v3296_v47  ;;  %v3305_v32 = vcombine.high %v21686_v2, %v3296_v47 }
 0x646   : > { %v16591_v25 = vcombine.low %v15284_v33, %v15284_v33  ;;  %v16592_v16 = vcombine.high %v15284_v33, %v15284_v33  ;;  %v16655_v52 = vcombine.low %v15290_v56, %v15290_v56  ;;  %v16656_v13 = vcombine.high %v15290_v56, %v15290_v56  ;;  %15735 = vst.msk [vmem:[%s19921_s9 + $0x60] sm:$0xf] %vm6110_vm0, %v16559_v46 }
 0x647   : > { %15736 = vst.msk [vmem:[%s19921_s9 + $0x64] sm:$0xf] %vm6110_vm0, %v16560_v51  ;;  %15799 = vst.msk [vmem:[%s19921_s9 + $0x160] sm:$0xf] %vm6110_vm0, %v16623_v3  ;;  %v3312_v29 = vrot.slane %v3304_v24, %v22121_v27  ;;  %v3320_v34 = vcombine.low %v21691_v59, %v3303_v43  ;;  %v3321_v30 = vcombine.high %v21691_v59, %v3303_v43  ;;  %v6547_v31 = vshrl.u32 %v22179_v48, 16 }
 0x648   : > { %15800 = vst.msk [vmem:[%s19921_s9 + $0x164] sm:$0xf] %vm6110_vm0, %v16624_v28  ;;  %15767 = vst.msk [vmem:[%s19921_s9 + $0xe0] sm:$0xf] %vm6110_vm0, %v16591_v25  ;;  %v3362_v38 = vrot.slane %v1756_v35, %v22119_v0  ;;  %v3369_v58 = vrot.slane %v3355_v21, %v22119_v0  ;;  %v11401_v2 = vpack.i.b16 %v11164_v37, %v21693_v54 }
 0x649   : > { %15768 = vst.msk [vmem:[%s19921_s9 + $0xe4] sm:$0xf] %vm6110_vm0, %v16592_v16  ;;  %15831 = vst.msk [vmem:[%s19921_s9 + $0x1e0] sm:$0xf] %vm6110_vm0, %v16655_v52  ;;  %v3319_v1 = vrot.slane %v3305_v32, %v22121_v27  ;;  %v3328_v5 = vrot.slane %v3320_v34, %v22121_v27  ;;  %v3335_v59 = vrot.slane %v3321_v30, %v22121_v27 }
 0x64a   : > { %15832 = vst.msk [vmem:[%s19921_s9 + $0x1e4] sm:$0xf] %vm6110_vm0, %v16656_v13  ;;  %v3370_v63 = vcombine.low %v21698_v39, %v3362_v38  ;;  %v3371_v40 = vcombine.high %v21698_v39, %v3362_v38  ;;  %v3386_v55 = vcombine.low %v21704_v23, %v3369_v58  ;;  %v3387_v11 = vcombine.high %v21704_v23, %v3369_v58 }
 0x64b   : > { %v5034_v57 = vcombine.low %v3312_v29, %v3319_v1  ;;  %v16131_v17 = vcombine.high %v3312_v29, %v3319_v1  ;;  %v5050_v41 = vcombine.low %v3328_v5, %v3335_v59  ;;  %v16132_v6 = vcombine.high %v3328_v5, %v3335_v59  ;;  %v21787_v59 = vpop.permute.xlu1 %6293 }
 0x64c   : > { %v3378_v9 = vrot.slane %v3370_v63, %v22121_v27  ;;  %v3385_v45 = vrot.slane %v3371_v40, %v22121_v27  ;;  %v3394_v50 = vrot.slane %v3386_v55, %v22121_v27  ;;  %v3401_v20 = vrot.slane %v3387_v11, %v22121_v27 }
 0x64d   : > { %v5041_v14 = vrot.slane %v5034_v57, %v22119_v0  ;;  %v5049_v39 = vrot.slane %v16131_v17, %v22119_v0  ;;  %v5057_v35 = vrot.slane %v5050_v41, %v22119_v0  ;;  %v5065_v23 = vrot.slane %v16132_v6, %v22119_v0 }
 0x64e   : > { %v5084_v42 = vcombine.low %v3378_v9, %v3385_v45  ;;  %v16133_v53 = vcombine.high %v3378_v9, %v3385_v45  ;;  %v5100_v12 = vcombine.low %v3394_v50, %v3401_v20  ;;  %v16134_v15 = vcombine.high %v3394_v50, %v3401_v20 }
 0x64f   : > { %v5066_v49 = vcombine.low %v5041_v14, %v5049_v39  ;;  %v5074_v47 = vcombine.low %v5057_v35, %v5065_v23  ;;  %v11405_v21 = vpack.i.b16 %v11404_v62, %v11403_v18  ;;  %v13286_v33 = vcombine.high %v11401_v2, %v22112_v44 }
 0x650   : > { %v5091_v56 = vrot.slane %v5084_v42, %v22119_v0  ;;  %v5099_v46 = vrot.slane %v16133_v53, %v22119_v0  ;;  %v5107_v51 = vrot.slane %v5100_v12, %v22119_v0  ;;  %v5115_v3 = vrot.slane %v16134_v15, %v22119_v0 }
 0x651   : > { %v5073_v28 = vrot.slane %v5066_v49, %v22121_v27  ;;  %v5081_v43 = vrot.slane %v5074_v47, %v22121_v27  ;;  %v13293_v24 = vrot.slane %v11401_v2, %v22119_v0  ;;  %v13300_v37 = vrot.slane %v13286_v33, %v22119_v0  ;;  %v6326_v47 = vpop.permute.xlu1 %6325 }
 0x652   : > { %v5116_v54 = vcombine.low %v5091_v56, %v5099_v46  ;;  %v5124_v18 = vcombine.low %v5107_v51, %v5115_v3  ;;  %v13352_v25 = vcombine.high %v11405_v21, %v22112_v44  ;;  %v13359_v16 = vrot.slane %v11405_v21, %v22119_v0 }
 0x653   : > { %v5082_v52 = vcombine.low %v5073_v28, %v5081_v43  ;;  %v5083_v13 = vcombine.high %v5073_v28, %v5081_v43  ;;  %v13301_v32 = vcombine.low %v21710_v22, %v13293_v24  ;;  %v13302_v29 = vcombine.high %v21710_v22, %v13293_v24 }
 0x654   : > { %v5123_v34 = vrot.slane %v5116_v54, %v22121_v27  ;;  %v5131_v30 = vrot.slane %v5124_v18, %v22121_v27  ;;  %v13317_v38 = vcombine.low %v21713_v8, %v13300_v37  ;;  %v13318_v58 = vcombine.high %v21713_v8, %v13300_v37 }
 0x655   : > { %v5669_v2 = vshrl.u32 %v5082_v52, 16  ;;  %v5675_v62 = vshrl.u32 %v5083_v13, 16  ;;  %v13309_v1 = vrot.slane %v13301_v32, %v22121_v27  ;;  %v13316_v5 = vrot.slane %v13302_v29, %v22121_v27 }
 0x656   : > { %v5132_v63 = vcombine.low %v5123_v34, %v5131_v30  ;;  %v5133_v40 = vcombine.high %v5123_v34, %v5131_v30  ;;  %v13325_v22 = vrot.slane %v13317_v38, %v22121_v27  ;;  %v13332_v55 = vrot.slane %v13318_v58, %v22121_v27 }
 0x657   : > { %v13366_v11 = vrot.slane %v13352_v25, %v22119_v0  ;;  %v13367_v57 = vcombine.low %v21717_v26, %v13359_v16  ;;  %v13368_v8 = vcombine.high %v21717_v26, %v13359_v16  ;;  %v14935_v17 = vcombine.low %v13309_v1, %v13316_v5 }
 0x658   : > { %v5668_v41 = vpack.i.b16 %v5132_v63, %v5082_v52  ;;  %v5670_v6 = vshrl.u32 %v5132_v63, 16  ;;  %v5674_v9 = vpack.i.b16 %v5133_v40, %v5083_v13  ;;  %v5676_v45 = vshrl.u32 %v5133_v40, 16 }
 0x659   : > { %v13375_v50 = vrot.slane %v13367_v57, %v22121_v27  ;;  %v13382_v20 = vrot.slane %v13368_v8, %v22121_v27  ;;  %v13383_v14 = vcombine.low %v21720_v10, %v13366_v11  ;;  %v13384_v39 = vcombine.high %v21720_v10, %v13366_v11 }
 0x65a   : > { %v5671_v35 = vpack.i.b16 %v5670_v6, %v5669_v2  ;;  %v5677_v23 = vpack.i.b16 %v5676_v45, %v5675_v62  ;;  %v16173_v26 = vcombine.low %v5668_v41, %v5668_v41  ;;  %v16174_v42 = vcombine.high %v5668_v41, %v5668_v41  ;;  %v6358_v62 = vpop.permute.xlu1 %6357 }
 0x65b   : > { %v16237_v53 = vcombine.low %v5674_v9, %v5674_v9  ;;  %v16238_v12 = vcombine.high %v5674_v9, %v5674_v9  ;;  %v13391_v15 = vrot.slane %v13383_v14, %v22121_v27  ;;  %v13398_v49 = vrot.slane %v13384_v39, %v22121_v27 }
 0x65c   : > { %v16205_v21 = vcombine.low %v5671_v35, %v5671_v35  ;;  %v16206_v33 = vcombine.high %v5671_v35, %v5671_v35  ;;  %v16269_v10 = vcombine.low %v5677_v23, %v5677_v23  ;;  %v16270_v56 = vcombine.high %v5677_v23, %v5677_v23  ;;  %6133 = vst.msk [vmem:[%s18390_s24 + $0x58] sm:$0xf] %vm6110_vm0, %v16173_v26 }
 0x65d   : > { %6134 = vst.msk [vmem:[%s18390_s24 + $0x5c] sm:$0xf] %vm6110_vm0, %v16174_v42  ;;  %6197 = vst.msk [vmem:[%s18390_s24 + $0x158] sm:$0xf] %vm6110_vm0, %v16237_v53  ;;  %v14942_v46 = vrot.slane %v14935_v17, %v22119_v0  ;;  %v16527_v51 = vcombine.high %v13309_v1, %v13316_v5  ;;  %v14951_v3 = vcombine.low %v13325_v22, %v13332_v55  ;;  %v6548_v58 = vshrl.u32 %v21787_v59, 16 }
 0x65e   : > { %6198 = vst.msk [vmem:[%s18390_s24 + $0x15c] sm:$0xf] %vm6110_vm0, %v16238_v12  ;;  %v16528_v28 = vcombine.high %v13325_v22, %v13332_v55  ;;  %6165 = vst.msk [vmem:[%s18390_s24 + $0xd8] sm:$0xf] %vm6110_vm0, %v16205_v21  ;;  %v14985_v43 = vcombine.low %v13375_v50, %v13382_v20  ;;  %v16529_v24 = vcombine.high %v13375_v50, %v13382_v20  ;;  %v6555_v40 = vshrl.u32 %v6326_v47, 16 }
 0x65f   : > { %6166 = vst.msk [vmem:[%s18390_s24 + $0xdc] sm:$0xf] %vm6110_vm0, %v16206_v33  ;;  %6229 = vst.msk [vmem:[%s18390_s24 + $0x1d8] sm:$0xf] %vm6110_vm0, %v16269_v10  ;;  %v15001_v37 = vcombine.low %v13391_v15, %v13398_v49  ;;  %v16530_v54 = vcombine.high %v13391_v15, %v13398_v49  ;;  %v14950_v18 = vrot.slane %v16527_v51, %v22119_v0  ;;  %v6556_v41 = vshrl.u32 %v6358_v62, 16 }
 0x660   : > { %6230 = vst.msk [vmem:[%s18390_s24 + $0x1dc] sm:$0xf] %vm6110_vm0, %v16270_v56  ;;  %v14958_v25 = vrot.slane %v14951_v3, %v22119_v0  ;;  %v14966_v16 = vrot.slane %v16528_v28, %v22119_v0  ;;  %v6545_v52 = vpack.i.b16 %v21787_v59, %v22179_v48  ;;  %v14992_v13 = vrot.slane %v14985_v43, %v22119_v0 }
 0x661   : > { %v15000_v32 = vrot.slane %v16529_v24, %v22119_v0  ;;  %v15008_v29 = vrot.slane %v15001_v37, %v22119_v0  ;;  %v15016_v34 = vrot.slane %v16530_v54, %v22119_v0  ;;  %v14967_v30 = vcombine.low %v14942_v46, %v14950_v18  ;;  %v11166_v37 = vpop.permute.xlu1 %11165 }
 0x662   : > { %v14975_v38 = vcombine.low %v14958_v25, %v14966_v16  ;;  %v8075_v2 = vcombine.high %v6545_v52, %v22112_v44  ;;  %v8082_v63 = vrot.slane %v6545_v52, %v22119_v0  ;;  %v6549_v11 = vpack.i.b16 %v6548_v58, %v6547_v31 }
 0x663   : > { %v15017_v1 = vcombine.low %v14992_v13, %v15000_v32  ;;  %v15025_v5 = vcombine.low %v15008_v29, %v15016_v34  ;;  %v14974_v22 = vrot.slane %v14967_v30, %v22121_v27  ;;  %v6553_v17 = vpack.i.b16 %v6358_v62, %v6326_v47 }
 0x664   : > { %v14982_v55 = vrot.slane %v14975_v38, %v22121_v27  ;;  %v8089_v57 = vrot.slane %v8075_v2, %v22119_v0  ;;  %v8141_v45 = vcombine.high %v6549_v11, %v22112_v44  ;;  %v8148_v50 = vrot.slane %v6549_v11, %v22119_v0 }
 0x665   : > { %v15024_v8 = vrot.slane %v15017_v1, %v22121_v27  ;;  %v15032_v59 = vrot.slane %v15025_v5, %v22121_v27  ;;  %v6557_v39 = vpack.i.b16 %v6556_v41, %v6555_v40  ;;  %v8090_v48 = vcombine.high %v6553_v17, %v22112_v44 }
 0x666   : > { %v14983_v6 = vcombine.low %v14974_v22, %v14982_v55  ;;  %v14984_v9 = vcombine.high %v14974_v22, %v14982_v55  ;;  %v8155_v23 = vrot.slane %v8141_v45, %v22119_v0  ;;  %v8097_v26 = vrot.slane %v6553_v17, %v22119_v0 }
 0x667   : > { %v15033_v20 = vcombine.low %v15024_v8, %v15032_v59  ;;  %v15034_v14 = vcombine.high %v15024_v8, %v15032_v59  ;;  %v8104_v49 = vrot.slane %v8090_v48, %v22119_v0  ;;  %v8156_v33 = vcombine.high %v6557_v39, %v22112_v44 }
 0x668   : > { %v15306_v31 = vshrl.u32 %v14983_v6, 16  ;;  %v15312_v35 = vshrl.u32 %v14984_v9, 16  ;;  %v8105_v47 = vcombine.low %v8082_v63, %v8097_v26  ;;  %v8106_v21 = vcombine.high %v8082_v63, %v8097_v26 }
 0x669   : > { %v15305_v42 = vpack.i.b16 %v15033_v20, %v14983_v6  ;;  %v15307_v53 = vshrl.u32 %v15033_v20, 16  ;;  %v15311_v12 = vpack.i.b16 %v15034_v14, %v14984_v9  ;;  %v15313_v15 = vshrl.u32 %v15034_v14, 16 }
 0x66a   : > { %v8113_v43 = vrot.slane %v8105_v47, %v22121_v27  ;;  %v8120_v24 = vrot.slane %v8106_v21, %v22121_v27  ;;  %v8121_v52 = vcombine.low %v8089_v57, %v8104_v49  ;;  %v8122_v13 = vcombine.high %v8089_v57, %v8104_v49 }
 0x66b   : > { %v15308_v10 = vpack.i.b16 %v15307_v53, %v15306_v31  ;;  %v15314_v56 = vpack.i.b16 %v15313_v15, %v15312_v35  ;;  %v16563_v46 = vcombine.low %v15305_v42, %v15305_v42  ;;  %v16564_v51 = vcombine.high %v15305_v42, %v15305_v42 }
 0x66c   : > { %v16627_v3 = vcombine.low %v15311_v12, %v15311_v12  ;;  %v16628_v28 = vcombine.high %v15311_v12, %v15311_v12  ;;  %v8163_v32 = vrot.slane %v6557_v39, %v22119_v0  ;;  %v8170_v29 = vrot.slane %v8156_v33, %v22119_v0 }
 0x66d   : > { %v16595_v54 = vcombine.low %v15308_v10, %v15308_v10  ;;  %v16596_v18 = vcombine.high %v15308_v10, %v15308_v10  ;;  %v16659_v25 = vcombine.low %v15314_v56, %v15314_v56  ;;  %v16660_v16 = vcombine.high %v15314_v56, %v15314_v56  ;;  %15739 = vst.msk [vmem:[%s19921_s9 + $0x70] sm:$0xf] %vm6110_vm0, %v16563_v46 }
 0x66e   : > { %15740 = vst.msk [vmem:[%s19921_s9 + $0x74] sm:$0xf] %vm6110_vm0, %v16564_v51  ;;  %15803 = vst.msk [vmem:[%s19921_s9 + $0x170] sm:$0xf] %vm6110_vm0, %v16627_v3  ;;  %v9835_v34 = vcombine.low %v8113_v43, %v8120_v24  ;;  %v16323_v30 = vcombine.high %v8113_v43, %v8120_v24  ;;  %v11417_v38 = vpack.i.b16 %v11166_v37, %v21620_v60  ;;  %v11420_v58 = vshrl.u32 %v11166_v37, 16 }
 0x66f   : > { %15804 = vst.msk [vmem:[%s19921_s9 + $0x174] sm:$0xf] %vm6110_vm0, %v16628_v28  ;;  %15771 = vst.msk [vmem:[%s19921_s9 + $0xf0] sm:$0xf] %vm6110_vm0, %v16595_v54  ;;  %v8129_v2 = vrot.slane %v8121_v52, %v22121_v27  ;;  %v8136_v62 = vrot.slane %v8122_v13, %v22121_v27  ;;  %v8171_v1 = vcombine.low %v8148_v50, %v8163_v32 }
 0x670   : > { %15772 = vst.msk [vmem:[%s19921_s9 + $0xf4] sm:$0xf] %vm6110_vm0, %v16596_v18  ;;  %15835 = vst.msk [vmem:[%s19921_s9 + $0x1f0] sm:$0xf] %vm6110_vm0, %v16659_v25  ;;  %v8172_v5 = vcombine.high %v8148_v50, %v8163_v32  ;;  %v8187_v63 = vcombine.low %v8155_v23, %v8170_v29  ;;  %v8188_v40 = vcombine.high %v8155_v23, %v8170_v29 }
 0x671   : > { %15836 = vst.msk [vmem:[%s19921_s9 + $0x1f4] sm:$0xf] %vm6110_vm0, %v16660_v16  ;;  %v9842_v22 = vrot.slane %v9835_v34, %v22119_v0  ;;  %v9850_v55 = vrot.slane %v16323_v30, %v22119_v0  ;;  %v8179_v11 = vrot.slane %v8171_v1, %v22121_v27  ;;  %v9851_v8 = vcombine.low %v8129_v2, %v8136_v62 }
 0x672   : > { %v8186_v57 = vrot.slane %v8172_v5, %v22121_v27  ;;  %v16324_v59 = vcombine.high %v8129_v2, %v8136_v62  ;;  %v8195_v17 = vrot.slane %v8187_v63, %v22121_v27  ;;  %v8202_v41 = vrot.slane %v8188_v40, %v22121_v27 }
 0x673   : > { %v9867_v6 = vcombine.low %v9842_v22, %v9850_v55  ;;  %v11421_v9 = vpack.i.b16 %v11420_v58, %v11419_v7  ;;  %v9858_v45 = vrot.slane %v9851_v8, %v22119_v0  ;;  %v13418_v35 = vcombine.high %v11417_v38, %v22112_v44 }
 0x674   : > { %v9866_v50 = vrot.slane %v16324_v59, %v22119_v0  ;;  %v9885_v20 = vcombine.low %v8179_v11, %v8186_v57  ;;  %v16325_v14 = vcombine.high %v8179_v11, %v8186_v57  ;;  %v9901_v48 = vcombine.low %v8195_v17, %v8202_v41 }
 0x675   : > { %v9874_v39 = vrot.slane %v9867_v6, %v22121_v27  ;;  %v16326_v31 = vcombine.high %v8195_v17, %v8202_v41  ;;  %v13425_v60 = vrot.slane %v11417_v38, %v22119_v0  ;;  %v13432_v12 = vrot.slane %v13418_v35, %v22119_v0 }
 0x676   : > { %v9875_v23 = vcombine.low %v9858_v45, %v9866_v50  ;;  %v9892_v26 = vrot.slane %v9885_v20, %v22119_v0  ;;  %v9900_v42 = vrot.slane %v16325_v14, %v22119_v0  ;;  %v9908_v7 = vrot.slane %v9901_v48, %v22119_v0 }
 0x677   : > { %v9916_v53 = vrot.slane %v16326_v31, %v22119_v0  ;;  %v13484_v15 = vcombine.high %v11421_v9, %v22112_v44  ;;  %v13433_v21 = vcombine.low %v21624_v4, %v13425_v60  ;;  %v13434_v33 = vcombine.high %v21624_v4, %v13425_v60 }
 0x678   : > { %v9882_v49 = vrot.slane %v9875_v23, %v22121_v27  ;;  %v9917_v47 = vcombine.low %v9892_v26, %v9900_v42  ;;  %v13449_v56 = vcombine.low %v21627_v61, %v13432_v12  ;;  %v13450_v46 = vcombine.high %v21627_v61, %v13432_v12 }
 0x679   : > { %v9925_v10 = vcombine.low %v9908_v7, %v9916_v53  ;;  %v13491_v51 = vrot.slane %v11421_v9, %v22119_v0  ;;  %v13441_v44 = vrot.slane %v13433_v21, %v22121_v27  ;;  %v13448_v37 = vrot.slane %v13434_v33, %v22121_v27 }
 0x67a   : > { %v9883_v3 = vcombine.low %v9874_v39, %v9882_v49  ;;  %v9884_v28 = vcombine.high %v9874_v39, %v9882_v49  ;;  %v9924_v43 = vrot.slane %v9917_v47, %v22121_v27  ;;  %v13457_v54 = vrot.slane %v13449_v56, %v22121_v27 }
 0x67b   : > { %v9932_v24 = vrot.slane %v9925_v10, %v22121_v27  ;;  %v13464_v4 = vrot.slane %v13450_v46, %v22121_v27  ;;  %v13498_v61 = vrot.slane %v13484_v15, %v22119_v0  ;;  %v13499_v16 = vcombine.low %v21632_v36, %v13491_v51 }
 0x67c   : > { %v10470_v18 = vshrl.u32 %v9883_v3, 16  ;;  %v10476_v25 = vshrl.u32 %v9884_v28, 16  ;;  %v13500_v32 = vcombine.high %v21632_v36, %v13491_v51  ;;  %v15035_v29 = vcombine.low %v13441_v44, %v13448_v37 }
 0x67d   : > { %v9933_v52 = vcombine.low %v9924_v43, %v9932_v24  ;;  %v9934_v13 = vcombine.high %v9924_v43, %v9932_v24  ;;  %v13507_v34 = vrot.slane %v13499_v16, %v22121_v27  ;;  %v13515_v30 = vcombine.low %v21635_v19, %v13498_v61 }
 0x67e   : > { %v13516_v38 = vcombine.high %v21635_v19, %v13498_v61  ;;  %v16531_v58 = vcombine.high %v13441_v44, %v13448_v37  ;;  %v13514_v63 = vrot.slane %v13500_v32, %v22121_v27  ;;  %v15042_v22 = vrot.slane %v15035_v29, %v22119_v0 }
 0x67f   : > { %v10469_v2 = vpack.i.b16 %v9933_v52, %v9883_v3  ;;  %v10471_v62 = vshrl.u32 %v9933_v52, 16  ;;  %v10475_v1 = vpack.i.b16 %v9934_v13, %v9884_v28  ;;  %v10477_v5 = vshrl.u32 %v9934_v13, 16 }
 0x680   : > { %v13523_v40 = vrot.slane %v13515_v30, %v22121_v27  ;;  %v13530_v36 = vrot.slane %v13516_v38, %v22121_v27  ;;  %v15050_v17 = vrot.slane %v16531_v58, %v22119_v0  ;;  %v15051_v41 = vcombine.low %v13457_v54, %v13464_v4 }
 0x681   : > { %v10472_v55 = vpack.i.b16 %v10471_v62, %v10470_v18  ;;  %v10478_v11 = vpack.i.b16 %v10477_v5, %v10476_v25  ;;  %v16365_v19 = vcombine.low %v10469_v2, %v10469_v2  ;;  %v16366_v57 = vcombine.high %v10469_v2, %v10469_v2 }
 0x682   : > { %v16429_v8 = vcombine.low %v10475_v1, %v10475_v1  ;;  %v16430_v59 = vcombine.high %v10475_v1, %v10475_v1  ;;  %v15058_v20 = vrot.slane %v15051_v41, %v22119_v0  ;;  %v16532_v14 = vcombine.high %v13457_v54, %v13464_v4 }
 0x683   : > { %v16397_v6 = vcombine.low %v10472_v55, %v10472_v55  ;;  %v16398_v9 = vcombine.high %v10472_v55, %v10472_v55  ;;  %v16461_v45 = vcombine.low %v10478_v11, %v10478_v11  ;;  %v16462_v50 = vcombine.high %v10478_v11, %v10478_v11  ;;  %10933 = vst.msk [vmem:[%s18823_s15 + $0x58] sm:$0xf] %vm6110_vm0, %v16365_v19 }
 0x684   : > { %10934 = vst.msk [vmem:[%s18823_s15 + $0x5c] sm:$0xf] %vm6110_vm0, %v16366_v57  ;;  %10997 = vst.msk [vmem:[%s18823_s15 + $0x158] sm:$0xf] %vm6110_vm0, %v16429_v8  ;;  %v15085_v39 = vcombine.low %v13507_v34, %v13514_v63  ;;  %v16533_v48 = vcombine.high %v13507_v34, %v13514_v63  ;;  %v15101_v31 = vcombine.low %v13523_v40, %v13530_v36 }
 0x685   : > { %10998 = vst.msk [vmem:[%s18823_s15 + $0x15c] sm:$0xf] %vm6110_vm0, %v16430_v59  ;;  %10965 = vst.msk [vmem:[%s18823_s15 + $0xd8] sm:$0xf] %vm6110_vm0, %v16397_v6  ;;  %v16534_v35 = vcombine.high %v13523_v40, %v13530_v36  ;;  %v15066_v23 = vrot.slane %v16532_v14, %v22119_v0  ;;  %v15067_v26 = vcombine.low %v15042_v22, %v15050_v17 }
 0x686   : > { %10966 = vst.msk [vmem:[%s18823_s15 + $0xdc] sm:$0xf] %vm6110_vm0, %v16398_v9  ;;  %11029 = vst.msk [vmem:[%s18823_s15 + $0x1d8] sm:$0xf] %vm6110_vm0, %v16461_v45  ;;  %v15092_v42 = vrot.slane %v15085_v39, %v22119_v0  ;;  %v15100_v60 = vrot.slane %v16533_v48, %v22119_v0  ;;  %v15108_v7 = vrot.slane %v15101_v31, %v22119_v0 }
 0x687   : > { %11030 = vst.msk [vmem:[%s18823_s15 + $0x1dc] sm:$0xf] %vm6110_vm0, %v16462_v50  ;;  %v15116_v53 = vrot.slane %v16534_v35, %v22119_v0  ;;  %v15075_v12 = vcombine.low %v15058_v20, %v15066_v23  ;;  %v15074_v47 = vrot.slane %v15067_v26, %v22121_v27 }
 0x688   : > { %v15117_v15 = vcombine.low %v15092_v42, %v15100_v60 }
 0x689   : > { %v15125_v49 = vcombine.low %v15108_v7, %v15116_v53  ;;  %v15082_v21 = vrot.slane %v15075_v12, %v22121_v27 }
 0x68a   : > { %v15124_v33 = vrot.slane %v15117_v15, %v22121_v27 }
 0x68b   : > { %v15132_v10 = vrot.slane %v15125_v49, %v22121_v27  ;;  %v15083_v56 = vcombine.low %v15074_v47, %v15082_v21  ;;  %v15084_v46 = vcombine.high %v15074_v47, %v15082_v21 }
 0x68d   : > { %v15133_v51 = vcombine.low %v15124_v33, %v15132_v10  ;;  %v15134_v3 = vcombine.high %v15124_v33, %v15132_v10  ;;  %v15318_v28 = vshrl.u32 %v15083_v56, 16  ;;  %v15324_v43 = vshrl.u32 %v15084_v46, 16 }
 0x68f   : > { %v15317_v0 = vpack.i.b16 %v15133_v51, %v15083_v56  ;;  %v15319_v44 = vshrl.u32 %v15133_v51, 16  ;;  %v15323_v24 = vpack.i.b16 %v15134_v3, %v15084_v46  ;;  %v15325_v37 = vshrl.u32 %v15134_v3, 16 }
 0x691   : > { %v15320_v54 = vpack.i.b16 %v15319_v44, %v15318_v28  ;;  %v15326_v4 = vpack.i.b16 %v15325_v37, %v15324_v43  ;;  %v16565_v27 = vcombine.low %v15317_v0, %v15317_v0  ;;  %v16566_v18 = vcombine.high %v15317_v0, %v15317_v0 }
 0x692   : > { %v16629_v25 = vcombine.low %v15323_v24, %v15323_v24  ;;  %v16630_v61 = vcombine.high %v15323_v24, %v15323_v24 }
 0x693   : > { %v16597_v16 = vcombine.low %v15320_v54, %v15320_v54  ;;  %v16598_v52 = vcombine.high %v15320_v54, %v15320_v54  ;;  %v16661_v13 = vcombine.low %v15326_v4, %v15326_v4  ;;  %v16662_v32 = vcombine.high %v15326_v4, %v15326_v4  ;;  %15741 = vst.msk [vmem:[%s19921_s9 + $0x78] sm:$0xf] %vm6110_vm0, %v16565_v27 }
 0x694   : > { %15742 = vst.msk [vmem:[%s19921_s9 + $0x7c] sm:$0xf] %vm6110_vm0, %v16566_v18  ;;  %15805 = vst.msk [vmem:[%s19921_s9 + $0x178] sm:$0xf] %vm6110_vm0, %v16629_v25 }
 0x695   : > { %15806 = vst.msk [vmem:[%s19921_s9 + $0x17c] sm:$0xf] %vm6110_vm0, %v16630_v61  ;;  %15773 = vst.msk [vmem:[%s19921_s9 + $0xf8] sm:$0xf] %vm6110_vm0, %v16597_v16 }
 0x696   : > { %15774 = vst.msk [vmem:[%s19921_s9 + $0xfc] sm:$0xf] %vm6110_vm0, %v16598_v52  ;;  %15837 = vst.msk [vmem:[%s19921_s9 + $0x1f8] sm:$0xf] %vm6110_vm0, %v16661_v13 }
 0x697   : > { %15838 = vst.msk [vmem:[%s19921_s9 + $0x1fc] sm:$0xf] %vm6110_vm0, %v16662_v32 }
 0x698 PF: > { %s22_s29 = sadd.s32 1, %s17037_s29   ;;  %s22180_s24 = smov %s17021_s25 }
 0x699   : > { %p19_p4 = scmp.ge.s32.totalorder %s22_s29, 4   ;;  %s22181_s25 = smov %s17025_s26 }
 0x69a   : > { %s22182_s26 = smov %s17165_s30  ;;  %s22183_s27 = smov %s17033_s28 }
 0x69b   : > { %s22184_s28 = smov %s22186_s14  ;;  %21 = sbr.rel (!%p19_p4) target bundleno = 5 (0x5), region = 108 }
 0x6a0   :  { %15919 = vsyncpa [#allocation3], 1 }
 0x6a1   :  { %15921 = vsyncpa [#allocation3 + $0x1], 1 }
 0x6a2   :  { %15922 = vsyncpa [#allocation5], 1 }

</bundles_post_ra>
